<compile_context>
chip_gen: v7x
topology: tpu7x:2x2x1
jax: 0.10.0
libtpu: 0.0.40
codegen_flags: <defaults>
</compile_context>

<pallas_src>
import math
import numpy as np

import jax
import jax.numpy as jnp
from jax import lax
from jax.experimental import pallas as pl
from jax.experimental.pallas import tpu as pltpu

# ---- hyperparameters implied by the PyTorch module ----
MAX_FEATURES = 100        # vocabulary size (embedding rows)
EMBED_SIZE = 64           # embed_size
LSTM_H = 120              # lstm_hidden_size
GRU_H = 60                # gru_hidden_size
LSTM_HP = 128             # lane-padded LSTM hidden
GRU_HP = 128              # lane-padded GRU hidden
HEAD_IN = GRU_H * 6 + 1   # 361 = hh(120) + avg(120) + max(120) + f(1)
HEAD_HID = 16
BN_EPS = 1e-5


def packed_lstm_kernel(
    x_ref,        # (T*Bp, E)  f32 embedded tokens, sorted by length, time-major, batch-padded
    len_ref,      # (Bp, 1)    i32 lengths (0 for pad rows)
    f_ref,        # (Bp, 1)    f32 extra feature
    sel_ref,      # (4, Bp, Bp) f32 selection matrices reproducing hh_gru.view(-1, 2G)
    lwx_ref,      # (E, 8*Hp)   fused LSTM input weights  [fwd gates i,f,g,o | bwd gates]
    lwh_f_ref,    # (Hp, 4*Hp)  fwd LSTM recurrent weights (fused gates)
    lwh_b_ref,    # (Hp, 4*Hp)  bwd LSTM recurrent weights
    lb_ref,       # (1, 8*Hp)   fused LSTM biases (b_ih + b_hh), fwd | bwd
    gwx_ref,      # (2, Hp, 6*Gp) GRU input weights: [lstm-fwd half, lstm-bwd half] x [gru-fwd r,z,n | gru-bwd r,z,n]
    gbi_ref,      # (1, 6*Gp)   GRU input biases b_ih, fwd | bwd
    gwh_f_ref,    # (Gp, 3*Gp)  fwd GRU recurrent weights (fused gates r,z,n)
    gwh_b_ref,    # (Gp, 3*Gp)  bwd GRU recurrent weights
    gbh_f_ref,    # (1, 3*Gp)   fwd GRU recurrent biases b_hh
    gbh_b_ref,    # (1, 3*Gp)   bwd GRU recurrent biases b_hh
    w1hh_ref,     # (2, Gp, 16) linear1 rows for the hh_gru.view(-1, 2G) block (left/right chunk)
    w1p_ref,      # (4, Gp, 16) linear1 rows for avg_fwd, avg_bwd, max_fwd, max_bwd
    w1f_ref,      # (1, 16)     linear1 row for the scalar feature f
    b1_ref,       # (1, 16)
    bns_ref,      # (1, 16)     folded BatchNorm scale
    bnb_ref,      # (1, 16)     folded BatchNorm shift
    w2_ref,       # (16, 1)
    b2_ref,       # (1, 1)
    out_ref,      # (Bp, 1) f32 output (still in sorted order, pad rows garbage)
    xproj_ref,    # scratch VMEM (T*Bp, 8*Hp)  hoisted LSTM input projections (both dirs)
    lstm_fwd_ref, # scratch VMEM (T*Bp, Hp)    fwd LSTM packed outputs (zero where padded)
    lstm_bwd_ref, # scratch VMEM (T*Bp, Hp)    bwd LSTM packed outputs
    gproj_ref,    # scratch VMEM (T*Bp, 6*Gp)  hoisted GRU input projections (both dirs)
):
    Bp = len_ref.shape[0]
    T = x_ref.shape[0] // Bp
    Hp = LSTM_HP
    Gp = GRU_HP

    lens = len_ref[...]                        # (Bp, 1) i32
    l_max = jnp.max(lens)                      # padded length of the packed sequence
    inv_lmax = 1.0 / l_max.astype(jnp.float32)

    def dot(a, b):
        return jnp.dot(a, b, preferred_element_type=jnp.float32)

    sigmoid = jax.nn.sigmoid                   # EUP logistic

    # ---------------- hoisted LSTM input projections (one big MXU matmul) ----------------
    xproj_ref[...] = dot(x_ref[...], lwx_ref[...]) + lb_ref[...]

    lwh_f = lwh_f_ref[...]
    lwh_b = lwh_b_ref[...]

    zeros_BH = jnp.zeros((Bp, Hp), jnp.float32)

    def lstm_step(h, c, gates):
        # PyTorch gate order: i, f, g, o (lane-aligned 128-wide slices)
        gi = sigmoid(gates[:, 0 * Hp:1 * Hp])
        gf = sigmoid(gates[:, 1 * Hp:2 * Hp])
        gg = jnp.tanh(gates[:, 2 * Hp:3 * Hp])
        go = sigmoid(gates[:, 3 * Hp:4 * Hp])
        c_new = gf * c + gi * gg
        h_new = go * jnp.tanh(c_new)
        return h_new, c_new

    # ------------- fused fwd + bwd bidirectional LSTM over the packed sequence -------------
    def lstm_body(i, carry):
        hf, cf, hb, cb = carry
        tf = i
        tb = T - 1 - i
        rf = pl.multiple_of(tf * Bp, Bp)
        rb = pl.multiple_of(tb * Bp, Bp)

        gates_f = xproj_ref[pl.ds(rf, Bp), pl.ds(0, 4 * Hp)] + dot(hf, lwh_f)
        gates_b = xproj_ref[pl.ds(rb, Bp), pl.ds(4 * Hp, 4 * Hp)] + dot(hb, lwh_b)
        hf_new, cf_new = lstm_step(hf, cf, gates_f)
        hb_new, cb_new = lstm_step(hb, cb, gates_b)

        mf = tf < lens                                    # (Bp, 1) valid-step masks
        mb = tb < lens
        lstm_fwd_ref[pl.ds(rf, Bp), :] = jnp.where(mf, hf_new, 0.0)
        lstm_bwd_ref[pl.ds(rb, Bp), :] = jnp.where(mb, hb_new, 0.0)
        hf = jnp.where(mf, hf_new, hf)
        cf = jnp.where(mf, cf_new, cf)
        hb = jnp.where(mb, hb_new, hb)
        cb = jnp.where(mb, cb_new, cb)
        return hf, cf, hb, cb

    _ = lax.fori_loop(0, T, lstm_body,
                      (zeros_BH, zeros_BH, zeros_BH, zeros_BH), unroll=True)

    # ---------------- hoisted GRU input projections (both directions at once) ----------------
    gproj_ref[...] = (dot(lstm_fwd_ref[...], gwx_ref[0])
                      + dot(lstm_bwd_ref[...], gwx_ref[1])
                      + gbi_ref[...])

    gwh_f = gwh_f_ref[...]
    gwh_b = gwh_b_ref[...]
    gbh_f = gbh_f_ref[...]
    gbh_b = gbh_b_ref[...]

    zeros_BG = jnp.zeros((Bp, Gp), jnp.float32)
    neg_big = jnp.full((Bp, Gp), -1e30, jnp.float32)

    def gru_step(h, gi, gh):
        # PyTorch gate order: r, z, n ; gh carries b_hh so r gates (W_hn h + b_hn)
        r = sigmoid(gi[:, 0 * Gp:1 * Gp] + gh[:, 0 * Gp:1 * Gp])
        z = sigmoid(gi[:, 1 * Gp:2 * Gp] + gh[:, 1 * Gp:2 * Gp])
        n = jnp.tanh(gi[:, 2 * Gp:3 * Gp] + r * gh[:, 2 * Gp:3 * Gp])
        return (1.0 - z) * n + z * h

    # ------- fused fwd + bwd bidirectional GRU with fused masked mean/max pooling -------
    def gru_body(i, carry):
        hgf, sum_f, max_f, hgb, sum_b, max_b = carry
        tf = i
        tb = T - 1 - i
        rf = pl.multiple_of(tf * Bp, Bp)
        rb = pl.multiple_of(tb * Bp, Bp)

        gi_f = gproj_ref[pl.ds(rf, Bp), pl.ds(0, 3 * Gp)]
        gi_b = gproj_ref[pl.ds(rb, Bp), pl.ds(3 * Gp, 3 * Gp)]
        gh_f = dot(hgf, gwh_f) + gbh_f
        gh_b = dot(hgb, gwh_b) + gbh_b
        hf_new = gru_step(hgf, gi_f, gh_f)
        hb_new = gru_step(hgb, gi_b, gh_b)

        mf = tf < lens
        mb = tb < lens
        val_f = jnp.where(mf, hf_new, 0.0)                # padded GRU output rows
        val_b = jnp.where(mb, hb_new, 0.0)
        hgf = jnp.where(mf, hf_new, hgf)
        hgb = jnp.where(mb, hb_new, hgb)
        sum_f = sum_f + val_f
        sum_b = sum_b + val_b
        max_f = jnp.where(tf < l_max, jnp.maximum(max_f, val_f), max_f)
        max_b = jnp.where(tb < l_max, jnp.maximum(max_b, val_b), max_b)
        return hgf, sum_f, max_f, hgb, sum_b, max_b

    h_gf, sum_f, max_f, h_gb, sum_b, max_b = lax.fori_loop(
        0, T, gru_body,
        (zeros_BG, zeros_BG, neg_big, zeros_BG, zeros_BG, neg_big),
        unroll=True)

    # torch.mean over the padded dim-1 divides by the padded length = max(l)
    avg_f = sum_f * inv_lmax
    avg_b = sum_b * inv_lmax

    # ----- head: Linear(361->16) + ReLU + (Dropout=id) + BN(eval) + Linear(16->1) -----
    pre = (dot(avg_f, w1p_ref[0]) + dot(avg_b, w1p_ref[1])
           + dot(max_f, w1p_ref[2]) + dot(max_b, w1p_ref[3])
           + f_ref[...] * w1f_ref[...] + b1_ref[...])

    # hh_gru.view(-1, 2*G): flattens the (2, B, G) final-hidden tensor direction-major and
    # regroups into rows of 2G, MIXING batch rows exactly like the original PyTorch code.
    # Reproduced exactly (and vectorized) with constant selection matrices:
    #   left[i]  = chunk 2i   of the flat (2,B,G) array
    #   right[i] = chunk 2i+1
    left = dot(sel_ref[0], h_gf) + dot(sel_ref[1], h_gb)     # (Bp, Gp)
    right = dot(sel_ref[2], h_gf) + dot(sel_ref[3], h_gb)    # (Bp, Gp)
    pre = pre + dot(left, w1hh_ref[0]) + dot(right, w1hh_ref[1])

    h1 = jnp.maximum(pre, 0.0)                               # ReLU
    # TODO(synk): Dropout(0.1)/Dropout2d(0.1) are identity at inference; no RNG path implemented.
    h1 = h1 * bns_ref[...] + bnb_ref[...]                    # BatchNorm1d (eval, folded)
    out_ref[...] = dot(h1, w2_ref[...]) + b2_ref[...]        # (Bp, 1)


# ----------------------- parameter construction (deterministic) -----------------------
def init_params(key):
    ks = jax.random.split(key, 9)
    E, H, Hp, G, Gp = EMBED_SIZE, LSTM_H, LSTM_HP, GRU_H, GRU_HP

    def u(k, shape, fan):
        bound = 1.0 / math.sqrt(fan)
        return jax.random.uniform(k, shape, jnp.float32, -bound, bound)

    embedding = 0.1 * jax.random.normal(ks[0], (MAX_FEATURES, E), jnp.float32)

    def lstm_dir(k):
        k1, k2, k3, k4 = jax.random.split(k, 4)
        w_ih = u(k1, (4 * H, E), H)            # torch layout, gate order i,f,g,o
        w_hh = u(k2, (4 * H, H), H)
        b_ih = u(k3, (4 * H,), H)
        b_hh = u(k4, (4 * H,), H)
        wx = jnp.zeros((E, 4 * Hp), jnp.float32)
        wh = jnp.zeros((Hp, 4 * Hp), jnp.float32)
        b = jnp.zeros((1, 4 * Hp), jnp.float32)
        for g in range(4):
            wx = wx.at[:, g * Hp:g * Hp + H].set(w_ih[g * H:(g + 1) * H, :].T)
            wh = wh.at[:H, g * Hp:g * Hp + H].set(w_hh[g * H:(g + 1) * H, :].T)
            b = b.at[0, g * Hp:g * Hp + H].set(b_ih[g * H:(g + 1) * H] + b_hh[g * H:(g + 1) * H])
        return wx, wh, b

    lwx_f, lwh_f, lb_f = lstm_dir(ks[1])
    lwx_b, lwh_b, lb_b = lstm_dir(ks[2])
    lstm_wx = jnp.concatenate([lwx_f, lwx_b], axis=1)        # (E, 8*Hp)
    lstm_b = jnp.concatenate([lb_f, lb_b], axis=1)           # (1, 8*Hp)

    def gru_dir(k):
        k1, k2, k3, k4 = jax.random.split(k, 4)
        w_ih = u(k1, (3 * G, 2 * H), G)        # gate order r,z,n
        w_hh = u(k2, (3 * G, G), G)
        b_ih = u(k3, (3 * G,), G)
        b_hh = u(k4, (3 * G,), G)
        wx = jnp.zeros((2, Hp, 3 * Gp), jnp.float32)
        wh = jnp.zeros((Gp, 3 * Gp), jnp.float32)
        bi = jnp.zeros((1, 3 * Gp), jnp.float32)
        bh = jnp.zeros((1, 3 * Gp), jnp.float32)
        for g in range(3):
            blk = w_ih[g * G:(g + 1) * G, :]                 # (G, 2H)
            wx = wx.at[0, :H, g * Gp:g * Gp + G].set(blk[:, :H].T)   # lstm-fwd half of input
            wx = wx.at[1, :H, g * Gp:g * Gp + G].set(blk[:, H:].T)   # lstm-bwd half of input
            wh = wh.at[:G, g * Gp:g * Gp + G].set(w_hh[g * G:(g + 1) * G, :].T)
            bi = bi.at[0, g * Gp:g * Gp + G].set(b_ih[g * G:(g + 1) * G])
            bh = bh.at[0, g * Gp:g * Gp + G].set(b_hh[g * G:(g + 1) * G])
        return wx, wh, bi, bh

    gwx_f, gwh_f, gbi_f, gbh_f = gru_dir(ks[3])
    gwx_b, gwh_b, gbi_b, gbh_b = gru_dir(ks[4])
    gru_wx = jnp.concatenate([gwx_f, gwx_b], axis=2)         # (2, Hp, 6*Gp)
    gru_bi = jnp.concatenate([gbi_f, gbi_b], axis=1)         # (1, 6*Gp)

    w1 = u(ks[5], (HEAD_HID, HEAD_IN), HEAD_IN)              # nn.Linear(361, 16)
    b1 = u(ks[6], (HEAD_HID,), HEAD_IN)
    w1T = w1.T                                               # (361, 16)
    w1_hh = jnp.zeros((2, Gp, HEAD_HID), jnp.float32)
    w1_hh = w1_hh.at[0, :G].set(w1T[0:G])                    # left chunk of hh_gru row
    w1_hh = w1_hh.at[1, :G].set(w1T[G:2 * G])                # right chunk
    w1_pool = jnp.zeros((4, Gp, HEAD_HID), jnp.float32)
    for j in range(4):                                       # avg_f, avg_b, max_f, max_b
        w1_pool = w1_pool.at[j, :G].set(w1T[(2 + j) * G:(3 + j) * G])
    w1_f = w1T[6 * G:6 * G + 1]                              # (1, 16)

    # BatchNorm1d(16) eval-mode with default stats: gamma=1, beta=0, mean=0, var=1
    gamma = jnp.ones((HEAD_HID,), jnp.float32)
    beta = jnp.zeros((HEAD_HID,), jnp.float32)
    rmean = jnp.zeros((HEAD_HID,), jnp.float32)
    rvar = jnp.ones((HEAD_HID,), jnp.float32)
    bn_scale = (gamma / jnp.sqrt(rvar + BN_EPS)).reshape(1, HEAD_HID)
    bn_shift = (beta - rmean * bn_scale.reshape(-1)).reshape(1, HEAD_HID)

    w2 = u(ks[7], (1, HEAD_HID), HEAD_HID)                   # nn.Linear(16, 1)
    b2 = u(ks[8], (1,), HEAD_HID)

    return dict(
        embedding=embedding,
        lstm_wx=lstm_wx, lstm_wh_f=lwh_f, lstm_wh_b=lwh_b, lstm_b=lstm_b,
        gru_wx=gru_wx, gru_bi=gru_bi,
        gru_wh_f=gwh_f, gru_wh_b=gwh_b, gru_bh_f=gbh_f, gru_bh_b=gbh_b,
        w1_hh=w1_hh, w1_pool=w1_pool, w1_f=w1_f, b1=b1.reshape(1, HEAD_HID),
        bn_scale=bn_scale, bn_shift=bn_shift,
        w2=w2.T, b2=b2.reshape(1, 1),
    )


def _hh_view_selectors(B, Bp):
    """Constant selection matrices reproducing hh_gru.view(-1, 2*G) row mixing exactly.

    Row i of the (B, 2G) view = (chunk 2i, chunk 2i+1) of the flat (2, B, G) array.
    sel[0]/sel[1]: pick the left chunk from the fwd/bwd final hidden,
    sel[2]/sel[3]: pick the right chunk.
    """
    sel = np.zeros((4, Bp, Bp), np.float32)
    for i in range(B):
        for k, c in enumerate((2 * i, 2 * i + 1)):
            d, j = divmod(c, B)
            sel[2 * k + d, i, j] = 1.0
    return jnp.asarray(sel)


# ----------------------------------- wrapper -----------------------------------
def packed_sequence_lstm_forward(params, tokens, feats, lengths):
    """tokens: (B,T) int32, feats: (B,1) f32, lengths: (B,) int32 -> (B,1) f32."""
    B, T = tokens.shape
    Bp = ((B + 7) // 8) * 8                  # sublane-pad the batch

    # l, sort_idx = torch.sort(l, descending=True); unsort with argsort(sort_idx)
    sort_idx = jnp.argsort(-lengths)
    unsort_idx = jnp.argsort(sort_idx)
    lens_sorted = lengths[sort_idx].astype(jnp.int32)
    tok_sorted = tokens[sort_idx]
    f_sorted = feats[sort_idx].astype(jnp.float32).reshape(B, 1)

    emb = params["embedding"][tok_sorted]                        # (B, T, E) embedding lookup
    # Dropout2d(0.1) on the embedding: identity at inference.
    x_tbe = jnp.transpose(emb, (1, 0, 2)).astype(jnp.float32)    # time-major (T, B, E)
    x_2d = jnp.pad(x_tbe, ((0, 0), (0, Bp - B), (0, 0))).reshape(T * Bp, EMBED_SIZE)

    lens_pad = jnp.pad(lens_sorted, (0, Bp - B)).reshape(Bp, 1)  # pad rows have length 0
    f_pad = jnp.pad(f_sorted, ((0, Bp - B), (0, 0)))
    sel = _hh_view_selectors(B, Bp)

    kernel_args = (
        x_2d, lens_pad, f_pad, sel,
        params["lstm_wx"], params["lstm_wh_f"], params["lstm_wh_b"], params["lstm_b"],
        params["gru_wx"], params["gru_bi"],
        params["gru_wh_f"], params["gru_wh_b"], params["gru_bh_f"], params["gru_bh_b"],
        params["w1_hh"], params["w1_pool"], params["w1_f"], params["b1"],
        params["bn_scale"], params["bn_shift"], params["w2"], params["b2"],
    )

    out_pad = pl.pallas_call(
        packed_lstm_kernel,
        out_shape=jax.ShapeDtypeStruct((Bp, 1), jnp.float32),
        in_specs=[pl.BlockSpec(memory_space=pltpu.MemorySpace.VMEM)] * len(kernel_args),
        out_specs=pl.BlockSpec(memory_space=pltpu.MemorySpace.VMEM),
        scratch_shapes=[
            pltpu.VMEM((T * Bp, 8 * LSTM_HP), jnp.float32),   # hoisted LSTM input projections
            pltpu.VMEM((T * Bp, LSTM_HP), jnp.float32),       # fwd LSTM packed outputs
            pltpu.VMEM((T * Bp, LSTM_HP), jnp.float32),       # bwd LSTM packed outputs
            pltpu.VMEM((T * Bp, 6 * GRU_HP), jnp.float32),    # hoisted GRU input projections
        ],
        compiler_params=pltpu.CompilerParams(vmem_limit_bytes=32 * 1024 * 1024),
    )(*kernel_args)

    return out_pad[:B][unsort_idx]


if __name__ == "__main__":
    key = jax.random.PRNGKey(0)
    k_param, k_tok, k_feat = jax.random.split(key, 3)

    B, T = 4, 8
    params = init_params(k_param)
    tokens = jax.random.randint(k_tok, (B, T), 0, MAX_FEATURES, dtype=jnp.int32)
    feats = jax.random.normal(k_feat, (B, 1), jnp.float32)
    lengths = jnp.array([5, 8, 3, 8], dtype=jnp.int32)   # variable lengths, max == T

    out = packed_sequence_lstm_forward(params, tokens, feats, lengths)
    out = jax.block_until_ready(out)
    assert out.shape == (B, 1) and out.dtype == jnp.float32
    print("KERNEL_OK")
</pallas_src>

<mosaic_0001>
module attributes {stable_mosaic.version = 11 : i64} {
  func.func @packed_lstm_kernel(%arg0: memref<64x64xf32, #tpu.memory_space<vmem>>, %arg1: memref<8x1xi32, #tpu.memory_space<vmem>>, %arg2: memref<8x1xf32, #tpu.memory_space<vmem>>, %arg3: memref<4x8x8xf32, #tpu.memory_space<vmem>>, %arg4: memref<64x1024xf32, #tpu.memory_space<vmem>>, %arg5: memref<128x512xf32, #tpu.memory_space<vmem>>, %arg6: memref<128x512xf32, #tpu.memory_space<vmem>>, %arg7: memref<1x1024xf32, #tpu.memory_space<vmem>>, %arg8: memref<2x128x768xf32, #tpu.memory_space<vmem>>, %arg9: memref<1x768xf32, #tpu.memory_space<vmem>>, %arg10: memref<128x384xf32, #tpu.memory_space<vmem>>, %arg11: memref<128x384xf32, #tpu.memory_space<vmem>>, %arg12: memref<1x384xf32, #tpu.memory_space<vmem>>, %arg13: memref<1x384xf32, #tpu.memory_space<vmem>>, %arg14: memref<2x128x16xf32, #tpu.memory_space<vmem>>, %arg15: memref<4x128x16xf32, #tpu.memory_space<vmem>>, %arg16: memref<1x16xf32, #tpu.memory_space<vmem>>, %arg17: memref<1x16xf32, #tpu.memory_space<vmem>>, %arg18: memref<1x16xf32, #tpu.memory_space<vmem>>, %arg19: memref<1x16xf32, #tpu.memory_space<vmem>>, %arg20: memref<16x1xf32, #tpu.memory_space<vmem>>, %arg21: memref<1x1xf32, #tpu.memory_space<vmem>>, %arg22: memref<8x1xf32, #tpu.memory_space<vmem>>, %arg23: memref<64x1024xf32, #tpu.memory_space<vmem>>, %arg24: memref<64x128xf32, #tpu.memory_space<vmem>>, %arg25: memref<64x128xf32, #tpu.memory_space<vmem>>, %arg26: memref<64x768xf32, #tpu.memory_space<vmem>>) attributes {dimension_semantics = [], scalar_prefetch = 0 : i64, scratch_operands = 4 : i64, tpu.core_type = #tpu.core_type<tc>} {
    %c0 = arith.constant 0 : index
    %c0_0 = arith.constant 0 : index
    %0 = vector.load %arg1[%c0, %c0_0] : memref<8x1xi32, #tpu.memory_space<vmem>>, vector<8x1xi32>
    %1 = vector.shape_cast %0 : vector<8x1xi32> to vector<1x8x1xi32>
    %cst = arith.constant dense<-2147483648> : vector<1xi32>
    %2 = vector.multi_reduction <maxsi>, %1, %cst [1, 2] : vector<1x8x1xi32> to vector<1xi32>
    %3 = vector.shape_cast %2 : vector<1xi32> to vector<1x1x1xi32>
    %4 = vector.extract %3[0, 0, 0] : i32 from vector<1x1x1xi32>
    %5 = arith.sitofp %4 : i32 to f32
    %cst_1 = arith.constant 1.000000e+00 : f32
    %6 = arith.divf %cst_1, %5 : f32
    %c0_2 = arith.constant 0 : index
    %c0_3 = arith.constant 0 : index
    %7 = vector.load %arg0[%c0_2, %c0_3] : memref<64x64xf32, #tpu.memory_space<vmem>>, vector<64x64xf32>
    %c0_4 = arith.constant 0 : index
    %c0_5 = arith.constant 0 : index
    %8 = vector.load %arg4[%c0_4, %c0_5] : memref<64x1024xf32, #tpu.memory_space<vmem>>, vector<64x1024xf32>
    %cst_6 = arith.constant dense<0.000000e+00> : vector<64x1024xf32>
    %9 = tpu.matmul %7, %8, %cst_6 {dimension_numbers = #tpu.dot_dimension_numbers<[1], [0], [0], [1], [0, 0, 1, 1], [], []>} : vector<64x64xf32>, vector<64x1024xf32>, vector<64x1024xf32> -> vector<64x1024xf32>
    %c0_7 = arith.constant 0 : index
    %c0_8 = arith.constant 0 : index
    %10 = vector.load %arg7[%c0_7, %c0_8] : memref<1x1024xf32, #tpu.memory_space<vmem>>, vector<1x1024xf32>
    %11 = vector.broadcast %10 : vector<1x1024xf32> to vector<64x1024xf32>
    %12 = arith.addf %9, %11 : vector<64x1024xf32>
    %c0_9 = arith.constant 0 : index
    %c0_10 = arith.constant 0 : index
    %13 = vector.load %arg23[%c0_9, %c0_10] : memref<64x1024xf32, #tpu.memory_space<vmem>>, vector<64x1024xf32>
    tpu.vector_store %arg23[%c0_9, %c0_10], %12 {strides = array<i32>} : memref<64x1024xf32, #tpu.memory_space<vmem>>, vector<64x1024xf32>,
    %c0_11 = arith.constant 0 : index
    %c0_12 = arith.constant 0 : index
    %14 = vector.load %arg5[%c0_11, %c0_12] : memref<128x512xf32, #tpu.memory_space<vmem>>, vector<128x512xf32>
    %c0_13 = arith.constant 0 : index
    %c0_14 = arith.constant 0 : index
    %15 = vector.load %arg6[%c0_13, %c0_14] : memref<128x512xf32, #tpu.memory_space<vmem>>, vector<128x512xf32>
    %cst_15 = arith.constant 0.000000e+00 : f32
    %16 = vector.broadcast %cst_15 : f32 to vector<8x128xf32>
    %c0_i32 = arith.constant 0 : i32
    %c7_i32 = arith.constant 7 : i32
    %17 = arith.subi %c7_i32, %c0_i32 : i32
    %c8_i32 = arith.constant 8 : i32
    %18 = arith.muli %c0_i32, %c8_i32 : i32
    %19 = tpu.assume_multiple %18, 8 : i32
    %c8_i32_16 = arith.constant 8 : i32
    %20 = arith.muli %17, %c8_i32_16 : i32
    %21 = tpu.assume_multiple %20, 8 : i32
    %22 = arith.index_cast %19 : i32 to index
    %c0_17 = arith.constant 0 : index
    %23 = vector.load %arg23[%22, %c0_17] : memref<64x1024xf32, #tpu.memory_space<vmem>>, vector<8x512xf32>
    %cst_18 = arith.constant dense<0.000000e+00> : vector<8x512xf32>
    %24 = tpu.matmul %16, %14, %cst_18 {dimension_numbers = #tpu.dot_dimension_numbers<[1], [0], [0], [1], [0, 0, 1, 1], [], []>} : vector<8x128xf32>, vector<128x512xf32>, vector<8x512xf32> -> vector<8x512xf32>
    %25 = arith.addf %23, %24 : vector<8x512xf32>
    %26 = arith.index_cast %21 : i32 to index
    %c512 = arith.constant 512 : index
    %27 = vector.load %arg23[%26, %c512] : memref<64x1024xf32, #tpu.memory_space<vmem>>, vector<8x512xf32>
    %cst_19 = arith.constant dense<0.000000e+00> : vector<8x512xf32>
    %28 = tpu.matmul %16, %15, %cst_19 {dimension_numbers = #tpu.dot_dimension_numbers<[1], [0], [0], [1], [0, 0, 1, 1], [], []>} : vector<8x128xf32>, vector<128x512xf32>, vector<8x512xf32> -> vector<8x512xf32>
    %29 = arith.addf %27, %28 : vector<8x512xf32>
    %30 = vector.extract_strided_slice %25 {offsets = [0, 0], sizes = [8, 128], strides = [1, 1]} : vector<8x512xf32> to vector<8x128xf32>
    %31 = arith.negf %30 : vector<8x128xf32>
    %32 = math.exp %31 : vector<8x128xf32>
    %cst_20 = arith.constant 1.000000e+00 : f32
    %33 = vector.broadcast %cst_20 : f32 to vector<8x128xf32>
    %34 = arith.addf %33, %32 : vector<8x128xf32>
    %35 = arith.divf %33, %34 : vector<8x128xf32>
    %36 = vector.extract_strided_slice %25 {offsets = [0, 128], sizes = [8, 128], strides = [1, 1]} : vector<8x512xf32> to vector<8x128xf32>
    %37 = arith.negf %36 : vector<8x128xf32>
    %38 = math.exp %37 : vector<8x128xf32>
    %cst_21 = arith.constant 1.000000e+00 : f32
    %39 = vector.broadcast %cst_21 : f32 to vector<8x128xf32>
    %40 = arith.addf %39, %38 : vector<8x128xf32>
    %41 = arith.divf %39, %40 : vector<8x128xf32>
    %42 = vector.extract_strided_slice %25 {offsets = [0, 256], sizes = [8, 128], strides = [1, 1]} : vector<8x512xf32> to vector<8x128xf32>
    %43 = math.tanh %42 : vector<8x128xf32>
    %44 = vector.extract_strided_slice %25 {offsets = [0, 384], sizes = [8, 128], strides = [1, 1]} : vector<8x512xf32> to vector<8x128xf32>
    %45 = arith.negf %44 : vector<8x128xf32>
    %46 = math.exp %45 : vector<8x128xf32>
    %cst_22 = arith.constant 1.000000e+00 : f32
    %47 = vector.broadcast %cst_22 : f32 to vector<8x128xf32>
    %48 = arith.addf %47, %46 : vector<8x128xf32>
    %49 = arith.divf %47, %48 : vector<8x128xf32>
    %50 = arith.mulf %41, %16 : vector<8x128xf32>
    %51 = arith.mulf %35, %43 : vector<8x128xf32>
    %52 = arith.addf %50, %51 : vector<8x128xf32>
    %53 = math.tanh %52 : vector<8x128xf32>
    %54 = arith.mulf %49, %53 : vector<8x128xf32>
    %55 = vector.extract_strided_slice %29 {offsets = [0, 0], sizes = [8, 128], strides = [1, 1]} : vector<8x512xf32> to vector<8x128xf32>
    %56 = arith.negf %55 : vector<8x128xf32>
    %57 = math.exp %56 : vector<8x128xf32>
    %cst_23 = arith.constant 1.000000e+00 : f32
    %58 = vector.broadcast %cst_23 : f32 to vector<8x128xf32>
    %59 = arith.addf %58, %57 : vector<8x128xf32>
    %60 = arith.divf %58, %59 : vector<8x128xf32>
    %61 = vector.extract_strided_slice %29 {offsets = [0, 128], sizes = [8, 128], strides = [1, 1]} : vector<8x512xf32> to vector<8x128xf32>
    %62 = arith.negf %61 : vector<8x128xf32>
    %63 = math.exp %62 : vector<8x128xf32>
    %cst_24 = arith.constant 1.000000e+00 : f32
    %64 = vector.broadcast %cst_24 : f32 to vector<8x128xf32>
    %65 = arith.addf %64, %63 : vector<8x128xf32>
    %66 = arith.divf %64, %65 : vector<8x128xf32>
    %67 = vector.extract_strided_slice %29 {offsets = [0, 256], sizes = [8, 128], strides = [1, 1]} : vector<8x512xf32> to vector<8x128xf32>
    %68 = math.tanh %67 : vector<8x128xf32>
    %69 = vector.extract_strided_slice %29 {offsets = [0, 384], sizes = [8, 128], strides = [1, 1]} : vector<8x512xf32> to vector<8x128xf32>
    %70 = arith.negf %69 : vector<8x128xf32>
    %71 = math.exp %70 : vector<8x128xf32>
    %cst_25 = arith.constant 1.000000e+00 : f32
    %72 = vector.broadcast %cst_25 : f32 to vector<8x128xf32>
    %73 = arith.addf %72, %71 : vector<8x128xf32>
    %74 = arith.divf %72, %73 : vector<8x128xf32>
    %75 = arith.mulf %66, %16 : vector<8x128xf32>
    %76 = arith.mulf %60, %68 : vector<8x128xf32>
    %77 = arith.addf %75, %76 : vector<8x128xf32>
    %78 = math.tanh %77 : vector<8x128xf32>
    %79 = arith.mulf %74, %78 : vector<8x128xf32>
    %80 = vector.broadcast %c0_i32 : i32 to vector<8x1xi32>
    %81 = arith.cmpi slt, %80, %0 : vector<8x1xi32>
    %82 = vector.broadcast %17 : i32 to vector<8x1xi32>
    %83 = arith.cmpi slt, %82, %0 : vector<8x1xi32>
    %cst_26 = arith.constant 0.000000e+00 : f32
    %84 = vector.shape_cast %81 : vector<8x1xi1> to vector<8x1xi1>
    %85 = vector.broadcast %84 : vector<8x1xi1> to vector<8x128xi1>
    %86 = vector.broadcast %cst_26 : f32 to vector<8x128xf32>
    %87 = arith.select %85, %54, %86 : vector<8x128xi1>, vector<8x128xf32>
    %88 = arith.index_cast %19 : i32 to index
    %c0_27 = arith.constant 0 : index
    %89 = vector.load %arg24[%88, %c0_27] : memref<64x128xf32, #tpu.memory_space<vmem>>, vector<8x128xf32>
    tpu.vector_store %arg24[%88, %c0_27], %87 {strides = array<i32>} : memref<64x128xf32, #tpu.memory_space<vmem>>, vector<8x128xf32>,
    %cst_28 = arith.constant 0.000000e+00 : f32
    %90 = vector.shape_cast %83 : vector<8x1xi1> to vector<8x1xi1>
    %91 = vector.broadcast %90 : vector<8x1xi1> to vector<8x128xi1>
    %92 = vector.broadcast %cst_28 : f32 to vector<8x128xf32>
    %93 = arith.select %91, %79, %92 : vector<8x128xi1>, vector<8x128xf32>
    %94 = arith.index_cast %21 : i32 to index
    %c0_29 = arith.constant 0 : index
    %95 = vector.load %arg25[%94, %c0_29] : memref<64x128xf32, #tpu.memory_space<vmem>>, vector<8x128xf32>
    tpu.vector_store %arg25[%94, %c0_29], %93 {strides = array<i32>} : memref<64x128xf32, #tpu.memory_space<vmem>>, vector<8x128xf32>,
    %96 = vector.shape_cast %81 : vector<8x1xi1> to vector<8x1xi1>
    %97 = vector.broadcast %96 : vector<8x1xi1> to vector<8x128xi1>
    %98 = arith.select %97, %54, %16 : vector<8x128xi1>, vector<8x128xf32>
    %99 = vector.shape_cast %81 : vector<8x1xi1> to vector<8x1xi1>
    %100 = vector.broadcast %99 : vector<8x1xi1> to vector<8x128xi1>
    %101 = arith.select %100, %52, %16 : vector<8x128xi1>, vector<8x128xf32>
    %102 = vector.shape_cast %83 : vector<8x1xi1> to vector<8x1xi1>
    %103 = vector.broadcast %102 : vector<8x1xi1> to vector<8x128xi1>
    %104 = arith.select %103, %79, %16 : vector<8x128xi1>, vector<8x128xf32>
    %105 = vector.shape_cast %83 : vector<8x1xi1> to vector<8x1xi1>
    %106 = vector.broadcast %105 : vector<8x1xi1> to vector<8x128xi1>
    %107 = arith.select %106, %77, %16 : vector<8x128xi1>, vector<8x128xf32>
    %c1_i32 = arith.constant 1 : i32
    %c7_i32_30 = arith.constant 7 : i32
    %108 = arith.subi %c7_i32_30, %c1_i32 : i32
    %c8_i32_31 = arith.constant 8 : i32
    %109 = arith.muli %c1_i32, %c8_i32_31 : i32
    %110 = tpu.assume_multiple %109, 8 : i32
    %c8_i32_32 = arith.constant 8 : i32
    %111 = arith.muli %108, %c8_i32_32 : i32
    %112 = tpu.assume_multiple %111, 8 : i32
    %113 = arith.index_cast %110 : i32 to index
    %c0_33 = arith.constant 0 : index
    %114 = vector.load %arg23[%113, %c0_33] : memref<64x1024xf32, #tpu.memory_space<vmem>>, vector<8x512xf32>
    %cst_34 = arith.constant dense<0.000000e+00> : vector<8x512xf32>
    %115 = tpu.matmul %98, %14, %cst_34 {dimension_numbers = #tpu.dot_dimension_numbers<[1], [0], [0], [1], [0, 0, 1, 1], [], []>} : vector<8x128xf32>, vector<128x512xf32>, vector<8x512xf32> -> vector<8x512xf32>
    %116 = arith.addf %114, %115 : vector<8x512xf32>
    %117 = arith.index_cast %112 : i32 to index
    %c512_35 = arith.constant 512 : index
    %118 = vector.load %arg23[%117, %c512_35] : memref<64x1024xf32, #tpu.memory_space<vmem>>, vector<8x512xf32>
    %cst_36 = arith.constant dense<0.000000e+00> : vector<8x512xf32>
    %119 = tpu.matmul %104, %15, %cst_36 {dimension_numbers = #tpu.dot_dimension_numbers<[1], [0], [0], [1], [0, 0, 1, 1], [], []>} : vector<8x128xf32>, vector<128x512xf32>, vector<8x512xf32> -> vector<8x512xf32>
    %120 = arith.addf %118, %119 : vector<8x512xf32>
    %121 = vector.extract_strided_slice %116 {offsets = [0, 0], sizes = [8, 128], strides = [1, 1]} : vector<8x512xf32> to vector<8x128xf32>
    %122 = arith.negf %121 : vector<8x128xf32>
    %123 = math.exp %122 : vector<8x128xf32>
    %cst_37 = arith.constant 1.000000e+00 : f32
    %124 = vector.broadcast %cst_37 : f32 to vector<8x128xf32>
    %125 = arith.addf %124, %123 : vector<8x128xf32>
    %126 = arith.divf %124, %125 : vector<8x128xf32>
    %127 = vector.extract_strided_slice %116 {offsets = [0, 128], sizes = [8, 128], strides = [1, 1]} : vector<8x512xf32> to vector<8x128xf32>
    %128 = arith.negf %127 : vector<8x128xf32>
    %129 = math.exp %128 : vector<8x128xf32>
    %cst_38 = arith.constant 1.000000e+00 : f32
    %130 = vector.broadcast %cst_38 : f32 to vector<8x128xf32>
    %131 = arith.addf %130, %129 : vector<8x128xf32>
    %132 = arith.divf %130, %131 : vector<8x128xf32>
    %133 = vector.extract_strided_slice %116 {offsets = [0, 256], sizes = [8, 128], strides = [1, 1]} : vector<8x512xf32> to vector<8x128xf32>
    %134 = math.tanh %133 : vector<8x128xf32>
    %135 = vector.extract_strided_slice %116 {offsets = [0, 384], sizes = [8, 128], strides = [1, 1]} : vector<8x512xf32> to vector<8x128xf32>
    %136 = arith.negf %135 : vector<8x128xf32>
    %137 = math.exp %136 : vector<8x128xf32>
    %cst_39 = arith.constant 1.000000e+00 : f32
    %138 = vector.broadcast %cst_39 : f32 to vector<8x128xf32>
    %139 = arith.addf %138, %137 : vector<8x128xf32>
    %140 = arith.divf %138, %139 : vector<8x128xf32>
    %141 = arith.mulf %132, %101 : vector<8x128xf32>
    %142 = arith.mulf %126, %134 : vector<8x128xf32>
    %143 = arith.addf %141, %142 : vector<8x128xf32>
    %144 = math.tanh %143 : vector<8x128xf32>
    %145 = arith.mulf %140, %144 : vector<8x128xf32>
    %146 = vector.extract_strided_slice %120 {offsets = [0, 0], sizes = [8, 128], strides = [1, 1]} : vector<8x512xf32> to vector<8x128xf32>
    %147 = arith.negf %146 : vector<8x128xf32>
    %148 = math.exp %147 : vector<8x128xf32>
    %cst_40 = arith.constant 1.000000e+00 : f32
    %149 = vector.broadcast %cst_40 : f32 to vector<8x128xf32>
    %150 = arith.addf %149, %148 : vector<8x128xf32>
    %151 = arith.divf %149, %150 : vector<8x128xf32>
    %152 = vector.extract_strided_slice %120 {offsets = [0, 128], sizes = [8, 128], strides = [1, 1]} : vector<8x512xf32> to vector<8x128xf32>
    %153 = arith.negf %152 : vector<8x128xf32>
    %154 = math.exp %153 : vector<8x128xf32>
    %cst_41 = arith.constant 1.000000e+00 : f32
    %155 = vector.broadcast %cst_41 : f32 to vector<8x128xf32>
    %156 = arith.addf %155, %154 : vector<8x128xf32>
    %157 = arith.divf %155, %156 : vector<8x128xf32>
    %158 = vector.extract_strided_slice %120 {offsets = [0, 256], sizes = [8, 128], strides = [1, 1]} : vector<8x512xf32> to vector<8x128xf32>
    %159 = math.tanh %158 : vector<8x128xf32>
    %160 = vector.extract_strided_slice %120 {offsets = [0, 384], sizes = [8, 128], strides = [1, 1]} : vector<8x512xf32> to vector<8x128xf32>
    %161 = arith.negf %160 : vector<8x128xf32>
    %162 = math.exp %161 : vector<8x128xf32>
    %cst_42 = arith.constant 1.000000e+00 : f32
    %163 = vector.broadcast %cst_42 : f32 to vector<8x128xf32>
    %164 = arith.addf %163, %162 : vector<8x128xf32>
    %165 = arith.divf %163, %164 : vector<8x128xf32>
    %166 = arith.mulf %157, %107 : vector<8x128xf32>
    %167 = arith.mulf %151, %159 : vector<8x128xf32>
    %168 = arith.addf %166, %167 : vector<8x128xf32>
    %169 = math.tanh %168 : vector<8x128xf32>
    %170 = arith.mulf %165, %169 : vector<8x128xf32>
    %171 = vector.broadcast %c1_i32 : i32 to vector<8x1xi32>
    %172 = arith.cmpi slt, %171, %0 : vector<8x1xi32>
    %173 = vector.broadcast %108 : i32 to vector<8x1xi32>
    %174 = arith.cmpi slt, %173, %0 : vector<8x1xi32>
    %cst_43 = arith.constant 0.000000e+00 : f32
    %175 = vector.shape_cast %172 : vector<8x1xi1> to vector<8x1xi1>
    %176 = vector.broadcast %175 : vector<8x1xi1> to vector<8x128xi1>
    %177 = vector.broadcast %cst_43 : f32 to vector<8x128xf32>
    %178 = arith.select %176, %145, %177 : vector<8x128xi1>, vector<8x128xf32>
    %179 = arith.index_cast %110 : i32 to index
    %c0_44 = arith.constant 0 : index
    %180 = vector.load %arg24[%179, %c0_44] : memref<64x128xf32, #tpu.memory_space<vmem>>, vector<8x128xf32>
    tpu.vector_store %arg24[%179, %c0_44], %178 {strides = array<i32>} : memref<64x128xf32, #tpu.memory_space<vmem>>, vector<8x128xf32>,
    %cst_45 = arith.constant 0.000000e+00 : f32
    %181 = vector.shape_cast %174 : vector<8x1xi1> to vector<8x1xi1>
    %182 = vector.broadcast %181 : vector<8x1xi1> to vector<8x128xi1>
    %183 = vector.broadcast %cst_45 : f32 to vector<8x128xf32>
    %184 = arith.select %182, %170, %183 : vector<8x128xi1>, vector<8x128xf32>
    %185 = arith.index_cast %112 : i32 to index
    %c0_46 = arith.constant 0 : index
    %186 = vector.load %arg25[%185, %c0_46] : memref<64x128xf32, #tpu.memory_space<vmem>>, vector<8x128xf32>
    tpu.vector_store %arg25[%185, %c0_46], %184 {strides = array<i32>} : memref<64x128xf32, #tpu.memory_space<vmem>>, vector<8x128xf32>,
    %187 = vector.shape_cast %172 : vector<8x1xi1> to vector<8x1xi1>
    %188 = vector.broadcast %187 : vector<8x1xi1> to vector<8x128xi1>
    %189 = arith.select %188, %145, %98 : vector<8x128xi1>, vector<8x128xf32>
    %190 = vector.shape_cast %172 : vector<8x1xi1> to vector<8x1xi1>
    %191 = vector.broadcast %190 : vector<8x1xi1> to vector<8x128xi1>
    %192 = arith.select %191, %143, %101 : vector<8x128xi1>, vector<8x128xf32>
    %193 = vector.shape_cast %174 : vector<8x1xi1> to vector<8x1xi1>
    %194 = vector.broadcast %193 : vector<8x1xi1> to vector<8x128xi1>
    %195 = arith.select %194, %170, %104 : vector<8x128xi1>, vector<8x128xf32>
    %196 = vector.shape_cast %174 : vector<8x1xi1> to vector<8x1xi1>
    %197 = vector.broadcast %196 : vector<8x1xi1> to vector<8x128xi1>
    %198 = arith.select %197, %168, %107 : vector<8x128xi1>, vector<8x128xf32>
    %c2_i32 = arith.constant 2 : i32
    %c7_i32_47 = arith.constant 7 : i32
    %199 = arith.subi %c7_i32_47, %c2_i32 : i32
    %c8_i32_48 = arith.constant 8 : i32
    %200 = arith.muli %c2_i32, %c8_i32_48 : i32
    %201 = tpu.assume_multiple %200, 8 : i32
    %c8_i32_49 = arith.constant 8 : i32
    %202 = arith.muli %199, %c8_i32_49 : i32
    %203 = tpu.assume_multiple %202, 8 : i32
    %204 = arith.index_cast %201 : i32 to index
    %c0_50 = arith.constant 0 : index
    %205 = vector.load %arg23[%204, %c0_50] : memref<64x1024xf32, #tpu.memory_space<vmem>>, vector<8x512xf32>
    %cst_51 = arith.constant dense<0.000000e+00> : vector<8x512xf32>
    %206 = tpu.matmul %189, %14, %cst_51 {dimension_numbers = #tpu.dot_dimension_numbers<[1], [0], [0], [1], [0, 0, 1, 1], [], []>} : vector<8x128xf32>, vector<128x512xf32>, vector<8x512xf32> -> vector<8x512xf32>
    %207 = arith.addf %205, %206 : vector<8x512xf32>
    %208 = arith.index_cast %203 : i32 to index
    %c512_52 = arith.constant 512 : index
    %209 = vector.load %arg23[%208, %c512_52] : memref<64x1024xf32, #tpu.memory_space<vmem>>, vector<8x512xf32>
    %cst_53 = arith.constant dense<0.000000e+00> : vector<8x512xf32>
    %210 = tpu.matmul %195, %15, %cst_53 {dimension_numbers = #tpu.dot_dimension_numbers<[1], [0], [0], [1], [0, 0, 1, 1], [], []>} : vector<8x128xf32>, vector<128x512xf32>, vector<8x512xf32> -> vector<8x512xf32>
    %211 = arith.addf %209, %210 : vector<8x512xf32>
    %212 = vector.extract_strided_slice %207 {offsets = [0, 0], sizes = [8, 128], strides = [1, 1]} : vector<8x512xf32> to vector<8x128xf32>
    %213 = arith.negf %212 : vector<8x128xf32>
    %214 = math.exp %213 : vector<8x128xf32>
    %cst_54 = arith.constant 1.000000e+00 : f32
    %215 = vector.broadcast %cst_54 : f32 to vector<8x128xf32>
    %216 = arith.addf %215, %214 : vector<8x128xf32>
    %217 = arith.divf %215, %216 : vector<8x128xf32>
    %218 = vector.extract_strided_slice %207 {offsets = [0, 128], sizes = [8, 128], strides = [1, 1]} : vector<8x512xf32> to vector<8x128xf32>
    %219 = arith.negf %218 : vector<8x128xf32>
    %220 = math.exp %219 : vector<8x128xf32>
    %cst_55 = arith.constant 1.000000e+00 : f32
    %221 = vector.broadcast %cst_55 : f32 to vector<8x128xf32>
    %222 = arith.addf %221, %220 : vector<8x128xf32>
    %223 = arith.divf %221, %222 : vector<8x128xf32>
    %224 = vector.extract_strided_slice %207 {offsets = [0, 256], sizes = [8, 128], strides = [1, 1]} : vector<8x512xf32> to vector<8x128xf32>
    %225 = math.tanh %224 : vector<8x128xf32>
    %226 = vector.extract_strided_slice %207 {offsets = [0, 384], sizes = [8, 128], strides = [1, 1]} : vector<8x512xf32> to vector<8x128xf32>
    %227 = arith.negf %226 : vector<8x128xf32>
    %228 = math.exp %227 : vector<8x128xf32>
    %cst_56 = arith.constant 1.000000e+00 : f32
    %229 = vector.broadcast %cst_56 : f32 to vector<8x128xf32>
    %230 = arith.addf %229, %228 : vector<8x128xf32>
    %231 = arith.divf %229, %230 : vector<8x128xf32>
    %232 = arith.mulf %223, %192 : vector<8x128xf32>
    %233 = arith.mulf %217, %225 : vector<8x128xf32>
    %234 = arith.addf %232, %233 : vector<8x128xf32>
    %235 = math.tanh %234 : vector<8x128xf32>
    %236 = arith.mulf %231, %235 : vector<8x128xf32>
    %237 = vector.extract_strided_slice %211 {offsets = [0, 0], sizes = [8, 128], strides = [1, 1]} : vector<8x512xf32> to vector<8x128xf32>
    %238 = arith.negf %237 : vector<8x128xf32>
    %239 = math.exp %238 : vector<8x128xf32>
    %cst_57 = arith.constant 1.000000e+00 : f32
    %240 = vector.broadcast %cst_57 : f32 to vector<8x128xf32>
    %241 = arith.addf %240, %239 : vector<8x128xf32>
    %242 = arith.divf %240, %241 : vector<8x128xf32>
    %243 = vector.extract_strided_slice %211 {offsets = [0, 128], sizes = [8, 128], strides = [1, 1]} : vector<8x512xf32> to vector<8x128xf32>
    %244 = arith.negf %243 : vector<8x128xf32>
    %245 = math.exp %244 : vector<8x128xf32>
    %cst_58 = arith.constant 1.000000e+00 : f32
    %246 = vector.broadcast %cst_58 : f32 to vector<8x128xf32>
    %247 = arith.addf %246, %245 : vector<8x128xf32>
    %248 = arith.divf %246, %247 : vector<8x128xf32>
    %249 = vector.extract_strided_slice %211 {offsets = [0, 256], sizes = [8, 128], strides = [1, 1]} : vector<8x512xf32> to vector<8x128xf32>
    %250 = math.tanh %249 : vector<8x128xf32>
    %251 = vector.extract_strided_slice %211 {offsets = [0, 384], sizes = [8, 128], strides = [1, 1]} : vector<8x512xf32> to vector<8x128xf32>
    %252 = arith.negf %251 : vector<8x128xf32>
    %253 = math.exp %252 : vector<8x128xf32>
    %cst_59 = arith.constant 1.000000e+00 : f32
    %254 = vector.broadcast %cst_59 : f32 to vector<8x128xf32>
    %255 = arith.addf %254, %253 : vector<8x128xf32>
    %256 = arith.divf %254, %255 : vector<8x128xf32>
    %257 = arith.mulf %248, %198 : vector<8x128xf32>
    %258 = arith.mulf %242, %250 : vector<8x128xf32>
    %259 = arith.addf %257, %258 : vector<8x128xf32>
    %260 = math.tanh %259 : vector<8x128xf32>
    %261 = arith.mulf %256, %260 : vector<8x128xf32>
    %262 = vector.broadcast %c2_i32 : i32 to vector<8x1xi32>
    %263 = arith.cmpi slt, %262, %0 : vector<8x1xi32>
    %264 = vector.broadcast %199 : i32 to vector<8x1xi32>
    %265 = arith.cmpi slt, %264, %0 : vector<8x1xi32>
    %cst_60 = arith.constant 0.000000e+00 : f32
    %266 = vector.shape_cast %263 : vector<8x1xi1> to vector<8x1xi1>
    %267 = vector.broadcast %266 : vector<8x1xi1> to vector<8x128xi1>
    %268 = vector.broadcast %cst_60 : f32 to vector<8x128xf32>
    %269 = arith.select %267, %236, %268 : vector<8x128xi1>, vector<8x128xf32>
    %270 = arith.index_cast %201 : i32 to index
    %c0_61 = arith.constant 0 : index
    %271 = vector.load %arg24[%270, %c0_61] : memref<64x128xf32, #tpu.memory_space<vmem>>, vector<8x128xf32>
    tpu.vector_store %arg24[%270, %c0_61], %269 {strides = array<i32>} : memref<64x128xf32, #tpu.memory_space<vmem>>, vector<8x128xf32>,
    %cst_62 = arith.constant 0.000000e+00 : f32
    %272 = vector.shape_cast %265 : vector<8x1xi1> to vector<8x1xi1>
    %273 = vector.broadcast %272 : vector<8x1xi1> to vector<8x128xi1>
    %274 = vector.broadcast %cst_62 : f32 to vector<8x128xf32>
    %275 = arith.select %273, %261, %274 : vector<8x128xi1>, vector<8x128xf32>
    %276 = arith.index_cast %203 : i32 to index
    %c0_63 = arith.constant 0 : index
    %277 = vector.load %arg25[%276, %c0_63] : memref<64x128xf32, #tpu.memory_space<vmem>>, vector<8x128xf32>
    tpu.vector_store %arg25[%276, %c0_63], %275 {strides = array<i32>} : memref<64x128xf32, #tpu.memory_space<vmem>>, vector<8x128xf32>,
    %278 = vector.shape_cast %263 : vector<8x1xi1> to vector<8x1xi1>
    %279 = vector.broadcast %278 : vector<8x1xi1> to vector<8x128xi1>
    %280 = arith.select %279, %236, %189 : vector<8x128xi1>, vector<8x128xf32>
    %281 = vector.shape_cast %263 : vector<8x1xi1> to vector<8x1xi1>
    %282 = vector.broadcast %281 : vector<8x1xi1> to vector<8x128xi1>
    %283 = arith.select %282, %234, %192 : vector<8x128xi1>, vector<8x128xf32>
    %284 = vector.shape_cast %265 : vector<8x1xi1> to vector<8x1xi1>
    %285 = vector.broadcast %284 : vector<8x1xi1> to vector<8x128xi1>
    %286 = arith.select %285, %261, %195 : vector<8x128xi1>, vector<8x128xf32>
    %287 = vector.shape_cast %265 : vector<8x1xi1> to vector<8x1xi1>
    %288 = vector.broadcast %287 : vector<8x1xi1> to vector<8x128xi1>
    %289 = arith.select %288, %259, %198 : vector<8x128xi1>, vector<8x128xf32>
    %c3_i32 = arith.constant 3 : i32
    %c7_i32_64 = arith.constant 7 : i32
    %290 = arith.subi %c7_i32_64, %c3_i32 : i32
    %c8_i32_65 = arith.constant 8 : i32
    %291 = arith.muli %c3_i32, %c8_i32_65 : i32
    %292 = tpu.assume_multiple %291, 8 : i32
    %c8_i32_66 = arith.constant 8 : i32
    %293 = arith.muli %290, %c8_i32_66 : i32
    %294 = tpu.assume_multiple %293, 8 : i32
    %295 = arith.index_cast %292 : i32 to index
    %c0_67 = arith.constant 0 : index
    %296 = vector.load %arg23[%295, %c0_67] : memref<64x1024xf32, #tpu.memory_space<vmem>>, vector<8x512xf32>
    %cst_68 = arith.constant dense<0.000000e+00> : vector<8x512xf32>
    %297 = tpu.matmul %280, %14, %cst_68 {dimension_numbers = #tpu.dot_dimension_numbers<[1], [0], [0], [1], [0, 0, 1, 1], [], []>} : vector<8x128xf32>, vector<128x512xf32>, vector<8x512xf32> -> vector<8x512xf32>
    %298 = arith.addf %296, %297 : vector<8x512xf32>
    %299 = arith.index_cast %294 : i32 to index
    %c512_69 = arith.constant 512 : index
    %300 = vector.load %arg23[%299, %c512_69] : memref<64x1024xf32, #tpu.memory_space<vmem>>, vector<8x512xf32>
    %cst_70 = arith.constant dense<0.000000e+00> : vector<8x512xf32>
    %301 = tpu.matmul %286, %15, %cst_70 {dimension_numbers = #tpu.dot_dimension_numbers<[1], [0], [0], [1], [0, 0, 1, 1], [], []>} : vector<8x128xf32>, vector<128x512xf32>, vector<8x512xf32> -> vector<8x512xf32>
    %302 = arith.addf %300, %301 : vector<8x512xf32>
    %303 = vector.extract_strided_slice %298 {offsets = [0, 0], sizes = [8, 128], strides = [1, 1]} : vector<8x512xf32> to vector<8x128xf32>
    %304 = arith.negf %303 : vector<8x128xf32>
    %305 = math.exp %304 : vector<8x128xf32>
    %cst_71 = arith.constant 1.000000e+00 : f32
    %306 = vector.broadcast %cst_71 : f32 to vector<8x128xf32>
    %307 = arith.addf %306, %305 : vector<8x128xf32>
    %308 = arith.divf %306, %307 : vector<8x128xf32>
    %309 = vector.extract_strided_slice %298 {offsets = [0, 128], sizes = [8, 128], strides = [1, 1]} : vector<8x512xf32> to vector<8x128xf32>
    %310 = arith.negf %309 : vector<8x128xf32>
    %311 = math.exp %310 : vector<8x128xf32>
    %cst_72 = arith.constant 1.000000e+00 : f32
    %312 = vector.broadcast %cst_72 : f32 to vector<8x128xf32>
    %313 = arith.addf %312, %311 : vector<8x128xf32>
    %314 = arith.divf %312, %313 : vector<8x128xf32>
    %315 = vector.extract_strided_slice %298 {offsets = [0, 256], sizes = [8, 128], strides = [1, 1]} : vector<8x512xf32> to vector<8x128xf32>
    %316 = math.tanh %315 : vector<8x128xf32>
    %317 = vector.extract_strided_slice %298 {offsets = [0, 384], sizes = [8, 128], strides = [1, 1]} : vector<8x512xf32> to vector<8x128xf32>
    %318 = arith.negf %317 : vector<8x128xf32>
    %319 = math.exp %318 : vector<8x128xf32>
    %cst_73 = arith.constant 1.000000e+00 : f32
    %320 = vector.broadcast %cst_73 : f32 to vector<8x128xf32>
    %321 = arith.addf %320, %319 : vector<8x128xf32>
    %322 = arith.divf %320, %321 : vector<8x128xf32>
    %323 = arith.mulf %314, %283 : vector<8x128xf32>
    %324 = arith.mulf %308, %316 : vector<8x128xf32>
    %325 = arith.addf %323, %324 : vector<8x128xf32>
    %326 = math.tanh %325 : vector<8x128xf32>
    %327 = arith.mulf %322, %326 : vector<8x128xf32>
    %328 = vector.extract_strided_slice %302 {offsets = [0, 0], sizes = [8, 128], strides = [1, 1]} : vector<8x512xf32> to vector<8x128xf32>
    %329 = arith.negf %328 : vector<8x128xf32>
    %330 = math.exp %329 : vector<8x128xf32>
    %cst_74 = arith.constant 1.000000e+00 : f32
    %331 = vector.broadcast %cst_74 : f32 to vector<8x128xf32>
    %332 = arith.addf %331, %330 : vector<8x128xf32>
    %333 = arith.divf %331, %332 : vector<8x128xf32>
    %334 = vector.extract_strided_slice %302 {offsets = [0, 128], sizes = [8, 128], strides = [1, 1]} : vector<8x512xf32> to vector<8x128xf32>
    %335 = arith.negf %334 : vector<8x128xf32>
    %336 = math.exp %335 : vector<8x128xf32>
    %cst_75 = arith.constant 1.000000e+00 : f32
    %337 = vector.broadcast %cst_75 : f32 to vector<8x128xf32>
    %338 = arith.addf %337, %336 : vector<8x128xf32>
    %339 = arith.divf %337, %338 : vector<8x128xf32>
    %340 = vector.extract_strided_slice %302 {offsets = [0, 256], sizes = [8, 128], strides = [1, 1]} : vector<8x512xf32> to vector<8x128xf32>
    %341 = math.tanh %340 : vector<8x128xf32>
    %342 = vector.extract_strided_slice %302 {offsets = [0, 384], sizes = [8, 128], strides = [1, 1]} : vector<8x512xf32> to vector<8x128xf32>
    %343 = arith.negf %342 : vector<8x128xf32>
    %344 = math.exp %343 : vector<8x128xf32>
    %cst_76 = arith.constant 1.000000e+00 : f32
    %345 = vector.broadcast %cst_76 : f32 to vector<8x128xf32>
    %346 = arith.addf %345, %344 : vector<8x128xf32>
    %347 = arith.divf %345, %346 : vector<8x128xf32>
    %348 = arith.mulf %339, %289 : vector<8x128xf32>
    %349 = arith.mulf %333, %341 : vector<8x128xf32>
    %350 = arith.addf %348, %349 : vector<8x128xf32>
    %351 = math.tanh %350 : vector<8x128xf32>
    %352 = arith.mulf %347, %351 : vector<8x128xf32>
    %353 = vector.broadcast %c3_i32 : i32 to vector<8x1xi32>
    %354 = arith.cmpi slt, %353, %0 : vector<8x1xi32>
    %355 = vector.broadcast %290 : i32 to vector<8x1xi32>
    %356 = arith.cmpi slt, %355, %0 : vector<8x1xi32>
    %cst_77 = arith.constant 0.000000e+00 : f32
    %357 = vector.shape_cast %354 : vector<8x1xi1> to vector<8x1xi1>
    %358 = vector.broadcast %357 : vector<8x1xi1> to vector<8x128xi1>
    %359 = vector.broadcast %cst_77 : f32 to vector<8x128xf32>
    %360 = arith.select %358, %327, %359 : vector<8x128xi1>, vector<8x128xf32>
    %361 = arith.index_cast %292 : i32 to index
    %c0_78 = arith.constant 0 : index
    %362 = vector.load %arg24[%361, %c0_78] : memref<64x128xf32, #tpu.memory_space<vmem>>, vector<8x128xf32>
    tpu.vector_store %arg24[%361, %c0_78], %360 {strides = array<i32>} : memref<64x128xf32, #tpu.memory_space<vmem>>, vector<8x128xf32>,
    %cst_79 = arith.constant 0.000000e+00 : f32
    %363 = vector.shape_cast %356 : vector<8x1xi1> to vector<8x1xi1>
    %364 = vector.broadcast %363 : vector<8x1xi1> to vector<8x128xi1>
    %365 = vector.broadcast %cst_79 : f32 to vector<8x128xf32>
    %366 = arith.select %364, %352, %365 : vector<8x128xi1>, vector<8x128xf32>
    %367 = arith.index_cast %294 : i32 to index
    %c0_80 = arith.constant 0 : index
    %368 = vector.load %arg25[%367, %c0_80] : memref<64x128xf32, #tpu.memory_space<vmem>>, vector<8x128xf32>
    tpu.vector_store %arg25[%367, %c0_80], %366 {strides = array<i32>} : memref<64x128xf32, #tpu.memory_space<vmem>>, vector<8x128xf32>,
    %369 = vector.shape_cast %354 : vector<8x1xi1> to vector<8x1xi1>
    %370 = vector.broadcast %369 : vector<8x1xi1> to vector<8x128xi1>
    %371 = arith.select %370, %327, %280 : vector<8x128xi1>, vector<8x128xf32>
    %372 = vector.shape_cast %354 : vector<8x1xi1> to vector<8x1xi1>
    %373 = vector.broadcast %372 : vector<8x1xi1> to vector<8x128xi1>
    %374 = arith.select %373, %325, %283 : vector<8x128xi1>, vector<8x128xf32>
    %375 = vector.shape_cast %356 : vector<8x1xi1> to vector<8x1xi1>
    %376 = vector.broadcast %375 : vector<8x1xi1> to vector<8x128xi1>
    %377 = arith.select %376, %352, %286 : vector<8x128xi1>, vector<8x128xf32>
    %378 = vector.shape_cast %356 : vector<8x1xi1> to vector<8x1xi1>
    %379 = vector.broadcast %378 : vector<8x1xi1> to vector<8x128xi1>
    %380 = arith.select %379, %350, %289 : vector<8x128xi1>, vector<8x128xf32>
    %c4_i32 = arith.constant 4 : i32
    %c7_i32_81 = arith.constant 7 : i32
    %381 = arith.subi %c7_i32_81, %c4_i32 : i32
    %c8_i32_82 = arith.constant 8 : i32
    %382 = arith.muli %c4_i32, %c8_i32_82 : i32
    %383 = tpu.assume_multiple %382, 8 : i32
    %c8_i32_83 = arith.constant 8 : i32
    %384 = arith.muli %381, %c8_i32_83 : i32
    %385 = tpu.assume_multiple %384, 8 : i32
    %386 = arith.index_cast %383 : i32 to index
    %c0_84 = arith.constant 0 : index
    %387 = vector.load %arg23[%386, %c0_84] : memref<64x1024xf32, #tpu.memory_space<vmem>>, vector<8x512xf32>
    %cst_85 = arith.constant dense<0.000000e+00> : vector<8x512xf32>
    %388 = tpu.matmul %371, %14, %cst_85 {dimension_numbers = #tpu.dot_dimension_numbers<[1], [0], [0], [1], [0, 0, 1, 1], [], []>} : vector<8x128xf32>, vector<128x512xf32>, vector<8x512xf32> -> vector<8x512xf32>
    %389 = arith.addf %387, %388 : vector<8x512xf32>
    %390 = arith.index_cast %385 : i32 to index
    %c512_86 = arith.constant 512 : index
    %391 = vector.load %arg23[%390, %c512_86] : memref<64x1024xf32, #tpu.memory_space<vmem>>, vector<8x512xf32>
    %cst_87 = arith.constant dense<0.000000e+00> : vector<8x512xf32>
    %392 = tpu.matmul %377, %15, %cst_87 {dimension_numbers = #tpu.dot_dimension_numbers<[1], [0], [0], [1], [0, 0, 1, 1], [], []>} : vector<8x128xf32>, vector<128x512xf32>, vector<8x512xf32> -> vector<8x512xf32>
    %393 = arith.addf %391, %392 : vector<8x512xf32>
    %394 = vector.extract_strided_slice %389 {offsets = [0, 0], sizes = [8, 128], strides = [1, 1]} : vector<8x512xf32> to vector<8x128xf32>
    %395 = arith.negf %394 : vector<8x128xf32>
    %396 = math.exp %395 : vector<8x128xf32>
    %cst_88 = arith.constant 1.000000e+00 : f32
    %397 = vector.broadcast %cst_88 : f32 to vector<8x128xf32>
    %398 = arith.addf %397, %396 : vector<8x128xf32>
    %399 = arith.divf %397, %398 : vector<8x128xf32>
    %400 = vector.extract_strided_slice %389 {offsets = [0, 128], sizes = [8, 128], strides = [1, 1]} : vector<8x512xf32> to vector<8x128xf32>
    %401 = arith.negf %400 : vector<8x128xf32>
    %402 = math.exp %401 : vector<8x128xf32>
    %cst_89 = arith.constant 1.000000e+00 : f32
    %403 = vector.broadcast %cst_89 : f32 to vector<8x128xf32>
    %404 = arith.addf %403, %402 : vector<8x128xf32>
    %405 = arith.divf %403, %404 : vector<8x128xf32>
    %406 = vector.extract_strided_slice %389 {offsets = [0, 256], sizes = [8, 128], strides = [1, 1]} : vector<8x512xf32> to vector<8x128xf32>
    %407 = math.tanh %406 : vector<8x128xf32>
    %408 = vector.extract_strided_slice %389 {offsets = [0, 384], sizes = [8, 128], strides = [1, 1]} : vector<8x512xf32> to vector<8x128xf32>
    %409 = arith.negf %408 : vector<8x128xf32>
    %410 = math.exp %409 : vector<8x128xf32>
    %cst_90 = arith.constant 1.000000e+00 : f32
    %411 = vector.broadcast %cst_90 : f32 to vector<8x128xf32>
    %412 = arith.addf %411, %410 : vector<8x128xf32>
    %413 = arith.divf %411, %412 : vector<8x128xf32>
    %414 = arith.mulf %405, %374 : vector<8x128xf32>
    %415 = arith.mulf %399, %407 : vector<8x128xf32>
    %416 = arith.addf %414, %415 : vector<8x128xf32>
    %417 = math.tanh %416 : vector<8x128xf32>
    %418 = arith.mulf %413, %417 : vector<8x128xf32>
    %419 = vector.extract_strided_slice %393 {offsets = [0, 0], sizes = [8, 128], strides = [1, 1]} : vector<8x512xf32> to vector<8x128xf32>
    %420 = arith.negf %419 : vector<8x128xf32>
    %421 = math.exp %420 : vector<8x128xf32>
    %cst_91 = arith.constant 1.000000e+00 : f32
    %422 = vector.broadcast %cst_91 : f32 to vector<8x128xf32>
    %423 = arith.addf %422, %421 : vector<8x128xf32>
    %424 = arith.divf %422, %423 : vector<8x128xf32>
    %425 = vector.extract_strided_slice %393 {offsets = [0, 128], sizes = [8, 128], strides = [1, 1]} : vector<8x512xf32> to vector<8x128xf32>
    %426 = arith.negf %425 : vector<8x128xf32>
    %427 = math.exp %426 : vector<8x128xf32>
    %cst_92 = arith.constant 1.000000e+00 : f32
    %428 = vector.broadcast %cst_92 : f32 to vector<8x128xf32>
    %429 = arith.addf %428, %427 : vector<8x128xf32>
    %430 = arith.divf %428, %429 : vector<8x128xf32>
    %431 = vector.extract_strided_slice %393 {offsets = [0, 256], sizes = [8, 128], strides = [1, 1]} : vector<8x512xf32> to vector<8x128xf32>
    %432 = math.tanh %431 : vector<8x128xf32>
    %433 = vector.extract_strided_slice %393 {offsets = [0, 384], sizes = [8, 128], strides = [1, 1]} : vector<8x512xf32> to vector<8x128xf32>
    %434 = arith.negf %433 : vector<8x128xf32>
    %435 = math.exp %434 : vector<8x128xf32>
    %cst_93 = arith.constant 1.000000e+00 : f32
    %436 = vector.broadcast %cst_93 : f32 to vector<8x128xf32>
    %437 = arith.addf %436, %435 : vector<8x128xf32>
    %438 = arith.divf %436, %437 : vector<8x128xf32>
    %439 = arith.mulf %430, %380 : vector<8x128xf32>
    %440 = arith.mulf %424, %432 : vector<8x128xf32>
    %441 = arith.addf %439, %440 : vector<8x128xf32>
    %442 = math.tanh %441 : vector<8x128xf32>
    %443 = arith.mulf %438, %442 : vector<8x128xf32>
    %444 = vector.broadcast %c4_i32 : i32 to vector<8x1xi32>
    %445 = arith.cmpi slt, %444, %0 : vector<8x1xi32>
    %446 = vector.broadcast %381 : i32 to vector<8x1xi32>
    %447 = arith.cmpi slt, %446, %0 : vector<8x1xi32>
    %cst_94 = arith.constant 0.000000e+00 : f32
    %448 = vector.shape_cast %445 : vector<8x1xi1> to vector<8x1xi1>
    %449 = vector.broadcast %448 : vector<8x1xi1> to vector<8x128xi1>
    %450 = vector.broadcast %cst_94 : f32 to vector<8x128xf32>
    %451 = arith.select %449, %418, %450 : vector<8x128xi1>, vector<8x128xf32>
    %452 = arith.index_cast %383 : i32 to index
    %c0_95 = arith.constant 0 : index
    %453 = vector.load %arg24[%452, %c0_95] : memref<64x128xf32, #tpu.memory_space<vmem>>, vector<8x128xf32>
    tpu.vector_store %arg24[%452, %c0_95], %451 {strides = array<i32>} : memref<64x128xf32, #tpu.memory_space<vmem>>, vector<8x128xf32>,
    %cst_96 = arith.constant 0.000000e+00 : f32
    %454 = vector.shape_cast %447 : vector<8x1xi1> to vector<8x1xi1>
    %455 = vector.broadcast %454 : vector<8x1xi1> to vector<8x128xi1>
    %456 = vector.broadcast %cst_96 : f32 to vector<8x128xf32>
    %457 = arith.select %455, %443, %456 : vector<8x128xi1>, vector<8x128xf32>
    %458 = arith.index_cast %385 : i32 to index
    %c0_97 = arith.constant 0 : index
    %459 = vector.load %arg25[%458, %c0_97] : memref<64x128xf32, #tpu.memory_space<vmem>>, vector<8x128xf32>
    tpu.vector_store %arg25[%458, %c0_97], %457 {strides = array<i32>} : memref<64x128xf32, #tpu.memory_space<vmem>>, vector<8x128xf32>,
    %460 = vector.shape_cast %445 : vector<8x1xi1> to vector<8x1xi1>
    %461 = vector.broadcast %460 : vector<8x1xi1> to vector<8x128xi1>
    %462 = arith.select %461, %418, %371 : vector<8x128xi1>, vector<8x128xf32>
    %463 = vector.shape_cast %445 : vector<8x1xi1> to vector<8x1xi1>
    %464 = vector.broadcast %463 : vector<8x1xi1> to vector<8x128xi1>
    %465 = arith.select %464, %416, %374 : vector<8x128xi1>, vector<8x128xf32>
    %466 = vector.shape_cast %447 : vector<8x1xi1> to vector<8x1xi1>
    %467 = vector.broadcast %466 : vector<8x1xi1> to vector<8x128xi1>
    %468 = arith.select %467, %443, %377 : vector<8x128xi1>, vector<8x128xf32>
    %469 = vector.shape_cast %447 : vector<8x1xi1> to vector<8x1xi1>
    %470 = vector.broadcast %469 : vector<8x1xi1> to vector<8x128xi1>
    %471 = arith.select %470, %441, %380 : vector<8x128xi1>, vector<8x128xf32>
    %c5_i32 = arith.constant 5 : i32
    %c7_i32_98 = arith.constant 7 : i32
    %472 = arith.subi %c7_i32_98, %c5_i32 : i32
    %c8_i32_99 = arith.constant 8 : i32
    %473 = arith.muli %c5_i32, %c8_i32_99 : i32
    %474 = tpu.assume_multiple %473, 8 : i32
    %c8_i32_100 = arith.constant 8 : i32
    %475 = arith.muli %472, %c8_i32_100 : i32
    %476 = tpu.assume_multiple %475, 8 : i32
    %477 = arith.index_cast %474 : i32 to index
    %c0_101 = arith.constant 0 : index
    %478 = vector.load %arg23[%477, %c0_101] : memref<64x1024xf32, #tpu.memory_space<vmem>>, vector<8x512xf32>
    %cst_102 = arith.constant dense<0.000000e+00> : vector<8x512xf32>
    %479 = tpu.matmul %462, %14, %cst_102 {dimension_numbers = #tpu.dot_dimension_numbers<[1], [0], [0], [1], [0, 0, 1, 1], [], []>} : vector<8x128xf32>, vector<128x512xf32>, vector<8x512xf32> -> vector<8x512xf32>
    %480 = arith.addf %478, %479 : vector<8x512xf32>
    %481 = arith.index_cast %476 : i32 to index
    %c512_103 = arith.constant 512 : index
    %482 = vector.load %arg23[%481, %c512_103] : memref<64x1024xf32, #tpu.memory_space<vmem>>, vector<8x512xf32>
    %cst_104 = arith.constant dense<0.000000e+00> : vector<8x512xf32>
    %483 = tpu.matmul %468, %15, %cst_104 {dimension_numbers = #tpu.dot_dimension_numbers<[1], [0], [0], [1], [0, 0, 1, 1], [], []>} : vector<8x128xf32>, vector<128x512xf32>, vector<8x512xf32> -> vector<8x512xf32>
    %484 = arith.addf %482, %483 : vector<8x512xf32>
    %485 = vector.extract_strided_slice %480 {offsets = [0, 0], sizes = [8, 128], strides = [1, 1]} : vector<8x512xf32> to vector<8x128xf32>
    %486 = arith.negf %485 : vector<8x128xf32>
    %487 = math.exp %486 : vector<8x128xf32>
    %cst_105 = arith.constant 1.000000e+00 : f32
    %488 = vector.broadcast %cst_105 : f32 to vector<8x128xf32>
    %489 = arith.addf %488, %487 : vector<8x128xf32>
    %490 = arith.divf %488, %489 : vector<8x128xf32>
    %491 = vector.extract_strided_slice %480 {offsets = [0, 128], sizes = [8, 128], strides = [1, 1]} : vector<8x512xf32> to vector<8x128xf32>
    %492 = arith.negf %491 : vector<8x128xf32>
    %493 = math.exp %492 : vector<8x128xf32>
    %cst_106 = arith.constant 1.000000e+00 : f32
    %494 = vector.broadcast %cst_106 : f32 to vector<8x128xf32>
    %495 = arith.addf %494, %493 : vector<8x128xf32>
    %496 = arith.divf %494, %495 : vector<8x128xf32>
    %497 = vector.extract_strided_slice %480 {offsets = [0, 256], sizes = [8, 128], strides = [1, 1]} : vector<8x512xf32> to vector<8x128xf32>
    %498 = math.tanh %497 : vector<8x128xf32>
    %499 = vector.extract_strided_slice %480 {offsets = [0, 384], sizes = [8, 128], strides = [1, 1]} : vector<8x512xf32> to vector<8x128xf32>
    %500 = arith.negf %499 : vector<8x128xf32>
    %501 = math.exp %500 : vector<8x128xf32>
    %cst_107 = arith.constant 1.000000e+00 : f32
    %502 = vector.broadcast %cst_107 : f32 to vector<8x128xf32>
    %503 = arith.addf %502, %501 : vector<8x128xf32>
    %504 = arith.divf %502, %503 : vector<8x128xf32>
    %505 = arith.mulf %496, %465 : vector<8x128xf32>
    %506 = arith.mulf %490, %498 : vector<8x128xf32>
    %507 = arith.addf %505, %506 : vector<8x128xf32>
    %508 = math.tanh %507 : vector<8x128xf32>
    %509 = arith.mulf %504, %508 : vector<8x128xf32>
    %510 = vector.extract_strided_slice %484 {offsets = [0, 0], sizes = [8, 128], strides = [1, 1]} : vector<8x512xf32> to vector<8x128xf32>
    %511 = arith.negf %510 : vector<8x128xf32>
    %512 = math.exp %511 : vector<8x128xf32>
    %cst_108 = arith.constant 1.000000e+00 : f32
    %513 = vector.broadcast %cst_108 : f32 to vector<8x128xf32>
    %514 = arith.addf %513, %512 : vector<8x128xf32>
    %515 = arith.divf %513, %514 : vector<8x128xf32>
    %516 = vector.extract_strided_slice %484 {offsets = [0, 128], sizes = [8, 128], strides = [1, 1]} : vector<8x512xf32> to vector<8x128xf32>
    %517 = arith.negf %516 : vector<8x128xf32>
    %518 = math.exp %517 : vector<8x128xf32>
    %cst_109 = arith.constant 1.000000e+00 : f32
    %519 = vector.broadcast %cst_109 : f32 to vector<8x128xf32>
    %520 = arith.addf %519, %518 : vector<8x128xf32>
    %521 = arith.divf %519, %520 : vector<8x128xf32>
    %522 = vector.extract_strided_slice %484 {offsets = [0, 256], sizes = [8, 128], strides = [1, 1]} : vector<8x512xf32> to vector<8x128xf32>
    %523 = math.tanh %522 : vector<8x128xf32>
    %524 = vector.extract_strided_slice %484 {offsets = [0, 384], sizes = [8, 128], strides = [1, 1]} : vector<8x512xf32> to vector<8x128xf32>
    %525 = arith.negf %524 : vector<8x128xf32>
    %526 = math.exp %525 : vector<8x128xf32>
    %cst_110 = arith.constant 1.000000e+00 : f32
    %527 = vector.broadcast %cst_110 : f32 to vector<8x128xf32>
    %528 = arith.addf %527, %526 : vector<8x128xf32>
    %529 = arith.divf %527, %528 : vector<8x128xf32>
    %530 = arith.mulf %521, %471 : vector<8x128xf32>
    %531 = arith.mulf %515, %523 : vector<8x128xf32>
    %532 = arith.addf %530, %531 : vector<8x128xf32>
    %533 = math.tanh %532 : vector<8x128xf32>
    %534 = arith.mulf %529, %533 : vector<8x128xf32>
    %535 = vector.broadcast %c5_i32 : i32 to vector<8x1xi32>
    %536 = arith.cmpi slt, %535, %0 : vector<8x1xi32>
    %537 = vector.broadcast %472 : i32 to vector<8x1xi32>
    %538 = arith.cmpi slt, %537, %0 : vector<8x1xi32>
    %cst_111 = arith.constant 0.000000e+00 : f32
    %539 = vector.shape_cast %536 : vector<8x1xi1> to vector<8x1xi1>
    %540 = vector.broadcast %539 : vector<8x1xi1> to vector<8x128xi1>
    %541 = vector.broadcast %cst_111 : f32 to vector<8x128xf32>
    %542 = arith.select %540, %509, %541 : vector<8x128xi1>, vector<8x128xf32>
    %543 = arith.index_cast %474 : i32 to index
    %c0_112 = arith.constant 0 : index
    %544 = vector.load %arg24[%543, %c0_112] : memref<64x128xf32, #tpu.memory_space<vmem>>, vector<8x128xf32>
    tpu.vector_store %arg24[%543, %c0_112], %542 {strides = array<i32>} : memref<64x128xf32, #tpu.memory_space<vmem>>, vector<8x128xf32>,
    %cst_113 = arith.constant 0.000000e+00 : f32
    %545 = vector.shape_cast %538 : vector<8x1xi1> to vector<8x1xi1>
    %546 = vector.broadcast %545 : vector<8x1xi1> to vector<8x128xi1>
    %547 = vector.broadcast %cst_113 : f32 to vector<8x128xf32>
    %548 = arith.select %546, %534, %547 : vector<8x128xi1>, vector<8x128xf32>
    %549 = arith.index_cast %476 : i32 to index
    %c0_114 = arith.constant 0 : index
    %550 = vector.load %arg25[%549, %c0_114] : memref<64x128xf32, #tpu.memory_space<vmem>>, vector<8x128xf32>
    tpu.vector_store %arg25[%549, %c0_114], %548 {strides = array<i32>} : memref<64x128xf32, #tpu.memory_space<vmem>>, vector<8x128xf32>,
    %551 = vector.shape_cast %536 : vector<8x1xi1> to vector<8x1xi1>
    %552 = vector.broadcast %551 : vector<8x1xi1> to vector<8x128xi1>
    %553 = arith.select %552, %509, %462 : vector<8x128xi1>, vector<8x128xf32>
    %554 = vector.shape_cast %536 : vector<8x1xi1> to vector<8x1xi1>
    %555 = vector.broadcast %554 : vector<8x1xi1> to vector<8x128xi1>
    %556 = arith.select %555, %507, %465 : vector<8x128xi1>, vector<8x128xf32>
    %557 = vector.shape_cast %538 : vector<8x1xi1> to vector<8x1xi1>
    %558 = vector.broadcast %557 : vector<8x1xi1> to vector<8x128xi1>
    %559 = arith.select %558, %534, %468 : vector<8x128xi1>, vector<8x128xf32>
    %560 = vector.shape_cast %538 : vector<8x1xi1> to vector<8x1xi1>
    %561 = vector.broadcast %560 : vector<8x1xi1> to vector<8x128xi1>
    %562 = arith.select %561, %532, %471 : vector<8x128xi1>, vector<8x128xf32>
    %c6_i32 = arith.constant 6 : i32
    %c7_i32_115 = arith.constant 7 : i32
    %563 = arith.subi %c7_i32_115, %c6_i32 : i32
    %c8_i32_116 = arith.constant 8 : i32
    %564 = arith.muli %c6_i32, %c8_i32_116 : i32
    %565 = tpu.assume_multiple %564, 8 : i32
    %c8_i32_117 = arith.constant 8 : i32
    %566 = arith.muli %563, %c8_i32_117 : i32
    %567 = tpu.assume_multiple %566, 8 : i32
    %568 = arith.index_cast %565 : i32 to index
    %c0_118 = arith.constant 0 : index
    %569 = vector.load %arg23[%568, %c0_118] : memref<64x1024xf32, #tpu.memory_space<vmem>>, vector<8x512xf32>
    %cst_119 = arith.constant dense<0.000000e+00> : vector<8x512xf32>
    %570 = tpu.matmul %553, %14, %cst_119 {dimension_numbers = #tpu.dot_dimension_numbers<[1], [0], [0], [1], [0, 0, 1, 1], [], []>} : vector<8x128xf32>, vector<128x512xf32>, vector<8x512xf32> -> vector<8x512xf32>
    %571 = arith.addf %569, %570 : vector<8x512xf32>
    %572 = arith.index_cast %567 : i32 to index
    %c512_120 = arith.constant 512 : index
    %573 = vector.load %arg23[%572, %c512_120] : memref<64x1024xf32, #tpu.memory_space<vmem>>, vector<8x512xf32>
    %cst_121 = arith.constant dense<0.000000e+00> : vector<8x512xf32>
    %574 = tpu.matmul %559, %15, %cst_121 {dimension_numbers = #tpu.dot_dimension_numbers<[1], [0], [0], [1], [0, 0, 1, 1], [], []>} : vector<8x128xf32>, vector<128x512xf32>, vector<8x512xf32> -> vector<8x512xf32>
    %575 = arith.addf %573, %574 : vector<8x512xf32>
    %576 = vector.extract_strided_slice %571 {offsets = [0, 0], sizes = [8, 128], strides = [1, 1]} : vector<8x512xf32> to vector<8x128xf32>
    %577 = arith.negf %576 : vector<8x128xf32>
    %578 = math.exp %577 : vector<8x128xf32>
    %cst_122 = arith.constant 1.000000e+00 : f32
    %579 = vector.broadcast %cst_122 : f32 to vector<8x128xf32>
    %580 = arith.addf %579, %578 : vector<8x128xf32>
    %581 = arith.divf %579, %580 : vector<8x128xf32>
    %582 = vector.extract_strided_slice %571 {offsets = [0, 128], sizes = [8, 128], strides = [1, 1]} : vector<8x512xf32> to vector<8x128xf32>
    %583 = arith.negf %582 : vector<8x128xf32>
    %584 = math.exp %583 : vector<8x128xf32>
    %cst_123 = arith.constant 1.000000e+00 : f32
    %585 = vector.broadcast %cst_123 : f32 to vector<8x128xf32>
    %586 = arith.addf %585, %584 : vector<8x128xf32>
    %587 = arith.divf %585, %586 : vector<8x128xf32>
    %588 = vector.extract_strided_slice %571 {offsets = [0, 256], sizes = [8, 128], strides = [1, 1]} : vector<8x512xf32> to vector<8x128xf32>
    %589 = math.tanh %588 : vector<8x128xf32>
    %590 = vector.extract_strided_slice %571 {offsets = [0, 384], sizes = [8, 128], strides = [1, 1]} : vector<8x512xf32> to vector<8x128xf32>
    %591 = arith.negf %590 : vector<8x128xf32>
    %592 = math.exp %591 : vector<8x128xf32>
    %cst_124 = arith.constant 1.000000e+00 : f32
    %593 = vector.broadcast %cst_124 : f32 to vector<8x128xf32>
    %594 = arith.addf %593, %592 : vector<8x128xf32>
    %595 = arith.divf %593, %594 : vector<8x128xf32>
    %596 = arith.mulf %587, %556 : vector<8x128xf32>
    %597 = arith.mulf %581, %589 : vector<8x128xf32>
    %598 = arith.addf %596, %597 : vector<8x128xf32>
    %599 = math.tanh %598 : vector<8x128xf32>
    %600 = arith.mulf %595, %599 : vector<8x128xf32>
    %601 = vector.extract_strided_slice %575 {offsets = [0, 0], sizes = [8, 128], strides = [1, 1]} : vector<8x512xf32> to vector<8x128xf32>
    %602 = arith.negf %601 : vector<8x128xf32>
    %603 = math.exp %602 : vector<8x128xf32>
    %cst_125 = arith.constant 1.000000e+00 : f32
    %604 = vector.broadcast %cst_125 : f32 to vector<8x128xf32>
    %605 = arith.addf %604, %603 : vector<8x128xf32>
    %606 = arith.divf %604, %605 : vector<8x128xf32>
    %607 = vector.extract_strided_slice %575 {offsets = [0, 128], sizes = [8, 128], strides = [1, 1]} : vector<8x512xf32> to vector<8x128xf32>
    %608 = arith.negf %607 : vector<8x128xf32>
    %609 = math.exp %608 : vector<8x128xf32>
    %cst_126 = arith.constant 1.000000e+00 : f32
    %610 = vector.broadcast %cst_126 : f32 to vector<8x128xf32>
    %611 = arith.addf %610, %609 : vector<8x128xf32>
    %612 = arith.divf %610, %611 : vector<8x128xf32>
    %613 = vector.extract_strided_slice %575 {offsets = [0, 256], sizes = [8, 128], strides = [1, 1]} : vector<8x512xf32> to vector<8x128xf32>
    %614 = math.tanh %613 : vector<8x128xf32>
    %615 = vector.extract_strided_slice %575 {offsets = [0, 384], sizes = [8, 128], strides = [1, 1]} : vector<8x512xf32> to vector<8x128xf32>
    %616 = arith.negf %615 : vector<8x128xf32>
    %617 = math.exp %616 : vector<8x128xf32>
    %cst_127 = arith.constant 1.000000e+00 : f32
    %618 = vector.broadcast %cst_127 : f32 to vector<8x128xf32>
    %619 = arith.addf %618, %617 : vector<8x128xf32>
    %620 = arith.divf %618, %619 : vector<8x128xf32>
    %621 = arith.mulf %612, %562 : vector<8x128xf32>
    %622 = arith.mulf %606, %614 : vector<8x128xf32>
    %623 = arith.addf %621, %622 : vector<8x128xf32>
    %624 = math.tanh %623 : vector<8x128xf32>
    %625 = arith.mulf %620, %624 : vector<8x128xf32>
    %626 = vector.broadcast %c6_i32 : i32 to vector<8x1xi32>
    %627 = arith.cmpi slt, %626, %0 : vector<8x1xi32>
    %628 = vector.broadcast %563 : i32 to vector<8x1xi32>
    %629 = arith.cmpi slt, %628, %0 : vector<8x1xi32>
    %cst_128 = arith.constant 0.000000e+00 : f32
    %630 = vector.shape_cast %627 : vector<8x1xi1> to vector<8x1xi1>
    %631 = vector.broadcast %630 : vector<8x1xi1> to vector<8x128xi1>
    %632 = vector.broadcast %cst_128 : f32 to vector<8x128xf32>
    %633 = arith.select %631, %600, %632 : vector<8x128xi1>, vector<8x128xf32>
    %634 = arith.index_cast %565 : i32 to index
    %c0_129 = arith.constant 0 : index
    %635 = vector.load %arg24[%634, %c0_129] : memref<64x128xf32, #tpu.memory_space<vmem>>, vector<8x128xf32>
    tpu.vector_store %arg24[%634, %c0_129], %633 {strides = array<i32>} : memref<64x128xf32, #tpu.memory_space<vmem>>, vector<8x128xf32>,
    %cst_130 = arith.constant 0.000000e+00 : f32
    %636 = vector.shape_cast %629 : vector<8x1xi1> to vector<8x1xi1>
    %637 = vector.broadcast %636 : vector<8x1xi1> to vector<8x128xi1>
    %638 = vector.broadcast %cst_130 : f32 to vector<8x128xf32>
    %639 = arith.select %637, %625, %638 : vector<8x128xi1>, vector<8x128xf32>
    %640 = arith.index_cast %567 : i32 to index
    %c0_131 = arith.constant 0 : index
    %641 = vector.load %arg25[%640, %c0_131] : memref<64x128xf32, #tpu.memory_space<vmem>>, vector<8x128xf32>
    tpu.vector_store %arg25[%640, %c0_131], %639 {strides = array<i32>} : memref<64x128xf32, #tpu.memory_space<vmem>>, vector<8x128xf32>,
    %642 = vector.shape_cast %627 : vector<8x1xi1> to vector<8x1xi1>
    %643 = vector.broadcast %642 : vector<8x1xi1> to vector<8x128xi1>
    %644 = arith.select %643, %600, %553 : vector<8x128xi1>, vector<8x128xf32>
    %645 = vector.shape_cast %627 : vector<8x1xi1> to vector<8x1xi1>
    %646 = vector.broadcast %645 : vector<8x1xi1> to vector<8x128xi1>
    %647 = arith.select %646, %598, %556 : vector<8x128xi1>, vector<8x128xf32>
    %648 = vector.shape_cast %629 : vector<8x1xi1> to vector<8x1xi1>
    %649 = vector.broadcast %648 : vector<8x1xi1> to vector<8x128xi1>
    %650 = arith.select %649, %625, %559 : vector<8x128xi1>, vector<8x128xf32>
    %651 = vector.shape_cast %629 : vector<8x1xi1> to vector<8x1xi1>
    %652 = vector.broadcast %651 : vector<8x1xi1> to vector<8x128xi1>
    %653 = arith.select %652, %623, %562 : vector<8x128xi1>, vector<8x128xf32>
    %c7_i32_132 = arith.constant 7 : i32
    %c7_i32_133 = arith.constant 7 : i32
    %654 = arith.subi %c7_i32_133, %c7_i32_132 : i32
    %c8_i32_134 = arith.constant 8 : i32
    %655 = arith.muli %c7_i32_132, %c8_i32_134 : i32
    %656 = tpu.assume_multiple %655, 8 : i32
    %c8_i32_135 = arith.constant 8 : i32
    %657 = arith.muli %654, %c8_i32_135 : i32
    %658 = tpu.assume_multiple %657, 8 : i32
    %659 = arith.index_cast %656 : i32 to index
    %c0_136 = arith.constant 0 : index
    %660 = vector.load %arg23[%659, %c0_136] : memref<64x1024xf32, #tpu.memory_space<vmem>>, vector<8x512xf32>
    %cst_137 = arith.constant dense<0.000000e+00> : vector<8x512xf32>
    %661 = tpu.matmul %644, %14, %cst_137 {dimension_numbers = #tpu.dot_dimension_numbers<[1], [0], [0], [1], [0, 0, 1, 1], [], []>} : vector<8x128xf32>, vector<128x512xf32>, vector<8x512xf32> -> vector<8x512xf32>
    %662 = arith.addf %660, %661 : vector<8x512xf32>
    %663 = arith.index_cast %658 : i32 to index
    %c512_138 = arith.constant 512 : index
    %664 = vector.load %arg23[%663, %c512_138] : memref<64x1024xf32, #tpu.memory_space<vmem>>, vector<8x512xf32>
    %cst_139 = arith.constant dense<0.000000e+00> : vector<8x512xf32>
    %665 = tpu.matmul %650, %15, %cst_139 {dimension_numbers = #tpu.dot_dimension_numbers<[1], [0], [0], [1], [0, 0, 1, 1], [], []>} : vector<8x128xf32>, vector<128x512xf32>, vector<8x512xf32> -> vector<8x512xf32>
    %666 = arith.addf %664, %665 : vector<8x512xf32>
    %667 = vector.extract_strided_slice %662 {offsets = [0, 0], sizes = [8, 128], strides = [1, 1]} : vector<8x512xf32> to vector<8x128xf32>
    %668 = arith.negf %667 : vector<8x128xf32>
    %669 = math.exp %668 : vector<8x128xf32>
    %cst_140 = arith.constant 1.000000e+00 : f32
    %670 = vector.broadcast %cst_140 : f32 to vector<8x128xf32>
    %671 = arith.addf %670, %669 : vector<8x128xf32>
    %672 = arith.divf %670, %671 : vector<8x128xf32>
    %673 = vector.extract_strided_slice %662 {offsets = [0, 128], sizes = [8, 128], strides = [1, 1]} : vector<8x512xf32> to vector<8x128xf32>
    %674 = arith.negf %673 : vector<8x128xf32>
    %675 = math.exp %674 : vector<8x128xf32>
    %cst_141 = arith.constant 1.000000e+00 : f32
    %676 = vector.broadcast %cst_141 : f32 to vector<8x128xf32>
    %677 = arith.addf %676, %675 : vector<8x128xf32>
    %678 = arith.divf %676, %677 : vector<8x128xf32>
    %679 = vector.extract_strided_slice %662 {offsets = [0, 256], sizes = [8, 128], strides = [1, 1]} : vector<8x512xf32> to vector<8x128xf32>
    %680 = math.tanh %679 : vector<8x128xf32>
    %681 = vector.extract_strided_slice %662 {offsets = [0, 384], sizes = [8, 128], strides = [1, 1]} : vector<8x512xf32> to vector<8x128xf32>
    %682 = arith.negf %681 : vector<8x128xf32>
    %683 = math.exp %682 : vector<8x128xf32>
    %cst_142 = arith.constant 1.000000e+00 : f32
    %684 = vector.broadcast %cst_142 : f32 to vector<8x128xf32>
    %685 = arith.addf %684, %683 : vector<8x128xf32>
    %686 = arith.divf %684, %685 : vector<8x128xf32>
    %687 = arith.mulf %678, %647 : vector<8x128xf32>
    %688 = arith.mulf %672, %680 : vector<8x128xf32>
    %689 = arith.addf %687, %688 : vector<8x128xf32>
    %690 = math.tanh %689 : vector<8x128xf32>
    %691 = arith.mulf %686, %690 : vector<8x128xf32>
    %692 = vector.extract_strided_slice %666 {offsets = [0, 0], sizes = [8, 128], strides = [1, 1]} : vector<8x512xf32> to vector<8x128xf32>
    %693 = arith.negf %692 : vector<8x128xf32>
    %694 = math.exp %693 : vector<8x128xf32>
    %cst_143 = arith.constant 1.000000e+00 : f32
    %695 = vector.broadcast %cst_143 : f32 to vector<8x128xf32>
    %696 = arith.addf %695, %694 : vector<8x128xf32>
    %697 = arith.divf %695, %696 : vector<8x128xf32>
    %698 = vector.extract_strided_slice %666 {offsets = [0, 128], sizes = [8, 128], strides = [1, 1]} : vector<8x512xf32> to vector<8x128xf32>
    %699 = arith.negf %698 : vector<8x128xf32>
    %700 = math.exp %699 : vector<8x128xf32>
    %cst_144 = arith.constant 1.000000e+00 : f32
    %701 = vector.broadcast %cst_144 : f32 to vector<8x128xf32>
    %702 = arith.addf %701, %700 : vector<8x128xf32>
    %703 = arith.divf %701, %702 : vector<8x128xf32>
    %704 = vector.extract_strided_slice %666 {offsets = [0, 256], sizes = [8, 128], strides = [1, 1]} : vector<8x512xf32> to vector<8x128xf32>
    %705 = math.tanh %704 : vector<8x128xf32>
    %706 = vector.extract_strided_slice %666 {offsets = [0, 384], sizes = [8, 128], strides = [1, 1]} : vector<8x512xf32> to vector<8x128xf32>
    %707 = arith.negf %706 : vector<8x128xf32>
    %708 = math.exp %707 : vector<8x128xf32>
    %cst_145 = arith.constant 1.000000e+00 : f32
    %709 = vector.broadcast %cst_145 : f32 to vector<8x128xf32>
    %710 = arith.addf %709, %708 : vector<8x128xf32>
    %711 = arith.divf %709, %710 : vector<8x128xf32>
    %712 = arith.mulf %703, %653 : vector<8x128xf32>
    %713 = arith.mulf %697, %705 : vector<8x128xf32>
    %714 = arith.addf %712, %713 : vector<8x128xf32>
    %715 = math.tanh %714 : vector<8x128xf32>
    %716 = arith.mulf %711, %715 : vector<8x128xf32>
    %717 = vector.broadcast %c7_i32_132 : i32 to vector<8x1xi32>
    %718 = arith.cmpi slt, %717, %0 : vector<8x1xi32>
    %719 = vector.broadcast %654 : i32 to vector<8x1xi32>
    %720 = arith.cmpi slt, %719, %0 : vector<8x1xi32>
    %cst_146 = arith.constant 0.000000e+00 : f32
    %721 = vector.shape_cast %718 : vector<8x1xi1> to vector<8x1xi1>
    %722 = vector.broadcast %721 : vector<8x1xi1> to vector<8x128xi1>
    %723 = vector.broadcast %cst_146 : f32 to vector<8x128xf32>
    %724 = arith.select %722, %691, %723 : vector<8x128xi1>, vector<8x128xf32>
    %725 = arith.index_cast %656 : i32 to index
    %c0_147 = arith.constant 0 : index
    %726 = vector.load %arg24[%725, %c0_147] : memref<64x128xf32, #tpu.memory_space<vmem>>, vector<8x128xf32>
    tpu.vector_store %arg24[%725, %c0_147], %724 {strides = array<i32>} : memref<64x128xf32, #tpu.memory_space<vmem>>, vector<8x128xf32>,
    %cst_148 = arith.constant 0.000000e+00 : f32
    %727 = vector.shape_cast %720 : vector<8x1xi1> to vector<8x1xi1>
    %728 = vector.broadcast %727 : vector<8x1xi1> to vector<8x128xi1>
    %729 = vector.broadcast %cst_148 : f32 to vector<8x128xf32>
    %730 = arith.select %728, %716, %729 : vector<8x128xi1>, vector<8x128xf32>
    %731 = arith.index_cast %658 : i32 to index
    %c0_149 = arith.constant 0 : index
    %732 = vector.load %arg25[%731, %c0_149] : memref<64x128xf32, #tpu.memory_space<vmem>>, vector<8x128xf32>
    tpu.vector_store %arg25[%731, %c0_149], %730 {strides = array<i32>} : memref<64x128xf32, #tpu.memory_space<vmem>>, vector<8x128xf32>,
    %733 = vector.shape_cast %718 : vector<8x1xi1> to vector<8x1xi1>
    %734 = vector.broadcast %733 : vector<8x1xi1> to vector<8x128xi1>
    %735 = arith.select %734, %691, %644 : vector<8x128xi1>, vector<8x128xf32>
    %736 = vector.shape_cast %718 : vector<8x1xi1> to vector<8x1xi1>
    %737 = vector.broadcast %736 : vector<8x1xi1> to vector<8x128xi1>
    %738 = arith.select %737, %689, %647 : vector<8x128xi1>, vector<8x128xf32>
    %739 = vector.shape_cast %720 : vector<8x1xi1> to vector<8x1xi1>
    %740 = vector.broadcast %739 : vector<8x1xi1> to vector<8x128xi1>
    %741 = arith.select %740, %716, %650 : vector<8x128xi1>, vector<8x128xf32>
    %742 = vector.shape_cast %720 : vector<8x1xi1> to vector<8x1xi1>
    %743 = vector.broadcast %742 : vector<8x1xi1> to vector<8x128xi1>
    %744 = arith.select %743, %714, %653 : vector<8x128xi1>, vector<8x128xf32>
    %c8_i32_150 = arith.constant 8 : i32
    %c0_151 = arith.constant 0 : index
    %c0_152 = arith.constant 0 : index
    %745 = vector.load %arg24[%c0_151, %c0_152] : memref<64x128xf32, #tpu.memory_space<vmem>>, vector<64x128xf32>
    %c0_153 = arith.constant 0 : index
    %c0_154 = arith.constant 0 : index
    %c0_155 = arith.constant 0 : index
    %746 = vector.load %arg8[%c0_153, %c0_154, %c0_155] : memref<2x128x768xf32, #tpu.memory_space<vmem>>, vector<1x128x768xf32>
    %747 = vector.shape_cast %746 : vector<1x128x768xf32> to vector<128x768xf32>
    %cst_156 = arith.constant dense<0.000000e+00> : vector<64x768xf32>
    %748 = tpu.matmul %745, %747, %cst_156 {dimension_numbers = #tpu.dot_dimension_numbers<[1], [0], [0], [1], [0, 0, 1, 1], [], []>} : vector<64x128xf32>, vector<128x768xf32>, vector<64x768xf32> -> vector<64x768xf32>
    %c0_157 = arith.constant 0 : index
    %c0_158 = arith.constant 0 : index
    %749 = vector.load %arg25[%c0_157, %c0_158] : memref<64x128xf32, #tpu.memory_space<vmem>>, vector<64x128xf32>
    %c1 = arith.constant 1 : index
    %c0_159 = arith.constant 0 : index
    %c0_160 = arith.constant 0 : index
    %750 = vector.load %arg8[%c1, %c0_159, %c0_160] : memref<2x128x768xf32, #tpu.memory_space<vmem>>, vector<1x128x768xf32>
    %751 = vector.shape_cast %750 : vector<1x128x768xf32> to vector<128x768xf32>
    %cst_161 = arith.constant dense<0.000000e+00> : vector<64x768xf32>
    %752 = tpu.matmul %749, %751, %cst_161 {dimension_numbers = #tpu.dot_dimension_numbers<[1], [0], [0], [1], [0, 0, 1, 1], [], []>} : vector<64x128xf32>, vector<128x768xf32>, vector<64x768xf32> -> vector<64x768xf32>
    %753 = arith.addf %748, %752 : vector<64x768xf32>
    %c0_162 = arith.constant 0 : index
    %c0_163 = arith.constant 0 : index
    %754 = vector.load %arg9[%c0_162, %c0_163] : memref<1x768xf32, #tpu.memory_space<vmem>>, vector<1x768xf32>
    %755 = vector.broadcast %754 : vector<1x768xf32> to vector<64x768xf32>
    %756 = arith.addf %753, %755 : vector<64x768xf32>
    %c0_164 = arith.constant 0 : index
    %c0_165 = arith.constant 0 : index
    %757 = vector.load %arg26[%c0_164, %c0_165] : memref<64x768xf32, #tpu.memory_space<vmem>>, vector<64x768xf32>
    tpu.vector_store %arg26[%c0_164, %c0_165], %756 {strides = array<i32>} : memref<64x768xf32, #tpu.memory_space<vmem>>, vector<64x768xf32>,
    %c0_166 = arith.constant 0 : index
    %c0_167 = arith.constant 0 : index
    %758 = vector.load %arg10[%c0_166, %c0_167] : memref<128x384xf32, #tpu.memory_space<vmem>>, vector<128x384xf32>
    %c0_168 = arith.constant 0 : index
    %c0_169 = arith.constant 0 : index
    %759 = vector.load %arg11[%c0_168, %c0_169] : memref<128x384xf32, #tpu.memory_space<vmem>>, vector<128x384xf32>
    %c0_170 = arith.constant 0 : index
    %c0_171 = arith.constant 0 : index
    %760 = vector.load %arg12[%c0_170, %c0_171] : memref<1x384xf32, #tpu.memory_space<vmem>>, vector<1x384xf32>
    %c0_172 = arith.constant 0 : index
    %c0_173 = arith.constant 0 : index
    %761 = vector.load %arg13[%c0_172, %c0_173] : memref<1x384xf32, #tpu.memory_space<vmem>>, vector<1x384xf32>
    %cst_174 = arith.constant 0.000000e+00 : f32
    %762 = vector.broadcast %cst_174 : f32 to vector<8x128xf32>
    %cst_175 = arith.constant -1.000000e+30 : f32
    %763 = vector.broadcast %cst_175 : f32 to vector<8x128xf32>
    %c0_i32_176 = arith.constant 0 : i32
    %c7_i32_177 = arith.constant 7 : i32
    %764 = arith.subi %c7_i32_177, %c0_i32_176 : i32
    %c8_i32_178 = arith.constant 8 : i32
    %765 = arith.muli %c0_i32_176, %c8_i32_178 : i32
    %766 = tpu.assume_multiple %765, 8 : i32
    %c8_i32_179 = arith.constant 8 : i32
    %767 = arith.muli %764, %c8_i32_179 : i32
    %768 = tpu.assume_multiple %767, 8 : i32
    %769 = arith.index_cast %766 : i32 to index
    %c0_180 = arith.constant 0 : index
    %770 = vector.load %arg26[%769, %c0_180] : memref<64x768xf32, #tpu.memory_space<vmem>>, vector<8x384xf32>
    %771 = arith.index_cast %768 : i32 to index
    %c384 = arith.constant 384 : index
    %772 = vector.load %arg26[%771, %c384] : memref<64x768xf32, #tpu.memory_space<vmem>>, vector<8x384xf32>
    %cst_181 = arith.constant dense<0.000000e+00> : vector<8x384xf32>
    %773 = tpu.matmul %762, %758, %cst_181 {dimension_numbers = #tpu.dot_dimension_numbers<[1], [0], [0], [1], [0, 0, 1, 1], [], []>} : vector<8x128xf32>, vector<128x384xf32>, vector<8x384xf32> -> vector<8x384xf32>
    %774 = vector.broadcast %760 : vector<1x384xf32> to vector<8x384xf32>
    %775 = arith.addf %773, %774 : vector<8x384xf32>
    %cst_182 = arith.constant dense<0.000000e+00> : vector<8x384xf32>
    %776 = tpu.matmul %762, %759, %cst_182 {dimension_numbers = #tpu.dot_dimension_numbers<[1], [0], [0], [1], [0, 0, 1, 1], [], []>} : vector<8x128xf32>, vector<128x384xf32>, vector<8x384xf32> -> vector<8x384xf32>
    %777 = vector.broadcast %761 : vector<1x384xf32> to vector<8x384xf32>
    %778 = arith.addf %776, %777 : vector<8x384xf32>
    %779 = vector.extract_strided_slice %770 {offsets = [0, 0], sizes = [8, 128], strides = [1, 1]} : vector<8x384xf32> to vector<8x128xf32>
    %780 = vector.extract_strided_slice %775 {offsets = [0, 0], sizes = [8, 128], strides = [1, 1]} : vector<8x384xf32> to vector<8x128xf32>
    %781 = arith.addf %779, %780 : vector<8x128xf32>
    %782 = arith.negf %781 : vector<8x128xf32>
    %783 = math.exp %782 : vector<8x128xf32>
    %cst_183 = arith.constant 1.000000e+00 : f32
    %784 = vector.broadcast %cst_183 : f32 to vector<8x128xf32>
    %785 = arith.addf %784, %783 : vector<8x128xf32>
    %786 = arith.divf %784, %785 : vector<8x128xf32>
    %787 = vector.extract_strided_slice %770 {offsets = [0, 128], sizes = [8, 128], strides = [1, 1]} : vector<8x384xf32> to vector<8x128xf32>
    %788 = vector.extract_strided_slice %775 {offsets = [0, 128], sizes = [8, 128], strides = [1, 1]} : vector<8x384xf32> to vector<8x128xf32>
    %789 = arith.addf %787, %788 : vector<8x128xf32>
    %790 = arith.negf %789 : vector<8x128xf32>
    %791 = math.exp %790 : vector<8x128xf32>
    %cst_184 = arith.constant 1.000000e+00 : f32
    %792 = vector.broadcast %cst_184 : f32 to vector<8x128xf32>
    %793 = arith.addf %792, %791 : vector<8x128xf32>
    %794 = arith.divf %792, %793 : vector<8x128xf32>
    %795 = vector.extract_strided_slice %770 {offsets = [0, 256], sizes = [8, 128], strides = [1, 1]} : vector<8x384xf32> to vector<8x128xf32>
    %796 = vector.extract_strided_slice %775 {offsets = [0, 256], sizes = [8, 128], strides = [1, 1]} : vector<8x384xf32> to vector<8x128xf32>
    %797 = arith.mulf %786, %796 : vector<8x128xf32>
    %798 = arith.addf %795, %797 : vector<8x128xf32>
    %799 = math.tanh %798 : vector<8x128xf32>
    %cst_185 = arith.constant 1.000000e+00 : f32
    %800 = vector.broadcast %cst_185 : f32 to vector<8x128xf32>
    %801 = arith.subf %800, %794 : vector<8x128xf32>
    %802 = arith.mulf %801, %799 : vector<8x128xf32>
    %803 = arith.mulf %794, %762 : vector<8x128xf32>
    %804 = arith.addf %802, %803 : vector<8x128xf32>
    %805 = vector.extract_strided_slice %772 {offsets = [0, 0], sizes = [8, 128], strides = [1, 1]} : vector<8x384xf32> to vector<8x128xf32>
    %806 = vector.extract_strided_slice %778 {offsets = [0, 0], sizes = [8, 128], strides = [1, 1]} : vector<8x384xf32> to vector<8x128xf32>
    %807 = arith.addf %805, %806 : vector<8x128xf32>
    %808 = arith.negf %807 : vector<8x128xf32>
    %809 = math.exp %808 : vector<8x128xf32>
    %cst_186 = arith.constant 1.000000e+00 : f32
    %810 = vector.broadcast %cst_186 : f32 to vector<8x128xf32>
    %811 = arith.addf %810, %809 : vector<8x128xf32>
    %812 = arith.divf %810, %811 : vector<8x128xf32>
    %813 = vector.extract_strided_slice %772 {offsets = [0, 128], sizes = [8, 128], strides = [1, 1]} : vector<8x384xf32> to vector<8x128xf32>
    %814 = vector.extract_strided_slice %778 {offsets = [0, 128], sizes = [8, 128], strides = [1, 1]} : vector<8x384xf32> to vector<8x128xf32>
    %815 = arith.addf %813, %814 : vector<8x128xf32>
    %816 = arith.negf %815 : vector<8x128xf32>
    %817 = math.exp %816 : vector<8x128xf32>
    %cst_187 = arith.constant 1.000000e+00 : f32
    %818 = vector.broadcast %cst_187 : f32 to vector<8x128xf32>
    %819 = arith.addf %818, %817 : vector<8x128xf32>
    %820 = arith.divf %818, %819 : vector<8x128xf32>
    %821 = vector.extract_strided_slice %772 {offsets = [0, 256], sizes = [8, 128], strides = [1, 1]} : vector<8x384xf32> to vector<8x128xf32>
    %822 = vector.extract_strided_slice %778 {offsets = [0, 256], sizes = [8, 128], strides = [1, 1]} : vector<8x384xf32> to vector<8x128xf32>
    %823 = arith.mulf %812, %822 : vector<8x128xf32>
    %824 = arith.addf %821, %823 : vector<8x128xf32>
    %825 = math.tanh %824 : vector<8x128xf32>
    %cst_188 = arith.constant 1.000000e+00 : f32
    %826 = vector.broadcast %cst_188 : f32 to vector<8x128xf32>
    %827 = arith.subf %826, %820 : vector<8x128xf32>
    %828 = arith.mulf %827, %825 : vector<8x128xf32>
    %829 = arith.mulf %820, %762 : vector<8x128xf32>
    %830 = arith.addf %828, %829 : vector<8x128xf32>
    %831 = vector.broadcast %c0_i32_176 : i32 to vector<8x1xi32>
    %832 = arith.cmpi slt, %831, %0 : vector<8x1xi32>
    %833 = vector.broadcast %764 : i32 to vector<8x1xi32>
    %834 = arith.cmpi slt, %833, %0 : vector<8x1xi32>
    %cst_189 = arith.constant 0.000000e+00 : f32
    %835 = vector.shape_cast %832 : vector<8x1xi1> to vector<8x1xi1>
    %836 = vector.broadcast %835 : vector<8x1xi1> to vector<8x128xi1>
    %837 = vector.broadcast %cst_189 : f32 to vector<8x128xf32>
    %838 = arith.select %836, %804, %837 : vector<8x128xi1>, vector<8x128xf32>
    %cst_190 = arith.constant 0.000000e+00 : f32
    %839 = vector.shape_cast %834 : vector<8x1xi1> to vector<8x1xi1>
    %840 = vector.broadcast %839 : vector<8x1xi1> to vector<8x128xi1>
    %841 = vector.broadcast %cst_190 : f32 to vector<8x128xf32>
    %842 = arith.select %840, %830, %841 : vector<8x128xi1>, vector<8x128xf32>
    %843 = vector.shape_cast %832 : vector<8x1xi1> to vector<8x1xi1>
    %844 = vector.broadcast %843 : vector<8x1xi1> to vector<8x128xi1>
    %845 = arith.select %844, %804, %762 : vector<8x128xi1>, vector<8x128xf32>
    %846 = vector.shape_cast %834 : vector<8x1xi1> to vector<8x1xi1>
    %847 = vector.broadcast %846 : vector<8x1xi1> to vector<8x128xi1>
    %848 = arith.select %847, %830, %762 : vector<8x128xi1>, vector<8x128xf32>
    %849 = arith.addf %762, %838 : vector<8x128xf32>
    %850 = arith.addf %762, %842 : vector<8x128xf32>
    %851 = arith.cmpi slt, %c0_i32_176, %4 : i32
    %852 = arith.maximumf %763, %838 : vector<8x128xf32>
    %853 = arith.select %851, %852, %763 : vector<8x128xf32>
    %854 = arith.cmpi slt, %764, %4 : i32
    %855 = arith.maximumf %763, %842 : vector<8x128xf32>
    %856 = arith.select %854, %855, %763 : vector<8x128xf32>
    %c1_i32_191 = arith.constant 1 : i32
    %c7_i32_192 = arith.constant 7 : i32
    %857 = arith.subi %c7_i32_192, %c1_i32_191 : i32
    %c8_i32_193 = arith.constant 8 : i32
    %858 = arith.muli %c1_i32_191, %c8_i32_193 : i32
    %859 = tpu.assume_multiple %858, 8 : i32
    %c8_i32_194 = arith.constant 8 : i32
    %860 = arith.muli %857, %c8_i32_194 : i32
    %861 = tpu.assume_multiple %860, 8 : i32
    %862 = arith.index_cast %859 : i32 to index
    %c0_195 = arith.constant 0 : index
    %863 = vector.load %arg26[%862, %c0_195] : memref<64x768xf32, #tpu.memory_space<vmem>>, vector<8x384xf32>
    %864 = arith.index_cast %861 : i32 to index
    %c384_196 = arith.constant 384 : index
    %865 = vector.load %arg26[%864, %c384_196] : memref<64x768xf32, #tpu.memory_space<vmem>>, vector<8x384xf32>
    %cst_197 = arith.constant dense<0.000000e+00> : vector<8x384xf32>
    %866 = tpu.matmul %845, %758, %cst_197 {dimension_numbers = #tpu.dot_dimension_numbers<[1], [0], [0], [1], [0, 0, 1, 1], [], []>} : vector<8x128xf32>, vector<128x384xf32>, vector<8x384xf32> -> vector<8x384xf32>
    %867 = vector.broadcast %760 : vector<1x384xf32> to vector<8x384xf32>
    %868 = arith.addf %866, %867 : vector<8x384xf32>
    %cst_198 = arith.constant dense<0.000000e+00> : vector<8x384xf32>
    %869 = tpu.matmul %848, %759, %cst_198 {dimension_numbers = #tpu.dot_dimension_numbers<[1], [0], [0], [1], [0, 0, 1, 1], [], []>} : vector<8x128xf32>, vector<128x384xf32>, vector<8x384xf32> -> vector<8x384xf32>
    %870 = vector.broadcast %761 : vector<1x384xf32> to vector<8x384xf32>
    %871 = arith.addf %869, %870 : vector<8x384xf32>
    %872 = vector.extract_strided_slice %863 {offsets = [0, 0], sizes = [8, 128], strides = [1, 1]} : vector<8x384xf32> to vector<8x128xf32>
    %873 = vector.extract_strided_slice %868 {offsets = [0, 0], sizes = [8, 128], strides = [1, 1]} : vector<8x384xf32> to vector<8x128xf32>
    %874 = arith.addf %872, %873 : vector<8x128xf32>
    %875 = arith.negf %874 : vector<8x128xf32>
    %876 = math.exp %875 : vector<8x128xf32>
    %cst_199 = arith.constant 1.000000e+00 : f32
    %877 = vector.broadcast %cst_199 : f32 to vector<8x128xf32>
    %878 = arith.addf %877, %876 : vector<8x128xf32>
    %879 = arith.divf %877, %878 : vector<8x128xf32>
    %880 = vector.extract_strided_slice %863 {offsets = [0, 128], sizes = [8, 128], strides = [1, 1]} : vector<8x384xf32> to vector<8x128xf32>
    %881 = vector.extract_strided_slice %868 {offsets = [0, 128], sizes = [8, 128], strides = [1, 1]} : vector<8x384xf32> to vector<8x128xf32>
    %882 = arith.addf %880, %881 : vector<8x128xf32>
    %883 = arith.negf %882 : vector<8x128xf32>
    %884 = math.exp %883 : vector<8x128xf32>
    %cst_200 = arith.constant 1.000000e+00 : f32
    %885 = vector.broadcast %cst_200 : f32 to vector<8x128xf32>
    %886 = arith.addf %885, %884 : vector<8x128xf32>
    %887 = arith.divf %885, %886 : vector<8x128xf32>
    %888 = vector.extract_strided_slice %863 {offsets = [0, 256], sizes = [8, 128], strides = [1, 1]} : vector<8x384xf32> to vector<8x128xf32>
    %889 = vector.extract_strided_slice %868 {offsets = [0, 256], sizes = [8, 128], strides = [1, 1]} : vector<8x384xf32> to vector<8x128xf32>
    %890 = arith.mulf %879, %889 : vector<8x128xf32>
    %891 = arith.addf %888, %890 : vector<8x128xf32>
    %892 = math.tanh %891 : vector<8x128xf32>
    %cst_201 = arith.constant 1.000000e+00 : f32
    %893 = vector.broadcast %cst_201 : f32 to vector<8x128xf32>
    %894 = arith.subf %893, %887 : vector<8x128xf32>
    %895 = arith.mulf %894, %892 : vector<8x128xf32>
    %896 = arith.mulf %887, %845 : vector<8x128xf32>
    %897 = arith.addf %895, %896 : vector<8x128xf32>
    %898 = vector.extract_strided_slice %865 {offsets = [0, 0], sizes = [8, 128], strides = [1, 1]} : vector<8x384xf32> to vector<8x128xf32>
    %899 = vector.extract_strided_slice %871 {offsets = [0, 0], sizes = [8, 128], strides = [1, 1]} : vector<8x384xf32> to vector<8x128xf32>
    %900 = arith.addf %898, %899 : vector<8x128xf32>
    %901 = arith.negf %900 : vector<8x128xf32>
    %902 = math.exp %901 : vector<8x128xf32>
    %cst_202 = arith.constant 1.000000e+00 : f32
    %903 = vector.broadcast %cst_202 : f32 to vector<8x128xf32>
    %904 = arith.addf %903, %902 : vector<8x128xf32>
    %905 = arith.divf %903, %904 : vector<8x128xf32>
    %906 = vector.extract_strided_slice %865 {offsets = [0, 128], sizes = [8, 128], strides = [1, 1]} : vector<8x384xf32> to vector<8x128xf32>
    %907 = vector.extract_strided_slice %871 {offsets = [0, 128], sizes = [8, 128], strides = [1, 1]} : vector<8x384xf32> to vector<8x128xf32>
    %908 = arith.addf %906, %907 : vector<8x128xf32>
    %909 = arith.negf %908 : vector<8x128xf32>
    %910 = math.exp %909 : vector<8x128xf32>
    %cst_203 = arith.constant 1.000000e+00 : f32
    %911 = vector.broadcast %cst_203 : f32 to vector<8x128xf32>
    %912 = arith.addf %911, %910 : vector<8x128xf32>
    %913 = arith.divf %911, %912 : vector<8x128xf32>
    %914 = vector.extract_strided_slice %865 {offsets = [0, 256], sizes = [8, 128], strides = [1, 1]} : vector<8x384xf32> to vector<8x128xf32>
    %915 = vector.extract_strided_slice %871 {offsets = [0, 256], sizes = [8, 128], strides = [1, 1]} : vector<8x384xf32> to vector<8x128xf32>
    %916 = arith.mulf %905, %915 : vector<8x128xf32>
    %917 = arith.addf %914, %916 : vector<8x128xf32>
    %918 = math.tanh %917 : vector<8x128xf32>
    %cst_204 = arith.constant 1.000000e+00 : f32
    %919 = vector.broadcast %cst_204 : f32 to vector<8x128xf32>
    %920 = arith.subf %919, %913 : vector<8x128xf32>
    %921 = arith.mulf %920, %918 : vector<8x128xf32>
    %922 = arith.mulf %913, %848 : vector<8x128xf32>
    %923 = arith.addf %921, %922 : vector<8x128xf32>
    %924 = vector.broadcast %c1_i32_191 : i32 to vector<8x1xi32>
    %925 = arith.cmpi slt, %924, %0 : vector<8x1xi32>
    %926 = vector.broadcast %857 : i32 to vector<8x1xi32>
    %927 = arith.cmpi slt, %926, %0 : vector<8x1xi32>
    %cst_205 = arith.constant 0.000000e+00 : f32
    %928 = vector.shape_cast %925 : vector<8x1xi1> to vector<8x1xi1>
    %929 = vector.broadcast %928 : vector<8x1xi1> to vector<8x128xi1>
    %930 = vector.broadcast %cst_205 : f32 to vector<8x128xf32>
    %931 = arith.select %929, %897, %930 : vector<8x128xi1>, vector<8x128xf32>
    %cst_206 = arith.constant 0.000000e+00 : f32
    %932 = vector.shape_cast %927 : vector<8x1xi1> to vector<8x1xi1>
    %933 = vector.broadcast %932 : vector<8x1xi1> to vector<8x128xi1>
    %934 = vector.broadcast %cst_206 : f32 to vector<8x128xf32>
    %935 = arith.select %933, %923, %934 : vector<8x128xi1>, vector<8x128xf32>
    %936 = vector.shape_cast %925 : vector<8x1xi1> to vector<8x1xi1>
    %937 = vector.broadcast %936 : vector<8x1xi1> to vector<8x128xi1>
    %938 = arith.select %937, %897, %845 : vector<8x128xi1>, vector<8x128xf32>
    %939 = vector.shape_cast %927 : vector<8x1xi1> to vector<8x1xi1>
    %940 = vector.broadcast %939 : vector<8x1xi1> to vector<8x128xi1>
    %941 = arith.select %940, %923, %848 : vector<8x128xi1>, vector<8x128xf32>
    %942 = arith.addf %849, %931 : vector<8x128xf32>
    %943 = arith.addf %850, %935 : vector<8x128xf32>
    %944 = arith.cmpi slt, %c1_i32_191, %4 : i32
    %945 = arith.maximumf %853, %931 : vector<8x128xf32>
    %946 = arith.select %944, %945, %853 : vector<8x128xf32>
    %947 = arith.cmpi slt, %857, %4 : i32
    %948 = arith.maximumf %856, %935 : vector<8x128xf32>
    %949 = arith.select %947, %948, %856 : vector<8x128xf32>
    %c2_i32_207 = arith.constant 2 : i32
    %c7_i32_208 = arith.constant 7 : i32
    %950 = arith.subi %c7_i32_208, %c2_i32_207 : i32
    %c8_i32_209 = arith.constant 8 : i32
    %951 = arith.muli %c2_i32_207, %c8_i32_209 : i32
    %952 = tpu.assume_multiple %951, 8 : i32
    %c8_i32_210 = arith.constant 8 : i32
    %953 = arith.muli %950, %c8_i32_210 : i32
    %954 = tpu.assume_multiple %953, 8 : i32
    %955 = arith.index_cast %952 : i32 to index
    %c0_211 = arith.constant 0 : index
    %956 = vector.load %arg26[%955, %c0_211] : memref<64x768xf32, #tpu.memory_space<vmem>>, vector<8x384xf32>
    %957 = arith.index_cast %954 : i32 to index
    %c384_212 = arith.constant 384 : index
    %958 = vector.load %arg26[%957, %c384_212] : memref<64x768xf32, #tpu.memory_space<vmem>>, vector<8x384xf32>
    %cst_213 = arith.constant dense<0.000000e+00> : vector<8x384xf32>
    %959 = tpu.matmul %938, %758, %cst_213 {dimension_numbers = #tpu.dot_dimension_numbers<[1], [0], [0], [1], [0, 0, 1, 1], [], []>} : vector<8x128xf32>, vector<128x384xf32>, vector<8x384xf32> -> vector<8x384xf32>
    %960 = vector.broadcast %760 : vector<1x384xf32> to vector<8x384xf32>
    %961 = arith.addf %959, %960 : vector<8x384xf32>
    %cst_214 = arith.constant dense<0.000000e+00> : vector<8x384xf32>
    %962 = tpu.matmul %941, %759, %cst_214 {dimension_numbers = #tpu.dot_dimension_numbers<[1], [0], [0], [1], [0, 0, 1, 1], [], []>} : vector<8x128xf32>, vector<128x384xf32>, vector<8x384xf32> -> vector<8x384xf32>
    %963 = vector.broadcast %761 : vector<1x384xf32> to vector<8x384xf32>
    %964 = arith.addf %962, %963 : vector<8x384xf32>
    %965 = vector.extract_strided_slice %956 {offsets = [0, 0], sizes = [8, 128], strides = [1, 1]} : vector<8x384xf32> to vector<8x128xf32>
    %966 = vector.extract_strided_slice %961 {offsets = [0, 0], sizes = [8, 128], strides = [1, 1]} : vector<8x384xf32> to vector<8x128xf32>
    %967 = arith.addf %965, %966 : vector<8x128xf32>
    %968 = arith.negf %967 : vector<8x128xf32>
    %969 = math.exp %968 : vector<8x128xf32>
    %cst_215 = arith.constant 1.000000e+00 : f32
    %970 = vector.broadcast %cst_215 : f32 to vector<8x128xf32>
    %971 = arith.addf %970, %969 : vector<8x128xf32>
    %972 = arith.divf %970, %971 : vector<8x128xf32>
    %973 = vector.extract_strided_slice %956 {offsets = [0, 128], sizes = [8, 128], strides = [1, 1]} : vector<8x384xf32> to vector<8x128xf32>
    %974 = vector.extract_strided_slice %961 {offsets = [0, 128], sizes = [8, 128], strides = [1, 1]} : vector<8x384xf32> to vector<8x128xf32>
    %975 = arith.addf %973, %974 : vector<8x128xf32>
    %976 = arith.negf %975 : vector<8x128xf32>
    %977 = math.exp %976 : vector<8x128xf32>
    %cst_216 = arith.constant 1.000000e+00 : f32
    %978 = vector.broadcast %cst_216 : f32 to vector<8x128xf32>
    %979 = arith.addf %978, %977 : vector<8x128xf32>
    %980 = arith.divf %978, %979 : vector<8x128xf32>
    %981 = vector.extract_strided_slice %956 {offsets = [0, 256], sizes = [8, 128], strides = [1, 1]} : vector<8x384xf32> to vector<8x128xf32>
    %982 = vector.extract_strided_slice %961 {offsets = [0, 256], sizes = [8, 128], strides = [1, 1]} : vector<8x384xf32> to vector<8x128xf32>
    %983 = arith.mulf %972, %982 : vector<8x128xf32>
    %984 = arith.addf %981, %983 : vector<8x128xf32>
    %985 = math.tanh %984 : vector<8x128xf32>
    %cst_217 = arith.constant 1.000000e+00 : f32
    %986 = vector.broadcast %cst_217 : f32 to vector<8x128xf32>
    %987 = arith.subf %986, %980 : vector<8x128xf32>
    %988 = arith.mulf %987, %985 : vector<8x128xf32>
    %989 = arith.mulf %980, %938 : vector<8x128xf32>
    %990 = arith.addf %988, %989 : vector<8x128xf32>
    %991 = vector.extract_strided_slice %958 {offsets = [0, 0], sizes = [8, 128], strides = [1, 1]} : vector<8x384xf32> to vector<8x128xf32>
    %992 = vector.extract_strided_slice %964 {offsets = [0, 0], sizes = [8, 128], strides = [1, 1]} : vector<8x384xf32> to vector<8x128xf32>
    %993 = arith.addf %991, %992 : vector<8x128xf32>
    %994 = arith.negf %993 : vector<8x128xf32>
    %995 = math.exp %994 : vector<8x128xf32>
    %cst_218 = arith.constant 1.000000e+00 : f32
    %996 = vector.broadcast %cst_218 : f32 to vector<8x128xf32>
    %997 = arith.addf %996, %995 : vector<8x128xf32>
    %998 = arith.divf %996, %997 : vector<8x128xf32>
    %999 = vector.extract_strided_slice %958 {offsets = [0, 128], sizes = [8, 128], strides = [1, 1]} : vector<8x384xf32> to vector<8x128xf32>
    %1000 = vector.extract_strided_slice %964 {offsets = [0, 128], sizes = [8, 128], strides = [1, 1]} : vector<8x384xf32> to vector<8x128xf32>
    %1001 = arith.addf %999, %1000 : vector<8x128xf32>
    %1002 = arith.negf %1001 : vector<8x128xf32>
    %1003 = math.exp %1002 : vector<8x128xf32>
    %cst_219 = arith.constant 1.000000e+00 : f32
    %1004 = vector.broadcast %cst_219 : f32 to vector<8x128xf32>
    %1005 = arith.addf %1004, %1003 : vector<8x128xf32>
    %1006 = arith.divf %1004, %1005 : vector<8x128xf32>
    %1007 = vector.extract_strided_slice %958 {offsets = [0, 256], sizes = [8, 128], strides = [1, 1]} : vector<8x384xf32> to vector<8x128xf32>
    %1008 = vector.extract_strided_slice %964 {offsets = [0, 256], sizes = [8, 128], strides = [1, 1]} : vector<8x384xf32> to vector<8x128xf32>
    %1009 = arith.mulf %998, %1008 : vector<8x128xf32>
    %1010 = arith.addf %1007, %1009 : vector<8x128xf32>
    %1011 = math.tanh %1010 : vector<8x128xf32>
    %cst_220 = arith.constant 1.000000e+00 : f32
    %1012 = vector.broadcast %cst_220 : f32 to vector<8x128xf32>
    %1013 = arith.subf %1012, %1006 : vector<8x128xf32>
    %1014 = arith.mulf %1013, %1011 : vector<8x128xf32>
    %1015 = arith.mulf %1006, %941 : vector<8x128xf32>
    %1016 = arith.addf %1014, %1015 : vector<8x128xf32>
    %1017 = vector.broadcast %c2_i32_207 : i32 to vector<8x1xi32>
    %1018 = arith.cmpi slt, %1017, %0 : vector<8x1xi32>
    %1019 = vector.broadcast %950 : i32 to vector<8x1xi32>
    %1020 = arith.cmpi slt, %1019, %0 : vector<8x1xi32>
    %cst_221 = arith.constant 0.000000e+00 : f32
    %1021 = vector.shape_cast %1018 : vector<8x1xi1> to vector<8x1xi1>
    %1022 = vector.broadcast %1021 : vector<8x1xi1> to vector<8x128xi1>
    %1023 = vector.broadcast %cst_221 : f32 to vector<8x128xf32>
    %1024 = arith.select %1022, %990, %1023 : vector<8x128xi1>, vector<8x128xf32>
    %cst_222 = arith.constant 0.000000e+00 : f32
    %1025 = vector.shape_cast %1020 : vector<8x1xi1> to vector<8x1xi1>
    %1026 = vector.broadcast %1025 : vector<8x1xi1> to vector<8x128xi1>
    %1027 = vector.broadcast %cst_222 : f32 to vector<8x128xf32>
    %1028 = arith.select %1026, %1016, %1027 : vector<8x128xi1>, vector<8x128xf32>
    %1029 = vector.shape_cast %1018 : vector<8x1xi1> to vector<8x1xi1>
    %1030 = vector.broadcast %1029 : vector<8x1xi1> to vector<8x128xi1>
    %1031 = arith.select %1030, %990, %938 : vector<8x128xi1>, vector<8x128xf32>
    %1032 = vector.shape_cast %1020 : vector<8x1xi1> to vector<8x1xi1>
    %1033 = vector.broadcast %1032 : vector<8x1xi1> to vector<8x128xi1>
    %1034 = arith.select %1033, %1016, %941 : vector<8x128xi1>, vector<8x128xf32>
    %1035 = arith.addf %942, %1024 : vector<8x128xf32>
    %1036 = arith.addf %943, %1028 : vector<8x128xf32>
    %1037 = arith.cmpi slt, %c2_i32_207, %4 : i32
    %1038 = arith.maximumf %946, %1024 : vector<8x128xf32>
    %1039 = arith.select %1037, %1038, %946 : vector<8x128xf32>
    %1040 = arith.cmpi slt, %950, %4 : i32
    %1041 = arith.maximumf %949, %1028 : vector<8x128xf32>
    %1042 = arith.select %1040, %1041, %949 : vector<8x128xf32>
    %c3_i32_223 = arith.constant 3 : i32
    %c7_i32_224 = arith.constant 7 : i32
    %1043 = arith.subi %c7_i32_224, %c3_i32_223 : i32
    %c8_i32_225 = arith.constant 8 : i32
    %1044 = arith.muli %c3_i32_223, %c8_i32_225 : i32
    %1045 = tpu.assume_multiple %1044, 8 : i32
    %c8_i32_226 = arith.constant 8 : i32
    %1046 = arith.muli %1043, %c8_i32_226 : i32
    %1047 = tpu.assume_multiple %1046, 8 : i32
    %1048 = arith.index_cast %1045 : i32 to index
    %c0_227 = arith.constant 0 : index
    %1049 = vector.load %arg26[%1048, %c0_227] : memref<64x768xf32, #tpu.memory_space<vmem>>, vector<8x384xf32>
    %1050 = arith.index_cast %1047 : i32 to index
    %c384_228 = arith.constant 384 : index
    %1051 = vector.load %arg26[%1050, %c384_228] : memref<64x768xf32, #tpu.memory_space<vmem>>, vector<8x384xf32>
    %cst_229 = arith.constant dense<0.000000e+00> : vector<8x384xf32>
    %1052 = tpu.matmul %1031, %758, %cst_229 {dimension_numbers = #tpu.dot_dimension_numbers<[1], [0], [0], [1], [0, 0, 1, 1], [], []>} : vector<8x128xf32>, vector<128x384xf32>, vector<8x384xf32> -> vector<8x384xf32>
    %1053 = vector.broadcast %760 : vector<1x384xf32> to vector<8x384xf32>
    %1054 = arith.addf %1052, %1053 : vector<8x384xf32>
    %cst_230 = arith.constant dense<0.000000e+00> : vector<8x384xf32>
    %1055 = tpu.matmul %1034, %759, %cst_230 {dimension_numbers = #tpu.dot_dimension_numbers<[1], [0], [0], [1], [0, 0, 1, 1], [], []>} : vector<8x128xf32>, vector<128x384xf32>, vector<8x384xf32> -> vector<8x384xf32>
    %1056 = vector.broadcast %761 : vector<1x384xf32> to vector<8x384xf32>
    %1057 = arith.addf %1055, %1056 : vector<8x384xf32>
    %1058 = vector.extract_strided_slice %1049 {offsets = [0, 0], sizes = [8, 128], strides = [1, 1]} : vector<8x384xf32> to vector<8x128xf32>
    %1059 = vector.extract_strided_slice %1054 {offsets = [0, 0], sizes = [8, 128], strides = [1, 1]} : vector<8x384xf32> to vector<8x128xf32>
    %1060 = arith.addf %1058, %1059 : vector<8x128xf32>
    %1061 = arith.negf %1060 : vector<8x128xf32>
    %1062 = math.exp %1061 : vector<8x128xf32>
    %cst_231 = arith.constant 1.000000e+00 : f32
    %1063 = vector.broadcast %cst_231 : f32 to vector<8x128xf32>
    %1064 = arith.addf %1063, %1062 : vector<8x128xf32>
    %1065 = arith.divf %1063, %1064 : vector<8x128xf32>
    %1066 = vector.extract_strided_slice %1049 {offsets = [0, 128], sizes = [8, 128], strides = [1, 1]} : vector<8x384xf32> to vector<8x128xf32>
    %1067 = vector.extract_strided_slice %1054 {offsets = [0, 128], sizes = [8, 128], strides = [1, 1]} : vector<8x384xf32> to vector<8x128xf32>
    %1068 = arith.addf %1066, %1067 : vector<8x128xf32>
    %1069 = arith.negf %1068 : vector<8x128xf32>
    %1070 = math.exp %1069 : vector<8x128xf32>
    %cst_232 = arith.constant 1.000000e+00 : f32
    %1071 = vector.broadcast %cst_232 : f32 to vector<8x128xf32>
    %1072 = arith.addf %1071, %1070 : vector<8x128xf32>
    %1073 = arith.divf %1071, %1072 : vector<8x128xf32>
    %1074 = vector.extract_strided_slice %1049 {offsets = [0, 256], sizes = [8, 128], strides = [1, 1]} : vector<8x384xf32> to vector<8x128xf32>
    %1075 = vector.extract_strided_slice %1054 {offsets = [0, 256], sizes = [8, 128], strides = [1, 1]} : vector<8x384xf32> to vector<8x128xf32>
    %1076 = arith.mulf %1065, %1075 : vector<8x128xf32>
    %1077 = arith.addf %1074, %1076 : vector<8x128xf32>
    %1078 = math.tanh %1077 : vector<8x128xf32>
    %cst_233 = arith.constant 1.000000e+00 : f32
    %1079 = vector.broadcast %cst_233 : f32 to vector<8x128xf32>
    %1080 = arith.subf %1079, %1073 : vector<8x128xf32>
    %1081 = arith.mulf %1080, %1078 : vector<8x128xf32>
    %1082 = arith.mulf %1073, %1031 : vector<8x128xf32>
    %1083 = arith.addf %1081, %1082 : vector<8x128xf32>
    %1084 = vector.extract_strided_slice %1051 {offsets = [0, 0], sizes = [8, 128], strides = [1, 1]} : vector<8x384xf32> to vector<8x128xf32>
    %1085 = vector.extract_strided_slice %1057 {offsets = [0, 0], sizes = [8, 128], strides = [1, 1]} : vector<8x384xf32> to vector<8x128xf32>
    %1086 = arith.addf %1084, %1085 : vector<8x128xf32>
    %1087 = arith.negf %1086 : vector<8x128xf32>
    %1088 = math.exp %1087 : vector<8x128xf32>
    %cst_234 = arith.constant 1.000000e+00 : f32
    %1089 = vector.broadcast %cst_234 : f32 to vector<8x128xf32>
    %1090 = arith.addf %1089, %1088 : vector<8x128xf32>
    %1091 = arith.divf %1089, %1090 : vector<8x128xf32>
    %1092 = vector.extract_strided_slice %1051 {offsets = [0, 128], sizes = [8, 128], strides = [1, 1]} : vector<8x384xf32> to vector<8x128xf32>
    %1093 = vector.extract_strided_slice %1057 {offsets = [0, 128], sizes = [8, 128], strides = [1, 1]} : vector<8x384xf32> to vector<8x128xf32>
    %1094 = arith.addf %1092, %1093 : vector<8x128xf32>
    %1095 = arith.negf %1094 : vector<8x128xf32>
    %1096 = math.exp %1095 : vector<8x128xf32>
    %cst_235 = arith.constant 1.000000e+00 : f32
    %1097 = vector.broadcast %cst_235 : f32 to vector<8x128xf32>
    %1098 = arith.addf %1097, %1096 : vector<8x128xf32>
    %1099 = arith.divf %1097, %1098 : vector<8x128xf32>
    %1100 = vector.extract_strided_slice %1051 {offsets = [0, 256], sizes = [8, 128], strides = [1, 1]} : vector<8x384xf32> to vector<8x128xf32>
    %1101 = vector.extract_strided_slice %1057 {offsets = [0, 256], sizes = [8, 128], strides = [1, 1]} : vector<8x384xf32> to vector<8x128xf32>
    %1102 = arith.mulf %1091, %1101 : vector<8x128xf32>
    %1103 = arith.addf %1100, %1102 : vector<8x128xf32>
    %1104 = math.tanh %1103 : vector<8x128xf32>
    %cst_236 = arith.constant 1.000000e+00 : f32
    %1105 = vector.broadcast %cst_236 : f32 to vector<8x128xf32>
    %1106 = arith.subf %1105, %1099 : vector<8x128xf32>
    %1107 = arith.mulf %1106, %1104 : vector<8x128xf32>
    %1108 = arith.mulf %1099, %1034 : vector<8x128xf32>
    %1109 = arith.addf %1107, %1108 : vector<8x128xf32>
    %1110 = vector.broadcast %c3_i32_223 : i32 to vector<8x1xi32>
    %1111 = arith.cmpi slt, %1110, %0 : vector<8x1xi32>
    %1112 = vector.broadcast %1043 : i32 to vector<8x1xi32>
    %1113 = arith.cmpi slt, %1112, %0 : vector<8x1xi32>
    %cst_237 = arith.constant 0.000000e+00 : f32
    %1114 = vector.shape_cast %1111 : vector<8x1xi1> to vector<8x1xi1>
    %1115 = vector.broadcast %1114 : vector<8x1xi1> to vector<8x128xi1>
    %1116 = vector.broadcast %cst_237 : f32 to vector<8x128xf32>
    %1117 = arith.select %1115, %1083, %1116 : vector<8x128xi1>, vector<8x128xf32>
    %cst_238 = arith.constant 0.000000e+00 : f32
    %1118 = vector.shape_cast %1113 : vector<8x1xi1> to vector<8x1xi1>
    %1119 = vector.broadcast %1118 : vector<8x1xi1> to vector<8x128xi1>
    %1120 = vector.broadcast %cst_238 : f32 to vector<8x128xf32>
    %1121 = arith.select %1119, %1109, %1120 : vector<8x128xi1>, vector<8x128xf32>
    %1122 = vector.shape_cast %1111 : vector<8x1xi1> to vector<8x1xi1>
    %1123 = vector.broadcast %1122 : vector<8x1xi1> to vector<8x128xi1>
    %1124 = arith.select %1123, %1083, %1031 : vector<8x128xi1>, vector<8x128xf32>
    %1125 = vector.shape_cast %1113 : vector<8x1xi1> to vector<8x1xi1>
    %1126 = vector.broadcast %1125 : vector<8x1xi1> to vector<8x128xi1>
    %1127 = arith.select %1126, %1109, %1034 : vector<8x128xi1>, vector<8x128xf32>
    %1128 = arith.addf %1035, %1117 : vector<8x128xf32>
    %1129 = arith.addf %1036, %1121 : vector<8x128xf32>
    %1130 = arith.cmpi slt, %c3_i32_223, %4 : i32
    %1131 = arith.maximumf %1039, %1117 : vector<8x128xf32>
    %1132 = arith.select %1130, %1131, %1039 : vector<8x128xf32>
    %1133 = arith.cmpi slt, %1043, %4 : i32
    %1134 = arith.maximumf %1042, %1121 : vector<8x128xf32>
    %1135 = arith.select %1133, %1134, %1042 : vector<8x128xf32>
    %c4_i32_239 = arith.constant 4 : i32
    %c7_i32_240 = arith.constant 7 : i32
    %1136 = arith.subi %c7_i32_240, %c4_i32_239 : i32
    %c8_i32_241 = arith.constant 8 : i32
    %1137 = arith.muli %c4_i32_239, %c8_i32_241 : i32
    %1138 = tpu.assume_multiple %1137, 8 : i32
    %c8_i32_242 = arith.constant 8 : i32
    %1139 = arith.muli %1136, %c8_i32_242 : i32
    %1140 = tpu.assume_multiple %1139, 8 : i32
    %1141 = arith.index_cast %1138 : i32 to index
    %c0_243 = arith.constant 0 : index
    %1142 = vector.load %arg26[%1141, %c0_243] : memref<64x768xf32, #tpu.memory_space<vmem>>, vector<8x384xf32>
    %1143 = arith.index_cast %1140 : i32 to index
    %c384_244 = arith.constant 384 : index
    %1144 = vector.load %arg26[%1143, %c384_244] : memref<64x768xf32, #tpu.memory_space<vmem>>, vector<8x384xf32>
    %cst_245 = arith.constant dense<0.000000e+00> : vector<8x384xf32>
    %1145 = tpu.matmul %1124, %758, %cst_245 {dimension_numbers = #tpu.dot_dimension_numbers<[1], [0], [0], [1], [0, 0, 1, 1], [], []>} : vector<8x128xf32>, vector<128x384xf32>, vector<8x384xf32> -> vector<8x384xf32>
    %1146 = vector.broadcast %760 : vector<1x384xf32> to vector<8x384xf32>
    %1147 = arith.addf %1145, %1146 : vector<8x384xf32>
    %cst_246 = arith.constant dense<0.000000e+00> : vector<8x384xf32>
    %1148 = tpu.matmul %1127, %759, %cst_246 {dimension_numbers = #tpu.dot_dimension_numbers<[1], [0], [0], [1], [0, 0, 1, 1], [], []>} : vector<8x128xf32>, vector<128x384xf32>, vector<8x384xf32> -> vector<8x384xf32>
    %1149 = vector.broadcast %761 : vector<1x384xf32> to vector<8x384xf32>
    %1150 = arith.addf %1148, %1149 : vector<8x384xf32>
    %1151 = vector.extract_strided_slice %1142 {offsets = [0, 0], sizes = [8, 128], strides = [1, 1]} : vector<8x384xf32> to vector<8x128xf32>
    %1152 = vector.extract_strided_slice %1147 {offsets = [0, 0], sizes = [8, 128], strides = [1, 1]} : vector<8x384xf32> to vector<8x128xf32>
    %1153 = arith.addf %1151, %1152 : vector<8x128xf32>
    %1154 = arith.negf %1153 : vector<8x128xf32>
    %1155 = math.exp %1154 : vector<8x128xf32>
    %cst_247 = arith.constant 1.000000e+00 : f32
    %1156 = vector.broadcast %cst_247 : f32 to vector<8x128xf32>
    %1157 = arith.addf %1156, %1155 : vector<8x128xf32>
    %1158 = arith.divf %1156, %1157 : vector<8x128xf32>
    %1159 = vector.extract_strided_slice %1142 {offsets = [0, 128], sizes = [8, 128], strides = [1, 1]} : vector<8x384xf32> to vector<8x128xf32>
    %1160 = vector.extract_strided_slice %1147 {offsets = [0, 128], sizes = [8, 128], strides = [1, 1]} : vector<8x384xf32> to vector<8x128xf32>
    %1161 = arith.addf %1159, %1160 : vector<8x128xf32>
    %1162 = arith.negf %1161 : vector<8x128xf32>
    %1163 = math.exp %1162 : vector<8x128xf32>
    %cst_248 = arith.constant 1.000000e+00 : f32
    %1164 = vector.broadcast %cst_248 : f32 to vector<8x128xf32>
    %1165 = arith.addf %1164, %1163 : vector<8x128xf32>
    %1166 = arith.divf %1164, %1165 : vector<8x128xf32>
    %1167 = vector.extract_strided_slice %1142 {offsets = [0, 256], sizes = [8, 128], strides = [1, 1]} : vector<8x384xf32> to vector<8x128xf32>
    %1168 = vector.extract_strided_slice %1147 {offsets = [0, 256], sizes = [8, 128], strides = [1, 1]} : vector<8x384xf32> to vector<8x128xf32>
    %1169 = arith.mulf %1158, %1168 : vector<8x128xf32>
    %1170 = arith.addf %1167, %1169 : vector<8x128xf32>
    %1171 = math.tanh %1170 : vector<8x128xf32>
    %cst_249 = arith.constant 1.000000e+00 : f32
    %1172 = vector.broadcast %cst_249 : f32 to vector<8x128xf32>
    %1173 = arith.subf %1172, %1166 : vector<8x128xf32>
    %1174 = arith.mulf %1173, %1171 : vector<8x128xf32>
    %1175 = arith.mulf %1166, %1124 : vector<8x128xf32>
    %1176 = arith.addf %1174, %1175 : vector<8x128xf32>
    %1177 = vector.extract_strided_slice %1144 {offsets = [0, 0], sizes = [8, 128], strides = [1, 1]} : vector<8x384xf32> to vector<8x128xf32>
    %1178 = vector.extract_strided_slice %1150 {offsets = [0, 0], sizes = [8, 128], strides = [1, 1]} : vector<8x384xf32> to vector<8x128xf32>
    %1179 = arith.addf %1177, %1178 : vector<8x128xf32>
    %1180 = arith.negf %1179 : vector<8x128xf32>
    %1181 = math.exp %1180 : vector<8x128xf32>
    %cst_250 = arith.constant 1.000000e+00 : f32
    %1182 = vector.broadcast %cst_250 : f32 to vector<8x128xf32>
    %1183 = arith.addf %1182, %1181 : vector<8x128xf32>
    %1184 = arith.divf %1182, %1183 : vector<8x128xf32>
    %1185 = vector.extract_strided_slice %1144 {offsets = [0, 128], sizes = [8, 128], strides = [1, 1]} : vector<8x384xf32> to vector<8x128xf32>
    %1186 = vector.extract_strided_slice %1150 {offsets = [0, 128], sizes = [8, 128], strides = [1, 1]} : vector<8x384xf32> to vector<8x128xf32>
    %1187 = arith.addf %1185, %1186 : vector<8x128xf32>
    %1188 = arith.negf %1187 : vector<8x128xf32>
    %1189 = math.exp %1188 : vector<8x128xf32>
    %cst_251 = arith.constant 1.000000e+00 : f32
    %1190 = vector.broadcast %cst_251 : f32 to vector<8x128xf32>
    %1191 = arith.addf %1190, %1189 : vector<8x128xf32>
    %1192 = arith.divf %1190, %1191 : vector<8x128xf32>
    %1193 = vector.extract_strided_slice %1144 {offsets = [0, 256], sizes = [8, 128], strides = [1, 1]} : vector<8x384xf32> to vector<8x128xf32>
    %1194 = vector.extract_strided_slice %1150 {offsets = [0, 256], sizes = [8, 128], strides = [1, 1]} : vector<8x384xf32> to vector<8x128xf32>
    %1195 = arith.mulf %1184, %1194 : vector<8x128xf32>
    %1196 = arith.addf %1193, %1195 : vector<8x128xf32>
    %1197 = math.tanh %1196 : vector<8x128xf32>
    %cst_252 = arith.constant 1.000000e+00 : f32
    %1198 = vector.broadcast %cst_252 : f32 to vector<8x128xf32>
    %1199 = arith.subf %1198, %1192 : vector<8x128xf32>
    %1200 = arith.mulf %1199, %1197 : vector<8x128xf32>
    %1201 = arith.mulf %1192, %1127 : vector<8x128xf32>
    %1202 = arith.addf %1200, %1201 : vector<8x128xf32>
    %1203 = vector.broadcast %c4_i32_239 : i32 to vector<8x1xi32>
    %1204 = arith.cmpi slt, %1203, %0 : vector<8x1xi32>
    %1205 = vector.broadcast %1136 : i32 to vector<8x1xi32>
    %1206 = arith.cmpi slt, %1205, %0 : vector<8x1xi32>
    %cst_253 = arith.constant 0.000000e+00 : f32
    %1207 = vector.shape_cast %1204 : vector<8x1xi1> to vector<8x1xi1>
    %1208 = vector.broadcast %1207 : vector<8x1xi1> to vector<8x128xi1>
    %1209 = vector.broadcast %cst_253 : f32 to vector<8x128xf32>
    %1210 = arith.select %1208, %1176, %1209 : vector<8x128xi1>, vector<8x128xf32>
    %cst_254 = arith.constant 0.000000e+00 : f32
    %1211 = vector.shape_cast %1206 : vector<8x1xi1> to vector<8x1xi1>
    %1212 = vector.broadcast %1211 : vector<8x1xi1> to vector<8x128xi1>
    %1213 = vector.broadcast %cst_254 : f32 to vector<8x128xf32>
    %1214 = arith.select %1212, %1202, %1213 : vector<8x128xi1>, vector<8x128xf32>
    %1215 = vector.shape_cast %1204 : vector<8x1xi1> to vector<8x1xi1>
    %1216 = vector.broadcast %1215 : vector<8x1xi1> to vector<8x128xi1>
    %1217 = arith.select %1216, %1176, %1124 : vector<8x128xi1>, vector<8x128xf32>
    %1218 = vector.shape_cast %1206 : vector<8x1xi1> to vector<8x1xi1>
    %1219 = vector.broadcast %1218 : vector<8x1xi1> to vector<8x128xi1>
    %1220 = arith.select %1219, %1202, %1127 : vector<8x128xi1>, vector<8x128xf32>
    %1221 = arith.addf %1128, %1210 : vector<8x128xf32>
    %1222 = arith.addf %1129, %1214 : vector<8x128xf32>
    %1223 = arith.cmpi slt, %c4_i32_239, %4 : i32
    %1224 = arith.maximumf %1132, %1210 : vector<8x128xf32>
    %1225 = arith.select %1223, %1224, %1132 : vector<8x128xf32>
    %1226 = arith.cmpi slt, %1136, %4 : i32
    %1227 = arith.maximumf %1135, %1214 : vector<8x128xf32>
    %1228 = arith.select %1226, %1227, %1135 : vector<8x128xf32>
    %c5_i32_255 = arith.constant 5 : i32
    %c7_i32_256 = arith.constant 7 : i32
    %1229 = arith.subi %c7_i32_256, %c5_i32_255 : i32
    %c8_i32_257 = arith.constant 8 : i32
    %1230 = arith.muli %c5_i32_255, %c8_i32_257 : i32
    %1231 = tpu.assume_multiple %1230, 8 : i32
    %c8_i32_258 = arith.constant 8 : i32
    %1232 = arith.muli %1229, %c8_i32_258 : i32
    %1233 = tpu.assume_multiple %1232, 8 : i32
    %1234 = arith.index_cast %1231 : i32 to index
    %c0_259 = arith.constant 0 : index
    %1235 = vector.load %arg26[%1234, %c0_259] : memref<64x768xf32, #tpu.memory_space<vmem>>, vector<8x384xf32>
    %1236 = arith.index_cast %1233 : i32 to index
    %c384_260 = arith.constant 384 : index
    %1237 = vector.load %arg26[%1236, %c384_260] : memref<64x768xf32, #tpu.memory_space<vmem>>, vector<8x384xf32>
    %cst_261 = arith.constant dense<0.000000e+00> : vector<8x384xf32>
    %1238 = tpu.matmul %1217, %758, %cst_261 {dimension_numbers = #tpu.dot_dimension_numbers<[1], [0], [0], [1], [0, 0, 1, 1], [], []>} : vector<8x128xf32>, vector<128x384xf32>, vector<8x384xf32> -> vector<8x384xf32>
    %1239 = vector.broadcast %760 : vector<1x384xf32> to vector<8x384xf32>
    %1240 = arith.addf %1238, %1239 : vector<8x384xf32>
    %cst_262 = arith.constant dense<0.000000e+00> : vector<8x384xf32>
    %1241 = tpu.matmul %1220, %759, %cst_262 {dimension_numbers = #tpu.dot_dimension_numbers<[1], [0], [0], [1], [0, 0, 1, 1], [], []>} : vector<8x128xf32>, vector<128x384xf32>, vector<8x384xf32> -> vector<8x384xf32>
    %1242 = vector.broadcast %761 : vector<1x384xf32> to vector<8x384xf32>
    %1243 = arith.addf %1241, %1242 : vector<8x384xf32>
    %1244 = vector.extract_strided_slice %1235 {offsets = [0, 0], sizes = [8, 128], strides = [1, 1]} : vector<8x384xf32> to vector<8x128xf32>
    %1245 = vector.extract_strided_slice %1240 {offsets = [0, 0], sizes = [8, 128], strides = [1, 1]} : vector<8x384xf32> to vector<8x128xf32>
    %1246 = arith.addf %1244, %1245 : vector<8x128xf32>
    %1247 = arith.negf %1246 : vector<8x128xf32>
    %1248 = math.exp %1247 : vector<8x128xf32>
    %cst_263 = arith.constant 1.000000e+00 : f32
    %1249 = vector.broadcast %cst_263 : f32 to vector<8x128xf32>
    %1250 = arith.addf %1249, %1248 : vector<8x128xf32>
    %1251 = arith.divf %1249, %1250 : vector<8x128xf32>
    %1252 = vector.extract_strided_slice %1235 {offsets = [0, 128], sizes = [8, 128], strides = [1, 1]} : vector<8x384xf32> to vector<8x128xf32>
    %1253 = vector.extract_strided_slice %1240 {offsets = [0, 128], sizes = [8, 128], strides = [1, 1]} : vector<8x384xf32> to vector<8x128xf32>
    %1254 = arith.addf %1252, %1253 : vector<8x128xf32>
    %1255 = arith.negf %1254 : vector<8x128xf32>
    %1256 = math.exp %1255 : vector<8x128xf32>
    %cst_264 = arith.constant 1.000000e+00 : f32
    %1257 = vector.broadcast %cst_264 : f32 to vector<8x128xf32>
    %1258 = arith.addf %1257, %1256 : vector<8x128xf32>
    %1259 = arith.divf %1257, %1258 : vector<8x128xf32>
    %1260 = vector.extract_strided_slice %1235 {offsets = [0, 256], sizes = [8, 128], strides = [1, 1]} : vector<8x384xf32> to vector<8x128xf32>
    %1261 = vector.extract_strided_slice %1240 {offsets = [0, 256], sizes = [8, 128], strides = [1, 1]} : vector<8x384xf32> to vector<8x128xf32>
    %1262 = arith.mulf %1251, %1261 : vector<8x128xf32>
    %1263 = arith.addf %1260, %1262 : vector<8x128xf32>
    %1264 = math.tanh %1263 : vector<8x128xf32>
    %cst_265 = arith.constant 1.000000e+00 : f32
    %1265 = vector.broadcast %cst_265 : f32 to vector<8x128xf32>
    %1266 = arith.subf %1265, %1259 : vector<8x128xf32>
    %1267 = arith.mulf %1266, %1264 : vector<8x128xf32>
    %1268 = arith.mulf %1259, %1217 : vector<8x128xf32>
    %1269 = arith.addf %1267, %1268 : vector<8x128xf32>
    %1270 = vector.extract_strided_slice %1237 {offsets = [0, 0], sizes = [8, 128], strides = [1, 1]} : vector<8x384xf32> to vector<8x128xf32>
    %1271 = vector.extract_strided_slice %1243 {offsets = [0, 0], sizes = [8, 128], strides = [1, 1]} : vector<8x384xf32> to vector<8x128xf32>
    %1272 = arith.addf %1270, %1271 : vector<8x128xf32>
    %1273 = arith.negf %1272 : vector<8x128xf32>
    %1274 = math.exp %1273 : vector<8x128xf32>
    %cst_266 = arith.constant 1.000000e+00 : f32
    %1275 = vector.broadcast %cst_266 : f32 to vector<8x128xf32>
    %1276 = arith.addf %1275, %1274 : vector<8x128xf32>
    %1277 = arith.divf %1275, %1276 : vector<8x128xf32>
    %1278 = vector.extract_strided_slice %1237 {offsets = [0, 128], sizes = [8, 128], strides = [1, 1]} : vector<8x384xf32> to vector<8x128xf32>
    %1279 = vector.extract_strided_slice %1243 {offsets = [0, 128], sizes = [8, 128], strides = [1, 1]} : vector<8x384xf32> to vector<8x128xf32>
    %1280 = arith.addf %1278, %1279 : vector<8x128xf32>
    %1281 = arith.negf %1280 : vector<8x128xf32>
    %1282 = math.exp %1281 : vector<8x128xf32>
    %cst_267 = arith.constant 1.000000e+00 : f32
    %1283 = vector.broadcast %cst_267 : f32 to vector<8x128xf32>
    %1284 = arith.addf %1283, %1282 : vector<8x128xf32>
    %1285 = arith.divf %1283, %1284 : vector<8x128xf32>
    %1286 = vector.extract_strided_slice %1237 {offsets = [0, 256], sizes = [8, 128], strides = [1, 1]} : vector<8x384xf32> to vector<8x128xf32>
    %1287 = vector.extract_strided_slice %1243 {offsets = [0, 256], sizes = [8, 128], strides = [1, 1]} : vector<8x384xf32> to vector<8x128xf32>
    %1288 = arith.mulf %1277, %1287 : vector<8x128xf32>
    %1289 = arith.addf %1286, %1288 : vector<8x128xf32>
    %1290 = math.tanh %1289 : vector<8x128xf32>
    %cst_268 = arith.constant 1.000000e+00 : f32
    %1291 = vector.broadcast %cst_268 : f32 to vector<8x128xf32>
    %1292 = arith.subf %1291, %1285 : vector<8x128xf32>
    %1293 = arith.mulf %1292, %1290 : vector<8x128xf32>
    %1294 = arith.mulf %1285, %1220 : vector<8x128xf32>
    %1295 = arith.addf %1293, %1294 : vector<8x128xf32>
    %1296 = vector.broadcast %c5_i32_255 : i32 to vector<8x1xi32>
    %1297 = arith.cmpi slt, %1296, %0 : vector<8x1xi32>
    %1298 = vector.broadcast %1229 : i32 to vector<8x1xi32>
    %1299 = arith.cmpi slt, %1298, %0 : vector<8x1xi32>
    %cst_269 = arith.constant 0.000000e+00 : f32
    %1300 = vector.shape_cast %1297 : vector<8x1xi1> to vector<8x1xi1>
    %1301 = vector.broadcast %1300 : vector<8x1xi1> to vector<8x128xi1>
    %1302 = vector.broadcast %cst_269 : f32 to vector<8x128xf32>
    %1303 = arith.select %1301, %1269, %1302 : vector<8x128xi1>, vector<8x128xf32>
    %cst_270 = arith.constant 0.000000e+00 : f32
    %1304 = vector.shape_cast %1299 : vector<8x1xi1> to vector<8x1xi1>
    %1305 = vector.broadcast %1304 : vector<8x1xi1> to vector<8x128xi1>
    %1306 = vector.broadcast %cst_270 : f32 to vector<8x128xf32>
    %1307 = arith.select %1305, %1295, %1306 : vector<8x128xi1>, vector<8x128xf32>
    %1308 = vector.shape_cast %1297 : vector<8x1xi1> to vector<8x1xi1>
    %1309 = vector.broadcast %1308 : vector<8x1xi1> to vector<8x128xi1>
    %1310 = arith.select %1309, %1269, %1217 : vector<8x128xi1>, vector<8x128xf32>
    %1311 = vector.shape_cast %1299 : vector<8x1xi1> to vector<8x1xi1>
    %1312 = vector.broadcast %1311 : vector<8x1xi1> to vector<8x128xi1>
    %1313 = arith.select %1312, %1295, %1220 : vector<8x128xi1>, vector<8x128xf32>
    %1314 = arith.addf %1221, %1303 : vector<8x128xf32>
    %1315 = arith.addf %1222, %1307 : vector<8x128xf32>
    %1316 = arith.cmpi slt, %c5_i32_255, %4 : i32
    %1317 = arith.maximumf %1225, %1303 : vector<8x128xf32>
    %1318 = arith.select %1316, %1317, %1225 : vector<8x128xf32>
    %1319 = arith.cmpi slt, %1229, %4 : i32
    %1320 = arith.maximumf %1228, %1307 : vector<8x128xf32>
    %1321 = arith.select %1319, %1320, %1228 : vector<8x128xf32>
    %c6_i32_271 = arith.constant 6 : i32
    %c7_i32_272 = arith.constant 7 : i32
    %1322 = arith.subi %c7_i32_272, %c6_i32_271 : i32
    %c8_i32_273 = arith.constant 8 : i32
    %1323 = arith.muli %c6_i32_271, %c8_i32_273 : i32
    %1324 = tpu.assume_multiple %1323, 8 : i32
    %c8_i32_274 = arith.constant 8 : i32
    %1325 = arith.muli %1322, %c8_i32_274 : i32
    %1326 = tpu.assume_multiple %1325, 8 : i32
    %1327 = arith.index_cast %1324 : i32 to index
    %c0_275 = arith.constant 0 : index
    %1328 = vector.load %arg26[%1327, %c0_275] : memref<64x768xf32, #tpu.memory_space<vmem>>, vector<8x384xf32>
    %1329 = arith.index_cast %1326 : i32 to index
    %c384_276 = arith.constant 384 : index
    %1330 = vector.load %arg26[%1329, %c384_276] : memref<64x768xf32, #tpu.memory_space<vmem>>, vector<8x384xf32>
    %cst_277 = arith.constant dense<0.000000e+00> : vector<8x384xf32>
    %1331 = tpu.matmul %1310, %758, %cst_277 {dimension_numbers = #tpu.dot_dimension_numbers<[1], [0], [0], [1], [0, 0, 1, 1], [], []>} : vector<8x128xf32>, vector<128x384xf32>, vector<8x384xf32> -> vector<8x384xf32>
    %1332 = vector.broadcast %760 : vector<1x384xf32> to vector<8x384xf32>
    %1333 = arith.addf %1331, %1332 : vector<8x384xf32>
    %cst_278 = arith.constant dense<0.000000e+00> : vector<8x384xf32>
    %1334 = tpu.matmul %1313, %759, %cst_278 {dimension_numbers = #tpu.dot_dimension_numbers<[1], [0], [0], [1], [0, 0, 1, 1], [], []>} : vector<8x128xf32>, vector<128x384xf32>, vector<8x384xf32> -> vector<8x384xf32>
    %1335 = vector.broadcast %761 : vector<1x384xf32> to vector<8x384xf32>
    %1336 = arith.addf %1334, %1335 : vector<8x384xf32>
    %1337 = vector.extract_strided_slice %1328 {offsets = [0, 0], sizes = [8, 128], strides = [1, 1]} : vector<8x384xf32> to vector<8x128xf32>
    %1338 = vector.extract_strided_slice %1333 {offsets = [0, 0], sizes = [8, 128], strides = [1, 1]} : vector<8x384xf32> to vector<8x128xf32>
    %1339 = arith.addf %1337, %1338 : vector<8x128xf32>
    %1340 = arith.negf %1339 : vector<8x128xf32>
    %1341 = math.exp %1340 : vector<8x128xf32>
    %cst_279 = arith.constant 1.000000e+00 : f32
    %1342 = vector.broadcast %cst_279 : f32 to vector<8x128xf32>
    %1343 = arith.addf %1342, %1341 : vector<8x128xf32>
    %1344 = arith.divf %1342, %1343 : vector<8x128xf32>
    %1345 = vector.extract_strided_slice %1328 {offsets = [0, 128], sizes = [8, 128], strides = [1, 1]} : vector<8x384xf32> to vector<8x128xf32>
    %1346 = vector.extract_strided_slice %1333 {offsets = [0, 128], sizes = [8, 128], strides = [1, 1]} : vector<8x384xf32> to vector<8x128xf32>
    %1347 = arith.addf %1345, %1346 : vector<8x128xf32>
    %1348 = arith.negf %1347 : vector<8x128xf32>
    %1349 = math.exp %1348 : vector<8x128xf32>
    %cst_280 = arith.constant 1.000000e+00 : f32
    %1350 = vector.broadcast %cst_280 : f32 to vector<8x128xf32>
    %1351 = arith.addf %1350, %1349 : vector<8x128xf32>
    %1352 = arith.divf %1350, %1351 : vector<8x128xf32>
    %1353 = vector.extract_strided_slice %1328 {offsets = [0, 256], sizes = [8, 128], strides = [1, 1]} : vector<8x384xf32> to vector<8x128xf32>
    %1354 = vector.extract_strided_slice %1333 {offsets = [0, 256], sizes = [8, 128], strides = [1, 1]} : vector<8x384xf32> to vector<8x128xf32>
    %1355 = arith.mulf %1344, %1354 : vector<8x128xf32>
    %1356 = arith.addf %1353, %1355 : vector<8x128xf32>
    %1357 = math.tanh %1356 : vector<8x128xf32>
    %cst_281 = arith.constant 1.000000e+00 : f32
    %1358 = vector.broadcast %cst_281 : f32 to vector<8x128xf32>
    %1359 = arith.subf %1358, %1352 : vector<8x128xf32>
    %1360 = arith.mulf %1359, %1357 : vector<8x128xf32>
    %1361 = arith.mulf %1352, %1310 : vector<8x128xf32>
    %1362 = arith.addf %1360, %1361 : vector<8x128xf32>
    %1363 = vector.extract_strided_slice %1330 {offsets = [0, 0], sizes = [8, 128], strides = [1, 1]} : vector<8x384xf32> to vector<8x128xf32>
    %1364 = vector.extract_strided_slice %1336 {offsets = [0, 0], sizes = [8, 128], strides = [1, 1]} : vector<8x384xf32> to vector<8x128xf32>
    %1365 = arith.addf %1363, %1364 : vector<8x128xf32>
    %1366 = arith.negf %1365 : vector<8x128xf32>
    %1367 = math.exp %1366 : vector<8x128xf32>
    %cst_282 = arith.constant 1.000000e+00 : f32
    %1368 = vector.broadcast %cst_282 : f32 to vector<8x128xf32>
    %1369 = arith.addf %1368, %1367 : vector<8x128xf32>
    %1370 = arith.divf %1368, %1369 : vector<8x128xf32>
    %1371 = vector.extract_strided_slice %1330 {offsets = [0, 128], sizes = [8, 128], strides = [1, 1]} : vector<8x384xf32> to vector<8x128xf32>
    %1372 = vector.extract_strided_slice %1336 {offsets = [0, 128], sizes = [8, 128], strides = [1, 1]} : vector<8x384xf32> to vector<8x128xf32>
    %1373 = arith.addf %1371, %1372 : vector<8x128xf32>
    %1374 = arith.negf %1373 : vector<8x128xf32>
    %1375 = math.exp %1374 : vector<8x128xf32>
    %cst_283 = arith.constant 1.000000e+00 : f32
    %1376 = vector.broadcast %cst_283 : f32 to vector<8x128xf32>
    %1377 = arith.addf %1376, %1375 : vector<8x128xf32>
    %1378 = arith.divf %1376, %1377 : vector<8x128xf32>
    %1379 = vector.extract_strided_slice %1330 {offsets = [0, 256], sizes = [8, 128], strides = [1, 1]} : vector<8x384xf32> to vector<8x128xf32>
    %1380 = vector.extract_strided_slice %1336 {offsets = [0, 256], sizes = [8, 128], strides = [1, 1]} : vector<8x384xf32> to vector<8x128xf32>
    %1381 = arith.mulf %1370, %1380 : vector<8x128xf32>
    %1382 = arith.addf %1379, %1381 : vector<8x128xf32>
    %1383 = math.tanh %1382 : vector<8x128xf32>
    %cst_284 = arith.constant 1.000000e+00 : f32
    %1384 = vector.broadcast %cst_284 : f32 to vector<8x128xf32>
    %1385 = arith.subf %1384, %1378 : vector<8x128xf32>
    %1386 = arith.mulf %1385, %1383 : vector<8x128xf32>
    %1387 = arith.mulf %1378, %1313 : vector<8x128xf32>
    %1388 = arith.addf %1386, %1387 : vector<8x128xf32>
    %1389 = vector.broadcast %c6_i32_271 : i32 to vector<8x1xi32>
    %1390 = arith.cmpi slt, %1389, %0 : vector<8x1xi32>
    %1391 = vector.broadcast %1322 : i32 to vector<8x1xi32>
    %1392 = arith.cmpi slt, %1391, %0 : vector<8x1xi32>
    %cst_285 = arith.constant 0.000000e+00 : f32
    %1393 = vector.shape_cast %1390 : vector<8x1xi1> to vector<8x1xi1>
    %1394 = vector.broadcast %1393 : vector<8x1xi1> to vector<8x128xi1>
    %1395 = vector.broadcast %cst_285 : f32 to vector<8x128xf32>
    %1396 = arith.select %1394, %1362, %1395 : vector<8x128xi1>, vector<8x128xf32>
    %cst_286 = arith.constant 0.000000e+00 : f32
    %1397 = vector.shape_cast %1392 : vector<8x1xi1> to vector<8x1xi1>
    %1398 = vector.broadcast %1397 : vector<8x1xi1> to vector<8x128xi1>
    %1399 = vector.broadcast %cst_286 : f32 to vector<8x128xf32>
    %1400 = arith.select %1398, %1388, %1399 : vector<8x128xi1>, vector<8x128xf32>
    %1401 = vector.shape_cast %1390 : vector<8x1xi1> to vector<8x1xi1>
    %1402 = vector.broadcast %1401 : vector<8x1xi1> to vector<8x128xi1>
    %1403 = arith.select %1402, %1362, %1310 : vector<8x128xi1>, vector<8x128xf32>
    %1404 = vector.shape_cast %1392 : vector<8x1xi1> to vector<8x1xi1>
    %1405 = vector.broadcast %1404 : vector<8x1xi1> to vector<8x128xi1>
    %1406 = arith.select %1405, %1388, %1313 : vector<8x128xi1>, vector<8x128xf32>
    %1407 = arith.addf %1314, %1396 : vector<8x128xf32>
    %1408 = arith.addf %1315, %1400 : vector<8x128xf32>
    %1409 = arith.cmpi slt, %c6_i32_271, %4 : i32
    %1410 = arith.maximumf %1318, %1396 : vector<8x128xf32>
    %1411 = arith.select %1409, %1410, %1318 : vector<8x128xf32>
    %1412 = arith.cmpi slt, %1322, %4 : i32
    %1413 = arith.maximumf %1321, %1400 : vector<8x128xf32>
    %1414 = arith.select %1412, %1413, %1321 : vector<8x128xf32>
    %c7_i32_287 = arith.constant 7 : i32
    %c7_i32_288 = arith.constant 7 : i32
    %1415 = arith.subi %c7_i32_288, %c7_i32_287 : i32
    %c8_i32_289 = arith.constant 8 : i32
    %1416 = arith.muli %c7_i32_287, %c8_i32_289 : i32
    %1417 = tpu.assume_multiple %1416, 8 : i32
    %c8_i32_290 = arith.constant 8 : i32
    %1418 = arith.muli %1415, %c8_i32_290 : i32
    %1419 = tpu.assume_multiple %1418, 8 : i32
    %1420 = arith.index_cast %1417 : i32 to index
    %c0_291 = arith.constant 0 : index
    %1421 = vector.load %arg26[%1420, %c0_291] : memref<64x768xf32, #tpu.memory_space<vmem>>, vector<8x384xf32>
    %1422 = arith.index_cast %1419 : i32 to index
    %c384_292 = arith.constant 384 : index
    %1423 = vector.load %arg26[%1422, %c384_292] : memref<64x768xf32, #tpu.memory_space<vmem>>, vector<8x384xf32>
    %cst_293 = arith.constant dense<0.000000e+00> : vector<8x384xf32>
    %1424 = tpu.matmul %1403, %758, %cst_293 {dimension_numbers = #tpu.dot_dimension_numbers<[1], [0], [0], [1], [0, 0, 1, 1], [], []>} : vector<8x128xf32>, vector<128x384xf32>, vector<8x384xf32> -> vector<8x384xf32>
    %1425 = vector.broadcast %760 : vector<1x384xf32> to vector<8x384xf32>
    %1426 = arith.addf %1424, %1425 : vector<8x384xf32>
    %cst_294 = arith.constant dense<0.000000e+00> : vector<8x384xf32>
    %1427 = tpu.matmul %1406, %759, %cst_294 {dimension_numbers = #tpu.dot_dimension_numbers<[1], [0], [0], [1], [0, 0, 1, 1], [], []>} : vector<8x128xf32>, vector<128x384xf32>, vector<8x384xf32> -> vector<8x384xf32>
    %1428 = vector.broadcast %761 : vector<1x384xf32> to vector<8x384xf32>
    %1429 = arith.addf %1427, %1428 : vector<8x384xf32>
    %1430 = vector.extract_strided_slice %1421 {offsets = [0, 0], sizes = [8, 128], strides = [1, 1]} : vector<8x384xf32> to vector<8x128xf32>
    %1431 = vector.extract_strided_slice %1426 {offsets = [0, 0], sizes = [8, 128], strides = [1, 1]} : vector<8x384xf32> to vector<8x128xf32>
    %1432 = arith.addf %1430, %1431 : vector<8x128xf32>
    %1433 = arith.negf %1432 : vector<8x128xf32>
    %1434 = math.exp %1433 : vector<8x128xf32>
    %cst_295 = arith.constant 1.000000e+00 : f32
    %1435 = vector.broadcast %cst_295 : f32 to vector<8x128xf32>
    %1436 = arith.addf %1435, %1434 : vector<8x128xf32>
    %1437 = arith.divf %1435, %1436 : vector<8x128xf32>
    %1438 = vector.extract_strided_slice %1421 {offsets = [0, 128], sizes = [8, 128], strides = [1, 1]} : vector<8x384xf32> to vector<8x128xf32>
    %1439 = vector.extract_strided_slice %1426 {offsets = [0, 128], sizes = [8, 128], strides = [1, 1]} : vector<8x384xf32> to vector<8x128xf32>
    %1440 = arith.addf %1438, %1439 : vector<8x128xf32>
    %1441 = arith.negf %1440 : vector<8x128xf32>
    %1442 = math.exp %1441 : vector<8x128xf32>
    %cst_296 = arith.constant 1.000000e+00 : f32
    %1443 = vector.broadcast %cst_296 : f32 to vector<8x128xf32>
    %1444 = arith.addf %1443, %1442 : vector<8x128xf32>
    %1445 = arith.divf %1443, %1444 : vector<8x128xf32>
    %1446 = vector.extract_strided_slice %1421 {offsets = [0, 256], sizes = [8, 128], strides = [1, 1]} : vector<8x384xf32> to vector<8x128xf32>
    %1447 = vector.extract_strided_slice %1426 {offsets = [0, 256], sizes = [8, 128], strides = [1, 1]} : vector<8x384xf32> to vector<8x128xf32>
    %1448 = arith.mulf %1437, %1447 : vector<8x128xf32>
    %1449 = arith.addf %1446, %1448 : vector<8x128xf32>
    %1450 = math.tanh %1449 : vector<8x128xf32>
    %cst_297 = arith.constant 1.000000e+00 : f32
    %1451 = vector.broadcast %cst_297 : f32 to vector<8x128xf32>
    %1452 = arith.subf %1451, %1445 : vector<8x128xf32>
    %1453 = arith.mulf %1452, %1450 : vector<8x128xf32>
    %1454 = arith.mulf %1445, %1403 : vector<8x128xf32>
    %1455 = arith.addf %1453, %1454 : vector<8x128xf32>
    %1456 = vector.extract_strided_slice %1423 {offsets = [0, 0], sizes = [8, 128], strides = [1, 1]} : vector<8x384xf32> to vector<8x128xf32>
    %1457 = vector.extract_strided_slice %1429 {offsets = [0, 0], sizes = [8, 128], strides = [1, 1]} : vector<8x384xf32> to vector<8x128xf32>
    %1458 = arith.addf %1456, %1457 : vector<8x128xf32>
    %1459 = arith.negf %1458 : vector<8x128xf32>
    %1460 = math.exp %1459 : vector<8x128xf32>
    %cst_298 = arith.constant 1.000000e+00 : f32
    %1461 = vector.broadcast %cst_298 : f32 to vector<8x128xf32>
    %1462 = arith.addf %1461, %1460 : vector<8x128xf32>
    %1463 = arith.divf %1461, %1462 : vector<8x128xf32>
    %1464 = vector.extract_strided_slice %1423 {offsets = [0, 128], sizes = [8, 128], strides = [1, 1]} : vector<8x384xf32> to vector<8x128xf32>
    %1465 = vector.extract_strided_slice %1429 {offsets = [0, 128], sizes = [8, 128], strides = [1, 1]} : vector<8x384xf32> to vector<8x128xf32>
    %1466 = arith.addf %1464, %1465 : vector<8x128xf32>
    %1467 = arith.negf %1466 : vector<8x128xf32>
    %1468 = math.exp %1467 : vector<8x128xf32>
    %cst_299 = arith.constant 1.000000e+00 : f32
    %1469 = vector.broadcast %cst_299 : f32 to vector<8x128xf32>
    %1470 = arith.addf %1469, %1468 : vector<8x128xf32>
    %1471 = arith.divf %1469, %1470 : vector<8x128xf32>
    %1472 = vector.extract_strided_slice %1423 {offsets = [0, 256], sizes = [8, 128], strides = [1, 1]} : vector<8x384xf32> to vector<8x128xf32>
    %1473 = vector.extract_strided_slice %1429 {offsets = [0, 256], sizes = [8, 128], strides = [1, 1]} : vector<8x384xf32> to vector<8x128xf32>
    %1474 = arith.mulf %1463, %1473 : vector<8x128xf32>
    %1475 = arith.addf %1472, %1474 : vector<8x128xf32>
    %1476 = math.tanh %1475 : vector<8x128xf32>
    %cst_300 = arith.constant 1.000000e+00 : f32
    %1477 = vector.broadcast %cst_300 : f32 to vector<8x128xf32>
    %1478 = arith.subf %1477, %1471 : vector<8x128xf32>
    %1479 = arith.mulf %1478, %1476 : vector<8x128xf32>
    %1480 = arith.mulf %1471, %1406 : vector<8x128xf32>
    %1481 = arith.addf %1479, %1480 : vector<8x128xf32>
    %1482 = vector.broadcast %c7_i32_287 : i32 to vector<8x1xi32>
    %1483 = arith.cmpi slt, %1482, %0 : vector<8x1xi32>
    %1484 = vector.broadcast %1415 : i32 to vector<8x1xi32>
    %1485 = arith.cmpi slt, %1484, %0 : vector<8x1xi32>
    %cst_301 = arith.constant 0.000000e+00 : f32
    %1486 = vector.shape_cast %1483 : vector<8x1xi1> to vector<8x1xi1>
    %1487 = vector.broadcast %1486 : vector<8x1xi1> to vector<8x128xi1>
    %1488 = vector.broadcast %cst_301 : f32 to vector<8x128xf32>
    %1489 = arith.select %1487, %1455, %1488 : vector<8x128xi1>, vector<8x128xf32>
    %cst_302 = arith.constant 0.000000e+00 : f32
    %1490 = vector.shape_cast %1485 : vector<8x1xi1> to vector<8x1xi1>
    %1491 = vector.broadcast %1490 : vector<8x1xi1> to vector<8x128xi1>
    %1492 = vector.broadcast %cst_302 : f32 to vector<8x128xf32>
    %1493 = arith.select %1491, %1481, %1492 : vector<8x128xi1>, vector<8x128xf32>
    %1494 = vector.shape_cast %1483 : vector<8x1xi1> to vector<8x1xi1>
    %1495 = vector.broadcast %1494 : vector<8x1xi1> to vector<8x128xi1>
    %1496 = arith.select %1495, %1455, %1403 : vector<8x128xi1>, vector<8x128xf32>
    %1497 = vector.shape_cast %1485 : vector<8x1xi1> to vector<8x1xi1>
    %1498 = vector.broadcast %1497 : vector<8x1xi1> to vector<8x128xi1>
    %1499 = arith.select %1498, %1481, %1406 : vector<8x128xi1>, vector<8x128xf32>
    %1500 = arith.addf %1407, %1489 : vector<8x128xf32>
    %1501 = arith.addf %1408, %1493 : vector<8x128xf32>
    %1502 = arith.cmpi slt, %c7_i32_287, %4 : i32
    %1503 = arith.maximumf %1411, %1489 : vector<8x128xf32>
    %1504 = arith.select %1502, %1503, %1411 : vector<8x128xf32>
    %1505 = arith.cmpi slt, %1415, %4 : i32
    %1506 = arith.maximumf %1414, %1493 : vector<8x128xf32>
    %1507 = arith.select %1505, %1506, %1414 : vector<8x128xf32>
    %c8_i32_303 = arith.constant 8 : i32
    %1508 = vector.broadcast %6 : f32 to vector<8x128xf32>
    %1509 = arith.mulf %1500, %1508 : vector<8x128xf32>
    %1510 = vector.broadcast %6 : f32 to vector<8x128xf32>
    %1511 = arith.mulf %1501, %1510 : vector<8x128xf32>
    %c0_304 = arith.constant 0 : index
    %c0_305 = arith.constant 0 : index
    %c0_306 = arith.constant 0 : index
    %1512 = vector.load %arg15[%c0_304, %c0_305, %c0_306] : memref<4x128x16xf32, #tpu.memory_space<vmem>>, vector<1x128x16xf32>
    %1513 = vector.shape_cast %1512 : vector<1x128x16xf32> to vector<128x16xf32>
    %cst_307 = arith.constant dense<0.000000e+00> : vector<8x16xf32>
    %1514 = tpu.matmul %1509, %1513, %cst_307 {dimension_numbers = #tpu.dot_dimension_numbers<[1], [0], [0], [1], [0, 0, 1, 1], [], []>} : vector<8x128xf32>, vector<128x16xf32>, vector<8x16xf32> -> vector<8x16xf32>
    %c1_308 = arith.constant 1 : index
    %c0_309 = arith.constant 0 : index
    %c0_310 = arith.constant 0 : index
    %1515 = vector.load %arg15[%c1_308, %c0_309, %c0_310] : memref<4x128x16xf32, #tpu.memory_space<vmem>>, vector<1x128x16xf32>
    %1516 = vector.shape_cast %1515 : vector<1x128x16xf32> to vector<128x16xf32>
    %cst_311 = arith.constant dense<0.000000e+00> : vector<8x16xf32>
    %1517 = tpu.matmul %1511, %1516, %cst_311 {dimension_numbers = #tpu.dot_dimension_numbers<[1], [0], [0], [1], [0, 0, 1, 1], [], []>} : vector<8x128xf32>, vector<128x16xf32>, vector<8x16xf32> -> vector<8x16xf32>
    %1518 = arith.addf %1514, %1517 : vector<8x16xf32>
    %c2 = arith.constant 2 : index
    %c0_312 = arith.constant 0 : index
    %c0_313 = arith.constant 0 : index
    %1519 = vector.load %arg15[%c2, %c0_312, %c0_313] : memref<4x128x16xf32, #tpu.memory_space<vmem>>, vector<1x128x16xf32>
    %1520 = vector.shape_cast %1519 : vector<1x128x16xf32> to vector<128x16xf32>
    %cst_314 = arith.constant dense<0.000000e+00> : vector<8x16xf32>
    %1521 = tpu.matmul %1504, %1520, %cst_314 {dimension_numbers = #tpu.dot_dimension_numbers<[1], [0], [0], [1], [0, 0, 1, 1], [], []>} : vector<8x128xf32>, vector<128x16xf32>, vector<8x16xf32> -> vector<8x16xf32>
    %1522 = arith.addf %1518, %1521 : vector<8x16xf32>
    %c3 = arith.constant 3 : index
    %c0_315 = arith.constant 0 : index
    %c0_316 = arith.constant 0 : index
    %1523 = vector.load %arg15[%c3, %c0_315, %c0_316] : memref<4x128x16xf32, #tpu.memory_space<vmem>>, vector<1x128x16xf32>
    %1524 = vector.shape_cast %1523 : vector<1x128x16xf32> to vector<128x16xf32>
    %cst_317 = arith.constant dense<0.000000e+00> : vector<8x16xf32>
    %1525 = tpu.matmul %1507, %1524, %cst_317 {dimension_numbers = #tpu.dot_dimension_numbers<[1], [0], [0], [1], [0, 0, 1, 1], [], []>} : vector<8x128xf32>, vector<128x16xf32>, vector<8x16xf32> -> vector<8x16xf32>
    %1526 = arith.addf %1522, %1525 : vector<8x16xf32>
    %c0_318 = arith.constant 0 : index
    %c0_319 = arith.constant 0 : index
    %1527 = vector.load %arg2[%c0_318, %c0_319] : memref<8x1xf32, #tpu.memory_space<vmem>>, vector<8x1xf32>
    %c0_320 = arith.constant 0 : index
    %c0_321 = arith.constant 0 : index
    %1528 = vector.load %arg16[%c0_320, %c0_321] : memref<1x16xf32, #tpu.memory_space<vmem>>, vector<1x16xf32>
    %1529 = vector.broadcast %1527 : vector<8x1xf32> to vector<8x16xf32>
    %1530 = vector.broadcast %1528 : vector<1x16xf32> to vector<8x16xf32>
    %1531 = arith.mulf %1529, %1530 : vector<8x16xf32>
    %1532 = arith.addf %1526, %1531 : vector<8x16xf32>
    %c0_322 = arith.constant 0 : index
    %c0_323 = arith.constant 0 : index
    %1533 = vector.load %arg17[%c0_322, %c0_323] : memref<1x16xf32, #tpu.memory_space<vmem>>, vector<1x16xf32>
    %1534 = vector.broadcast %1533 : vector<1x16xf32> to vector<8x16xf32>
    %1535 = arith.addf %1532, %1534 : vector<8x16xf32>
    %c0_324 = arith.constant 0 : index
    %c0_325 = arith.constant 0 : index
    %c0_326 = arith.constant 0 : index
    %1536 = vector.load %arg3[%c0_324, %c0_325, %c0_326] : memref<4x8x8xf32, #tpu.memory_space<vmem>>, vector<1x8x8xf32>
    %1537 = vector.shape_cast %1536 : vector<1x8x8xf32> to vector<8x8xf32>
    %cst_327 = arith.constant dense<0.000000e+00> : vector<8x128xf32>
    %1538 = tpu.matmul %1537, %1496, %cst_327 {dimension_numbers = #tpu.dot_dimension_numbers<[1], [0], [0], [1], [0, 0, 1, 1], [], []>} : vector<8x8xf32>, vector<8x128xf32>, vector<8x128xf32> -> vector<8x128xf32>
    %c1_328 = arith.constant 1 : index
    %c0_329 = arith.constant 0 : index
    %c0_330 = arith.constant 0 : index
    %1539 = vector.load %arg3[%c1_328, %c0_329, %c0_330] : memref<4x8x8xf32, #tpu.memory_space<vmem>>, vector<1x8x8xf32>
    %1540 = vector.shape_cast %1539 : vector<1x8x8xf32> to vector<8x8xf32>
    %cst_331 = arith.constant dense<0.000000e+00> : vector<8x128xf32>
    %1541 = tpu.matmul %1540, %1499, %cst_331 {dimension_numbers = #tpu.dot_dimension_numbers<[1], [0], [0], [1], [0, 0, 1, 1], [], []>} : vector<8x8xf32>, vector<8x128xf32>, vector<8x128xf32> -> vector<8x128xf32>
    %1542 = arith.addf %1538, %1541 : vector<8x128xf32>
    %c2_332 = arith.constant 2 : index
    %c0_333 = arith.constant 0 : index
    %c0_334 = arith.constant 0 : index
    %1543 = vector.load %arg3[%c2_332, %c0_333, %c0_334] : memref<4x8x8xf32, #tpu.memory_space<vmem>>, vector<1x8x8xf32>
    %1544 = vector.shape_cast %1543 : vector<1x8x8xf32> to vector<8x8xf32>
    %cst_335 = arith.constant dense<0.000000e+00> : vector<8x128xf32>
    %1545 = tpu.matmul %1544, %1496, %cst_335 {dimension_numbers = #tpu.dot_dimension_numbers<[1], [0], [0], [1], [0, 0, 1, 1], [], []>} : vector<8x8xf32>, vector<8x128xf32>, vector<8x128xf32> -> vector<8x128xf32>
    %c3_336 = arith.constant 3 : index
    %c0_337 = arith.constant 0 : index
    %c0_338 = arith.constant 0 : index
    %1546 = vector.load %arg3[%c3_336, %c0_337, %c0_338] : memref<4x8x8xf32, #tpu.memory_space<vmem>>, vector<1x8x8xf32>
    %1547 = vector.shape_cast %1546 : vector<1x8x8xf32> to vector<8x8xf32>
    %cst_339 = arith.constant dense<0.000000e+00> : vector<8x128xf32>
    %1548 = tpu.matmul %1547, %1499, %cst_339 {dimension_numbers = #tpu.dot_dimension_numbers<[1], [0], [0], [1], [0, 0, 1, 1], [], []>} : vector<8x8xf32>, vector<8x128xf32>, vector<8x128xf32> -> vector<8x128xf32>
    %1549 = arith.addf %1545, %1548 : vector<8x128xf32>
    %c0_340 = arith.constant 0 : index
    %c0_341 = arith.constant 0 : index
    %c0_342 = arith.constant 0 : index
    %1550 = vector.load %arg14[%c0_340, %c0_341, %c0_342] : memref<2x128x16xf32, #tpu.memory_space<vmem>>, vector<1x128x16xf32>
    %1551 = vector.shape_cast %1550 : vector<1x128x16xf32> to vector<128x16xf32>
    %cst_343 = arith.constant dense<0.000000e+00> : vector<8x16xf32>
    %1552 = tpu.matmul %1542, %1551, %cst_343 {dimension_numbers = #tpu.dot_dimension_numbers<[1], [0], [0], [1], [0, 0, 1, 1], [], []>} : vector<8x128xf32>, vector<128x16xf32>, vector<8x16xf32> -> vector<8x16xf32>
    %1553 = arith.addf %1535, %1552 : vector<8x16xf32>
    %c1_344 = arith.constant 1 : index
    %c0_345 = arith.constant 0 : index
    %c0_346 = arith.constant 0 : index
    %1554 = vector.load %arg14[%c1_344, %c0_345, %c0_346] : memref<2x128x16xf32, #tpu.memory_space<vmem>>, vector<1x128x16xf32>
    %1555 = vector.shape_cast %1554 : vector<1x128x16xf32> to vector<128x16xf32>
    %cst_347 = arith.constant dense<0.000000e+00> : vector<8x16xf32>
    %1556 = tpu.matmul %1549, %1555, %cst_347 {dimension_numbers = #tpu.dot_dimension_numbers<[1], [0], [0], [1], [0, 0, 1, 1], [], []>} : vector<8x128xf32>, vector<128x16xf32>, vector<8x16xf32> -> vector<8x16xf32>
    %1557 = arith.addf %1553, %1556 : vector<8x16xf32>
    %cst_348 = arith.constant 0.000000e+00 : f32
    %1558 = vector.broadcast %cst_348 : f32 to vector<8x16xf32>
    %1559 = arith.maximumf %1557, %1558 : vector<8x16xf32>
    %c0_349 = arith.constant 0 : index
    %c0_350 = arith.constant 0 : index
    %1560 = vector.load %arg18[%c0_349, %c0_350] : memref<1x16xf32, #tpu.memory_space<vmem>>, vector<1x16xf32>
    %1561 = vector.broadcast %1560 : vector<1x16xf32> to vector<8x16xf32>
    %1562 = arith.mulf %1559, %1561 : vector<8x16xf32>
    %c0_351 = arith.constant 0 : index
    %c0_352 = arith.constant 0 : index
    %1563 = vector.load %arg19[%c0_351, %c0_352] : memref<1x16xf32, #tpu.memory_space<vmem>>, vector<1x16xf32>
    %1564 = vector.broadcast %1563 : vector<1x16xf32> to vector<8x16xf32>
    %1565 = arith.addf %1562, %1564 : vector<8x16xf32>
    %c0_353 = arith.constant 0 : index
    %c0_354 = arith.constant 0 : index
    %1566 = vector.load %arg20[%c0_353, %c0_354] : memref<16x1xf32, #tpu.memory_space<vmem>>, vector<16x1xf32>
    %cst_355 = arith.constant dense<0.000000e+00> : vector<8x1xf32>
    %1567 = tpu.matmul %1565, %1566, %cst_355 {dimension_numbers = #tpu.dot_dimension_numbers<[1], [0], [0], [1], [0, 0, 1, 1], [], []>} : vector<8x16xf32>, vector<16x1xf32>, vector<8x1xf32> -> vector<8x1xf32>
    %c0_356 = arith.constant 0 : index
    %c0_357 = arith.constant 0 : index
    %1568 = vector.load %arg21[%c0_356, %c0_357] : memref<1x1xf32, #tpu.memory_space<vmem>>, vector<1x1xf32>
    %1569 = vector.broadcast %1568 : vector<1x1xf32> to vector<8x1xf32>
    %1570 = arith.addf %1567, %1569 : vector<8x1xf32>
    %c0_358 = arith.constant 0 : index
    %c0_359 = arith.constant 0 : index
    %1571 = vector.load %arg22[%c0_358, %c0_359] : memref<8x1xf32, #tpu.memory_space<vmem>>, vector<8x1xf32>
    tpu.vector_store %arg22[%c0_358, %c0_359], %1570 {strides = array<i32>} : memref<8x1xf32, #tpu.memory_space<vmem>>, vector<8x1xf32>,
    return
  }
}

</mosaic_0001>

<bundles_post_ra>
// kernel: tpu_custom_call.1
= control target key start
LH: loop header
LB: loop body
LE: loop exit
PB: predicated region body
PF: predicated region fallthrough
CT: control target
= control target key end

     0   :  { %s17022_s0 = inlined_call_operand.hbm [shape: f32[64,64], index: 0, kind: input, shape index: {}]   ;;  %s17023_s1 = inlined_call_operand.vmem [shape: s32[8,1], index: 1, kind: input, shape index: {}]   ;;  %s17024_s2 = inlined_call_operand.vmem [shape: f32[8,1], index: 2, kind: input, shape index: {}]   ;;  %s17025_s3 = inlined_call_operand.hbm [shape: f32[4,8,8], index: 3, kind: input, shape index: {}]   ;;  %s17026_s4 = inlined_call_operand.vmem [shape: f32[64,1024], index: 4, kind: input, shape index: {}]   ;;  %s17027_s5 = inlined_call_operand.hbm [shape: f32[128,512], index: 5, kind: input, shape index: {}]   ;;  %s17028_s6 = inlined_call_operand.hbm [shape: f32[128,512], index: 6, kind: input, shape index: {}]   ;;  %s17029_s7 = inlined_call_operand.hbm [shape: f32[1,1024], index: 7, kind: input, shape index: {}]   ;;  %s17030_s8 = inlined_call_operand.hbm [shape: f32[2,128,768], index: 8, kind: input, shape index: {}]   ;;  %s17031_s9 = inlined_call_operand.hbm [shape: f32[1,768], index: 9, kind: input, shape index: {}]   ;;  %s17032_s10 = inlined_call_operand.vmem [shape: f32[128,384], index: 10, kind: input, shape index: {}]   ;;  %s17033_s11 = inlined_call_operand.hbm [shape: f32[128,384], index: 11, kind: input, shape index: {}]   ;;  %s17034_s12 = inlined_call_operand.vmem [shape: f32[1,384], index: 12, kind: input, shape index: {}]   ;;  %s17035_s13 = inlined_call_operand.vmem [shape: f32[1,384], index: 13, kind: input, shape index: {}]   ;;  %s17036_s14 = inlined_call_operand.vmem [shape: f32[2,128,16], index: 14, kind: input, shape index: {}]   ;;  %s17037_s15 = inlined_call_operand.vmem [shape: f32[4,128,16], index: 15, kind: input, shape index: {}]   ;;  %s17038_s16 = inlined_call_operand.vmem [shape: f32[1,16], index: 16, kind: input, shape index: {}]   ;;  %s17039_s17 = inlined_call_operand.vmem [shape: f32[1,16], index: 17, kind: input, shape index: {}]   ;;  %s17040_s18 = inlined_call_operand.vmem [shape: f32[1,16], index: 18, kind: input, shape index: {}]   ;;  %s17041_s19 = inlined_call_operand.vmem [shape: f32[1,16], index: 19, kind: input, shape index: {}]   ;;  %s17042_s20 = inlined_call_operand.vmem [shape: f32[16,1], index: 20, kind: input, shape index: {}]   ;;  %s17043_s21 = inlined_call_operand.<no memory space> [shape: f32[1,1], index: 21, kind: input, shape index: {}]   ;;  %s17044_s22 = inlined_call_operand.vmem [shape: f32[8,1], index: 22, kind: output, shape index: {}]  }
   0x1   :  { %17246 = sst [smem:[#allocation95_spill]] %s17022_s0  ;;  %v27_v0 = vstv %s17043_s21 }
   0x2   :  { %17247 = sst [smem:[#allocation96_spill]] %s17023_s1  ;;  %28 = vst [vmem:[#allocation6] sm:$0x1] %v27_v0 }
   0x3   :  { %17248 = sst [smem:[#allocation97_spill]] %s17024_s2 }
   0x4   :  { %17249 = sst [smem:[#allocation98_spill]] %s17025_s3 }
   0x5   :  { %17250 = sst [smem:[#allocation99_spill]] %s17026_s4 }
   0x6   :  { %17251 = sst [smem:[#allocation100_spill]] %s17027_s5 }
   0x7   :  { %17252 = sst [smem:[#allocation101_spill]] %s17028_s6 }
   0x8   :  { %17253 = sst [smem:[#allocation102_spill]] %s17041_s19 }
   0x9   :  { %17254 = sst [smem:[#allocation103_spill]] %s17044_s22 }
   0xa   :  { %29 = vsyncpa [#allocation8], 0 }
   0xb   :  { %30 = vsyncpa [#allocation10], 0 }
   0xc   :  { %31 = vsyncpa [#allocation13], 0 }
   0xd   :  { %32 = vsyncpa [#allocation16], 0 }
   0xe   :  { %33 = vsyncpa [#allocation19], 0  ;;  %s13430_s29 = smov [#allocation9]   ;;  %s17255_s23 = sld [smem:[#allocation98_spill]] }
   0xf   :  { %s55_s30 = sshll.u32 %s13430_s29, 4  ;;  %s56_s30 = int_to_ptr.vmem [resolvable:$true] %s55_s30 }
  0x14   :  { %s13244_s1 = scalar_lea.hbm %s17255_s23, 512 }
  0x15   :  { %p13245_p0 = scmp.ne.s32.totalorder %s17255_s23, %s13244_s1  ;;  %p13248_p1 = scmp.lt.u32.totalorder %s13244_s1, %s17255_s23 }
  0x17   :  { %p13250_p2 = pnand %p13248_p1, %p13245_p0 }
  0x19   :  { %13253 = shalt.err (!%p13250_p2)
}
  0x1a   :  { %s13254_s21 = scalar_lea.vmem %s56_s30, 512  ;;  %p13259_p4 = scmp.lt.s32.totalorder %s56_s30, %s56_s30 }
  0x1b   :  { %p13255_p3 = scmp.ne.s32.totalorder %s56_s30, %s13254_s21  ;;  %p13260_p5 = scmp.lt.s32.totalorder %s13254_s21, %s13254_s21 }
  0x1d   :  { %p13261_p6 = por %p13260_p5, %p13259_p4 }
  0x1f   :  { %p13262_p7 = pnand %p13261_p6, %p13255_p3 }
  0x21   :  { %13265 = shalt.err (!%p13262_p7)
}
  0x22   :  { %s17052_s26 = smov 128   ;;  %s13432_s2 = smov 8  }
  0x23   :  { %61 = dma.hbm_to_vmem [thread:$0]  %s17255_s23, 512, %s56_s30, [#allocation10], %s17052_s26, %s17052_s26, %s13432_s2  }
  0x24   :  { %s13433_s28 = smov [#allocation12]   ;;  %s13434_s4 = smov [#allocation15]  }
  0x25   :  { %s81_s29 = sshll.u32 %s13433_s28, 4  ;;  %s103_s0 = sshll.u32 %s13434_s4, 4  ;;  %s82_s29 = int_to_ptr.vmem [resolvable:$true] %s81_s29  ;;  %s104_s0 = int_to_ptr.vmem [resolvable:$true] %s103_s0 }
  0x26   :  { %s17256_s24 = sld [smem:[#allocation101_spill]] }
  0x2c   :  { %s13266_s6 = scalar_lea.hbm %s17256_s24, 8192 }
  0x2d   :  { %p13267_p8 = scmp.ne.s32.totalorder %s17256_s24, %s13266_s6  ;;  %p13270_p9 = scmp.lt.u32.totalorder %s13266_s6, %s17256_s24 }
  0x2f   :  { %p13272_p10 = pnand %p13270_p9, %p13267_p8 }
  0x31   :  { %13275 = shalt.err (!%p13272_p10)
}
  0x32   :  { %s13276_s30 = scalar_lea.vmem %s82_s29, 8192  ;;  %p13281_p12 = scmp.lt.s32.totalorder %s82_s29, %s82_s29 }
  0x33   :  { %p13277_p11 = scmp.ne.s32.totalorder %s82_s29, %s13276_s30  ;;  %p13282_p13 = scmp.lt.s32.totalorder %s13276_s30, %s13276_s30 }
  0x35   :  { %p13283_p0 = por %p13282_p13, %p13281_p12 }
  0x37   :  { %p13284_p1 = pnand %p13283_p0, %p13277_p11 }
  0x39   :  { %13287 = shalt.err (!%p13284_p1)
}
  0x3a   :  { %s17050_s23 = smov 512   ;;  %s17051_s27 = smov 32  }
  0x3b   :  { %87 = dma.hbm_to_vmem [thread:$0]  %s17256_s24, 8192, %s82_s29, [#allocation13], %s17050_s23, %s17050_s23, %s17051_s27  }
  0x3c   :  { %s13288_s4 = scalar_lea.hbm %s17030_s8, 24576 }
  0x3d   :  { %p13289_p2 = scmp.ne.s32.totalorder %s17030_s8, %s13288_s4  ;;  %p13292_p3 = scmp.lt.u32.totalorder %s13288_s4, %s17030_s8 }
  0x3f   :  { %p13294_p4 = pnand %p13292_p3, %p13289_p2 }
  0x41   :  { %13297 = shalt.err (!%p13294_p4)
}
  0x42   :  { %s13298_s21 = scalar_lea.vmem %s104_s0, 24576  ;;  %p13303_p6 = scmp.lt.s32.totalorder %s104_s0, %s104_s0 }
  0x43   :  { %p13299_p5 = scmp.ne.s32.totalorder %s104_s0, %s13298_s21  ;;  %p13304_p7 = scmp.lt.s32.totalorder %s13298_s21, %s13298_s21 }
  0x45   :  { %p13305_p8 = por %p13304_p7, %p13303_p6 }
  0x47   :  { %p13306_p9 = pnand %p13305_p8, %p13299_p5 }
  0x49   :  { %13309 = shalt.err (!%p13306_p9)
}
  0x4a   :  { %s13437_s29 = smov 768   ;;  %s13438_s24 = smov 48  }
  0x4b   :  { %109 = dma.hbm_to_vmem [thread:$0]  %s17030_s8, 24576, %s104_s0, [#allocation16], %s13437_s29, %s13437_s29, %s13438_s24  }
  0x4c   :  { %s13439_s28 = smov [#allocation7]   ;;  %s13440_s22 = smov [#allocation11]  }
  0x4d   :  { %s39_s19 = sshll.u32 %s13439_s28, 4  ;;  %s69_s4 = sshll.u32 %s13440_s22, 4  ;;  %s40_s19 = int_to_ptr.vmem [resolvable:$true] %s39_s19  ;;  %s70_s4 = int_to_ptr.vmem [resolvable:$true] %s69_s4 }
  0x4e   :  { %s17257_s6 = sld [smem:[#allocation95_spill]] }
  0x54   :  { %s13310_s25 = scalar_lea.hbm %s17257_s6, 1024 }
  0x55   :  { %p13311_p10 = scmp.ne.s32.totalorder %s17257_s6, %s13310_s25  ;;  %p13314_p11 = scmp.lt.u32.totalorder %s13310_s25, %s17257_s6 }
  0x57   :  { %p13316_p12 = pnand %p13314_p11, %p13311_p10 }
  0x59   :  { %13319 = shalt.err (!%p13316_p12)
}
  0x5a   :  { %s13320_s8 = scalar_lea.vmem %s40_s19, 1024  ;;  %p13325_p0 = scmp.lt.s32.totalorder %s40_s19, %s40_s19 }
  0x5b   :  { %p13321_p13 = scmp.ne.s32.totalorder %s40_s19, %s13320_s8  ;;  %p13326_p1 = scmp.lt.s32.totalorder %s13320_s8, %s13320_s8 }
  0x5d   :  { %p13327_p2 = por %p13326_p1, %p13325_p0 }
  0x5f   :  { %p13328_p3 = pnand %p13327_p2, %p13321_p13 }
  0x61   :  { %13331 = shalt.err (!%p13328_p3)
}
  0x62   :  { %s17258_s0 = smov 128   ;;  %s17259_s27 = sld [smem:[#allocation100_spill]] }
  0x63   :  { %45 = dma.hbm_to_vmem [thread:$0]  %s17257_s6, 1024, %s40_s19, [#allocation8], %s17258_s0, %s17258_s0, %s13432_s2  }
  0x68   :  { %s13332_s30 = scalar_lea.hbm %s17259_s27, 8192 }
  0x69   :  { %p13333_p4 = scmp.ne.s32.totalorder %s17259_s27, %s13332_s30  ;;  %p13336_p5 = scmp.lt.u32.totalorder %s13332_s30, %s17259_s27 }
  0x6b   :  { %p13338_p6 = pnand %p13336_p5, %p13333_p4 }
  0x6d   :  { %13341 = shalt.err (!%p13338_p6)
}
  0x6e   :  { %s13342_s5 = scalar_lea.vmem %s70_s4, 8192  ;;  %p13347_p8 = scmp.lt.s32.totalorder %s70_s4, %s70_s4 }
  0x6f   :  { %p13343_p7 = scmp.ne.s32.totalorder %s70_s4, %s13342_s5  ;;  %p13348_p9 = scmp.lt.s32.totalorder %s13342_s5, %s13342_s5 }
  0x71   :  { %p13349_p10 = por %p13348_p9, %p13347_p8 }
  0x73   :  { %p13350_p11 = pnand %p13349_p10, %p13343_p7 }
  0x75   :  { %13353 = shalt.err (!%p13350_p11)
}
  0x76   :  { %s17260_s2 = smov 32   ;;  %s17261_s19 = smov 512  }
  0x77   :  { %75 = dma.hbm_to_vmem [thread:$0]  %s17259_s27, 8192, %s70_s4, [#allocation10], %s17261_s19, %s17261_s19, %s17260_s2  }
  0x78   :  { %s13441_s21 = smov [#allocation14]   ;;  %s13442_s0 = smov [#allocation17]  }
  0x79   :  { %s94_s8 = sshll.u32 %s13441_s21, 4  ;;  %s116_s29 = sshll.u32 %s13442_s0, 4  ;;  %s95_s8 = int_to_ptr.vmem [resolvable:$true] %s94_s8  ;;  %s117_s29 = int_to_ptr.vmem [resolvable:$true] %s116_s29 }
  0x7a   :  { %s13354_s26 = scalar_lea.hbm %s17029_s7, 128 }
  0x7b   :  { %p13355_p12 = scmp.ne.s32.totalorder %s17029_s7, %s13354_s26  ;;  %p13358_p13 = scmp.lt.u32.totalorder %s13354_s26, %s17029_s7 }
  0x7d   :  { %p13360_p0 = pnand %p13358_p13, %p13355_p12 }
  0x7f   :  { %13363 = shalt.err (!%p13360_p0)
}
  0x80   :  { %s13364_s4 = scalar_lea.vmem %s95_s8, 128  ;;  %p13369_p2 = scmp.lt.s32.totalorder %s95_s8, %s95_s8 }
  0x81   :  { %p13365_p1 = scmp.ne.s32.totalorder %s95_s8, %s13364_s4  ;;  %p13370_p3 = scmp.lt.s32.totalorder %s13364_s4, %s13364_s4 }
  0x83   :  { %p13371_p4 = por %p13370_p3, %p13369_p2 }
  0x85   :  { %p13372_p5 = pnand %p13371_p4, %p13365_p1 }
  0x87   :  { %13375 = shalt.err (!%p13372_p5)
}
  0x88   :  { %97 = dma.hbm_to_vmem [thread:$0]  %s17029_s7, 128, %s95_s8, [#allocation13]  }
  0x89   :  { %s13376_s19 = scalar_lea.hbm %s17031_s9, 96 }
  0x8a   :  { %p13377_p6 = scmp.ne.s32.totalorder %s17031_s9, %s13376_s19  ;;  %p13380_p7 = scmp.lt.u32.totalorder %s13376_s19, %s17031_s9 }
  0x8c   :  { %p13382_p8 = pnand %p13380_p7, %p13377_p6 }
  0x8e   :  { %13385 = shalt.err (!%p13382_p8)
}
  0x8f   :  { %s13386_s24 = scalar_lea.vmem %s117_s29, 96  ;;  %p13391_p10 = scmp.lt.s32.totalorder %s117_s29, %s117_s29 }
  0x90   :  { %p13387_p9 = scmp.ne.s32.totalorder %s117_s29, %s13386_s24  ;;  %p13392_p11 = scmp.lt.s32.totalorder %s13386_s24, %s13386_s24 }
  0x92   :  { %p13393_p12 = por %p13392_p11, %p13391_p10 }
  0x94   :  { %p13394_p13 = pnand %p13393_p12, %p13387_p9 }
  0x96   :  { %13397 = shalt.err (!%p13394_p13)
}
  0x97   :  { %119 = dma.hbm_to_vmem [thread:$0]  %s17031_s9, 96, %s117_s29, [#allocation16]  }
  0x98   :  { %s13443_s23 = smov [#allocation18]   ;;  %s13398_s28 = scalar_lea.hbm %s17033_s11, 6144 }
  0x99   :  { %s127_s26 = sshll.u32 %s13443_s23, 4  ;;  %p13399_p0 = scmp.ne.s32.totalorder %s17033_s11, %s13398_s28  ;;  %s128_s26 = int_to_ptr.vmem [resolvable:$true] %s127_s26 }
  0x9a   :  { %p13402_p1 = scmp.lt.u32.totalorder %s13398_s28, %s17033_s11 }
  0x9c   :  { %p13404_p2 = pnand %p13402_p1, %p13399_p0 }
  0x9e   :  { %13407 = shalt.err (!%p13404_p2)
}
  0x9f   :  { %s13408_s5 = scalar_lea.vmem %s128_s26, 6144  ;;  %p13413_p4 = scmp.lt.s32.totalorder %s128_s26, %s128_s26 }
  0xa0   :  { %p13409_p3 = scmp.ne.s32.totalorder %s128_s26, %s13408_s5  ;;  %p13414_p5 = scmp.lt.s32.totalorder %s13408_s5, %s13408_s5 }
  0xa2   :  { %p13415_p6 = por %p13414_p5, %p13413_p4 }
  0xa4   :  { %p13416_p7 = pnand %p13415_p6, %p13409_p3 }
  0xa6   :  { %13419 = shalt.err (!%p13416_p7)
}
  0xa7   :  { %s13444_s9 = smov 384   ;;  %s13445_s29 = smov 24  }
  0xa8   :  { %133 = dma.hbm_to_vmem [thread:$0]  %s17033_s11, 6144, %s128_s26, [#allocation19], %s13444_s9, %s13444_s9, %s13445_s29  }
  0xa9   :  { %13420 = dma.done.wait [#allocation8], 1024  }
  0xaa   :  { %13421 = vsyncadd [#allocation8], 4294966272 }
  0xab   :  { %13422 = dma.done.wait [#allocation10], 8704  }
  0xac   :  { %13423 = vsyncadd [#allocation10], 4294958592 }
  0xad   :  { %13424 = dma.done.wait [#allocation13], 8320  }
  0xae   :  { %13425 = vsyncadd [#allocation13], 4294958976 }
  0xaf   :  { %13426 = dma.done.wait [#allocation16], 24672  }
  0xb0   :  { %13427 = vsyncadd [#allocation16], 4294942624 }
  0xb1   :  { %13428 = dma.done.wait [#allocation19], 6144  }
  0xb2   :  { %13429 = vsyncadd [#allocation19], 4294961152  ;;  %v17055_v1 = vmov 0.0   ;;  %s17262_s21 = sld [smem:[#allocation99_spill]]  ;;  %v13744_v33 = vld [vmem:[#allocation7] sm:$0xff]  ;;  %vm323_vm0 = vcmask 523264  }
  0xb3   :  { %412 = vmatprep.mubr.f32.mxu1 %v17055_v1  ;;  %1216 = vmatprep.mubr.f32.mxu0 %v17055_v1  ;;  %v13752_v38 = vld [vmem:[#allocation7 + $0x8] sm:$0xff]  ;;  %v928_v43 = vld [vmem:[#allocation12] sm:$0xff]  ;;  %v13788_v61 = vld [vmem:[#allocation7 + $0x10] sm:$0xff]  ;;  %s17277_s4 = sld [smem:[#allocation96_spill]]  ;;  %vm17236_vm5 = vcmask 7168   ;;  %s17290_s8 = sld [smem:[#allocation97_spill]] }
  0xb4   :  { %v929_v41 = vld [vmem:[#allocation12 + $0x8] sm:$0xff]  ;;  %v932_v44 = vld [vmem:[#allocation12 + $0x20] sm:$0xff]  ;;  %s17807_s7 = sld [smem:[#allocation103_spill]] }
  0xb5   :  { %v933_v42 = vld [vmem:[#allocation12 + $0x28] sm:$0xff]  ;;  %v13771_v49 = vpack.c.bf16 %v932_v44, %v928_v43  ;;  %v936_v56 = vld [vmem:[#allocation12 + $0x40] sm:$0xff]  ;;  %v13855_v43 = vld [vmem:[#allocation7 + $0x38] sm:$0xff] }
  0xb6   :  { %v13769_v48 = vpack.c.bf16 %v933_v42, %v929_v41  ;;  %v937_v50 = vld [vmem:[#allocation12 + $0x48] sm:$0xff]  ;;  %v940_v57 = vld [vmem:[#allocation12 + $0x60] sm:$0xff] }
  0xb7   :  { %v941_v54 = vld [vmem:[#allocation12 + $0x68] sm:$0xff]  ;;  %v13785_v59 = vpack.c.bf16 %v940_v57, %v936_v56  ;;  %v944_v63 = vld [vmem:[#allocation12 + $0x80] sm:$0xff] }
  0xb8   :  { %v218_v2 = vld [vmem:[%s17262_s21 + $0x8] sm:$0xff]  ;;  %v217_v4 = vld [vmem:[%s17262_s21] sm:$0xff]  ;;  %v220_v25 = vld [vmem:[%s17262_s21 + $0x18] sm:$0xff]  ;;  %17263 = vst [vmem:[#allocation25_spill] sm:$0xff] %v13769_v48  ;;  %10366 = vmatprep.subr.bf16.mxu0 %v13769_v48  ;;  %v13780_v55 = vpack.c.bf16 %v941_v54, %v937_v50 }
  0xb9   :  { %v226_v3 = vld [vmem:[%s17262_s21 + $0x48] sm:$0xff]  ;;  %v225_v6 = vld [vmem:[%s17262_s21 + $0x40] sm:$0xff]  ;;  %v228_v26 = vld [vmem:[%s17262_s21 + $0x58] sm:$0xff]  ;;  %10368 = vmatpush1.bf16.msra.mxu0 %v13771_v49 }
  0xba   :  { %v10237_v5 = vpack.c.bf16 %v226_v3, %v218_v2  ;;  %v234_v7 = vld [vmem:[%s17262_s21 + $0x88] sm:$0xff]  ;;  %v10239_v9 = vpack.c.bf16 %v225_v6, %v217_v4  ;;  %v233_v11 = vld [vmem:[%s17262_s21 + $0x80] sm:$0xff]  ;;  %v10253_v28 = vpack.c.bf16 %v228_v26, %v220_v25  ;;  %v219_v29 = vld [vmem:[%s17262_s21 + $0x10] sm:$0xff]  ;;  %10370 = vmatprep.subr.bf16.mxu0 %v13780_v55 }
  0xbb   :  { %v242_v8 = vld [vmem:[%s17262_s21 + $0xc8] sm:$0xff]  ;;  %v241_v12 = vld [vmem:[%s17262_s21 + $0xc0] sm:$0xff]  ;;  %v227_v30 = vld [vmem:[%s17262_s21 + $0x50] sm:$0xff] }
  0xbc   :  { %v10241_v10 = vpack.c.bf16 %v242_v8, %v234_v7  ;;  %v250_v13 = vld [vmem:[%s17262_s21 + $0x108] sm:$0xff]  ;;  %10238 = vmatprep.subr.bf16.mxu1 %v10237_v5  ;;  %v10243_v15 = vpack.c.bf16 %v241_v12, %v233_v11  ;;  %v249_v17 = vld [vmem:[%s17262_s21 + $0x100] sm:$0xff]  ;;  %v236_v31 = vld [vmem:[%s17262_s21 + $0x98] sm:$0xff]  ;;  %v10255_v34 = vpack.c.bf16 %v227_v30, %v219_v29 }
  0xbd   :  { %v258_v14 = vld [vmem:[%s17262_s21 + $0x148] sm:$0xff]  ;;  %10240 = vmatpush1.bf16.msra.mxu1 %v10239_v9  ;;  %v257_v18 = vld [vmem:[%s17262_s21 + $0x140] sm:$0xff]  ;;  %v244_v32 = vld [vmem:[%s17262_s21 + $0xd8] sm:$0xff]  ;;  %10372 = vmatpush1.bf16.msra.mxu0 %v13785_v59 }
  0xbe   :  { %10242 = vmatprep.subr.bf16.mxu1 %v10241_v10  ;;  %v10245_v16 = vpack.c.bf16 %v258_v14, %v250_v13  ;;  %v266_v19 = vld [vmem:[%s17262_s21 + $0x188] sm:$0xff]  ;;  %v10247_v21 = vpack.c.bf16 %v257_v18, %v249_v17  ;;  %v265_v23 = vld [vmem:[%s17262_s21 + $0x180] sm:$0xff]  ;;  %v10257_v35 = vpack.c.bf16 %v244_v32, %v236_v31  ;;  %v235_v36 = vld [vmem:[%s17262_s21 + $0x90] sm:$0xff] }
  0xbf   :  { %v274_v20 = vld [vmem:[%s17262_s21 + $0x1c8] sm:$0xff]  ;;  %v273_v24 = vld [vmem:[%s17262_s21 + $0x1c0] sm:$0xff]  ;;  %v243_v37 = vld [vmem:[%s17262_s21 + $0xd0] sm:$0xff] }
  0xc0   :  { %v10249_v22 = vpack.c.bf16 %v274_v20, %v266_v19  ;;  %v10251_v27 = vpack.c.bf16 %v273_v24, %v265_v23  ;;  %v252_v39 = vld [vmem:[%s17262_s21 + $0x118] sm:$0xff]  ;;  %v10259_v45 = vpack.c.bf16 %v243_v37, %v235_v36  ;;  %v251_v46 = vld [vmem:[%s17262_s21 + $0x110] sm:$0xff]  ;;  %v948_v0 = vld [vmem:[#allocation12 + $0xa0] sm:$0xff] }
  0xc1   :  { %10244 = vmatpush1.bf16.msra.mxu1 %v10243_v15  ;;  %v260_v40 = vld [vmem:[%s17262_s21 + $0x158] sm:$0xff]  ;;  %v259_v47 = vld [vmem:[%s17262_s21 + $0x150] sm:$0xff]  ;;  %v222_v5 = vld [vmem:[%s17262_s21 + $0x28] sm:$0xff]  ;;  %v13808_v10 = vpack.c.bf16 %v948_v0, %v944_v63 }
  0xc2   :  { %10246 = vmatprep.subr.bf16.mxu1 %v10245_v16  ;;  %v10261_v51 = vpack.c.bf16 %v260_v40, %v252_v39  ;;  %v268_v52 = vld [vmem:[%s17262_s21 + $0x198] sm:$0xff]  ;;  %v945_v58 = vld [vmem:[#allocation12 + $0x88] sm:$0xff]  ;;  %v10263_v62 = vpack.c.bf16 %v259_v47, %v251_v46  ;;  %v952_v13 = vld [vmem:[#allocation12 + $0xc0] sm:$0xff] }
  0xc3   :  { %v276_v53 = vld [vmem:[%s17262_s21 + $0x1d8] sm:$0xff]  ;;  %v949_v60 = vld [vmem:[#allocation12 + $0xa8] sm:$0xff]  ;;  %v956_v14 = vld [vmem:[#allocation12 + $0xe0] sm:$0xff] }
  0xc4   :  { %v10265_v2 = vpack.c.bf16 %v276_v53, %v268_v52  ;;  %v267_v3 = vld [vmem:[%s17262_s21 + $0x190] sm:$0xff]  ;;  %v13800_v6 = vpack.c.bf16 %v949_v60, %v945_v58  ;;  %v230_v7 = vld [vmem:[%s17262_s21 + $0x68] sm:$0xff]  ;;  %v13811_v11 = vld [vmem:[#allocation7 + $0x18] sm:$0xff]  ;;  %v13819_v19 = vpack.c.bf16 %v956_v14, %v952_v13 }
  0xc5   :  { %10248 = vmatpush1.bf16.msra.mxu1 %v10247_v21  ;;  %v275_v4 = vld [vmem:[%s17262_s21 + $0x1d0] sm:$0xff]  ;;  %v10269_v15 = vpack.c.bf16 %v230_v7, %v222_v5  ;;  %v13822_v20 = vld [vmem:[#allocation7 + $0x20] sm:$0xff] }
  0xc6   :  { %10250 = vmatprep.subr.bf16.mxu1 %v10249_v22  ;;  %v953_v8 = vld [vmem:[#allocation12 + $0xc8] sm:$0xff]  ;;  %v10267_v12 = vpack.c.bf16 %v275_v4, %v267_v3  ;;  %10374 = vmatprep.subr.bf16.mxu0 %v13800_v6  ;;  %v960_v22 = vld [vmem:[#allocation12 + $0x100] sm:$0xff] }
  0xc7   :  { %v957_v9 = vld [vmem:[#allocation12 + $0xe8] sm:$0xff]  ;;  %10376 = vmatpush1.bf16.msra.mxu0 %v13808_v10  ;;  %v964_v23 = vld [vmem:[#allocation12 + $0x120] sm:$0xff] }
  0xc8   :  { %v13814_v16 = vpack.c.bf16 %v957_v9, %v953_v8  ;;  %v961_v17 = vld [vmem:[#allocation12 + $0x108] sm:$0xff]  ;;  %v13830_v26 = vpack.c.bf16 %v964_v23, %v960_v22  ;;  %v968_v29 = vld [vmem:[#allocation12 + $0x140] sm:$0xff] }
  0xc9   :  { %10252 = vmatpush1.bf16.msra.mxu1 %v10251_v27  ;;  %v965_v18 = vld [vmem:[#allocation12 + $0x128] sm:$0xff]  ;;  %v972_v30 = vld [vmem:[#allocation12 + $0x160] sm:$0xff] }
  0xca   :  { %10254 = vmatprep.subr.bf16.mxu1 %v10253_v28  ;;  %v13824_v21 = vpack.c.bf16 %v965_v18, %v961_v17  ;;  %10378 = vmatprep.subr.bf16.mxu0 %v13814_v16  ;;  %v969_v24 = vld [vmem:[#allocation12 + $0x148] sm:$0xff]  ;;  %v976_v37 = vld [vmem:[#allocation12 + $0x180] sm:$0xff] }
  0xcb   :  { %v973_v25 = vld [vmem:[#allocation12 + $0x168] sm:$0xff]  ;;  %10380 = vmatpush1.bf16.msra.mxu0 %v13819_v19  ;;  %v980_v39 = vld [vmem:[#allocation12 + $0x1a0] sm:$0xff] }
  0xcc   :  { %8813 = vmatmul.mubr.msk.f32.vlgmr.msra.gmra.mrb[0].mxu1 %vm323_vm0, %v13744_v33  ;;  %v13833_v27 = vld [vmem:[#allocation7 + $0x28] sm:$0xff]  ;;  %10382 = vmatprep.subr.bf16.mxu0 %v13824_v21  ;;  %v13836_v28 = vpack.c.bf16 %v973_v25, %v969_v24  ;;  %v13852_v42 = vpack.c.bf16 %v980_v39, %v976_v37  ;;  %v988_v46 = vld [vmem:[#allocation12 + $0x1e0] sm:$0xff]  ;;  %v224_v37 = vld [vmem:[%s17262_s21 + $0x38] sm:$0xff] }
  0xcd   :  { %418 = vmatprep.mubr.f32.mxu1 %v17055_v1  ;;  %10256 = vmatpush1.bf16.msra.mxu1 %v10255_v34  ;;  %v977_v31 = vld [vmem:[#allocation12 + $0x188] sm:$0xff]  ;;  %v13841_v34 = vpack.c.bf16 %v972_v30, %v968_v29  ;;  %v221_v47 = vld [vmem:[%s17262_s21 + $0x20] sm:$0xff] }
  0xce   :  { %10258 = vmatprep.subr.bf16.mxu1 %v10257_v35  ;;  %v981_v32 = vld [vmem:[#allocation12 + $0x1a8] sm:$0xff]  ;;  %v13844_v35 = vld [vmem:[#allocation7 + $0x30] sm:$0xff]  ;;  %v229_v50 = vld [vmem:[%s17262_s21 + $0x60] sm:$0xff] }
  0xcf   :  { %10384 = vmatpush1.bf16.msra.mxu0 %v13830_v26  ;;  %v13847_v36 = vpack.c.bf16 %v981_v32, %v977_v31  ;;  %v985_v40 = vld [vmem:[#allocation12 + $0x1c8] sm:$0xff]  ;;  %v10271_v54 = vpack.c.bf16 %v229_v50, %v221_v47  ;;  %v237_v60 = vld [vmem:[%s17262_s21 + $0xa0] sm:$0xff] }
  0xd0   :  { %8814 = vmatmul.mubr.msk.f32.gmra.mrb[2].mxu1 %vm323_vm0, %v13752_v38  ;;  %10386 = vmatprep.subr.bf16.mxu0 %v13836_v28  ;;  %v989_v41 = vld [vmem:[#allocation12 + $0x1e8] sm:$0xff]  ;;  %v868_v3 = vld [vmem:[#allocation11 + $0x20] sm:$0xff] }
  0xd1   :  { %424 = vmatprep.mubr.f32.mxu1 %v17055_v1  ;;  %10260 = vmatpush1.bf16.msra.mxu1 %v10259_v45  ;;  %v13858_v44 = vpack.c.bf16 %v989_v41, %v985_v40  ;;  %v984_v45 = vld [vmem:[#allocation12 + $0x1c0] sm:$0xff]  ;;  %v865_v56 = vld [vmem:[#allocation11 + $0x8] sm:$0xff]  ;;  %v232_v40 = vld [vmem:[%s17262_s21 + $0x78] sm:$0xff] }
  0xd2   :  { %10262 = vmatprep.subr.bf16.mxu1 %v10261_v51  ;;  %v238_v51 = vld [vmem:[%s17262_s21 + $0xa8] sm:$0xff]  ;;  %v13875_v53 = vpack.c.bf16 %v988_v46, %v984_v45  ;;  %v261_v13 = vld [vmem:[%s17262_s21 + $0x160] sm:$0xff] }
  0xd3   :  { %10388 = vmatpush1.bf16.msra.mxu0 %v13841_v34  ;;  %v246_v52 = vld [vmem:[%s17262_s21 + $0xe8] sm:$0xff]  ;;  %v269_v31 = vld [vmem:[%s17262_s21 + $0x1a0] sm:$0xff] }
  0xd4   :  { %8815 = vmatmul.mubr.msk.f32.gmra.mrb[4].mxu1 %vm323_vm0, %v13788_v61  ;;  %10390 = vmatprep.subr.bf16.mxu0 %v13847_v36  ;;  %v869_v57 = vld [vmem:[#allocation11 + $0x28] sm:$0xff]  ;;  %v10273_v58 = vpack.c.bf16 %v246_v52, %v238_v51  ;;  %v872_v18 = vld [vmem:[#allocation11 + $0x40] sm:$0xff]  ;;  %v10285_v52 = vpack.c.bf16 %v232_v40, %v224_v37  ;;  %v240_v37 = vld [vmem:[%s17262_s21 + $0xb8] sm:$0xff] }
  0xd5   :  { %430 = vmatprep.mubr.f32.mxu1 %v17055_v1  ;;  %10264 = vmatpush1.bf16.msra.mxu1 %v10263_v62  ;;  %v245_v62 = vld [vmem:[%s17262_s21 + $0xe0] sm:$0xff]  ;;  %v254_v63 = vld [vmem:[%s17262_s21 + $0x128] sm:$0xff]  ;;  %v13894_v4 = vpack.c.bf16 %v869_v57, %v865_v56 }
  0xd6   :  { %10266 = vmatprep.subr.bf16.mxu1 %v10265_v2  ;;  %v262_v0 = vld [vmem:[%s17262_s21 + $0x168] sm:$0xff]  ;;  %v10275_v5 = vpack.c.bf16 %v245_v62, %v237_v60  ;;  %v277_v32 = vld [vmem:[%s17262_s21 + $0x1e0] sm:$0xff] }
  0xd7   :  { %10392 = vmatpush1.bf16.msra.mxu0 %v13852_v42  ;;  %v864_v2 = vld [vmem:[#allocation11] sm:$0xff]  ;;  %v873_v7 = vld [vmem:[#allocation11 + $0x48] sm:$0xff]  ;;  %v10277_v9 = vpack.c.bf16 %v262_v0, %v254_v63  ;;  %v10283_v47 = vpack.c.bf16 %v277_v32, %v269_v31 }
  0xd8   :  { %8816 = vmatmul.mubr.msk.f32.gmra.mrb[6].mxu1 %vm323_vm0, %v13811_v11  ;;  %10394 = vmatprep.subr.bf16.mxu0 %v13858_v44  ;;  %v877_v8 = vld [vmem:[#allocation11 + $0x68] sm:$0xff]  ;;  %v876_v22 = vld [vmem:[#allocation11 + $0x60] sm:$0xff] }
  0xd9   :  { %436 = vmatprep.mubr.f32.mxu1 %v17055_v1  ;;  %10268 = vmatpush1.bf16.msra.mxu1 %v10267_v12  ;;  %v253_v12 = vld [vmem:[%s17262_s21 + $0x120] sm:$0xff]  ;;  %v270_v14 = vld [vmem:[%s17262_s21 + $0x1a8] sm:$0xff]  ;;  %v13915_v23 = vpack.c.bf16 %v877_v8, %v873_v7  ;;  %v13928_v39 = vpack.c.bf16 %v876_v22, %v872_v18  ;;  %v223_v31 = vld [vmem:[%s17262_s21 + $0x30] sm:$0xff] }
  0xda   :  { %10270 = vmatprep.subr.bf16.mxu1 %v10269_v15  ;;  %v13906_v15 = vpack.c.bf16 %v868_v3, %v864_v2  ;;  %v278_v17 = vld [vmem:[%s17262_s21 + $0x1e8] sm:$0xff]  ;;  %v10279_v24 = vpack.c.bf16 %v261_v13, %v253_v12  ;;  %v231_v32 = vld [vmem:[%s17262_s21 + $0x70] sm:$0xff] }
  0xdb   :  { %10396 = vmatpush1.bf16.msra.mxu0 %v13875_v53  ;;  %v881_v25 = vld [vmem:[#allocation11 + $0x88] sm:$0xff]  ;;  %v10281_v30 = vpack.c.bf16 %v278_v17, %v270_v14  ;;  %17264 = vst [vmem:[#allocation26_spill] sm:$0xff] %v13928_v39  ;;  %v880_v41 = vld [vmem:[#allocation11 + $0x80] sm:$0xff] }
  0xdc   :  { %8817 = vmatmul.mubr.msk.f32.gmra.mrb[8].mxu1 %vm323_vm0, %v13822_v20  ;;  %10430 = vmatprep.subr.bf16.mxu0 %v13894_v4  ;;  %v885_v29 = vld [vmem:[#allocation11 + $0xa8] sm:$0xff]  ;;  %v884_v45 = vld [vmem:[#allocation11 + $0xa0] sm:$0xff] }
  0xdd   :  { %442 = vmatprep.mubr.f32.mxu1 %v17055_v1  ;;  %v13937_v46 = vpack.c.bf16 %v885_v29, %v881_v25  ;;  %v889_v50 = vld [vmem:[#allocation11 + $0xc8] sm:$0xff]  ;;  %v888_v56 = vld [vmem:[#allocation11 + $0xc0] sm:$0xff] }
  0xde   :  { %1217 = vmatmul.mubr.f32.vlgmr.msra.gmra.mrb[0].mxu0 %v17055_v1  ;;  %v893_v51 = vld [vmem:[#allocation11 + $0xe8] sm:$0xff]  ;;  %v892_v57 = vld [vmem:[#allocation11 + $0xe0] sm:$0xff] }
  0xdf   :  { %10432 = vmatpush1.bf16.msra.mxu0 %v13906_v15  ;;  %1436 = vmatprep.mubr.f32.mxu0 %v17055_v1  ;;  %17265 = vst [vmem:[#allocation27_spill] sm:$0xff] %v13937_v46  ;;  %v897_v60 = vld [vmem:[#allocation11 + $0x108] sm:$0xff]  ;;  %v13950_v63 = vpack.c.bf16 %v892_v57, %v888_v56  ;;  %v896_v2 = vld [vmem:[#allocation11 + $0x100] sm:$0xff] }
  0xe0   :  { %8818 = vmatmul.mubr.msk.f32.gmra.mrb[10].mxu1 %vm323_vm0, %v13833_v27  ;;  %10434 = vmatprep.subr.bf16.mxu0 %v13915_v23  ;;  %v901_v62 = vld [vmem:[#allocation11 + $0x128] sm:$0xff]  ;;  %v900_v3 = vld [vmem:[#allocation11 + $0x120] sm:$0xff] }
  0xe1   :  { %448 = vmatprep.mubr.f32.mxu1 %v17055_v1  ;;  %17268 = vst [vmem:[#allocation30_spill] sm:$0xff] %v13950_v63  ;;  %v13953_v0 = vpack.c.bf16 %v901_v62, %v897_v60  ;;  %v909_v7 = vld [vmem:[#allocation11 + $0x168] sm:$0xff]  ;;  %v13960_v8 = vpack.c.bf16 %v900_v3, %v896_v2  ;;  %v904_v12 = vld [vmem:[#allocation11 + $0x140] sm:$0xff]  ;;  %v256_v62 = vld [vmem:[%s17262_s21 + $0x138] sm:$0xff] }
  0xe2   :  { %v908_v13 = vld [vmem:[#allocation11 + $0x160] sm:$0xff]  ;;  %v913_v14 = vld [vmem:[#allocation11 + $0x188] sm:$0xff]  ;;  %v264_v2 = vld [vmem:[%s17262_s21 + $0x178] sm:$0xff] }
  0xe3   :  { %10436 = vmatpush1.bf16.msra.mxu0 %v13928_v39  ;;  %17269 = vst [vmem:[#allocation31_spill] sm:$0xff] %v13953_v0  ;;  %17270 = vst [vmem:[#allocation32_spill] sm:$0xff] %v13960_v8  ;;  %v917_v17 = vld [vmem:[#allocation11 + $0x1a8] sm:$0xff]  ;;  %v13969_v18 = vpack.c.bf16 %v908_v13, %v904_v12  ;;  %v916_v25 = vld [vmem:[#allocation11 + $0x1a0] sm:$0xff] }
  0xe4   :  { %8819 = vmatmul.mubr.msk.f32.gmra.mrb[12].mxu1 %vm323_vm0, %v13844_v35  ;;  %10438 = vmatprep.subr.bf16.mxu0 %v13937_v46  ;;  %v13971_v22 = vpack.c.bf16 %v917_v17, %v913_v14  ;;  %v921_v29 = vld [vmem:[#allocation11 + $0x1c8] sm:$0xff]  ;;  %v14018_v3 = vld [vmem:[%s17277_s4] sm:$0xff]  ;;  %v17053_v14 = vmov 0  }
  0xe5   :  { %454 = vmatprep.mubr.f32.mxu1 %v17055_v1  ;;  %17272 = vst [vmem:[#allocation34_spill] sm:$0xff] %v13969_v18  ;;  %v239_v56 = vld [vmem:[%s17262_s21 + $0xb0] sm:$0xff]  ;;  %vm1346_vm1 = vcmp.gt.s32.totalorder %v14018_v3, 0  ;;  %vm1347_vm2 = vcmp.gt.s32.totalorder %v14018_v3, 7  ;;  %12824 = vset.pattern.permute.xlu0 %v17053_v14  ;;  %vm2095_vm3 = vcmp.gt.s32.totalorder %v14018_v3, 2  ;;  %vm2471_vm4 = vcmp.gt.s32.totalorder %v14018_v3, 3 }
  0xe6   :  { %17273 = vst [vmem:[#allocation35_spill] sm:$0xff] %v13971_v22  ;;  %v247_v57 = vld [vmem:[%s17262_s21 + $0xf0] sm:$0xff]  ;;  %v1348_v17 = vsel %vm1346_vm1, 1, %v17053_v14  ;;  %12825 = vset.pattern.permute.xlu1 %v17053_v14  ;;  %vm1719_vm6 = vcmp.gt.s32.totalorder %v14018_v3, 1  ;;  %vm1720_vm7 = vcmp.gt.s32.totalorder %v14018_v3, 6  ;;  %vm2096_vm8 = vcmp.gt.s32.totalorder %v14018_v3, 5 }
  0xe7   :  { %v255_v12 = vld [vmem:[%s17262_s21 + $0x130] sm:$0xff]  ;;  %1350 = vperm.xlu0 %12824, %v1348_v17   ;;  %vm2472_vm9 = vcmp.gt.s32.totalorder %v14018_v3, 4 }
  0xe8   :  { %8820 = vmatmul.mubr.msk.f32.gmra.mrb[14].mxu1 %vm323_vm0, %v13855_v43  ;;  %v263_v13 = vld [vmem:[%s17262_s21 + $0x170] sm:$0xff] }
  0xe9   :  { %525 = vmatprep.mubr.f32.mxu1 %v17055_v1  ;;  %v882_v17 = vld [vmem:[#allocation11 + $0x90] sm:$0xff] }
  0xec   :  { %8821 = vmatmul.mubr.msk.f32.vlgmr.msra.gmra.mrb[16].mxu1 %vm323_vm0, %v13744_v33 }
  0xed   :  { %531 = vmatprep.mubr.f32.mxu1 %v17055_v1  ;;  %10272 = vmatpush1.bf16.msra.mxu1 %v10271_v54  ;;  %v13941_v54 = vpack.c.bf16 %v884_v45, %v880_v41  ;;  %v248_v41 = vld [vmem:[%s17262_s21 + $0xf8] sm:$0xff] }
  0xee   :  { %10274 = vmatprep.subr.bf16.mxu1 %v10273_v58  ;;  %v13946_v58 = vpack.c.bf16 %v893_v51, %v889_v50  ;;  %v924_v50 = vld [vmem:[#allocation11 + $0x1e0] sm:$0xff]  ;;  %v10287_v51 = vpack.c.bf16 %v231_v32, %v223_v31  ;;  %v271_v32 = vld [vmem:[%s17262_s21 + $0x1b0] sm:$0xff] }
  0xef   :  { %17266 = vst [vmem:[#allocation28_spill] sm:$0xff] %v13941_v54  ;;  %10440 = vmatpush1.bf16.msra.mxu0 %v13941_v54 }
  0xf0   :  { %8822 = vmatmul.mubr.msk.f32.gmra.mrb[18].mxu1 %vm323_vm0, %v13752_v38  ;;  %17267 = vst [vmem:[#allocation29_spill] sm:$0xff] %v13946_v58  ;;  %10442 = vmatprep.subr.bf16.mxu0 %v13946_v58 }
  0xf1   :  { %537 = vmatprep.mubr.f32.mxu1 %v17055_v1  ;;  %10276 = vmatpush1.bf16.msra.mxu1 %v10275_v5  ;;  %v905_v5 = vld [vmem:[#allocation11 + $0x148] sm:$0xff] }
  0xf2   :  { %10278 = vmatprep.subr.bf16.mxu1 %v10277_v9  ;;  %v13962_v9 = vpack.c.bf16 %v909_v7, %v905_v5  ;;  %v10291_v5 = vpack.c.bf16 %v247_v57, %v239_v56  ;;  %v10293_v7 = vpack.c.bf16 %v264_v2, %v256_v62  ;;  %v875_v56 = vld [vmem:[#allocation11 + $0x58] sm:$0xff]  ;;  %v874_v2 = vld [vmem:[#allocation11 + $0x50] sm:$0xff] }
  0xf3   :  { %10444 = vmatpush1.bf16.msra.mxu0 %v13950_v63  ;;  %v879_v57 = vld [vmem:[#allocation11 + $0x78] sm:$0xff] }
  0xf4   :  { %8823 = vmatmul.mubr.msk.f32.gmra.mrb[20].mxu1 %vm323_vm0, %v13788_v61  ;;  %10446 = vmatprep.subr.bf16.mxu0 %v13953_v0  ;;  %17271 = vst [vmem:[#allocation33_spill] sm:$0xff] %v13962_v9  ;;  %v14124_v62 = vpack.c.bf16 %v879_v57, %v875_v56 }
  0xf5   :  { %543 = vmatprep.mubr.f32.mxu1 %v17055_v1  ;;  %10280 = vmatpush1.bf16.msra.mxu1 %v10279_v24  ;;  %v912_v24 = vld [vmem:[#allocation11 + $0x180] sm:$0xff] }
  0xf6   :  { %10282 = vmatprep.subr.bf16.mxu1 %v10281_v30  ;;  %v925_v30 = vld [vmem:[#allocation11 + $0x1e8] sm:$0xff]  ;;  %v13987_v40 = vpack.c.bf16 %v916_v25, %v912_v24  ;;  %v272_v24 = vld [vmem:[%s17262_s21 + $0x1b8] sm:$0xff]  ;;  %17280 = vst [vmem:[#allocation41_spill] sm:$0xff] %v14124_v62 }
  0xf7   :  { %10448 = vmatpush1.bf16.msra.mxu0 %v13960_v8  ;;  %v13992_v45 = vpack.c.bf16 %v925_v30, %v921_v29  ;;  %v280_v25 = vld [vmem:[%s17262_s21 + $0x1f8] sm:$0xff]  ;;  %v1355_v29 = vsel %vm1347_vm2, 1, %v17053_v14  ;;  %v10295_v30 = vpack.c.bf16 %v263_v13, %v255_v12  ;;  %vm13449_vm2 = vmmov 0  }
  0xf8   :  { %8824 = vmatmul.mubr.msk.f32.gmra.mrb[22].mxu1 %vm323_vm0, %v13811_v11  ;;  %10450 = vmatprep.subr.bf16.mxu0 %v13962_v9  ;;  %17274 = vst [vmem:[#allocation36_spill] sm:$0xff] %v13987_v40  ;;  %v10297_v31 = vpack.c.bf16 %v280_v25, %v272_v24  ;;  %v887_v12 = vld [vmem:[#allocation11 + $0xb8] sm:$0xff]  ;;  %v886_v24 = vld [vmem:[#allocation11 + $0xb0] sm:$0xff] }
  0xf9   :  { %549 = vmatprep.mubr.f32.mxu1 %v17055_v1  ;;  %10284 = vmatpush1.bf16.msra.mxu1 %v10283_v47  ;;  %17275 = vst [vmem:[#allocation37_spill] sm:$0xff] %v13992_v45  ;;  %v920_v47 = vld [vmem:[#allocation11 + $0x1c0] sm:$0xff]  ;;  %v891_v25 = vld [vmem:[#allocation11 + $0xd8] sm:$0xff] }
  0xfa   :  { %10286 = vmatprep.subr.bf16.mxu1 %v10285_v52  ;;  %v10289_v52 = vpack.c.bf16 %v248_v41, %v240_v37  ;;  %v14005_v60 = vpack.c.bf16 %v924_v50, %v920_v47  ;;  %v279_v37 = vld [vmem:[%s17262_s21 + $0x1f0] sm:$0xff]  ;;  %1357 = vperm.xlu0 %12824, %v1355_v29   ;;  %v2097_v47 = vsel %vm2095_vm3, 1, %v17053_v14  ;;  %v2473_v50 = vsel %vm2471_vm4, 1, %v17053_v14  ;;  %v895_v29 = vld [vmem:[#allocation11 + $0xf8] sm:$0xff]  ;;  %s17805_s21 = sld [smem:[#allocation102_spill]] }
  0xfb   :  { %10452 = vmatpush1.bf16.msra.mxu0 %v13969_v18  ;;  %v10299_v41 = vpack.c.bf16 %v279_v37, %v271_v32  ;;  %v890_v32 = vld [vmem:[#allocation11 + $0xd0] sm:$0xff] }
  0xfc   :  { %8825 = vmatmul.mubr.msk.f32.gmra.mrb[24].mxu1 %vm323_vm0, %v13822_v20  ;;  %10454 = vmatprep.subr.bf16.mxu0 %v13971_v22  ;;  %17276 = vst [vmem:[#allocation38_spill] sm:$0xff] %v14005_v60  ;;  %v894_v37 = vld [vmem:[#allocation11 + $0xf0] sm:$0xff] }
  0xfd   :  { %555 = vmatprep.mubr.f32.mxu1 %v17055_v1  ;;  %v938_v14 = vld [vmem:[#allocation12 + $0x50] sm:$0xff] }
  0xfe   :  { %2099 = vperm.xlu0 %12824, %v2097_v47   ;;  %v903_v47 = vld [vmem:[#allocation11 + $0x138] sm:$0xff] }
  0xff   :  { %10456 = vmatpush1.bf16.msra.mxu0 %v13987_v40 }
 0x100   :  { %8826 = vmatmul.mubr.msk.f32.gmra.mrb[26].mxu1 %vm323_vm0, %v13833_v27  ;;  %10458 = vmatprep.subr.bf16.mxu0 %v13992_v45 }
 0x101   :  { %561 = vmatprep.mubr.f32.mxu1 %v17055_v1 }
 0x102   :  { %2475 = vperm.xlu0 %12824, %v2473_v50   ;;  %v14142_v50 = vpack.c.bf16 %v894_v37, %v890_v32  ;;  %v918_v32 = vld [vmem:[#allocation11 + $0x1b0] sm:$0xff]  ;;  %v923_v37 = vld [vmem:[#allocation11 + $0x1d8] sm:$0xff] }
 0x103   :  { %10460 = vmatpush1.bf16.msra.mxu0 %v14005_v60 }
 0x104   :  { %8827 = vmatmul.mubr.msk.f32.gmra.mrb[28].mxu1 %vm323_vm0, %v13844_v35  ;;  %10494 = vmatprep.subr.bf16.mxu0 %v13769_v48  ;;  %17285 = vst [vmem:[#allocation46_spill] sm:$0xff] %v14142_v50 }
 0x105   :  { %567 = vmatprep.mubr.f32.mxu1 %v17055_v1 }
 0x108   :  { %8828 = vmatmul.mubr.msk.f32.gmra.mrb[30].mxu1 %vm323_vm0, %v13855_v43 }
 0x109   :  { %638 = vmatprep.mubr.f32.mxu1 %v17055_v1 }
 0x10c   :  { %8829 = vmatmul.mubr.msk.f32.vlgmr.msra.gmra.mrb[32].mxu1 %vm323_vm0, %v13744_v33 }
 0x10d   :  { %644 = vmatprep.mubr.f32.mxu1 %v17055_v1  ;;  %10288 = vmatpush1.bf16.msra.mxu1 %v10287_v51  ;;  %v870_v51 = vld [vmem:[#allocation11 + $0x30] sm:$0xff] }
 0x10e   :  { %10290 = vmatprep.subr.bf16.mxu1 %v10289_v52 }
 0x110   :  { %8830 = vmatmul.mubr.msk.f32.gmra.mrb[34].mxu1 %vm323_vm0, %v13752_v38 }
 0x111   :  { %650 = vmatprep.mubr.f32.mxu1 %v17055_v1  ;;  %10292 = vmatpush1.bf16.msra.mxu1 %v10291_v5  ;;  %v878_v5 = vld [vmem:[#allocation11 + $0x70] sm:$0xff] }
 0x112   :  { %10294 = vmatprep.subr.bf16.mxu1 %v10293_v7  ;;  %v883_v7 = vld [vmem:[#allocation11 + $0x98] sm:$0xff] }
 0x113   :  { %v14133_v13 = vpack.c.bf16 %v887_v12, %v883_v7  ;;  %v915_v7 = vld [vmem:[#allocation11 + $0x198] sm:$0xff] }
 0x114   :  { %8831 = vmatmul.mubr.msk.f32.gmra.mrb[36].mxu1 %vm323_vm0, %v13788_v61  ;;  %v919_v12 = vld [vmem:[#allocation11 + $0x1b8] sm:$0xff] }
 0x115   :  { %656 = vmatprep.mubr.f32.mxu1 %v17055_v1  ;;  %10296 = vmatpush1.bf16.msra.mxu1 %v10295_v30  ;;  %17282 = vst [vmem:[#allocation43_spill] sm:$0xff] %v14133_v13  ;;  %v14136_v30 = vpack.c.bf16 %v886_v24, %v882_v17  ;;  %v8191_v24 = vld [vmem:[%s17290_s8] sm:$0xff] }
 0x116   :  { %10298 = vmatprep.subr.bf16.mxu1 %v10297_v31  ;;  %v14139_v31 = vpack.c.bf16 %v895_v29, %v891_v25  ;;  %v14160_v25 = vpack.c.bf16 %v919_v12, %v915_v7  ;;  %v914_v29 = vld [vmem:[#allocation11 + $0x190] sm:$0xff] }
 0x117   :  { %17283 = vst [vmem:[#allocation44_spill] sm:$0xff] %v14136_v30  ;;  %v930_v12 = vld [vmem:[#allocation12 + $0x10] sm:$0xff] }
 0x118   :  { %8832 = vmatmul.mubr.msk.f32.gmra.mrb[38].mxu1 %vm323_vm0, %v13811_v11  ;;  %17284 = vst [vmem:[#allocation45_spill] sm:$0xff] %v14139_v31  ;;  %17291 = vst [vmem:[#allocation51_spill] sm:$0xff] %v14160_v25 }
 0x119   :  { %662 = vmatprep.mubr.f32.mxu1 %v17055_v1  ;;  %10300 = vmatpush1.bf16.msra.mxu1 %v10299_v41  ;;  %v899_v41 = vld [vmem:[#allocation11 + $0x118] sm:$0xff] }
 0x11a   :  { %10302 = vmatprep.subr.bf16.mxu1 %v13894_v4 }
 0x11c   :  { %8833 = vmatmul.mubr.msk.f32.gmra.mrb[40].mxu1 %vm323_vm0, %v13822_v20 }
 0x11d   :  { %668 = vmatprep.mubr.f32.mxu1 %v17055_v1 }
 0x120   :  { %8834 = vmatmul.mubr.msk.f32.gmra.mrb[42].mxu1 %vm323_vm0, %v13833_v27 }
 0x121   :  { %674 = vmatprep.mubr.f32.mxu1 %v17055_v1 }
 0x124   :  { %8835 = vmatmul.mubr.msk.f32.gmra.mrb[44].mxu1 %vm323_vm0, %v13844_v35 }
 0x125   :  { %680 = vmatprep.mubr.f32.mxu1 %v17055_v1 }
 0x128   :  { %8836 = vmatmul.mubr.msk.f32.gmra.mrb[46].mxu1 %vm323_vm0, %v13855_v43 }
 0x129   :  { %751 = vmatprep.mubr.f32.mxu1 %v17055_v1 }
 0x12c   :  { %8837 = vmatmul.mubr.msk.f32.vlgmr.msra.gmra.mrb[48].mxu1 %vm323_vm0, %v13744_v33  ;;  %v14100_v33 = vsel %vm17236_vm5, %v14018_v3, 2147483648 }
 0x12d   :  { %10304 = vmatpush1.bf16.msra.mxu1 %v13906_v15  ;;  %757 = vmatprep.mubr.f32.mxu1 %v17055_v1  ;;  %17278 = vst [vmem:[#allocation39_spill] sm:$0xff] %v14100_v33 }
 0x12e   :  { %10306 = vmatprep.subr.bf16.mxu1 %v13915_v23 }
 0x130   :  { %8838 = vmatmul.mubr.msk.f32.gmra.mrb[50].mxu1 %vm323_vm0, %v13752_v38  ;;  %v182_v38 = vshra.s32 %v14100_v33, 16 }
 0x131   :  { %10308 = vmatpush1.bf16.msra.mxu1 %v13928_v39  ;;  %763 = vmatprep.mubr.f32.mxu1 %v17055_v1 }
 0x132   :  { %10310 = vmatprep.subr.bf16.mxu1 %v13937_v46  ;;  %v14115_v52 = vcvt.s32.f32 %v182_v38  ;;  %v14145_v38 = vpack.c.bf16 %v903_v47, %v899_v41  ;;  %v927_v41 = vld [vmem:[#allocation11 + $0x1f8] sm:$0xff]  ;;  %v14163_v47 = vpack.c.bf16 %v918_v32, %v914_v29 }
 0x133   :  { %v939_v29 = vld [vmem:[#allocation12 + $0x58] sm:$0xff] }
 0x134   :  { %8839 = vmatmul.mubr.msk.f32.gmra.mrb[52].mxu1 %vm323_vm0, %v13788_v61  ;;  %v867_v61 = vld [vmem:[#allocation11 + $0x18] sm:$0xff]  ;;  %17279 = vst [vmem:[#allocation40_spill] sm:$0xff] %v14115_v52  ;;  %185 = vmax.xlane.f32.xlu0 %v14115_v52  ;;  %17286 = vst [vmem:[#allocation47_spill] sm:$0xff] %v14145_v38  ;;  %v17296_v52 = vmov 0.0  }
 0x135   :  { %10312 = vmatpush1.bf16.msra.mxu1 %v13941_v54  ;;  %769 = vmatprep.mubr.f32.mxu1 %v17055_v1  ;;  %17292 = vst [vmem:[#allocation52_spill] sm:$0xff] %v14163_v47  ;;  %v943_v32 = vld [vmem:[#allocation12 + $0x78] sm:$0xff] }
 0x136   :  { %10314 = vmatprep.subr.bf16.mxu1 %v13946_v58  ;;  %v990_v58 = vld [vmem:[#allocation12 + $0x1f0] sm:$0xff] }
 0x138   :  { %8840 = vmatmul.mubr.msk.f32.gmra.mrb[54].mxu1 %vm323_vm0, %v13811_v11  ;;  %v871_v11 = vld [vmem:[#allocation11 + $0x38] sm:$0xff] }
 0x139   :  { %10316 = vmatpush1.bf16.msra.mxu1 %v13950_v63  ;;  %775 = vmatprep.mubr.f32.mxu1 %v17055_v1  ;;  %v986_v63 = vld [vmem:[#allocation12 + $0x1d0] sm:$0xff] }
 0x13a   :  { %10318 = vmatprep.subr.bf16.mxu1 %v13953_v0  ;;  %v982_v0 = vld [vmem:[#allocation12 + $0x1b0] sm:$0xff] }
 0x13c   :  { %8841 = vmatmul.mubr.msk.f32.gmra.mrb[56].mxu1 %vm323_vm0, %v13822_v20  ;;  %v14113_v20 = vpack.c.bf16 %v871_v11, %v867_v61  ;;  %v898_v61 = vld [vmem:[#allocation11 + $0x110] sm:$0xff] }
 0x13d   :  { %10320 = vmatpush1.bf16.msra.mxu1 %v13960_v8  ;;  %781 = vmatprep.mubr.f32.mxu1 %v17055_v1  ;;  %v902_v11 = vld [vmem:[#allocation11 + $0x130] sm:$0xff] }
 0x13e   :  { %10322 = vmatprep.subr.bf16.mxu1 %v13962_v9  ;;  %v14148_v56 = vpack.c.bf16 %v902_v11, %v898_v61  ;;  %v14166_v61 = vpack.c.bf16 %v927_v41, %v923_v37  ;;  %v922_v11 = vld [vmem:[#allocation11 + $0x1d0] sm:$0xff]  ;;  %v14178_v41 = vpack.c.bf16 %v943_v32, %v939_v29  ;;  %v955_v29 = vld [vmem:[#allocation12 + $0xd8] sm:$0xff] }
 0x13f   :  { %v959_v32 = vld [vmem:[#allocation12 + $0xf8] sm:$0xff]  ;;  %v974_v9 = vld [vmem:[#allocation12 + $0x170] sm:$0xff] }
 0x140   :  { %8842 = vmatmul.mubr.msk.f32.gmra.mrb[58].mxu1 %vm323_vm0, %v13833_v27  ;;  %v866_v27 = vld [vmem:[#allocation11 + $0x10] sm:$0xff]  ;;  %17287 = vst [vmem:[#allocation48_spill] sm:$0xff] %v14148_v56  ;;  %17293 = vst [vmem:[#allocation53_spill] sm:$0xff] %v14166_v61  ;;  %v14192_v48 = vpack.c.bf16 %v959_v32, %v955_v29 }
 0x141   :  { %10324 = vmatpush1.bf16.msra.mxu1 %v13969_v18  ;;  %787 = vmatprep.mubr.f32.mxu1 %v17055_v1  ;;  %v970_v18 = vld [vmem:[#allocation12 + $0x150] sm:$0xff] }
 0x142   :  { %10326 = vmatprep.subr.bf16.mxu1 %v13971_v22  ;;  %v966_v22 = vld [vmem:[#allocation12 + $0x130] sm:$0xff] }
 0x143   :  { %v978_v8 = vld [vmem:[#allocation12 + $0x190] sm:$0xff] }
 0x144   :  { %8843 = vmatmul.mubr.msk.f32.gmra.mrb[60].mxu1 %vm323_vm0, %v13844_v35  ;;  %v14121_v35 = vpack.c.bf16 %v870_v51, %v866_v27  ;;  %v907_v27 = vld [vmem:[#allocation11 + $0x158] sm:$0xff] }
 0x145   :  { %10328 = vmatpush1.bf16.msra.mxu1 %v13987_v40  ;;  %793 = vmatprep.mubr.f32.mxu1 %v17055_v1  ;;  %v911_v51 = vld [vmem:[#allocation11 + $0x178] sm:$0xff]  ;;  %v962_v40 = vld [vmem:[#allocation12 + $0x110] sm:$0xff] }
 0x146   :  { %10330 = vmatprep.subr.bf16.mxu1 %v13992_v45  ;;  %v14151_v57 = vpack.c.bf16 %v911_v51, %v907_v27  ;;  %v926_v27 = vld [vmem:[#allocation11 + $0x1f0] sm:$0xff]  ;;  %v931_v51 = vld [vmem:[#allocation12 + $0x18] sm:$0xff]  ;;  %v14201_v29 = vpack.c.bf16 %v966_v22, %v962_v40 }
 0x147   :  { %v967_v45 = vld [vmem:[#allocation12 + $0x138] sm:$0xff] }
 0x148   :  { %8844 = vmatmul.mubr.msk.f32.gmra.mrb[62].mxu1 %vm323_vm0, %v13855_v43  ;;  %v14129_v43 = vpack.c.bf16 %v878_v5, %v874_v2  ;;  %17288 = vst [vmem:[#allocation49_spill] sm:$0xff] %v14151_v57  ;;  %v906_v2 = vld [vmem:[#allocation11 + $0x150] sm:$0xff]  ;;  %v987_v22 = vld [vmem:[#allocation12 + $0x1d8] sm:$0xff] }
 0x149   :  { %10332 = vmatpush1.bf16.msra.mxu1 %v14005_v60  ;;  %1063 = vmatprep.mubr.f32.mxu1 %v17055_v1  ;;  %v910_v5 = vld [vmem:[#allocation11 + $0x170] sm:$0xff]  ;;  %v963_v60 = vld [vmem:[#allocation12 + $0x118] sm:$0xff] }
 0x14a   :  { %10334 = vmatprep.subr.bf16.mxu1 %v14113_v20  ;;  %17281 = vst [vmem:[#allocation42_spill] sm:$0xff] %v14129_v43  ;;  %v14154_v17 = vpack.c.bf16 %v910_v5, %v906_v2  ;;  %8195 = vperm.xlu0 %12824, %v8191_v24   ;;  %v935_v2 = vld [vmem:[#allocation12 + $0x38] sm:$0xff]  ;;  %v14169_v5 = vpack.c.bf16 %v926_v27, %v922_v11  ;;  %v934_v24 = vld [vmem:[#allocation12 + $0x30] sm:$0xff] }
 0x14b   :  { %v14172_v7 = vpack.c.bf16 %v935_v2, %v931_v51  ;;  %v14175_v37 = vpack.c.bf16 %v934_v24, %v930_v12  ;;  %v947_v11 = vld [vmem:[#allocation12 + $0x98] sm:$0xff]  ;;  %v946_v12 = vld [vmem:[#allocation12 + $0x90] sm:$0xff] }
 0x14c   :  { %1064 = vmatmul.mubr.f32.vlgmr.msra.gmra.mrb[0].mxu1 %v17055_v1  ;;  %17289 = vst [vmem:[#allocation50_spill] sm:$0xff] %v14154_v17  ;;  %17294 = vst [vmem:[#allocation54_spill] sm:$0xff] %v14169_v5  ;;  %v951_v27 = vld [vmem:[#allocation12 + $0xb8] sm:$0xff]  ;;  %v950_v24 = vld [vmem:[#allocation12 + $0xb0] sm:$0xff] }
 0x14d   :  { %10336 = vmatpush1.bf16.msra.mxu1 %v14121_v35  ;;  %1134 = vmatprep.mubr.f32.mxu1 %v17055_v1  ;;  %17295 = vst [vmem:[#allocation55_spill] sm:$0xff] %v14172_v7  ;;  %v942_v1 = vld [vmem:[#allocation12 + $0x70] sm:$0xff]  ;;  %v14186_v2 = vpack.c.bf16 %v951_v27, %v947_v11  ;;  %v14189_v33 = vpack.c.bf16 %v950_v24, %v946_v12  ;;  %v971_v12 = vld [vmem:[#allocation12 + $0x158] sm:$0xff] }
 0x14e   :  { %10338 = vmatprep.subr.bf16.mxu1 %v14124_v62  ;;  %v14182_v51 = vpack.c.bf16 %v942_v1, %v938_v14  ;;  %v954_v1 = vld [vmem:[#allocation12 + $0xd0] sm:$0xff]  ;;  %v14198_v27 = vpack.c.bf16 %v967_v45, %v963_v60  ;;  %v975_v24 = vld [vmem:[#allocation12 + $0x178] sm:$0xff]  ;;  %v14207_v45 = vpack.c.bf16 %v974_v9, %v970_v18  ;;  %v14219_v9 = vpack.c.bf16 %v990_v58, %v986_v63 }
 0x14f   :  { %v958_v14 = vld [vmem:[#allocation12 + $0xf0] sm:$0xff]  ;;  %v14204_v32 = vpack.c.bf16 %v975_v24, %v971_v12  ;;  %v991_v40 = vld [vmem:[#allocation12 + $0x1f8] sm:$0xff]  ;;  %v14213_v12 = vpack.c.bf16 %v982_v0, %v978_v8 }
 0x150   :  { %v14195_v11 = vpack.c.bf16 %v958_v14, %v954_v1  ;;  %v979_v1 = vld [vmem:[#allocation12 + $0x198] sm:$0xff]  ;;  %v14216_v24 = vpack.c.bf16 %v991_v40, %v987_v22 }
 0x151   :  { %10340 = vmatpush1.bf16.msra.mxu1 %v14129_v43  ;;  %v983_v14 = vld [vmem:[#allocation12 + $0x1b8] sm:$0xff] }
 0x152   :  { %10342 = vmatprep.subr.bf16.mxu1 %v14133_v13  ;;  %v14210_v60 = vpack.c.bf16 %v983_v14, %v979_v1 }
 0x155   :  { %10344 = vmatpush1.bf16.msra.mxu1 %v14136_v30 }
 0x156   :  { %10346 = vmatprep.subr.bf16.mxu1 %v14139_v31 }
 0x159   :  { %10348 = vmatpush1.bf16.msra.mxu1 %v14142_v50 }
 0x15a   :  { %10350 = vmatprep.subr.bf16.mxu1 %v14145_v38 }
 0x15d   :  { %10352 = vmatpush1.bf16.msra.mxu1 %v14148_v56 }
 0x15e   :  { %10354 = vmatprep.subr.bf16.mxu1 %v14151_v57 }
 0x161   :  { %10356 = vmatpush1.bf16.msra.mxu1 %v14154_v17 }
 0x162   :  { %10358 = vmatprep.subr.bf16.mxu1 %v14160_v25 }
 0x165   :  { %10360 = vmatpush1.bf16.msra.mxu1 %v14163_v47 }
 0x166   :  { %10362 = vmatprep.subr.bf16.mxu1 %v14166_v61 }
 0x169   :  { %10364 = vmatpush1.bf16.msra.mxu1 %v14169_v5 }
 0x16a   :  { %10398 = vmatprep.subr.bf16.mxu1 %v14172_v7 }
 0x16c   :  { %1135 = vmatmul.mubr.f32.vlgmr.msra.gmra.mrb[16].mxu1 %v17296_v52 }
 0x16d   :  { %10400 = vmatpush1.bf16.msra.mxu1 %v14175_v37  ;;  %1287 = vmatprep.mubr.f32.mxu1 %v17296_v52 }
 0x16e   :  { %10402 = vmatprep.subr.bf16.mxu1 %v14178_v41 }
 0x171   :  { %10404 = vmatpush1.bf16.msra.mxu1 %v14182_v51 }
 0x172   :  { %10406 = vmatprep.subr.bf16.mxu1 %v14186_v2 }
 0x175   :  { %10408 = vmatpush1.bf16.msra.mxu1 %v14189_v33 }
 0x176   :  { %10410 = vmatprep.subr.bf16.mxu1 %v14192_v48 }
 0x179   :  { %10412 = vmatpush1.bf16.msra.mxu1 %v14195_v11 }
 0x17a   :  { %10414 = vmatprep.subr.bf16.mxu1 %v14198_v27 }
 0x17d   :  { %10416 = vmatpush1.bf16.msra.mxu1 %v14201_v29 }
 0x17e   :  { %10418 = vmatprep.subr.bf16.mxu1 %v14204_v32 }
 0x181   :  { %10420 = vmatpush1.bf16.msra.mxu1 %v14207_v45 }
 0x182   :  { %10422 = vmatprep.subr.bf16.mxu1 %v14210_v60 }
 0x185   :  { %10424 = vmatpush1.bf16.msra.mxu1 %v14213_v12 }
 0x186   :  { %10426 = vmatprep.subr.bf16.mxu1 %v14216_v24 }
 0x189   :  { %10428 = vmatpush1.bf16.msra.mxu1 %v14219_v9 }
 0x18a   :  { %10462 = vmatprep.subr.bf16.mxu1 %v14113_v20 }
 0x18c   :  { %1288 = vmatmul.mubr.f32.vlgmr.msra.gmra.mrb[62].mxu1 %v17296_v52 }
 0x18d   :  { %10464 = vmatpush1.bf16.msra.mxu1 %v14121_v35  ;;  %1507 = vmatprep.mubr.f32.mxu1 %v17296_v52 }
 0x18e   :  { %10466 = vmatprep.subr.bf16.mxu1 %v14124_v62 }
 0x191   :  { %10468 = vmatpush1.bf16.msra.mxu1 %v14129_v43 }
 0x192   :  { %10470 = vmatprep.subr.bf16.mxu1 %v14133_v13 }
 0x195   :  { %10472 = vmatpush1.bf16.msra.mxu1 %v14136_v30 }
 0x196   :  { %10474 = vmatprep.subr.bf16.mxu1 %v14139_v31 }
 0x199   :  { %10476 = vmatpush1.bf16.msra.mxu1 %v14142_v50 }
 0x19a   :  { %10478 = vmatprep.subr.bf16.mxu1 %v14145_v38 }
 0x19d   :  { %10480 = vmatpush1.bf16.msra.mxu1 %v14148_v56 }
 0x19e   :  { %10482 = vmatprep.subr.bf16.mxu1 %v14151_v57 }
 0x1a1   :  { %10484 = vmatpush1.bf16.msra.mxu1 %v14154_v17 }
 0x1a2   :  { %10486 = vmatprep.subr.bf16.mxu1 %v14160_v25 }
 0x1a3   :  { %v14238_v58 = vpop.f32.mrb[2].mxu1 }
 0x1a4   :  { %17297 = vst [vmem:[#allocation56_spill] sm:$0xff] %v14238_v58  ;;  %v14240_v63 = vpop.f32.mrb[3].mxu1 }
 0x1a5   :  { %17298 = vst [vmem:[#allocation57_spill] sm:$0xff] %v14240_v63  ;;  %10488 = vmatpush1.bf16.msra.mxu1 %v14163_v47 }
 0x1a6   :  { %10490 = vmatprep.subr.bf16.mxu1 %v14166_v61  ;;  %v283_v61 = vlaneseq }
 0x1a7   :  { %v14244_v0 = vpop.f32.mrb[4].mxu1 }
 0x1a8   :  { %17299 = vst [vmem:[#allocation58_spill] sm:$0xff] %v14244_v0  ;;  %v14246_v8 = vpop.f32.mrb[5].mxu1 }
 0x1a9   :  { %17300 = vst [vmem:[#allocation59_spill] sm:$0xff] %v14246_v8  ;;  %10492 = vmatpush1.bf16.msra.mxu1 %v14169_v5 }
 0x1aa   :  { %10526 = vmatprep.subr.bf16.mxu1 %v14172_v7 }
 0x1ab   :  { %v14250_v18 = vpop.f32.mrb[6].mxu1 }
 0x1ac   :  { %17301 = vst [vmem:[#allocation60_spill] sm:$0xff] %v14250_v18  ;;  %v14252_v1 = vpop.f32.mrb[7].mxu1 }
 0x1ad   :  { %17302 = vst [vmem:[#allocation61_spill] sm:$0xff] %v14252_v1  ;;  %v14270_v1 = vshrl.u32 %v283_v61, 7 }
 0x1af   :  { %v14254_v14 = vpop.f32.mrb[8].mxu1  ;;  %17311 = vst [vmem:[#allocation70_spill] sm:$0xff] %v14270_v1 }
 0x1b0   :  { %17303 = vst [vmem:[#allocation62_spill] sm:$0xff] %v14254_v14  ;;  %v14256_v22 = vpop.f32.mrb[9].mxu1  ;;  %v17099_v14 = vsub.s32 4, %v14270_v1 }
 0x1b1   :  { %17304 = vst [vmem:[#allocation63_spill] sm:$0xff] %v14256_v22  ;;  %v1218_v7 = vpop.f32.mrb[0].mxu0  ;;  %v17104_v22 = vsub.s32 5, %v14270_v1 }
 0x1b2   :  { %v1220_v18 = vpop.f32.mrb[1].mxu0 }
 0x1b3   :  { %v14258_v40 = vpop.f32.mrb[10].mxu1 }
 0x1b4   :  { %17305 = vst [vmem:[#allocation64_spill] sm:$0xff] %v14258_v40  ;;  %v14260_v63 = vpop.f32.mrb[11].mxu1  ;;  %v14274_v40 = vld [vmem:[#allocation14] sm:$0xff] }
 0x1b5   :  { %17306 = vst [vmem:[#allocation65_spill] sm:$0xff] %v14260_v63 }
 0x1b7   :  { %v14262_v58 = vpop.f32.mrb[12].mxu1 }
 0x1b8   :  { %17307 = vst [vmem:[#allocation66_spill] sm:$0xff] %v14262_v58  ;;  %v14264_v0 = vpop.f32.mrb[13].mxu1  ;;  %v302_v58 = vrot.slane %v14274_v40, %v17099_v14 }
 0x1b9   :  { %17308 = vst [vmem:[#allocation67_spill] sm:$0xff] %v14264_v0 }
 0x1bb   :  { %v14266_v8 = vpop.f32.mrb[14].mxu1 }
 0x1bc   :  { %17309 = vst [vmem:[#allocation68_spill] sm:$0xff] %v14266_v8  ;;  %v14268_v5 = vpop.f32.mrb[15].mxu1  ;;  %v306_v8 = vrot.slane %v14274_v40, %v17104_v22 }
 0x1bd   :  { %17310 = vst [vmem:[#allocation69_spill] sm:$0xff] %v14268_v5 }
 0x1df   :  { %v640_v5 = vpop.f32.mrb[32].mxu1 }
 0x1e0   :  { %v14282_v0 = vadd.f32 %v640_v5, %v302_v58  ;;  %v642_v63 = vpop.f32.mrb[33].mxu1 }
 0x1e1   :  { %v14284_v61 = vadd.f32 %v642_v63, %v306_v8 }
 0x1e2   :  { %17312 = vst [vmem:[#allocation71_spill] sm:$0xff] %v14282_v0 }
 0x1e3   :  { %17313 = vst [vmem:[#allocation72_spill] sm:$0xff] %v14284_v61  ;;  %v646_v47 = vpop.f32.mrb[34].mxu1 }
 0x1e4   :  { %v14286_v25 = vadd.f32 %v646_v47, %v302_v58  ;;  %v648_v17 = vpop.f32.mrb[35].mxu1 }
 0x1e5   :  { %v14288_v57 = vadd.f32 %v648_v17, %v306_v8 }
 0x1e6   :  { %17314 = vst [vmem:[#allocation73_spill] sm:$0xff] %v14286_v25 }
 0x1e7   :  { %17315 = vst [vmem:[#allocation74_spill] sm:$0xff] %v14288_v57  ;;  %v652_v56 = vpop.f32.mrb[36].mxu1 }
 0x1e8   :  { %v14290_v38 = vadd.f32 %v652_v56, %v302_v58  ;;  %v654_v14 = vpop.f32.mrb[37].mxu1 }
 0x1e9   :  { %v14292_v50 = vadd.f32 %v654_v14, %v306_v8 }
 0x1ea   :  { %17316 = vst [vmem:[#allocation75_spill] sm:$0xff] %v14290_v38 }
 0x1eb   :  { %17317 = vst [vmem:[#allocation76_spill] sm:$0xff] %v14292_v50  ;;  %v658_v31 = vpop.f32.mrb[38].mxu1 }
 0x1ec   :  { %v14294_v22 = vadd.f32 %v658_v31, %v302_v58  ;;  %v660_v5 = vpop.f32.mrb[39].mxu1 }
 0x1ed   :  { %v14296_v0 = vadd.f32 %v660_v5, %v306_v8 }
 0x1ee   :  { %17318 = vst [vmem:[#allocation77_spill] sm:$0xff] %v14294_v22 }
 0x1ef   :  { %17319 = vst [vmem:[#allocation78_spill] sm:$0xff] %v14296_v0  ;;  %v664_v63 = vpop.f32.mrb[40].mxu1 }
 0x1f0   :  { %v14298_v61 = vadd.f32 %v664_v63, %v302_v58  ;;  %v666_v47 = vpop.f32.mrb[41].mxu1 }
 0x1f1   :  { %v14300_v25 = vadd.f32 %v666_v47, %v306_v8  ;;  %v17326_v47 = vmov 0  }
 0x1f2   :  { %17320 = vst [vmem:[#allocation79_spill] sm:$0xff] %v14298_v61 }
 0x1f3   :  { %17321 = vst [vmem:[#allocation80_spill] sm:$0xff] %v14300_v25  ;;  %v670_v17 = vpop.f32.mrb[42].mxu1 }
 0x1f4   :  { %v14302_v57 = vadd.f32 %v670_v17, %v302_v58  ;;  %v672_v56 = vpop.f32.mrb[43].mxu1  ;;  %v1721_v17 = vsel %vm1719_vm6, 1, %v17326_v47 }
 0x1f5   :  { %v14304_v38 = vadd.f32 %v672_v56, %v306_v8  ;;  %1723 = vperm.xlu1 %12825, %v1721_v17   ;;  %v1729_v56 = vsel %vm1720_vm7, 1, %v17326_v47  ;;  %v14335_v17 = vsub.s32 2, %v14270_v1 }
 0x1f6   :  { %17322 = vst [vmem:[#allocation81_spill] sm:$0xff] %v14302_v57 }
 0x1f7   :  { %17323 = vst [vmem:[#allocation82_spill] sm:$0xff] %v14304_v38  ;;  %v676_v14 = vpop.f32.mrb[44].mxu1  ;;  %17331 = vst [vmem:[#allocation89_spill] sm:$0xff] %v14335_v17 }
 0x1f8   :  { %v14306_v50 = vadd.f32 %v676_v14, %v302_v58  ;;  %v678_v31 = vpop.f32.mrb[45].mxu1  ;;  %v2105_v14 = vsel %vm2096_vm8, 1, %v17326_v47 }
 0x1f9   :  { %v14308_v22 = vadd.f32 %v678_v31, %v306_v8  ;;  %1731 = vperm.xlu1 %12825, %v1729_v56  }
 0x1fa   :  { %17324 = vst [vmem:[#allocation83_spill] sm:$0xff] %v14306_v50 }
 0x1fb   :  { %17325 = vst [vmem:[#allocation84_spill] sm:$0xff] %v14308_v22  ;;  %v682_v5 = vpop.f32.mrb[46].mxu1 }
 0x1fc   :  { %v683_v0 = vadd.f32 %v682_v5, %v302_v58  ;;  %v684_v30 = vpop.f32.mrb[47].mxu1 }
 0x1fd   :  { %v685_v63 = vadd.f32 %v684_v30, %v306_v8  ;;  %2107 = vperm.xlu1 %12825, %v2105_v14   ;;  %v2481_v30 = vsel %vm2472_vm9, 1, %v17326_v47  ;;  %v14322_v8 = vsub.s32 0, %v14270_v1  ;;  %v17115_v14 = vsub.s32 3, %v14270_v1 }
 0x1fe   :  { %v1294_v61 = vadd.f32 %v1218_v7, %v683_v0  ;;  %v14319_v0 = vsub.s32 1, %v14270_v1 }
 0x1ff   :  { %v1295_v54 = vadd.f32 %v1220_v18, %v685_v63  ;;  %17328 = vst [vmem:[#allocation86_spill] sm:$0xff] %v14322_v8  ;;  %v14330_v31 = vrot.slane %v14274_v40, %v14322_v8  ;;  %v14340_v8 = vrot.slane %v14274_v40, %v14335_v17 }
 0x200   :  { %17327 = vst [vmem:[#allocation85_spill] sm:$0xff] %v14319_v0  ;;  %v14326_v18 = vrot.slane %v14274_v40, %v14319_v0  ;;  %v8848_v57 = vmul.f32 -1.442695, %v1294_v61 }
 0x201   :  { %2483 = vperm.xlu1 %12825, %v2481_v30   ;;  %17330 = vst [vmem:[#allocation88_spill] sm:$0xff] %v14330_v31  ;;  %17332 = vst [vmem:[#allocation90_spill] sm:$0xff] %v14340_v8  ;;  %v8849_v38 = vmul.f32 -1.442695, %v1295_v54 }
 0x202   :  { %17329 = vst [vmem:[#allocation87_spill] sm:$0xff] %v14326_v18 }
 0x21f   :  { %v1065_v7 = vpop.f32.mrb[0].mxu1 }
 0x220   :  { %v1067_v58 = vpop.f32.mrb[1].mxu1  ;;  %v12560_v5 = vadd.f32 %v1065_v7, %v14330_v31  ;;  %v14345_v7 = vrot.slane %v14274_v40, %v17115_v14 }
 0x221   :  { %v12561_v3 = vadd.f32 %v1067_v58, %v14326_v18 }
 0x222   :  { %v8845_v47 = vmul.f32 -1.442695, %v12560_v5 }
 0x223   :  { %v8846_v63 = vmul.f32 -1.442695, %v12561_v3 }
 0x225   :  { %12826 = vpow2.f32 %v8846_v63 }
 0x226   :  { %12828 = vpow2.f32 %v8845_v47 }
 0x22f   :  { %v12827_v56 = vpop.eup %12826 }
 0x230   :  { %v12829_v30 = vpop.eup %12828  ;;  %v1307_v0 = vadd.f32 1.0, %v12827_v56 }
 0x231   :  { %v1301_v25 = vadd.f32 1.0, %v12829_v30 }
 0x232   :  { %12830 = vrcp.f32 %v1307_v0 }
 0x233   :  { %12832 = vrcp.f32 %v1301_v25  ;;  %v309_v25 = vsub.s32 6, %v14270_v1 }
 0x23c   :  { %v12831_v56 = vpop.eup %12830 }
 0x23d   :  { %v12833_v17 = vpop.eup %12832  ;;  %v1317_v22 = vmul.f32 0.0, %v12831_v56 }
 0x23f   :  { %v1136_v58 = vpop.f32.mrb[16].mxu1 }
 0x240   :  { %v12590_v3 = vadd.f32 %v1136_v58, %v14340_v8  ;;  %v1138_v5 = vpop.f32.mrb[17].mxu1 }
 0x241   :  { %v12591_v63 = vadd.f32 %v1138_v5, %v14345_v7 }
 0x242   :  { %12834 = vtanh.f32 %v12590_v3  ;;  %v313_v3 = vsub.s32 7, %v14270_v1  ;;  %v17348_v1 = vld [vmem:[#allocation49_spill] sm:$0xff] }
 0x243   :  { %v8847_v47 = vmul.f32 -1.442695, %v12591_v63 }
 0x245   :  { %12836 = vpow2.f32 %v8847_v47 }
 0x246   :  { %12838 = vpow2.f32 %v8849_v38 }
 0x247   :  { %12840 = vpow2.f32 %v8848_v57  ;;  %v14359_v57 = vpop.permute.xlu0 %1350 }
 0x248   :  { %17334 = vst [vmem:[#allocation92_spill] sm:$0xff] %v14359_v57  ;;  %vm17237_vm10 = vcmp.eq.s32.totalorder %v14359_v57, 1  ;;  %v17387_v57 = vld [vmem:[#allocation34_spill] sm:$0xff] }
 0x24c   :  { %v12835_v30 = vpop.eup %12834 }
 0x24d   :  { %v1318_v50 = vmul.f32 %v12835_v30, %v12833_v17  ;;  %v14355_v17 = vrot.slane %v14274_v40, %v309_v25 }
 0x24f   :  { %v12837_v14 = vpop.eup %12836  ;;  %v14349_v18 = vadd.f32 %v1318_v50, %v1317_v22  ;;  %v14362_v22 = vrot.slane %v14274_v40, %v313_v3 }
 0x250   :  { %v1314_v0 = vadd.f32 1.0, %v12837_v14  ;;  %v12839_v58 = vpop.eup %12838 }
 0x251   :  { %12842 = vtanh.f32 %v14349_v18  ;;  %v12841_v5 = vpop.eup %12840  ;;  %v1331_v61 = vadd.f32 1.0, %v12839_v58 }
 0x252   :  { %12844 = vrcp.f32 %v1314_v0  ;;  %v1325_v38 = vadd.f32 1.0, %v12841_v5 }
 0x253   :  { %12846 = vrcp.f32 %v1331_v61 }
 0x254   :  { %12848 = vrcp.f32 %v1325_v38 }
 0x25b   :  { %v12843_v54 = vpop.eup %12842 }
 0x25c   :  { %v12845_v63 = vpop.eup %12844 }
 0x25d   :  { %v14357_v50 = vmul.f32 %v12845_v63, %v12843_v54  ;;  %v12847_v0 = vpop.eup %12846 }
 0x25e   :  { %v12849_v25 = vpop.eup %12848  ;;  %v1341_v3 = vmul.f32 0.0, %v12847_v0  ;;  %v17339_v0 = vld [vmem:[#allocation29_spill] sm:$0xff] }
 0x25f   :  { %17333 = vst [vmem:[#allocation91_spill] sm:$0xff] %v14357_v50  ;;  %v1289_v14 = vpop.f32.mrb[62].mxu1  ;;  %8851 = vmatmul.mubr.msk.f32.vlgmr.msra.gmra.mrb[2].mxu0 %vm17237_vm10, %v14357_v50  ;;  %8852 = vmatmul.mubr.msk.f32.vlgmr.msra.gmra.mrb[18].mxu1 %vm17237_vm10, %v14357_v50 }
 0x260   :  { %v12652_v47 = vadd.f32 %v1289_v14, %v14355_v17  ;;  %v1291_v56 = vpop.f32.mrb[63].mxu1  ;;  %10496 = vmatpush1.bf16.msra.mxu0 %v13771_v49  ;;  %10528 = vmatpush1.bf16.msra.mxu1 %v14175_v37 }
 0x261   :  { %v12653_v40 = vadd.f32 %v1291_v56, %v14362_v22  ;;  %10498 = vmatprep.subr.bf16.mxu0 %v13780_v55  ;;  %10530 = vmatprep.subr.bf16.mxu1 %v14178_v41 }
 0x262   :  { %12850 = vtanh.f32 %v12652_v47  ;;  %1589 = vmatprep.mubr.f32.mxu0 %v17296_v52  ;;  %1660 = vmatprep.mubr.f32.mxu1 %v17296_v52  ;;  %v14408_v47 = vpop.permute.xlu0 %1357 }
 0x263   :  { %v8850_v30 = vmul.f32 -1.442695, %v12653_v40  ;;  %17335 = vst [vmem:[#allocation93_spill] sm:$0xff] %v14408_v47  ;;  %vm1359_vm11 = vcmp.eq.s32.totalorder %v14408_v47, 1  ;;  %v17337_v40 = vld [vmem:[#allocation28_spill] sm:$0xff] }
 0x264   :  { %10500 = vmatpush1.bf16.msra.mxu0 %v13785_v59  ;;  %10532 = vmatpush1.bf16.msra.mxu1 %v14182_v51  ;;  %v17384_v47 = vld [vmem:[#allocation48_spill] sm:$0xff] }
 0x265   :  { %12852 = vpow2.f32 %v8850_v30  ;;  %10502 = vmatprep.subr.bf16.mxu0 %v13800_v6  ;;  %10534 = vmatprep.subr.bf16.mxu1 %v14186_v2  ;;  %v17338_v30 = vld [vmem:[#allocation44_spill] sm:$0xff] }
 0x268   :  { %10504 = vmatpush1.bf16.msra.mxu0 %v13808_v10  ;;  %10536 = vmatpush1.bf16.msra.mxu1 %v14189_v33 }
 0x269   :  { %10506 = vmatprep.subr.bf16.mxu0 %v13814_v16  ;;  %10538 = vmatprep.subr.bf16.mxu1 %v14192_v48 }
 0x26c   :  { %v12851_v58 = vpop.eup %12850  ;;  %10508 = vmatpush1.bf16.msra.mxu0 %v13819_v19  ;;  %10540 = vmatpush1.bf16.msra.mxu1 %v14195_v11 }
 0x26d   :  { %v1342_v5 = vmul.f32 %v12851_v58, %v12849_v25  ;;  %10510 = vmatprep.subr.bf16.mxu0 %v13824_v21  ;;  %10542 = vmatprep.subr.bf16.mxu1 %v14198_v27  ;;  %v17340_v25 = vld [vmem:[#allocation45_spill] sm:$0xff]  ;;  %v17341_v58 = vld [vmem:[#allocation30_spill] sm:$0xff] }
 0x26f   :  { %v12853_v54 = vpop.eup %12852  ;;  %v14391_v63 = vadd.f32 %v1342_v5, %v1341_v3  ;;  %v17342_v3 = vld [vmem:[#allocation46_spill] sm:$0xff]  ;;  %v17343_v5 = vld [vmem:[#allocation31_spill] sm:$0xff] }
 0x270   :  { %v1338_v61 = vadd.f32 1.0, %v12853_v54  ;;  %10512 = vmatpush1.bf16.msra.mxu0 %v13830_v26  ;;  %10544 = vmatpush1.bf16.msra.mxu1 %v14201_v29  ;;  %v17344_v54 = vld [vmem:[#allocation47_spill] sm:$0xff] }
 0x271   :  { %12854 = vtanh.f32 %v14391_v63  ;;  %10514 = vmatprep.subr.bf16.mxu0 %v13836_v28  ;;  %10546 = vmatprep.subr.bf16.mxu1 %v14204_v32 }
 0x272   :  { %12856 = vrcp.f32 %v1338_v61  ;;  %v17345_v61 = vld [vmem:[#allocation32_spill] sm:$0xff] }
 0x274   :  { %10516 = vmatpush1.bf16.msra.mxu0 %v13841_v34  ;;  %10548 = vmatpush1.bf16.msra.mxu1 %v14207_v45 }
 0x275   :  { %10518 = vmatprep.subr.bf16.mxu0 %v13847_v36  ;;  %10550 = vmatprep.subr.bf16.mxu1 %v14210_v60 }
 0x278   :  { %10520 = vmatpush1.bf16.msra.mxu0 %v13852_v42  ;;  %10552 = vmatpush1.bf16.msra.mxu1 %v14213_v12 }
 0x279   :  { %10522 = vmatprep.subr.bf16.mxu0 %v13858_v44  ;;  %10554 = vmatprep.subr.bf16.mxu1 %v14216_v24 }
 0x27b   :  { %v12855_v38 = vpop.eup %12854 }
 0x27c   :  { %v12857_v14 = vpop.eup %12856  ;;  %10524 = vmatpush1.bf16.msra.mxu0 %v13875_v53  ;;  %10556 = vmatpush1.bf16.msra.mxu1 %v14219_v9 }
 0x27d   :  { %v14410_v56 = vmul.f32 %v12857_v14, %v12855_v38  ;;  %10558 = vmatprep.subr.bf16.mxu0 %v13894_v4  ;;  %10590 = vmatprep.subr.bf16.mxu1 %v14113_v20  ;;  %v17346_v38 = vld [vmem:[#allocation48_spill] sm:$0xff]  ;;  %v17347_v14 = vld [vmem:[#allocation33_spill] sm:$0xff] }
 0x27f   :  { %17336 = vst [vmem:[#allocation94_spill] sm:$0xff] %v14410_v56  ;;  %8853 = vmatmul.mubr.msk.f32.vlgmr.msra.gmra.mrb[4].mxu0 %vm1359_vm11, %v14410_v56  ;;  %8854 = vmatmul.mubr.msk.f32.vlgmr.msra.gmra.mrb[60].mxu1 %vm1359_vm11, %v14410_v56 }
 0x280   :  { %10560 = vmatpush1.bf16.msra.mxu0 %v13906_v15  ;;  %10592 = vmatpush1.bf16.msra.mxu1 %v14121_v35 }
 0x281   :  { %10562 = vmatprep.subr.bf16.mxu0 %v13915_v23  ;;  %10594 = vmatprep.subr.bf16.mxu1 %v14124_v62 }
 0x282   :  { %1812 = vmatprep.mubr.f32.mxu0 %v17296_v52  ;;  %1883 = vmatprep.mubr.f32.mxu1 %v17296_v52 }
 0x284   :  { %10564 = vmatpush1.bf16.msra.mxu0 %v13928_v39  ;;  %10596 = vmatpush1.bf16.msra.mxu1 %v14129_v43 }
 0x285   :  { %10566 = vmatprep.subr.bf16.mxu0 %v13937_v46  ;;  %10598 = vmatprep.subr.bf16.mxu1 %v14133_v13 }
 0x288   :  { %10568 = vmatpush1.bf16.msra.mxu0 %v17337_v40  ;;  %10600 = vmatpush1.bf16.msra.mxu1 %v17338_v30  ;;  %v17349_v30 = vld [vmem:[#allocation34_spill] sm:$0xff]  ;;  %v17363_v40 = vld [vmem:[#allocation57_spill] sm:$0xff] }
 0x289   :  { %10570 = vmatprep.subr.bf16.mxu0 %v17339_v0  ;;  %10602 = vmatprep.subr.bf16.mxu1 %v17340_v25  ;;  %v17350_v0 = vld [vmem:[#allocation50_spill] sm:$0xff]  ;;  %v17351_v25 = vld [vmem:[#allocation35_spill] sm:$0xff] }
 0x28c   :  { %10572 = vmatpush1.bf16.msra.mxu0 %v17341_v58  ;;  %10604 = vmatpush1.bf16.msra.mxu1 %v17342_v3  ;;  %v17352_v58 = vld [vmem:[#allocation51_spill] sm:$0xff]  ;;  %v17353_v3 = vld [vmem:[#allocation36_spill] sm:$0xff] }
 0x28d   :  { %10574 = vmatprep.subr.bf16.mxu0 %v17343_v5  ;;  %10606 = vmatprep.subr.bf16.mxu1 %v17344_v54  ;;  %v17354_v5 = vld [vmem:[#allocation52_spill] sm:$0xff]  ;;  %v17355_v54 = vld [vmem:[#allocation37_spill] sm:$0xff] }
 0x290   :  { %10576 = vmatpush1.bf16.msra.mxu0 %v17345_v61  ;;  %10608 = vmatpush1.bf16.msra.mxu1 %v17346_v38  ;;  %v17356_v61 = vld [vmem:[#allocation53_spill] sm:$0xff]  ;;  %v17357_v38 = vld [vmem:[#allocation38_spill] sm:$0xff] }
 0x291   :  { %10578 = vmatprep.subr.bf16.mxu0 %v17347_v14  ;;  %10610 = vmatprep.subr.bf16.mxu1 %v17348_v1  ;;  %v17358_v14 = vld [vmem:[#allocation54_spill] sm:$0xff]  ;;  %v17359_v1 = vld [vmem:[#allocation25_spill] sm:$0xff] }
 0x294   :  { %10580 = vmatpush1.bf16.msra.mxu0 %v17349_v30  ;;  %10612 = vmatpush1.bf16.msra.mxu1 %v17350_v0  ;;  %v17360_v30 = vld [vmem:[#allocation55_spill] sm:$0xff] }
 0x295   :  { %10582 = vmatprep.subr.bf16.mxu0 %v17351_v25  ;;  %10614 = vmatprep.subr.bf16.mxu1 %v17352_v58  ;;  %v17361_v25 = vld [vmem:[#allocation56_spill] sm:$0xff]  ;;  %v17362_v58 = vld [vmem:[#allocation87_spill] sm:$0xff] }
 0x296   :  { %v421_v0 = vadd.f32 %v17361_v25, %v14330_v31 }
 0x298   :  { %10584 = vmatpush1.bf16.msra.mxu0 %v17353_v3  ;;  %10616 = vmatpush1.bf16.msra.mxu1 %v17354_v5  ;;  %v423_v3 = vadd.f32 %v17363_v40, %v17362_v58 }
 0x299   :  { %10586 = vmatprep.subr.bf16.mxu0 %v17355_v54  ;;  %10618 = vmatprep.subr.bf16.mxu1 %v17356_v61 }
 0x29c   :  { %10588 = vmatpush1.bf16.msra.mxu0 %v17357_v38  ;;  %10620 = vmatpush1.bf16.msra.mxu1 %v17358_v14 }
 0x29d   :  { %10622 = vmatprep.subr.bf16.mxu0 %v17359_v1  ;;  %10654 = vmatprep.subr.bf16.mxu1 %v17360_v30 }
 0x332   :  { %v1438_v13 = vpop.f32.mrb[2].mxu0  ;;  %v1509_v5 = vpop.f32.mrb[18].mxu1 }
 0x333   :  { %v1514_v46 = vadd.f32 %v1438_v13, %v421_v0  ;;  %v1440_v54 = vpop.f32.mrb[3].mxu0  ;;  %v1511_v43 = vpop.f32.mrb[19].mxu1  ;;  %v12592_v30 = vadd.f32 %v1509_v5, %v14340_v8 }
 0x334   :  { %v1515_v61 = vadd.f32 %v1440_v54, %v423_v3  ;;  %v12593_v1 = vadd.f32 %v1511_v43, %v14345_v7  ;;  %v1363_v43 = vsel %vm17237_vm10, %v14349_v18, 0.0 }
 0x335   :  { %v8855_v39 = vmul.f32 -1.442695, %v1514_v46  ;;  %v14461_v46 = vpop.permute.xlu1 %1723 }
 0x336   :  { %v8856_v38 = vmul.f32 -1.442695, %v1515_v61  ;;  %v8857_v14 = vmul.f32 -1.442695, %v12593_v1  ;;  %17364 = vst [vmem:[#allocation56_spill] sm:$0xff] %v14461_v46  ;;  %vm1725_vm12 = vcmp.eq.s32.totalorder %v14461_v46, 1 }
 0x337   :  { %12858 = vpow2.f32 %v8855_v39  ;;  %v17388_v46 = vld [vmem:[#allocation50_spill] sm:$0xff] }
 0x338   :  { %12860 = vpow2.f32 %v8856_v38 }
 0x339   :  { %12862 = vpow2.f32 %v8857_v14 }
 0x33a   :  { %12864 = vtanh.f32 %v12592_v30 }
 0x341   :  { %v12859_v62 = vpop.eup %12858 }
 0x342   :  { %v12861_v25 = vpop.eup %12860  ;;  %v1674_v31 = vadd.f32 1.0, %v12859_v62 }
 0x343   :  { %v1680_v40 = vadd.f32 1.0, %v12861_v25  ;;  %v12863_v13 = vpop.eup %12862 }
 0x344   :  { %12866 = vrcp.f32 %v1674_v31  ;;  %v12865_v0 = vpop.eup %12864  ;;  %v1687_v1 = vadd.f32 1.0, %v12863_v13  ;;  %v17365_v31 = vld [vmem:[#allocation83_spill] sm:$0xff] }
 0x345   :  { %12868 = vrcp.f32 %v1680_v40  ;;  %v17366_v40 = vld [vmem:[#allocation84_spill] sm:$0xff] }
 0x346   :  { %12870 = vrcp.f32 %v1687_v1 }
 0x34e   :  { %v12867_v3 = vpop.eup %12866 }
 0x34f   :  { %v12869_v39 = vpop.eup %12868  ;;  %v1691_v54 = vmul.f32 %v12867_v3, %v12865_v0 }
 0x350   :  { %v1690_v5 = vmul.f32 %v12869_v39, %v1363_v43  ;;  %v12871_v39 = vpop.eup %12870 }
 0x352   :  { %v1692_v62 = vadd.f32 %v1691_v54, %v1690_v5  ;;  %v1591_v30 = vpop.f32.mrb[4].mxu0  ;;  %v1662_v61 = vpop.f32.mrb[60].mxu1 }
 0x353   :  { %v1667_v38 = vadd.f32 %v1591_v30, %v17365_v31  ;;  %v1593_v14 = vpop.f32.mrb[5].mxu0  ;;  %v1664_v25 = vpop.f32.mrb[61].mxu1  ;;  %v12650_v5 = vadd.f32 %v1662_v61, %v14355_v17  ;;  %v1353_v31 = vsel %vm17237_vm10, %v14357_v50, 0.0  ;;  %v17383_v50 = vld [vmem:[#allocation32_spill] sm:$0xff] }
 0x354   :  { %12872 = vtanh.f32 %v1692_v62  ;;  %v1668_v8 = vadd.f32 %v1593_v14, %v17366_v40  ;;  %v14471_v0 = vsel %vm1725_vm12, %v1692_v62, %v1363_v43  ;;  %v12651_v3 = vadd.f32 %v1664_v25, %v14362_v22 }
 0x355   :  { %v8858_v18 = vmul.f32 -1.442695, %v1667_v38 }
 0x356   :  { %v8859_v13 = vmul.f32 -1.442695, %v1668_v8  ;;  %v8860_v1 = vmul.f32 -1.442695, %v12651_v3 }
 0x357   :  { %12874 = vpow2.f32 %v8858_v18 }
 0x358   :  { %12876 = vpow2.f32 %v8859_v13  ;;  %v1364_v13 = vsel %vm1359_vm11, %v14391_v63, 0.0 }
 0x359   :  { %12878 = vpow2.f32 %v8860_v1 }
 0x35a   :  { %12880 = vtanh.f32 %v12650_v5  ;;  %v14508_v5 = vpop.permute.xlu1 %1731 }
 0x35b   :  { %17368 = vst [vmem:[#allocation57_spill] sm:$0xff] %v14508_v5  ;;  %vm1733_vm13 = vcmp.eq.s32.totalorder %v14508_v5, 1  ;;  %v17389_v5 = vld [vmem:[#allocation35_spill] sm:$0xff] }
 0x35e   :  { %v12873_v54 = vpop.eup %12872 }
 0x35f   :  { %v14475_v30 = vmul.f32 %v12873_v54, %v12871_v39 }
 0x361   :  { %17367 = vst [vmem:[#allocation87_spill] sm:$0xff] %v14475_v30  ;;  %v12875_v14 = vpop.eup %12874  ;;  %v14483_v8 = vsel %vm1725_vm12, %v14475_v30, %v1353_v31  ;;  %v17382_v30 = vld [vmem:[#allocation47_spill] sm:$0xff] }
 0x362   :  { %v12877_v43 = vpop.eup %12876  ;;  %v1698_v62 = vadd.f32 1.0, %v12875_v14  ;;  %1813 = vmatmul.mubr.f32.vlgmr.msra.gmra.mrb[6].mxu0 %v14483_v8  ;;  %1884 = vmatmul.mubr.f32.vlgmr.msra.gmra.mrb[20].mxu1 %v14483_v8 }
 0x363   :  { %v1704_v61 = vadd.f32 1.0, %v12877_v43  ;;  %10624 = vmatpush1.bf16.msra.mxu0 %v13771_v49  ;;  %10656 = vmatpush1.bf16.msra.mxu1 %v14175_v37  ;;  %v12879_v38 = vpop.eup %12878 }
 0x364   :  { %12882 = vrcp.f32 %v1698_v62  ;;  %10626 = vmatprep.subr.bf16.mxu0 %v13780_v55  ;;  %10658 = vmatprep.subr.bf16.mxu1 %v14178_v41  ;;  %v12881_v25 = vpop.eup %12880  ;;  %v1711_v39 = vadd.f32 1.0, %v12879_v38  ;;  %v1360_v62 = vsel %vm1359_vm11, %v14410_v56, 0.0  ;;  %v17370_v38 = vld [vmem:[#allocation41_spill] sm:$0xff] }
 0x365   :  { %12884 = vrcp.f32 %v1704_v61  ;;  %1965 = vmatprep.mubr.f32.mxu0 %v17296_v52  ;;  %2036 = vmatprep.mubr.f32.mxu1 %v17296_v52  ;;  %v17385_v56 = vld [vmem:[#allocation33_spill] sm:$0xff] }
 0x366   :  { %12886 = vrcp.f32 %v1711_v39  ;;  %v17376_v39 = vld [vmem:[#allocation44_spill] sm:$0xff] }
 0x367   :  { %10628 = vmatpush1.bf16.msra.mxu0 %v13785_v59  ;;  %10660 = vmatpush1.bf16.msra.mxu1 %v14182_v51 }
 0x368   :  { %10630 = vmatprep.subr.bf16.mxu0 %v13800_v6  ;;  %10662 = vmatprep.subr.bf16.mxu1 %v14186_v2 }
 0x36b   :  { %10632 = vmatpush1.bf16.msra.mxu0 %v13808_v10  ;;  %10664 = vmatpush1.bf16.msra.mxu1 %v14189_v33 }
 0x36c   :  { %10634 = vmatprep.subr.bf16.mxu0 %v13814_v16  ;;  %10666 = vmatprep.subr.bf16.mxu1 %v14192_v48 }
 0x36e   :  { %v12883_v40 = vpop.eup %12882 }
 0x36f   :  { %v12885_v18 = vpop.eup %12884  ;;  %v1715_v3 = vmul.f32 %v12883_v40, %v12881_v25  ;;  %10636 = vmatpush1.bf16.msra.mxu0 %v13819_v19  ;;  %10668 = vmatpush1.bf16.msra.mxu1 %v14195_v11  ;;  %v17371_v25 = vld [vmem:[#allocation26_spill] sm:$0xff] }
 0x370   :  { %v1714_v54 = vmul.f32 %v12885_v18, %v1364_v13  ;;  %10638 = vmatprep.subr.bf16.mxu0 %v13824_v21  ;;  %10670 = vmatprep.subr.bf16.mxu1 %v14198_v27  ;;  %v12887_v31 = vpop.eup %12886  ;;  %v17372_v40 = vld [vmem:[#allocation42_spill] sm:$0xff]  ;;  %v17373_v18 = vld [vmem:[#allocation27_spill] sm:$0xff] }
 0x372   :  { %v1716_v1 = vadd.f32 %v1715_v3, %v1714_v54  ;;  %v17375_v3 = vld [vmem:[#allocation28_spill] sm:$0xff]  ;;  %v17377_v54 = vld [vmem:[#allocation29_spill] sm:$0xff] }
 0x373   :  { %10640 = vmatpush1.bf16.msra.mxu0 %v13830_v26  ;;  %10672 = vmatpush1.bf16.msra.mxu1 %v14201_v29 }
 0x374   :  { %12888 = vtanh.f32 %v1716_v1  ;;  %10642 = vmatprep.subr.bf16.mxu0 %v13836_v28  ;;  %10674 = vmatprep.subr.bf16.mxu1 %v14204_v32  ;;  %v14517_v63 = vsel %vm1733_vm13, %v1716_v1, %v1364_v13  ;;  %v17374_v13 = vld [vmem:[#allocation43_spill] sm:$0xff]  ;;  %v17378_v1 = vld [vmem:[#allocation45_spill] sm:$0xff] }
 0x377   :  { %10644 = vmatpush1.bf16.msra.mxu0 %v13841_v34  ;;  %10676 = vmatpush1.bf16.msra.mxu1 %v14207_v45 }
 0x378   :  { %10646 = vmatprep.subr.bf16.mxu0 %v13847_v36  ;;  %10678 = vmatprep.subr.bf16.mxu1 %v14210_v60 }
 0x37b   :  { %10648 = vmatpush1.bf16.msra.mxu0 %v13852_v42  ;;  %10680 = vmatpush1.bf16.msra.mxu1 %v14213_v12 }
 0x37c   :  { %10650 = vmatprep.subr.bf16.mxu0 %v13858_v44  ;;  %10682 = vmatprep.subr.bf16.mxu1 %v14216_v24 }
 0x37e   :  { %v12889_v14 = vpop.eup %12888 }
 0x37f   :  { %10652 = vmatpush1.bf16.msra.mxu0 %v13875_v53  ;;  %10684 = vmatpush1.bf16.msra.mxu1 %v14219_v9  ;;  %v14529_v43 = vmul.f32 %v12889_v14, %v12887_v31  ;;  %v17379_v31 = vld [vmem:[#allocation30_spill] sm:$0xff] }
 0x380   :  { %10686 = vmatprep.subr.bf16.mxu0 %v13894_v4  ;;  %10718 = vmatprep.subr.bf16.mxu1 %v14113_v20  ;;  %v17380_v14 = vld [vmem:[#allocation46_spill] sm:$0xff] }
 0x381   :  { %17369 = vst [vmem:[#allocation83_spill] sm:$0xff] %v14529_v43  ;;  %v14539_v61 = vsel %vm1733_vm13, %v14529_v43, %v1360_v62  ;;  %v17381_v62 = vld [vmem:[#allocation31_spill] sm:$0xff]  ;;  %v17386_v43 = vld [vmem:[#allocation49_spill] sm:$0xff] }
 0x382   :  { %1966 = vmatmul.mubr.f32.vlgmr.msra.gmra.mrb[8].mxu0 %v14539_v61  ;;  %2037 = vmatmul.mubr.f32.vlgmr.msra.gmra.mrb[58].mxu1 %v14539_v61 }
 0x383   :  { %10688 = vmatpush1.bf16.msra.mxu0 %v13906_v15  ;;  %10720 = vmatpush1.bf16.msra.mxu1 %v14121_v35 }
 0x384   :  { %10690 = vmatprep.subr.bf16.mxu0 %v13915_v23  ;;  %10722 = vmatprep.subr.bf16.mxu1 %v17370_v38 }
 0x385   :  { %2188 = vmatprep.mubr.f32.mxu0 %v17296_v52  ;;  %2259 = vmatprep.mubr.f32.mxu1 %v17296_v52 }
 0x387   :  { %10692 = vmatpush1.bf16.msra.mxu0 %v17371_v25  ;;  %10724 = vmatpush1.bf16.msra.mxu1 %v17372_v40 }
 0x388   :  { %10694 = vmatprep.subr.bf16.mxu0 %v17373_v18  ;;  %10726 = vmatprep.subr.bf16.mxu1 %v17374_v13 }
 0x38b   :  { %10696 = vmatpush1.bf16.msra.mxu0 %v17375_v3  ;;  %10728 = vmatpush1.bf16.msra.mxu1 %v17376_v39 }
 0x38c   :  { %10698 = vmatprep.subr.bf16.mxu0 %v17377_v54  ;;  %10730 = vmatprep.subr.bf16.mxu1 %v17378_v1 }
 0x38f   :  { %10700 = vmatpush1.bf16.msra.mxu0 %v17379_v31  ;;  %10732 = vmatpush1.bf16.msra.mxu1 %v17380_v14  ;;  %v17390_v31 = vld [vmem:[#allocation51_spill] sm:$0xff]  ;;  %v17391_v14 = vld [vmem:[#allocation36_spill] sm:$0xff] }
 0x390   :  { %10702 = vmatprep.subr.bf16.mxu0 %v17381_v62  ;;  %10734 = vmatprep.subr.bf16.mxu1 %v17382_v30  ;;  %v17392_v62 = vld [vmem:[#allocation52_spill] sm:$0xff]  ;;  %v17393_v30 = vld [vmem:[#allocation37_spill] sm:$0xff] }
 0x393   :  { %10704 = vmatpush1.bf16.msra.mxu0 %v17383_v50  ;;  %10736 = vmatpush1.bf16.msra.mxu1 %v17384_v47  ;;  %v17394_v50 = vld [vmem:[#allocation53_spill] sm:$0xff]  ;;  %v17395_v47 = vld [vmem:[#allocation38_spill] sm:$0xff] }
 0x394   :  { %10706 = vmatprep.subr.bf16.mxu0 %v17385_v56  ;;  %10738 = vmatprep.subr.bf16.mxu1 %v17386_v43  ;;  %v17396_v56 = vld [vmem:[#allocation54_spill] sm:$0xff]  ;;  %v17397_v43 = vld [vmem:[#allocation25_spill] sm:$0xff] }
 0x397   :  { %10708 = vmatpush1.bf16.msra.mxu0 %v17387_v57  ;;  %10740 = vmatpush1.bf16.msra.mxu1 %v17388_v46  ;;  %v17398_v57 = vld [vmem:[#allocation55_spill] sm:$0xff]  ;;  %v17399_v46 = vld [vmem:[#allocation88_spill] sm:$0xff] }
 0x398   :  { %10710 = vmatprep.subr.bf16.mxu0 %v17389_v5  ;;  %10742 = vmatprep.subr.bf16.mxu1 %v17390_v31  ;;  %v17400_v5 = vld [vmem:[#allocation58_spill] sm:$0xff]  ;;  %v17401_v31 = vld [vmem:[#allocation59_spill] sm:$0xff] }
 0x399   :  { %v427_v1 = vadd.f32 %v17400_v5, %v17399_v46 }
 0x39b   :  { %10712 = vmatpush1.bf16.msra.mxu0 %v17391_v14  ;;  %10744 = vmatpush1.bf16.msra.mxu1 %v17392_v62  ;;  %v429_v14 = vadd.f32 %v17401_v31, %v17362_v58 }
 0x39c   :  { %10714 = vmatprep.subr.bf16.mxu0 %v17393_v30  ;;  %10746 = vmatprep.subr.bf16.mxu1 %v17394_v50 }
 0x39f   :  { %10716 = vmatpush1.bf16.msra.mxu0 %v17395_v47  ;;  %10748 = vmatpush1.bf16.msra.mxu1 %v17396_v56 }
 0x3a0   :  { %10750 = vmatprep.subr.bf16.mxu0 %v17397_v43  ;;  %10782 = vmatprep.subr.bf16.mxu1 %v17398_v57  ;;  %v17402_v57 = vld [vmem:[#allocation90_spill] sm:$0xff] }
 0x435   :  { %v1814_v54 = vpop.f32.mrb[6].mxu0  ;;  %v1885_v62 = vpop.f32.mrb[20].mxu1 }
 0x436   :  { %v1890_v39 = vadd.f32 %v1814_v54, %v427_v1  ;;  %v1816_v30 = vpop.f32.mrb[7].mxu0  ;;  %v1887_v3 = vpop.f32.mrb[21].mxu1  ;;  %v12594_v18 = vadd.f32 %v1885_v62, %v17402_v57 }
 0x437   :  { %v1891_v50 = vadd.f32 %v1816_v30, %v429_v14  ;;  %v12595_v43 = vadd.f32 %v1887_v3, %v14345_v7  ;;  %v14584_v3 = vpop.permute.xlu0 %2099 }
 0x438   :  { %v8861_v13 = vmul.f32 -1.442695, %v1890_v39  ;;  %17403 = vst [vmem:[#allocation84_spill] sm:$0xff] %v14584_v3  ;;  %vm2101_vm14 = vcmp.eq.s32.totalorder %v14584_v3, 1  ;;  %v17425_v3 = vld [vmem:[#allocation50_spill] sm:$0xff] }
 0x439   :  { %v8862_v47 = vmul.f32 -1.442695, %v1891_v50  ;;  %v8863_v56 = vmul.f32 -1.442695, %v12595_v43 }
 0x43a   :  { %12890 = vpow2.f32 %v8861_v13 }
 0x43b   :  { %12892 = vpow2.f32 %v8862_v47 }
 0x43c   :  { %12894 = vpow2.f32 %v8863_v56  ;;  %v17404_v56 = vld [vmem:[#allocation81_spill] sm:$0xff] }
 0x43d   :  { %12896 = vtanh.f32 %v12594_v18 }
 0x444   :  { %v12891_v40 = vpop.eup %12890 }
 0x445   :  { %v12893_v5 = vpop.eup %12892  ;;  %v2050_v46 = vadd.f32 1.0, %v12891_v40 }
 0x446   :  { %v2056_v31 = vadd.f32 1.0, %v12893_v5  ;;  %v12895_v54 = vpop.eup %12894  ;;  %v17405_v5 = vld [vmem:[#allocation82_spill] sm:$0xff] }
 0x447   :  { %12898 = vrcp.f32 %v2050_v46  ;;  %v12897_v1 = vpop.eup %12896  ;;  %v2063_v13 = vadd.f32 1.0, %v12895_v54 }
 0x448   :  { %12900 = vrcp.f32 %v2056_v31 }
 0x449   :  { %12902 = vrcp.f32 %v2063_v13 }
 0x451   :  { %v12899_v30 = vpop.eup %12898 }
 0x452   :  { %v12901_v39 = vpop.eup %12900  ;;  %v2067_v50 = vmul.f32 %v12899_v30, %v12897_v1 }
 0x453   :  { %v2066_v47 = vmul.f32 %v12901_v39, %v14471_v0 }
 0x455   :  { %v2068_v43 = vadd.f32 %v2067_v50, %v2066_v47  ;;  %v1967_v14 = vpop.f32.mrb[8].mxu0  ;;  %v2038_v62 = vpop.f32.mrb[58].mxu1 }
 0x456   :  { %v2043_v40 = vadd.f32 %v1967_v14, %v17404_v56  ;;  %v1969_v46 = vpop.f32.mrb[9].mxu0  ;;  %v2040_v18 = vpop.f32.mrb[59].mxu1  ;;  %v12648_v14 = vadd.f32 %v2038_v62, %v14355_v17 }
 0x457   :  { %12904 = vtanh.f32 %v2068_v43  ;;  %v2044_v31 = vadd.f32 %v1969_v46, %v17405_v5  ;;  %v14592_v54 = vsel %vm2101_vm14, %v2068_v43, %v14471_v0  ;;  %v12649_v39 = vadd.f32 %v2040_v18, %v14362_v22  ;;  %v12903_v50 = vpop.eup %12902 }
 0x458   :  { %v8864_v1 = vmul.f32 -1.442695, %v2043_v40 }
 0x459   :  { %v8865_v30 = vmul.f32 -1.442695, %v2044_v31  ;;  %v8866_v47 = vmul.f32 -1.442695, %v12649_v39 }
 0x45a   :  { %12906 = vpow2.f32 %v8864_v1 }
 0x45b   :  { %12908 = vpow2.f32 %v8865_v30  ;;  %v14625_v30 = vpop.permute.xlu1 %2107 }
 0x45c   :  { %12910 = vpow2.f32 %v8866_v47  ;;  %17407 = vst [vmem:[#allocation59_spill] sm:$0xff] %v14625_v30  ;;  %vm2109_vm15 = vcmp.eq.s32.totalorder %v14625_v30, 1  ;;  %v17426_v30 = vld [vmem:[#allocation35_spill] sm:$0xff] }
 0x45d   :  { %12912 = vtanh.f32 %v12648_v14 }
 0x461   :  { %v12905_v13 = vpop.eup %12904 }
 0x462   :  { %v14596_v56 = vmul.f32 %v12905_v13, %v12903_v50 }
 0x464   :  { %17406 = vst [vmem:[#allocation58_spill] sm:$0xff] %v14596_v56  ;;  %v12907_v57 = vpop.eup %12906  ;;  %v14602_v0 = vsel %vm2101_vm14, %v14596_v56, %v14483_v8  ;;  %v17423_v56 = vld [vmem:[#allocation49_spill] sm:$0xff] }
 0x465   :  { %v12909_v43 = vpop.eup %12908  ;;  %v2074_v40 = vadd.f32 1.0, %v12907_v57  ;;  %2189 = vmatmul.mubr.f32.vlgmr.msra.gmra.mrb[10].mxu0 %v14602_v0  ;;  %2260 = vmatmul.mubr.f32.vlgmr.msra.gmra.mrb[22].mxu1 %v14602_v0 }
 0x466   :  { %v2080_v46 = vadd.f32 1.0, %v12909_v43  ;;  %10752 = vmatpush1.bf16.msra.mxu0 %v13771_v49  ;;  %10784 = vmatpush1.bf16.msra.mxu1 %v14175_v37  ;;  %v12911_v57 = vpop.eup %12910  ;;  %v17410_v43 = vld [vmem:[#allocation27_spill] sm:$0xff] }
 0x467   :  { %12914 = vrcp.f32 %v2074_v40  ;;  %10754 = vmatprep.subr.bf16.mxu0 %v13780_v55  ;;  %10786 = vmatprep.subr.bf16.mxu1 %v14178_v41  ;;  %v12913_v8 = vpop.eup %12912  ;;  %v2087_v31 = vadd.f32 1.0, %v12911_v57  ;;  %v17411_v40 = vld [vmem:[#allocation43_spill] sm:$0xff]  ;;  %v17413_v57 = vld [vmem:[#allocation44_spill] sm:$0xff] }
 0x468   :  { %12916 = vrcp.f32 %v2080_v46  ;;  %2341 = vmatprep.mubr.f32.mxu0 %v17296_v52  ;;  %2412 = vmatprep.mubr.f32.mxu1 %v17296_v52  ;;  %v17412_v46 = vld [vmem:[#allocation28_spill] sm:$0xff] }
 0x469   :  { %12918 = vrcp.f32 %v2087_v31  ;;  %v17418_v31 = vld [vmem:[#allocation31_spill] sm:$0xff] }
 0x46a   :  { %10756 = vmatpush1.bf16.msra.mxu0 %v13785_v59  ;;  %10788 = vmatpush1.bf16.msra.mxu1 %v14182_v51 }
 0x46b   :  { %10758 = vmatprep.subr.bf16.mxu0 %v13800_v6  ;;  %10790 = vmatprep.subr.bf16.mxu1 %v14186_v2 }
 0x46e   :  { %10760 = vmatpush1.bf16.msra.mxu0 %v13808_v10  ;;  %10792 = vmatpush1.bf16.msra.mxu1 %v14189_v33 }
 0x46f   :  { %10762 = vmatprep.subr.bf16.mxu0 %v13814_v16  ;;  %10794 = vmatprep.subr.bf16.mxu1 %v14192_v48 }
 0x471   :  { %v12915_v62 = vpop.eup %12914 }
 0x472   :  { %v12917_v18 = vpop.eup %12916  ;;  %v2091_v5 = vmul.f32 %v12915_v62, %v12913_v8  ;;  %10764 = vmatpush1.bf16.msra.mxu0 %v13819_v19  ;;  %10796 = vmatpush1.bf16.msra.mxu1 %v14195_v11  ;;  %v17414_v8 = vld [vmem:[#allocation29_spill] sm:$0xff] }
 0x473   :  { %v2090_v1 = vmul.f32 %v12917_v18, %v14517_v63  ;;  %10766 = vmatprep.subr.bf16.mxu0 %v13824_v21  ;;  %10798 = vmatprep.subr.bf16.mxu1 %v14198_v27  ;;  %v12919_v13 = vpop.eup %12918  ;;  %v17415_v62 = vld [vmem:[#allocation45_spill] sm:$0xff]  ;;  %v17416_v18 = vld [vmem:[#allocation30_spill] sm:$0xff] }
 0x475   :  { %v2092_v39 = vadd.f32 %v2091_v5, %v2090_v1  ;;  %v17417_v5 = vld [vmem:[#allocation46_spill] sm:$0xff]  ;;  %v17419_v1 = vld [vmem:[#allocation47_spill] sm:$0xff] }
 0x476   :  { %10768 = vmatpush1.bf16.msra.mxu0 %v13830_v26  ;;  %10800 = vmatpush1.bf16.msra.mxu1 %v14201_v29 }
 0x477   :  { %12920 = vtanh.f32 %v2092_v39  ;;  %10770 = vmatprep.subr.bf16.mxu0 %v13836_v28  ;;  %10802 = vmatprep.subr.bf16.mxu1 %v14204_v32  ;;  %v14635_v50 = vsel %vm2109_vm15, %v2092_v39, %v14517_v63  ;;  %v17420_v39 = vld [vmem:[#allocation32_spill] sm:$0xff] }
 0x47a   :  { %10772 = vmatpush1.bf16.msra.mxu0 %v13841_v34  ;;  %10804 = vmatpush1.bf16.msra.mxu1 %v14207_v45 }
 0x47b   :  { %10774 = vmatprep.subr.bf16.mxu0 %v13847_v36  ;;  %10806 = vmatprep.subr.bf16.mxu1 %v14210_v60 }
 0x47e   :  { %10776 = vmatpush1.bf16.msra.mxu0 %v13852_v42  ;;  %10808 = vmatpush1.bf16.msra.mxu1 %v14213_v12 }
 0x47f   :  { %10778 = vmatprep.subr.bf16.mxu0 %v13858_v44  ;;  %10810 = vmatprep.subr.bf16.mxu1 %v14216_v24 }
 0x481   :  { %v12921_v47 = vpop.eup %12920 }
 0x482   :  { %10780 = vmatpush1.bf16.msra.mxu0 %v13875_v53  ;;  %10812 = vmatpush1.bf16.msra.mxu1 %v14219_v9  ;;  %v14647_v63 = vmul.f32 %v12921_v47, %v12919_v13  ;;  %v17421_v13 = vld [vmem:[#allocation48_spill] sm:$0xff]  ;;  %v17422_v47 = vld [vmem:[#allocation33_spill] sm:$0xff] }
 0x483   :  { %10814 = vmatprep.subr.bf16.mxu0 %v13894_v4  ;;  %10846 = vmatprep.subr.bf16.mxu1 %v14113_v20 }
 0x484   :  { %17408 = vst [vmem:[#allocation81_spill] sm:$0xff] %v14647_v63  ;;  %v14655_v14 = vsel %vm2109_vm15, %v14647_v63, %v14539_v61  ;;  %v17409_v61 = vld [vmem:[#allocation42_spill] sm:$0xff] }
 0x485   :  { %2342 = vmatmul.mubr.f32.vlgmr.msra.gmra.mrb[12].mxu0 %v14655_v14  ;;  %2413 = vmatmul.mubr.f32.vlgmr.msra.gmra.mrb[56].mxu1 %v14655_v14  ;;  %v17424_v63 = vld [vmem:[#allocation34_spill] sm:$0xff] }
 0x486   :  { %10816 = vmatpush1.bf16.msra.mxu0 %v13906_v15  ;;  %10848 = vmatpush1.bf16.msra.mxu1 %v14121_v35 }
 0x487   :  { %10818 = vmatprep.subr.bf16.mxu0 %v13915_v23  ;;  %10850 = vmatprep.subr.bf16.mxu1 %v17370_v38 }
 0x488   :  { %2561 = vmatprep.mubr.f32.mxu0 %v17296_v52  ;;  %2632 = vmatprep.mubr.f32.mxu1 %v17296_v52 }
 0x48a   :  { %10820 = vmatpush1.bf16.msra.mxu0 %v17371_v25  ;;  %10852 = vmatpush1.bf16.msra.mxu1 %v17409_v61 }
 0x48b   :  { %10822 = vmatprep.subr.bf16.mxu0 %v17410_v43  ;;  %10854 = vmatprep.subr.bf16.mxu1 %v17411_v40 }
 0x48e   :  { %10824 = vmatpush1.bf16.msra.mxu0 %v17412_v46  ;;  %10856 = vmatpush1.bf16.msra.mxu1 %v17413_v57 }
 0x48f   :  { %10826 = vmatprep.subr.bf16.mxu0 %v17414_v8  ;;  %10858 = vmatprep.subr.bf16.mxu1 %v17415_v62 }
 0x492   :  { %10828 = vmatpush1.bf16.msra.mxu0 %v17416_v18  ;;  %10860 = vmatpush1.bf16.msra.mxu1 %v17417_v5  ;;  %v17427_v18 = vld [vmem:[#allocation51_spill] sm:$0xff]  ;;  %v17428_v5 = vld [vmem:[#allocation36_spill] sm:$0xff] }
 0x493   :  { %10830 = vmatprep.subr.bf16.mxu0 %v17418_v31  ;;  %10862 = vmatprep.subr.bf16.mxu1 %v17419_v1  ;;  %v17429_v31 = vld [vmem:[#allocation52_spill] sm:$0xff]  ;;  %v17430_v1 = vld [vmem:[#allocation37_spill] sm:$0xff] }
 0x496   :  { %10832 = vmatpush1.bf16.msra.mxu0 %v17420_v39  ;;  %10864 = vmatpush1.bf16.msra.mxu1 %v17421_v13  ;;  %v17431_v39 = vld [vmem:[#allocation53_spill] sm:$0xff]  ;;  %v17432_v13 = vld [vmem:[#allocation38_spill] sm:$0xff] }
 0x497   :  { %10834 = vmatprep.subr.bf16.mxu0 %v17422_v47  ;;  %10866 = vmatprep.subr.bf16.mxu1 %v17423_v56  ;;  %v17433_v47 = vld [vmem:[#allocation54_spill] sm:$0xff]  ;;  %v17434_v56 = vld [vmem:[#allocation25_spill] sm:$0xff] }
 0x49a   :  { %10836 = vmatpush1.bf16.msra.mxu0 %v17424_v63  ;;  %10868 = vmatpush1.bf16.msra.mxu1 %v17425_v3  ;;  %v17435_v63 = vld [vmem:[#allocation55_spill] sm:$0xff]  ;;  %v17436_v3 = vld [vmem:[#allocation88_spill] sm:$0xff] }
 0x49b   :  { %10838 = vmatprep.subr.bf16.mxu0 %v17426_v30  ;;  %10870 = vmatprep.subr.bf16.mxu1 %v17427_v18  ;;  %v17437_v30 = vld [vmem:[#allocation60_spill] sm:$0xff]  ;;  %v17438_v18 = vld [vmem:[#allocation61_spill] sm:$0xff] }
 0x49c   :  { %v433_v62 = vadd.f32 %v17437_v30, %v17436_v3 }
 0x49e   :  { %10840 = vmatpush1.bf16.msra.mxu0 %v17428_v5  ;;  %10872 = vmatpush1.bf16.msra.mxu1 %v17429_v31  ;;  %v435_v5 = vadd.f32 %v17438_v18, %v17362_v58 }
 0x49f   :  { %10842 = vmatprep.subr.bf16.mxu0 %v17430_v1  ;;  %10874 = vmatprep.subr.bf16.mxu1 %v17431_v39 }
 0x4a2   :  { %10844 = vmatpush1.bf16.msra.mxu0 %v17432_v13  ;;  %10876 = vmatpush1.bf16.msra.mxu1 %v17433_v47 }
 0x4a3   :  { %10878 = vmatprep.subr.bf16.mxu0 %v17434_v56  ;;  %10910 = vmatprep.subr.bf16.mxu1 %v17435_v63  ;;  %v17439_v63 = vld [vmem:[#allocation90_spill] sm:$0xff] }
 0x538   :  { %v2190_v8 = vpop.f32.mrb[10].mxu0  ;;  %v2261_v31 = vpop.f32.mrb[22].mxu1 }
 0x539   :  { %v2266_v57 = vadd.f32 %v2190_v8, %v433_v62  ;;  %v2192_v1 = vpop.f32.mrb[11].mxu0  ;;  %v2263_v46 = vpop.f32.mrb[23].mxu1  ;;  %v12596_v43 = vadd.f32 %v2261_v31, %v17439_v63 }
 0x53a   :  { %v2267_v39 = vadd.f32 %v2192_v1, %v435_v5  ;;  %v12597_v56 = vadd.f32 %v2263_v46, %v14345_v7  ;;  %v14700_v46 = vpop.permute.xlu0 %2475 }
 0x53b   :  { %v8867_v40 = vmul.f32 -1.442695, %v2266_v57  ;;  %17440 = vst [vmem:[#allocation82_spill] sm:$0xff] %v14700_v46  ;;  %vm2477_vm0 = vcmp.eq.s32.totalorder %v14700_v46, 1  ;;  %v17499_v46 = vld [vmem:[#allocation50_spill] sm:$0xff] }
 0x53c   :  { %v8868_v13 = vmul.f32 -1.442695, %v2267_v39  ;;  %v8869_v47 = vmul.f32 -1.442695, %v12597_v56 }
 0x53d   :  { %12922 = vpow2.f32 %v8867_v40 }
 0x53e   :  { %12924 = vpow2.f32 %v8868_v13 }
 0x53f   :  { %12926 = vpow2.f32 %v8869_v47 }
 0x540   :  { %12928 = vtanh.f32 %v12596_v43 }
 0x547   :  { %v12923_v61 = vpop.eup %12922 }
 0x548   :  { %v12925_v30 = vpop.eup %12924  ;;  %v2426_v3 = vadd.f32 1.0, %v12923_v61  ;;  %v17441_v61 = vld [vmem:[#allocation79_spill] sm:$0xff] }
 0x549   :  { %v2432_v18 = vadd.f32 1.0, %v12925_v30  ;;  %v12927_v8 = vpop.eup %12926  ;;  %v17442_v30 = vld [vmem:[#allocation80_spill] sm:$0xff] }
 0x54a   :  { %12930 = vrcp.f32 %v2426_v3  ;;  %v12929_v62 = vpop.eup %12928  ;;  %v2439_v40 = vadd.f32 1.0, %v12927_v8 }
 0x54b   :  { %12932 = vrcp.f32 %v2432_v18 }
 0x54c   :  { %12934 = vrcp.f32 %v2439_v40 }
 0x554   :  { %v12931_v5 = vpop.eup %12930 }
 0x555   :  { %v12933_v57 = vpop.eup %12932  ;;  %v2443_v1 = vmul.f32 %v12931_v5, %v12929_v62 }
 0x556   :  { %v2442_v39 = vmul.f32 %v12933_v57, %v14592_v54 }
 0x558   :  { %v2444_v56 = vadd.f32 %v2443_v1, %v2442_v39  ;;  %v2343_v31 = vpop.f32.mrb[12].mxu0  ;;  %v2414_v13 = vpop.f32.mrb[56].mxu1 }
 0x559   :  { %v2419_v43 = vadd.f32 %v2343_v31, %v17441_v61  ;;  %v2345_v3 = vpop.f32.mrb[13].mxu0  ;;  %v2416_v47 = vpop.f32.mrb[57].mxu1  ;;  %v12646_v31 = vadd.f32 %v2414_v13, %v14355_v17 }
 0x55a   :  { %12936 = vtanh.f32 %v2444_v56  ;;  %v2420_v18 = vadd.f32 %v2345_v3, %v17442_v30  ;;  %v14708_v8 = vsel %vm2477_vm0, %v2444_v56, %v14592_v54  ;;  %v12647_v57 = vadd.f32 %v2416_v47, %v14362_v22  ;;  %v12935_v1 = vpop.eup %12934 }
 0x55b   :  { %v8870_v62 = vmul.f32 -1.442695, %v2419_v43 }
 0x55c   :  { %v8871_v5 = vmul.f32 -1.442695, %v2420_v18  ;;  %v8872_v39 = vmul.f32 -1.442695, %v12647_v57 }
 0x55d   :  { %12938 = vpow2.f32 %v8870_v62  ;;  %v14738_v62 = vpop.permute.xlu1 %2483 }
 0x55e   :  { %12940 = vpow2.f32 %v8871_v5  ;;  %17444 = vst [vmem:[#allocation61_spill] sm:$0xff] %v14738_v62  ;;  %vm2485_vm1 = vcmp.eq.s32.totalorder %v14738_v62, 1  ;;  %v17498_v62 = vld [vmem:[#allocation34_spill] sm:$0xff] }
 0x55f   :  { %12942 = vpow2.f32 %v8872_v39 }
 0x560   :  { %12944 = vtanh.f32 %v12646_v31 }
 0x564   :  { %v12937_v40 = vpop.eup %12936 }
 0x565   :  { %v14712_v61 = vmul.f32 %v12937_v40, %v12935_v1 }
 0x567   :  { %17443 = vst [vmem:[#allocation60_spill] sm:$0xff] %v14712_v61  ;;  %v12939_v63 = vpop.eup %12938  ;;  %v14718_v54 = vsel %vm2477_vm0, %v14712_v61, %v14602_v0  ;;  %v17460_v61 = vld [vmem:[#allocation49_spill] sm:$0xff] }
 0x568   :  { %v12941_v56 = vpop.eup %12940  ;;  %v2450_v43 = vadd.f32 1.0, %v12939_v63  ;;  %2562 = vmatmul.mubr.f32.vlgmr.msra.gmra.mrb[14].mxu0 %v14718_v54  ;;  %2633 = vmatmul.mubr.f32.vlgmr.msra.gmra.mrb[24].mxu1 %v14718_v54 }
 0x569   :  { %v2456_v3 = vadd.f32 1.0, %v12941_v56  ;;  %10880 = vmatpush1.bf16.msra.mxu0 %v13771_v49  ;;  %10912 = vmatpush1.bf16.msra.mxu1 %v14175_v37  ;;  %v12943_v0 = vpop.eup %12942  ;;  %v17447_v56 = vld [vmem:[#allocation27_spill] sm:$0xff] }
 0x56a   :  { %12946 = vrcp.f32 %v2450_v43  ;;  %10882 = vmatprep.subr.bf16.mxu0 %v13780_v55  ;;  %10914 = vmatprep.subr.bf16.mxu1 %v14178_v41  ;;  %v12945_v63 = vpop.eup %12944  ;;  %v2463_v18 = vadd.f32 1.0, %v12943_v0  ;;  %v17448_v43 = vld [vmem:[#allocation43_spill] sm:$0xff]  ;;  %v17450_v0 = vld [vmem:[#allocation44_spill] sm:$0xff] }
 0x56b   :  { %12948 = vrcp.f32 %v2456_v3  ;;  %2711 = vmatprep.mubr.f32.mxu0 %v17296_v52  ;;  %2782 = vmatprep.mubr.f32.mxu1 %v17296_v52  ;;  %v17449_v3 = vld [vmem:[#allocation28_spill] sm:$0xff] }
 0x56c   :  { %12950 = vrcp.f32 %v2463_v18  ;;  %v17455_v18 = vld [vmem:[#allocation31_spill] sm:$0xff] }
 0x56d   :  { %10884 = vmatpush1.bf16.msra.mxu0 %v13785_v59  ;;  %10916 = vmatpush1.bf16.msra.mxu1 %v14182_v51 }
 0x56e   :  { %10886 = vmatprep.subr.bf16.mxu0 %v13800_v6  ;;  %10918 = vmatprep.subr.bf16.mxu1 %v14186_v2 }
 0x571   :  { %10888 = vmatpush1.bf16.msra.mxu0 %v13808_v10  ;;  %10920 = vmatpush1.bf16.msra.mxu1 %v14189_v33 }
 0x572   :  { %10890 = vmatprep.subr.bf16.mxu0 %v13814_v16  ;;  %10922 = vmatprep.subr.bf16.mxu1 %v14192_v48 }
 0x574   :  { %v12947_v13 = vpop.eup %12946 }
 0x575   :  { %v12949_v47 = vpop.eup %12948  ;;  %v2467_v30 = vmul.f32 %v12947_v13, %v12945_v63  ;;  %10892 = vmatpush1.bf16.msra.mxu0 %v13819_v19  ;;  %10924 = vmatpush1.bf16.msra.mxu1 %v14195_v11  ;;  %v17451_v63 = vld [vmem:[#allocation29_spill] sm:$0xff] }
 0x576   :  { %v2466_v5 = vmul.f32 %v12949_v47, %v14635_v50  ;;  %10894 = vmatprep.subr.bf16.mxu0 %v13824_v21  ;;  %10926 = vmatprep.subr.bf16.mxu1 %v14198_v27  ;;  %v12951_v40 = vpop.eup %12950  ;;  %v17452_v13 = vld [vmem:[#allocation45_spill] sm:$0xff]  ;;  %v17453_v47 = vld [vmem:[#allocation30_spill] sm:$0xff] }
 0x578   :  { %v2468_v57 = vadd.f32 %v2467_v30, %v2466_v5  ;;  %v17454_v30 = vld [vmem:[#allocation46_spill] sm:$0xff]  ;;  %v17456_v5 = vld [vmem:[#allocation47_spill] sm:$0xff] }
 0x579   :  { %10896 = vmatpush1.bf16.msra.mxu0 %v13830_v26  ;;  %10928 = vmatpush1.bf16.msra.mxu1 %v14201_v29 }
 0x57a   :  { %12952 = vtanh.f32 %v2468_v57  ;;  %10898 = vmatprep.subr.bf16.mxu0 %v13836_v28  ;;  %10930 = vmatprep.subr.bf16.mxu1 %v14204_v32  ;;  %v14751_v1 = vsel %vm2485_vm1, %v2468_v57, %v14635_v50  ;;  %v17457_v57 = vld [vmem:[#allocation32_spill] sm:$0xff] }
 0x57d   :  { %10900 = vmatpush1.bf16.msra.mxu0 %v13841_v34  ;;  %10932 = vmatpush1.bf16.msra.mxu1 %v14207_v45 }
 0x57e   :  { %10902 = vmatprep.subr.bf16.mxu0 %v13847_v36  ;;  %10934 = vmatprep.subr.bf16.mxu1 %v14210_v60 }
 0x581   :  { %10904 = vmatpush1.bf16.msra.mxu0 %v13852_v42  ;;  %10936 = vmatpush1.bf16.msra.mxu1 %v14213_v12 }
 0x582   :  { %10906 = vmatprep.subr.bf16.mxu0 %v13858_v44  ;;  %10938 = vmatprep.subr.bf16.mxu1 %v14216_v24 }
 0x584   :  { %v12953_v39 = vpop.eup %12952 }
 0x585   :  { %10908 = vmatpush1.bf16.msra.mxu0 %v13875_v53  ;;  %10940 = vmatpush1.bf16.msra.mxu1 %v14219_v9  ;;  %v14763_v50 = vmul.f32 %v12953_v39, %v12951_v40  ;;  %v17458_v40 = vld [vmem:[#allocation48_spill] sm:$0xff]  ;;  %v17459_v39 = vld [vmem:[#allocation33_spill] sm:$0xff] }
 0x586   :  { %10942 = vmatprep.subr.bf16.mxu0 %v13894_v4  ;;  %10974 = vmatprep.subr.bf16.mxu1 %v14113_v20 }
 0x587   :  { %17445 = vst [vmem:[#allocation79_spill] sm:$0xff] %v14763_v50  ;;  %v14771_v31 = vsel %vm2485_vm1, %v14763_v50, %v14655_v14  ;;  %v17446_v14 = vld [vmem:[#allocation42_spill] sm:$0xff] }
 0x588   :  { %2712 = vmatmul.mubr.f32.vlgmr.msra.gmra.mrb[16].mxu0 %v14771_v31  ;;  %2783 = vmatmul.mubr.f32.vlgmr.msra.gmra.mrb[54].mxu1 %v14771_v31  ;;  %v17461_v50 = vld [vmem:[#allocation34_spill] sm:$0xff] }
 0x589   :  { %10944 = vmatpush1.bf16.msra.mxu0 %v13906_v15  ;;  %10976 = vmatpush1.bf16.msra.mxu1 %v14121_v35 }
 0x58a   :  { %10946 = vmatprep.subr.bf16.mxu0 %v13915_v23  ;;  %10978 = vmatprep.subr.bf16.mxu1 %v17370_v38 }
 0x58b   :  { %2919 = vmatprep.mubr.f32.mxu0 %v17296_v52  ;;  %2990 = vmatprep.mubr.f32.mxu1 %v17296_v52 }
 0x58d   :  { %10948 = vmatpush1.bf16.msra.mxu0 %v17371_v25  ;;  %10980 = vmatpush1.bf16.msra.mxu1 %v17446_v14 }
 0x58e   :  { %10950 = vmatprep.subr.bf16.mxu0 %v17447_v56  ;;  %10982 = vmatprep.subr.bf16.mxu1 %v17448_v43 }
 0x591   :  { %10952 = vmatpush1.bf16.msra.mxu0 %v17449_v3  ;;  %10984 = vmatpush1.bf16.msra.mxu1 %v17450_v0 }
 0x592   :  { %10954 = vmatprep.subr.bf16.mxu0 %v17451_v63  ;;  %10986 = vmatprep.subr.bf16.mxu1 %v17452_v13  ;;  %v17462_v63 = vld [vmem:[#allocation50_spill] sm:$0xff]  ;;  %v17463_v13 = vld [vmem:[#allocation35_spill] sm:$0xff] }
 0x595   :  { %10956 = vmatpush1.bf16.msra.mxu0 %v17453_v47  ;;  %10988 = vmatpush1.bf16.msra.mxu1 %v17454_v30  ;;  %v17464_v47 = vld [vmem:[#allocation51_spill] sm:$0xff]  ;;  %v17465_v30 = vld [vmem:[#allocation36_spill] sm:$0xff] }
 0x596   :  { %10958 = vmatprep.subr.bf16.mxu0 %v17455_v18  ;;  %10990 = vmatprep.subr.bf16.mxu1 %v17456_v5  ;;  %v17466_v18 = vld [vmem:[#allocation52_spill] sm:$0xff]  ;;  %v17467_v5 = vld [vmem:[#allocation37_spill] sm:$0xff] }
 0x599   :  { %10960 = vmatpush1.bf16.msra.mxu0 %v17457_v57  ;;  %10992 = vmatpush1.bf16.msra.mxu1 %v17458_v40  ;;  %v17468_v57 = vld [vmem:[#allocation53_spill] sm:$0xff]  ;;  %v17469_v40 = vld [vmem:[#allocation38_spill] sm:$0xff] }
 0x59a   :  { %10962 = vmatprep.subr.bf16.mxu0 %v17459_v39  ;;  %10994 = vmatprep.subr.bf16.mxu1 %v17460_v61  ;;  %v17470_v39 = vld [vmem:[#allocation54_spill] sm:$0xff]  ;;  %v17471_v61 = vld [vmem:[#allocation25_spill] sm:$0xff] }
 0x59d   :  { %10964 = vmatpush1.bf16.msra.mxu0 %v17461_v50  ;;  %10996 = vmatpush1.bf16.msra.mxu1 %v17462_v63  ;;  %v17472_v50 = vld [vmem:[#allocation55_spill] sm:$0xff]  ;;  %v17473_v63 = vld [vmem:[#allocation88_spill] sm:$0xff] }
 0x59e   :  { %10966 = vmatprep.subr.bf16.mxu0 %v17463_v13  ;;  %10998 = vmatprep.subr.bf16.mxu1 %v17464_v47  ;;  %v17474_v13 = vld [vmem:[#allocation62_spill] sm:$0xff]  ;;  %v17475_v47 = vld [vmem:[#allocation63_spill] sm:$0xff] }
 0x59f   :  { %v439_v0 = vadd.f32 %v17474_v13, %v17473_v63 }
 0x5a1   :  { %10968 = vmatpush1.bf16.msra.mxu0 %v17465_v30  ;;  %11000 = vmatpush1.bf16.msra.mxu1 %v17466_v18  ;;  %v441_v30 = vadd.f32 %v17475_v47, %v17362_v58 }
 0x5a2   :  { %10970 = vmatprep.subr.bf16.mxu0 %v17467_v5  ;;  %11002 = vmatprep.subr.bf16.mxu1 %v17468_v57 }
 0x5a5   :  { %10972 = vmatpush1.bf16.msra.mxu0 %v17469_v40  ;;  %11004 = vmatpush1.bf16.msra.mxu1 %v17470_v39 }
 0x5a6   :  { %11006 = vmatprep.subr.bf16.mxu0 %v17471_v61  ;;  %11038 = vmatprep.subr.bf16.mxu1 %v17472_v50  ;;  %v17476_v50 = vld [vmem:[#allocation90_spill] sm:$0xff] }
 0x63b   :  { %v2563_v3 = vpop.f32.mrb[14].mxu0  ;;  %v2634_v18 = vpop.f32.mrb[24].mxu1 }
 0x63c   :  { %v2639_v43 = vadd.f32 %v2563_v3, %v439_v0  ;;  %v2565_v5 = vpop.f32.mrb[15].mxu0  ;;  %v2636_v56 = vpop.f32.mrb[25].mxu1  ;;  %v12598_v25 = vadd.f32 %v2634_v18, %v17476_v50  ;;  %v17477_v18 = vld [vmem:[#allocation77_spill] sm:$0xff] }
 0x63d   :  { %v2640_v57 = vadd.f32 %v2565_v5, %v441_v30  ;;  %v12599_v61 = vadd.f32 %v2636_v56, %v14345_v7 }
 0x63e   :  { %v8873_v14 = vmul.f32 -1.442695, %v2639_v43 }
 0x63f   :  { %v8874_v40 = vmul.f32 -1.442695, %v2640_v57  ;;  %v8875_v39 = vmul.f32 -1.442695, %v12599_v61 }
 0x640   :  { %12954 = vpow2.f32 %v8873_v14 }
 0x641   :  { %12956 = vpow2.f32 %v8874_v40 }
 0x642   :  { %12958 = vpow2.f32 %v8875_v39 }
 0x643   :  { %12960 = vtanh.f32 %v12598_v25  ;;  %v17478_v25 = vld [vmem:[#allocation78_spill] sm:$0xff] }
 0x64a   :  { %v12955_v38 = vpop.eup %12954 }
 0x64b   :  { %v12957_v13 = vpop.eup %12956  ;;  %v2796_v63 = vadd.f32 1.0, %v12955_v38 }
 0x64c   :  { %v2802_v47 = vadd.f32 1.0, %v12957_v13  ;;  %v12959_v3 = vpop.eup %12958 }
 0x64d   :  { %12962 = vrcp.f32 %v2796_v63  ;;  %v12961_v0 = vpop.eup %12960  ;;  %v2809_v14 = vadd.f32 1.0, %v12959_v3 }
 0x64e   :  { %12964 = vrcp.f32 %v2802_v47 }
 0x64f   :  { %12966 = vrcp.f32 %v2809_v14 }
 0x657   :  { %v12963_v30 = vpop.eup %12962 }
 0x658   :  { %v12965_v43 = vpop.eup %12964  ;;  %v2813_v5 = vmul.f32 %v12963_v30, %v12961_v0 }
 0x659   :  { %v2812_v57 = vmul.f32 %v12965_v43, %v14708_v8  ;;  %v12967_v30 = vpop.eup %12966 }
 0x65b   :  { %v2814_v56 = vadd.f32 %v2813_v5, %v2812_v57  ;;  %v2713_v61 = vpop.f32.mrb[16].mxu0  ;;  %v2784_v40 = vpop.f32.mrb[54].mxu1 }
 0x65c   :  { %v2789_v50 = vadd.f32 %v2713_v61, %v17477_v18  ;;  %v2715_v38 = vpop.f32.mrb[17].mxu0  ;;  %v2786_v39 = vpop.f32.mrb[55].mxu1  ;;  %v12644_v14 = vadd.f32 %v2784_v40, %v14355_v17 }
 0x65d   :  { %12968 = vtanh.f32 %v2814_v56  ;;  %v2790_v63 = vadd.f32 %v2715_v38, %v17478_v25  ;;  %v14821_v13 = vsel %vm2485_vm1, %v2814_v56, %v14708_v8  ;;  %v12645_v0 = vadd.f32 %v2786_v39, %v14362_v22 }
 0x65e   :  { %v8876_v47 = vmul.f32 -1.442695, %v2789_v50 }
 0x65f   :  { %v8877_v3 = vmul.f32 -1.442695, %v2790_v63  ;;  %v8878_v5 = vmul.f32 -1.442695, %v12645_v0 }
 0x660   :  { %12970 = vpow2.f32 %v8876_v47 }
 0x661   :  { %12972 = vpow2.f32 %v8877_v3 }
 0x662   :  { %12974 = vpow2.f32 %v8878_v5 }
 0x663   :  { %12976 = vtanh.f32 %v12644_v14  ;;  %v17481_v14 = vld [vmem:[#allocation41_spill] sm:$0xff] }
 0x667   :  { %v12969_v43 = vpop.eup %12968 }
 0x668   :  { %v14825_v57 = vmul.f32 %v12969_v43, %v12967_v30 }
 0x66a   :  { %17479 = vst [vmem:[#allocation80_spill] sm:$0xff] %v14825_v57  ;;  %v12971_v61 = vpop.eup %12970  ;;  %v14831_v8 = vsel %vm2485_vm1, %v14825_v57, %v14718_v54  ;;  %v17497_v57 = vld [vmem:[#allocation49_spill] sm:$0xff] }
 0x66b   :  { %v12973_v50 = vpop.eup %12972  ;;  %v2820_v56 = vadd.f32 1.0, %v12971_v61  ;;  %2920 = vmatmul.mubr.f32.vlgmr.msra.gmra.mrb[18].mxu0 %v14831_v8  ;;  %2991 = vmatmul.mubr.f32.vlgmr.msra.gmra.mrb[26].mxu1 %v14831_v8  ;;  %v17482_v61 = vld [vmem:[#allocation26_spill] sm:$0xff] }
 0x66c   :  { %v2826_v18 = vadd.f32 1.0, %v12973_v50  ;;  %11008 = vmatpush1.bf16.msra.mxu0 %v13771_v49  ;;  %11040 = vmatpush1.bf16.msra.mxu1 %v14175_v37  ;;  %v12975_v54 = vpop.eup %12974  ;;  %v17484_v50 = vld [vmem:[#allocation27_spill] sm:$0xff] }
 0x66d   :  { %12978 = vrcp.f32 %v2820_v56  ;;  %11010 = vmatprep.subr.bf16.mxu0 %v13780_v55  ;;  %11042 = vmatprep.subr.bf16.mxu1 %v14178_v41  ;;  %v12977_v40 = vpop.eup %12976  ;;  %v2833_v63 = vadd.f32 1.0, %v12975_v54  ;;  %v17485_v56 = vld [vmem:[#allocation43_spill] sm:$0xff]  ;;  %v17487_v54 = vld [vmem:[#allocation44_spill] sm:$0xff] }
 0x66e   :  { %12980 = vrcp.f32 %v2826_v18  ;;  %3069 = vmatprep.mubr.f32.mxu0 %v17296_v52  ;;  %3140 = vmatprep.mubr.f32.mxu1 %v17296_v52  ;;  %v17486_v18 = vld [vmem:[#allocation28_spill] sm:$0xff] }
 0x66f   :  { %12982 = vrcp.f32 %v2833_v63  ;;  %v17492_v63 = vld [vmem:[#allocation31_spill] sm:$0xff] }
 0x670   :  { %11012 = vmatpush1.bf16.msra.mxu0 %v13785_v59  ;;  %11044 = vmatpush1.bf16.msra.mxu1 %v14182_v51 }
 0x671   :  { %11014 = vmatprep.subr.bf16.mxu0 %v13800_v6  ;;  %11046 = vmatprep.subr.bf16.mxu1 %v14186_v2 }
 0x674   :  { %11016 = vmatpush1.bf16.msra.mxu0 %v13808_v10  ;;  %11048 = vmatpush1.bf16.msra.mxu1 %v14189_v33 }
 0x675   :  { %11018 = vmatprep.subr.bf16.mxu0 %v13814_v16  ;;  %11050 = vmatprep.subr.bf16.mxu1 %v14192_v48 }
 0x677   :  { %v12979_v38 = vpop.eup %12978 }
 0x678   :  { %v12981_v39 = vpop.eup %12980  ;;  %v2837_v25 = vmul.f32 %v12979_v38, %v12977_v40  ;;  %11020 = vmatpush1.bf16.msra.mxu0 %v13819_v19  ;;  %11052 = vmatpush1.bf16.msra.mxu1 %v14195_v11  ;;  %v17488_v40 = vld [vmem:[#allocation29_spill] sm:$0xff] }
 0x679   :  { %v2836_v47 = vmul.f32 %v12981_v39, %v14751_v1  ;;  %11022 = vmatprep.subr.bf16.mxu0 %v13824_v21  ;;  %11054 = vmatprep.subr.bf16.mxu1 %v14198_v27  ;;  %v12983_v30 = vpop.eup %12982  ;;  %v17489_v38 = vld [vmem:[#allocation45_spill] sm:$0xff]  ;;  %v17490_v39 = vld [vmem:[#allocation30_spill] sm:$0xff] }
 0x67b   :  { %v2838_v3 = vadd.f32 %v2837_v25, %v2836_v47  ;;  %v17491_v25 = vld [vmem:[#allocation46_spill] sm:$0xff]  ;;  %v17493_v47 = vld [vmem:[#allocation47_spill] sm:$0xff] }
 0x67c   :  { %11024 = vmatpush1.bf16.msra.mxu0 %v13830_v26  ;;  %11056 = vmatpush1.bf16.msra.mxu1 %v14201_v29 }
 0x67d   :  { %12984 = vtanh.f32 %v2838_v3  ;;  %11026 = vmatprep.subr.bf16.mxu0 %v13836_v28  ;;  %11058 = vmatprep.subr.bf16.mxu1 %v14204_v32  ;;  %v14861_v0 = vsel %vm2477_vm0, %v2838_v3, %v14751_v1  ;;  %v17494_v3 = vld [vmem:[#allocation32_spill] sm:$0xff] }
 0x680   :  { %11028 = vmatpush1.bf16.msra.mxu0 %v13841_v34  ;;  %11060 = vmatpush1.bf16.msra.mxu1 %v14207_v45 }
 0x681   :  { %11030 = vmatprep.subr.bf16.mxu0 %v13847_v36  ;;  %11062 = vmatprep.subr.bf16.mxu1 %v14210_v60 }
 0x684   :  { %11032 = vmatpush1.bf16.msra.mxu0 %v13852_v42  ;;  %11064 = vmatpush1.bf16.msra.mxu1 %v14213_v12 }
 0x685   :  { %11034 = vmatprep.subr.bf16.mxu0 %v13858_v44  ;;  %11066 = vmatprep.subr.bf16.mxu1 %v14216_v24 }
 0x687   :  { %v12985_v43 = vpop.eup %12984 }
 0x688   :  { %11036 = vmatpush1.bf16.msra.mxu0 %v13875_v53  ;;  %11068 = vmatpush1.bf16.msra.mxu1 %v14219_v9  ;;  %v14873_v1 = vmul.f32 %v12985_v43, %v12983_v30  ;;  %v17495_v30 = vld [vmem:[#allocation48_spill] sm:$0xff]  ;;  %v17496_v43 = vld [vmem:[#allocation33_spill] sm:$0xff] }
 0x689   :  { %11070 = vmatprep.subr.bf16.mxu0 %v13894_v4  ;;  %11102 = vmatprep.subr.bf16.mxu1 %v14113_v20 }
 0x68a   :  { %17480 = vst [vmem:[#allocation62_spill] sm:$0xff] %v14873_v1  ;;  %v14881_v5 = vsel %vm2477_vm0, %v14873_v1, %v14771_v31  ;;  %v17483_v31 = vld [vmem:[#allocation42_spill] sm:$0xff]  ;;  %v17500_v1 = vld [vmem:[#allocation35_spill] sm:$0xff] }
 0x68b   :  { %3070 = vmatmul.mubr.f32.vlgmr.msra.gmra.mrb[20].mxu0 %v14881_v5  ;;  %3141 = vmatmul.mubr.f32.vlgmr.msra.gmra.mrb[52].mxu1 %v14881_v5 }
 0x68c   :  { %11072 = vmatpush1.bf16.msra.mxu0 %v13906_v15  ;;  %11104 = vmatpush1.bf16.msra.mxu1 %v14121_v35 }
 0x68d   :  { %11074 = vmatprep.subr.bf16.mxu0 %v13915_v23  ;;  %11106 = vmatprep.subr.bf16.mxu1 %v17481_v14 }
 0x68e   :  { %3277 = vmatprep.mubr.f32.mxu0 %v17296_v52  ;;  %3348 = vmatprep.mubr.f32.mxu1 %v17296_v52 }
 0x690   :  { %11076 = vmatpush1.bf16.msra.mxu0 %v17482_v61  ;;  %11108 = vmatpush1.bf16.msra.mxu1 %v17483_v31 }
 0x691   :  { %11078 = vmatprep.subr.bf16.mxu0 %v17484_v50  ;;  %11110 = vmatprep.subr.bf16.mxu1 %v17485_v56 }
 0x694   :  { %11080 = vmatpush1.bf16.msra.mxu0 %v17486_v18  ;;  %11112 = vmatpush1.bf16.msra.mxu1 %v17487_v54 }
 0x695   :  { %11082 = vmatprep.subr.bf16.mxu0 %v17488_v40  ;;  %11114 = vmatprep.subr.bf16.mxu1 %v17489_v38 }
 0x698   :  { %11084 = vmatpush1.bf16.msra.mxu0 %v17490_v39  ;;  %11116 = vmatpush1.bf16.msra.mxu1 %v17491_v25  ;;  %v17501_v39 = vld [vmem:[#allocation51_spill] sm:$0xff]  ;;  %v17502_v25 = vld [vmem:[#allocation36_spill] sm:$0xff] }
 0x699   :  { %11086 = vmatprep.subr.bf16.mxu0 %v17492_v63  ;;  %11118 = vmatprep.subr.bf16.mxu1 %v17493_v47  ;;  %v17503_v63 = vld [vmem:[#allocation52_spill] sm:$0xff]  ;;  %v17504_v47 = vld [vmem:[#allocation37_spill] sm:$0xff] }
 0x69c   :  { %11088 = vmatpush1.bf16.msra.mxu0 %v17494_v3  ;;  %11120 = vmatpush1.bf16.msra.mxu1 %v17495_v30  ;;  %v17505_v3 = vld [vmem:[#allocation53_spill] sm:$0xff]  ;;  %v17506_v30 = vld [vmem:[#allocation38_spill] sm:$0xff] }
 0x69d   :  { %11090 = vmatprep.subr.bf16.mxu0 %v17496_v43  ;;  %11122 = vmatprep.subr.bf16.mxu1 %v17497_v57  ;;  %v17507_v43 = vld [vmem:[#allocation54_spill] sm:$0xff]  ;;  %v17508_v57 = vld [vmem:[#allocation25_spill] sm:$0xff] }
 0x6a0   :  { %11092 = vmatpush1.bf16.msra.mxu0 %v17498_v62  ;;  %11124 = vmatpush1.bf16.msra.mxu1 %v17499_v46  ;;  %v17509_v62 = vld [vmem:[#allocation55_spill] sm:$0xff]  ;;  %v17510_v46 = vld [vmem:[#allocation88_spill] sm:$0xff] }
 0x6a1   :  { %11094 = vmatprep.subr.bf16.mxu0 %v17500_v1  ;;  %11126 = vmatprep.subr.bf16.mxu1 %v17501_v39  ;;  %v17511_v1 = vld [vmem:[#allocation64_spill] sm:$0xff]  ;;  %v17512_v39 = vld [vmem:[#allocation65_spill] sm:$0xff] }
 0x6a2   :  { %v445_v38 = vadd.f32 %v17511_v1, %v17510_v46 }
 0x6a4   :  { %11096 = vmatpush1.bf16.msra.mxu0 %v17502_v25  ;;  %11128 = vmatpush1.bf16.msra.mxu1 %v17503_v63  ;;  %v447_v25 = vadd.f32 %v17512_v39, %v17362_v58 }
 0x6a5   :  { %11098 = vmatprep.subr.bf16.mxu0 %v17504_v47  ;;  %11130 = vmatprep.subr.bf16.mxu1 %v17505_v3 }
 0x6a8   :  { %11100 = vmatpush1.bf16.msra.mxu0 %v17506_v30  ;;  %11132 = vmatpush1.bf16.msra.mxu1 %v17507_v43 }
 0x6a9   :  { %11134 = vmatprep.subr.bf16.mxu0 %v17508_v57  ;;  %11166 = vmatprep.subr.bf16.mxu1 %v17509_v62  ;;  %v17513_v62 = vld [vmem:[#allocation90_spill] sm:$0xff] }
 0x73e   :  { %v2921_v40 = vpop.f32.mrb[18].mxu0  ;;  %v2992_v63 = vpop.f32.mrb[26].mxu1 }
 0x73f   :  { %v2997_v54 = vadd.f32 %v2921_v40, %v445_v38  ;;  %v2923_v47 = vpop.f32.mrb[19].mxu0  ;;  %v2994_v18 = vpop.f32.mrb[27].mxu1  ;;  %v12600_v50 = vadd.f32 %v2992_v63, %v17513_v62  ;;  %v17514_v63 = vld [vmem:[#allocation75_spill] sm:$0xff] }
 0x740   :  { %v2998_v3 = vadd.f32 %v2923_v47, %v447_v25  ;;  %v12601_v57 = vadd.f32 %v2994_v18, %v14345_v7 }
 0x741   :  { %v8879_v56 = vmul.f32 -1.442695, %v2997_v54 }
 0x742   :  { %v8880_v30 = vmul.f32 -1.442695, %v2998_v3  ;;  %v8881_v43 = vmul.f32 -1.442695, %v12601_v57 }
 0x743   :  { %12986 = vpow2.f32 %v8879_v56 }
 0x744   :  { %12988 = vpow2.f32 %v8880_v30 }
 0x745   :  { %12990 = vpow2.f32 %v8881_v43 }
 0x746   :  { %12992 = vtanh.f32 %v12600_v50  ;;  %v17515_v50 = vld [vmem:[#allocation76_spill] sm:$0xff] }
 0x74d   :  { %v12987_v31 = vpop.eup %12986 }
 0x74e   :  { %v12989_v1 = vpop.eup %12988  ;;  %v3154_v46 = vadd.f32 1.0, %v12987_v31 }
 0x74f   :  { %v3160_v39 = vadd.f32 1.0, %v12989_v1  ;;  %v12991_v40 = vpop.eup %12990  ;;  %v4977_v1 = vld [vmem:[%s17032_s10 + $0x150] sm:$0xff] }
 0x750   :  { %12994 = vrcp.f32 %v3154_v46  ;;  %v12993_v38 = vpop.eup %12992  ;;  %v3167_v56 = vadd.f32 1.0, %v12991_v40 }
 0x751   :  { %12996 = vrcp.f32 %v3160_v39 }
 0x752   :  { %12998 = vrcp.f32 %v3167_v56 }
 0x75a   :  { %v12995_v25 = vpop.eup %12994 }
 0x75b   :  { %v12997_v54 = vpop.eup %12996  ;;  %v3171_v47 = vmul.f32 %v12995_v25, %v12993_v38 }
 0x75c   :  { %v3170_v3 = vmul.f32 %v12997_v54, %v14821_v13  ;;  %v12999_v54 = vpop.eup %12998 }
 0x75e   :  { %v3172_v18 = vadd.f32 %v3171_v47, %v3170_v3  ;;  %v3071_v57 = vpop.f32.mrb[20].mxu0  ;;  %v3142_v30 = vpop.f32.mrb[52].mxu1 }
 0x75f   :  { %v3147_v62 = vadd.f32 %v3071_v57, %v17514_v63  ;;  %v3073_v31 = vpop.f32.mrb[21].mxu0  ;;  %v3144_v43 = vpop.f32.mrb[53].mxu1  ;;  %v12642_v3 = vadd.f32 %v3142_v30, %v14355_v17 }
 0x760   :  { %13000 = vtanh.f32 %v3172_v18  ;;  %v3148_v46 = vadd.f32 %v3073_v31, %v17515_v50  ;;  %v14931_v39 = vsel %vm2109_vm15, %v3172_v18, %v14821_v13  ;;  %v12643_v25 = vadd.f32 %v3144_v43, %v14362_v22 }
 0x761   :  { %v8882_v38 = vmul.f32 -1.442695, %v3147_v62 }
 0x762   :  { %v8883_v40 = vmul.f32 -1.442695, %v3148_v46  ;;  %v8884_v56 = vmul.f32 -1.442695, %v12643_v25 }
 0x763   :  { %13002 = vpow2.f32 %v8882_v38 }
 0x764   :  { %13004 = vpow2.f32 %v8883_v40 }
 0x765   :  { %13006 = vpow2.f32 %v8884_v56 }
 0x766   :  { %13008 = vtanh.f32 %v12642_v3 }
 0x76a   :  { %v13001_v47 = vpop.eup %13000 }
 0x76b   :  { %v14935_v57 = vmul.f32 %v13001_v47, %v12999_v54  ;;  %v4980_v54 = vld [vmem:[%s17032_s10 + $0x168] sm:$0xff] }
 0x76d   :  { %v13003_v63 = vpop.eup %13002  ;;  %v14941_v13 = vsel %vm2109_vm15, %v14935_v57, %v14831_v8 }
 0x76e   :  { %v13005_v62 = vpop.eup %13004  ;;  %v3178_v18 = vadd.f32 1.0, %v13003_v63  ;;  %3278 = vmatmul.mubr.f32.vlgmr.msra.gmra.mrb[22].mxu0 %v14941_v13  ;;  %3349 = vmatmul.mubr.f32.vlgmr.msra.gmra.mrb[28].mxu1 %v14941_v13 }
 0x76f   :  { %v3184_v31 = vadd.f32 1.0, %v13005_v62  ;;  %11136 = vmatpush1.bf16.msra.mxu0 %v13771_v49  ;;  %11168 = vmatpush1.bf16.msra.mxu1 %v14175_v37  ;;  %v13007_v8 = vpop.eup %13006  ;;  %v17521_v62 = vld [vmem:[#allocation28_spill] sm:$0xff] }
 0x770   :  { %13010 = vrcp.f32 %v3178_v18  ;;  %11138 = vmatprep.subr.bf16.mxu0 %v13780_v55  ;;  %11170 = vmatprep.subr.bf16.mxu1 %v14178_v41  ;;  %v13009_v30 = vpop.eup %13008  ;;  %v3191_v38 = vadd.f32 1.0, %v13007_v8  ;;  %v17526_v18 = vld [vmem:[#allocation46_spill] sm:$0xff]  ;;  %v17529_v8 = vld [vmem:[#allocation32_spill] sm:$0xff] }
 0x771   :  { %13012 = vrcp.f32 %v3184_v31  ;;  %3427 = vmatprep.mubr.f32.mxu0 %v17296_v52  ;;  %3498 = vmatprep.mubr.f32.mxu1 %v17296_v52  ;;  %v17527_v31 = vld [vmem:[#allocation31_spill] sm:$0xff] }
 0x772   :  { %13014 = vrcp.f32 %v3191_v38  ;;  %v17534_v38 = vld [vmem:[#allocation50_spill] sm:$0xff] }
 0x773   :  { %11140 = vmatpush1.bf16.msra.mxu0 %v13785_v59  ;;  %11172 = vmatpush1.bf16.msra.mxu1 %v14182_v51 }
 0x774   :  { %11142 = vmatprep.subr.bf16.mxu0 %v13800_v6  ;;  %11174 = vmatprep.subr.bf16.mxu1 %v14186_v2 }
 0x777   :  { %11144 = vmatpush1.bf16.msra.mxu0 %v13808_v10  ;;  %11176 = vmatpush1.bf16.msra.mxu1 %v14189_v33 }
 0x778   :  { %11146 = vmatprep.subr.bf16.mxu0 %v13814_v16  ;;  %11178 = vmatprep.subr.bf16.mxu1 %v14192_v48 }
 0x77a   :  { %v13011_v43 = vpop.eup %13010 }
 0x77b   :  { %v13013_v50 = vpop.eup %13012  ;;  %v3195_v46 = vmul.f32 %v13011_v43, %v13009_v30  ;;  %11148 = vmatpush1.bf16.msra.mxu0 %v13819_v19  ;;  %11180 = vmatpush1.bf16.msra.mxu1 %v14195_v11  ;;  %v17530_v30 = vld [vmem:[#allocation48_spill] sm:$0xff]  ;;  %v17531_v43 = vld [vmem:[#allocation33_spill] sm:$0xff] }
 0x77c   :  { %v3194_v40 = vmul.f32 %v13013_v50, %v14861_v0  ;;  %11150 = vmatprep.subr.bf16.mxu0 %v13824_v21  ;;  %11182 = vmatprep.subr.bf16.mxu1 %v14198_v27  ;;  %v13015_v56 = vpop.eup %13014  ;;  %v17532_v50 = vld [vmem:[#allocation49_spill] sm:$0xff] }
 0x77e   :  { %v3196_v25 = vadd.f32 %v3195_v46, %v3194_v40  ;;  %v17533_v46 = vld [vmem:[#allocation34_spill] sm:$0xff]  ;;  %v17535_v40 = vld [vmem:[#allocation35_spill] sm:$0xff] }
 0x77f   :  { %11152 = vmatpush1.bf16.msra.mxu0 %v13830_v26  ;;  %11184 = vmatpush1.bf16.msra.mxu1 %v14201_v29 }
 0x780   :  { %13016 = vtanh.f32 %v3196_v25  ;;  %11154 = vmatprep.subr.bf16.mxu0 %v13836_v28  ;;  %11186 = vmatprep.subr.bf16.mxu1 %v14204_v32  ;;  %v14971_v47 = vsel %vm2101_vm14, %v3196_v25, %v14861_v0  ;;  %v17536_v25 = vld [vmem:[#allocation51_spill] sm:$0xff] }
 0x783   :  { %11156 = vmatpush1.bf16.msra.mxu0 %v13841_v34  ;;  %11188 = vmatpush1.bf16.msra.mxu1 %v14207_v45 }
 0x784   :  { %11158 = vmatprep.subr.bf16.mxu0 %v13847_v36  ;;  %11190 = vmatprep.subr.bf16.mxu1 %v14210_v60 }
 0x787   :  { %11160 = vmatpush1.bf16.msra.mxu0 %v13852_v42  ;;  %11192 = vmatpush1.bf16.msra.mxu1 %v14213_v12 }
 0x788   :  { %11162 = vmatprep.subr.bf16.mxu0 %v13858_v44  ;;  %11194 = vmatprep.subr.bf16.mxu1 %v14216_v24 }
 0x78a   :  { %v13017_v3 = vpop.eup %13016 }
 0x78b   :  { %11164 = vmatpush1.bf16.msra.mxu0 %v13875_v53  ;;  %11196 = vmatpush1.bf16.msra.mxu1 %v14219_v9  ;;  %v14983_v0 = vmul.f32 %v13017_v3, %v13015_v56  ;;  %v17537_v56 = vld [vmem:[#allocation36_spill] sm:$0xff] }
 0x78c   :  { %11198 = vmatprep.subr.bf16.mxu0 %v13894_v4  ;;  %11230 = vmatprep.subr.bf16.mxu1 %v14113_v20  ;;  %v17518_v4 = vld [vmem:[#allocation42_spill] sm:$0xff]  ;;  %v17519_v20 = vld [vmem:[#allocation27_spill] sm:$0xff]  ;;  %v17538_v3 = vld [vmem:[#allocation52_spill] sm:$0xff] }
 0x78d   :  { %v14991_v63 = vsel %vm2101_vm14, %v14983_v0, %v14881_v5  ;;  %v17520_v5 = vld [vmem:[#allocation43_spill] sm:$0xff] }
 0x78e   :  { %3428 = vmatmul.mubr.f32.vlgmr.msra.gmra.mrb[24].mxu0 %v14991_v63  ;;  %3499 = vmatmul.mubr.f32.vlgmr.msra.gmra.mrb[50].mxu1 %v14991_v63 }
 0x78f   :  { %11200 = vmatpush1.bf16.msra.mxu0 %v13906_v15  ;;  %11232 = vmatpush1.bf16.msra.mxu1 %v14121_v35  ;;  %v17522_v15 = vld [vmem:[#allocation44_spill] sm:$0xff]  ;;  %v17523_v35 = vld [vmem:[#allocation29_spill] sm:$0xff] }
 0x790   :  { %11202 = vmatprep.subr.bf16.mxu0 %v13915_v23  ;;  %11234 = vmatprep.subr.bf16.mxu1 %v17481_v14  ;;  %v17524_v23 = vld [vmem:[#allocation45_spill] sm:$0xff]  ;;  %v17525_v14 = vld [vmem:[#allocation30_spill] sm:$0xff] }
 0x791   :  { %3635 = vmatprep.mubr.f32.mxu0 %v17296_v52  ;;  %3706 = vmatprep.mubr.f32.mxu1 %v17296_v52 }
 0x793   :  { %11204 = vmatpush1.bf16.msra.mxu0 %v17482_v61  ;;  %11236 = vmatpush1.bf16.msra.mxu1 %v17518_v4  ;;  %v17528_v61 = vld [vmem:[#allocation47_spill] sm:$0xff]  ;;  %v17539_v4 = vld [vmem:[#allocation37_spill] sm:$0xff] }
 0x794   :  { %11206 = vmatprep.subr.bf16.mxu0 %v17519_v20  ;;  %11238 = vmatprep.subr.bf16.mxu1 %v17520_v5  ;;  %v17540_v20 = vld [vmem:[#allocation53_spill] sm:$0xff]  ;;  %v17541_v5 = vld [vmem:[#allocation38_spill] sm:$0xff] }
 0x797   :  { %11208 = vmatpush1.bf16.msra.mxu0 %v17521_v62  ;;  %11240 = vmatpush1.bf16.msra.mxu1 %v17522_v15  ;;  %v17542_v62 = vld [vmem:[#allocation54_spill] sm:$0xff]  ;;  %v17543_v15 = vld [vmem:[#allocation25_spill] sm:$0xff] }
 0x798   :  { %11210 = vmatprep.subr.bf16.mxu0 %v17523_v35  ;;  %11242 = vmatprep.subr.bf16.mxu1 %v17524_v23  ;;  %v17544_v35 = vld [vmem:[#allocation55_spill] sm:$0xff]  ;;  %v17545_v23 = vld [vmem:[#allocation88_spill] sm:$0xff] }
 0x79b   :  { %11212 = vmatpush1.bf16.msra.mxu0 %v17525_v14  ;;  %11244 = vmatpush1.bf16.msra.mxu1 %v17526_v18  ;;  %v17546_v14 = vld [vmem:[#allocation66_spill] sm:$0xff] }
 0x79c   :  { %11214 = vmatprep.subr.bf16.mxu0 %v17527_v31  ;;  %11246 = vmatprep.subr.bf16.mxu1 %v17528_v61  ;;  %v451_v18 = vadd.f32 %v17546_v14, %v17545_v23  ;;  %v17547_v31 = vld [vmem:[#allocation67_spill] sm:$0xff] }
 0x79d   :  { %v453_v61 = vadd.f32 %v17547_v31, %v17362_v58 }
 0x79f   :  { %11216 = vmatpush1.bf16.msra.mxu0 %v17529_v8  ;;  %11248 = vmatpush1.bf16.msra.mxu1 %v17530_v30 }
 0x7a0   :  { %11218 = vmatprep.subr.bf16.mxu0 %v17531_v43  ;;  %11250 = vmatprep.subr.bf16.mxu1 %v17532_v50 }
 0x7a3   :  { %11220 = vmatpush1.bf16.msra.mxu0 %v17533_v46  ;;  %11252 = vmatpush1.bf16.msra.mxu1 %v17534_v38 }
 0x7a4   :  { %11222 = vmatprep.subr.bf16.mxu0 %v17535_v40  ;;  %11254 = vmatprep.subr.bf16.mxu1 %v17536_v25 }
 0x7a7   :  { %11224 = vmatpush1.bf16.msra.mxu0 %v17537_v56  ;;  %11256 = vmatpush1.bf16.msra.mxu1 %v17538_v3 }
 0x7a8   :  { %11226 = vmatprep.subr.bf16.mxu0 %v17539_v4  ;;  %11258 = vmatprep.subr.bf16.mxu1 %v17540_v20  ;;  %v17548_v4 = vld [vmem:[#allocation90_spill] sm:$0xff] }
 0x7ab   :  { %11228 = vmatpush1.bf16.msra.mxu0 %v17541_v5  ;;  %11260 = vmatpush1.bf16.msra.mxu1 %v17542_v62 }
 0x7ac   :  { %11262 = vmatprep.subr.bf16.mxu0 %v17543_v15  ;;  %11294 = vmatprep.subr.bf16.mxu1 %v17544_v35 }
 0x841   :  { %v3279_v8 = vpop.f32.mrb[22].mxu0  ;;  %v3350_v30 = vpop.f32.mrb[28].mxu1 }
 0x842   :  { %v3355_v43 = vadd.f32 %v3279_v8, %v451_v18  ;;  %v3281_v50 = vpop.f32.mrb[23].mxu0  ;;  %v3352_v46 = vpop.f32.mrb[29].mxu1  ;;  %v12602_v20 = vadd.f32 %v3350_v30, %v17548_v4  ;;  %v17549_v30 = vld [vmem:[#allocation73_spill] sm:$0xff] }
 0x843   :  { %v3356_v38 = vadd.f32 %v3281_v50, %v453_v61  ;;  %v12603_v56 = vadd.f32 %v3352_v46, %v14345_v7 }
 0x844   :  { %v8885_v40 = vmul.f32 -1.442695, %v3355_v43 }
 0x845   :  { %v8886_v25 = vmul.f32 -1.442695, %v3356_v38  ;;  %v8887_v3 = vmul.f32 -1.442695, %v12603_v56 }
 0x846   :  { %13018 = vpow2.f32 %v8885_v40 }
 0x847   :  { %13020 = vpow2.f32 %v8886_v25 }
 0x848   :  { %13022 = vpow2.f32 %v8887_v3 }
 0x849   :  { %13024 = vtanh.f32 %v12602_v20  ;;  %v17550_v20 = vld [vmem:[#allocation74_spill] sm:$0xff] }
 0x850   :  { %v13019_v5 = vpop.eup %13018 }
 0x851   :  { %v13021_v62 = vpop.eup %13020  ;;  %v3512_v15 = vadd.f32 1.0, %v13019_v5 }
 0x852   :  { %v3518_v35 = vadd.f32 1.0, %v13021_v62  ;;  %v13023_v14 = vpop.eup %13022 }
 0x853   :  { %13026 = vrcp.f32 %v3512_v15  ;;  %v13025_v18 = vpop.eup %13024  ;;  %v3525_v43 = vadd.f32 1.0, %v13023_v14 }
 0x854   :  { %13028 = vrcp.f32 %v3518_v35 }
 0x855   :  { %13030 = vrcp.f32 %v3525_v43 }
 0x85d   :  { %v13027_v31 = vpop.eup %13026 }
 0x85e   :  { %v13029_v61 = vpop.eup %13028  ;;  %v3529_v8 = vmul.f32 %v13027_v31, %v13025_v18 }
 0x85f   :  { %v3528_v50 = vmul.f32 %v13029_v61, %v14931_v39  ;;  %v13031_v31 = vpop.eup %13030 }
 0x861   :  { %v3530_v46 = vadd.f32 %v3529_v8, %v3528_v50  ;;  %v3429_v38 = vpop.f32.mrb[24].mxu0  ;;  %v3500_v40 = vpop.f32.mrb[50].mxu1 }
 0x862   :  { %v3505_v25 = vadd.f32 %v3429_v38, %v17549_v30  ;;  %v3431_v56 = vpop.f32.mrb[25].mxu0  ;;  %v3502_v3 = vpop.f32.mrb[51].mxu1  ;;  %v12640_v43 = vadd.f32 %v3500_v40, %v14355_v17  ;;  %v4053_v40 = vld [vmem:[#allocation15 + $0x3a0] sm:$0xff] }
 0x863   :  { %13032 = vtanh.f32 %v3530_v46  ;;  %v3506_v5 = vadd.f32 %v3431_v56, %v17550_v20  ;;  %v15041_v15 = vsel %vm1733_vm13, %v3530_v46, %v14931_v39  ;;  %v12641_v18 = vadd.f32 %v3502_v3, %v14362_v22  ;;  %v4045_v56 = vld [vmem:[#allocation15 + $0x360] sm:$0xff]  ;;  %v4051_v3 = vld [vmem:[#allocation15 + $0x390] sm:$0xff] }
 0x864   :  { %v8888_v35 = vmul.f32 -1.442695, %v3505_v25 }
 0x865   :  { %v8889_v14 = vmul.f32 -1.442695, %v3506_v5  ;;  %v8890_v8 = vmul.f32 -1.442695, %v12641_v18  ;;  %v11331_v5 = vpack.c.bf16 %v4051_v3, %v4045_v56  ;;  %v4101_v56 = vld [vmem:[#allocation15 + $0x520] sm:$0xff] }
 0x866   :  { %13034 = vpow2.f32 %v8888_v35  ;;  %v4060_v35 = vld [vmem:[#allocation15 + $0x3d8] sm:$0xff]  ;;  %v4093_v3 = vld [vmem:[#allocation15 + $0x4e0] sm:$0xff] }
 0x867   :  { %13036 = vpow2.f32 %v8889_v14  ;;  %v4066_v14 = vld [vmem:[#allocation15 + $0x408] sm:$0xff] }
 0x868   :  { %13038 = vpow2.f32 %v8890_v8  ;;  %v11365_v18 = vpack.c.bf16 %v4066_v14, %v4060_v35  ;;  %v4059_v8 = vld [vmem:[#allocation15 + $0x3d0] sm:$0xff]  ;;  %v4108_v14 = vld [vmem:[#allocation15 + $0x558] sm:$0xff] }
 0x869   :  { %13040 = vtanh.f32 %v12640_v43 }
 0x86d   :  { %v13033_v61 = vpop.eup %13032 }
 0x86e   :  { %v15045_v50 = vmul.f32 %v13033_v61, %v13031_v31  ;;  %v4058_v31 = vld [vmem:[#allocation15 + $0x3c8] sm:$0xff]  ;;  %v4064_v61 = vld [vmem:[#allocation15 + $0x3f8] sm:$0xff] }
 0x86f   :  { %v11333_v43 = vpack.c.bf16 %v4064_v61, %v4058_v31  ;;  %v4106_v31 = vld [vmem:[#allocation15 + $0x548] sm:$0xff] }
 0x870   :  { %v13035_v38 = vpop.eup %13034  ;;  %v3563_v39 = vsel %vm1733_vm13, %v15045_v50, %v14941_v13 }
 0x871   :  { %v13037_v46 = vpop.eup %13036  ;;  %v3536_v30 = vadd.f32 1.0, %v13035_v38  ;;  %3636 = vmatmul.mubr.f32.vlgmr.msra.gmra.mrb[26].mxu0 %v3563_v39  ;;  %3707 = vmatmul.mubr.f32.vlgmr.msra.gmra.mrb[30].mxu1 %v3563_v39  ;;  %v4065_v38 = vld [vmem:[#allocation15 + $0x400] sm:$0xff] }
 0x872   :  { %v3542_v25 = vadd.f32 1.0, %v13037_v46  ;;  %11264 = vmatpush1.bf16.msra.mxu0 %v13771_v49  ;;  %11296 = vmatpush1.bf16.msra.mxu1 %v14175_v37  ;;  %v13039_v49 = vpop.eup %13038  ;;  %v4057_v39 = vld [vmem:[#allocation15 + $0x3c0] sm:$0xff]  ;;  %v4063_v46 = vld [vmem:[#allocation15 + $0x3f0] sm:$0xff] }
 0x873   :  { %13042 = vrcp.f32 %v3536_v30  ;;  %11266 = vmatprep.subr.bf16.mxu0 %v13780_v55  ;;  %11298 = vmatprep.subr.bf16.mxu1 %v14178_v41  ;;  %v13041_v55 = vpop.eup %13040  ;;  %v11367_v30 = vpack.c.bf16 %v4065_v38, %v4059_v8  ;;  %v4112_v8 = vld [vmem:[#allocation15 + $0x578] sm:$0xff]  ;;  %v4113_v38 = vld [vmem:[#allocation15 + $0x580] sm:$0xff] }
 0x874   :  { %13044 = vrcp.f32 %v3542_v25  ;;  %3785 = vmatprep.mubr.f32.mxu0 %v17296_v52  ;;  %3856 = vmatprep.mubr.f32.mxu1 %v17296_v52  ;;  %v11335_v25 = vpack.c.bf16 %v4063_v46, %v4057_v39  ;;  %v11349_v39 = vpack.c.bf16 %v4112_v8, %v4106_v31 }
 0x876   :  { %11268 = vmatpush1.bf16.msra.mxu0 %v13785_v59  ;;  %11300 = vmatpush1.bf16.msra.mxu1 %v14182_v51  ;;  %v3549_v59 = vadd.f32 1.0, %v13039_v49  ;;  %v4072_v49 = vld [vmem:[#allocation15 + $0x438] sm:$0xff] }
 0x877   :  { %11270 = vmatprep.subr.bf16.mxu0 %v13800_v6  ;;  %11302 = vmatprep.subr.bf16.mxu1 %v14186_v2  ;;  %v4041_v2 = vld [vmem:[#allocation15 + $0x340] sm:$0xff] }
 0x878   :  { %13046 = vrcp.f32 %v3549_v59  ;;  %v4071_v59 = vld [vmem:[#allocation15 + $0x430] sm:$0xff] }
 0x87a   :  { %11272 = vmatpush1.bf16.msra.mxu0 %v13808_v10  ;;  %11304 = vmatpush1.bf16.msra.mxu1 %v14189_v33  ;;  %v4035_v33 = vld [vmem:[#allocation15 + $0x310] sm:$0xff] }
 0x87b   :  { %11274 = vmatprep.subr.bf16.mxu0 %v13814_v16  ;;  %11306 = vmatprep.subr.bf16.mxu1 %v14192_v48 }
 0x87d   :  { %v13043_v37 = vpop.eup %13042 }
 0x87e   :  { %v13045_v41 = vpop.eup %13044  ;;  %v3553_v13 = vmul.f32 %v13043_v37, %v13041_v55  ;;  %11276 = vmatpush1.bf16.msra.mxu0 %v13819_v19  ;;  %11308 = vmatpush1.bf16.msra.mxu1 %v14195_v11  ;;  %v4033_v11 = vld [vmem:[#allocation15 + $0x300] sm:$0xff]  ;;  %v4078_v55 = vld [vmem:[#allocation15 + $0x468] sm:$0xff] }
 0x87f   :  { %v3552_v6 = vmul.f32 %v13045_v41, %v14971_v47  ;;  %11278 = vmatprep.subr.bf16.mxu0 %v13824_v21  ;;  %11310 = vmatprep.subr.bf16.mxu1 %v14198_v27  ;;  %v4039_v27 = vld [vmem:[#allocation15 + $0x330] sm:$0xff]  ;;  %v11369_v37 = vpack.c.bf16 %v4078_v55, %v4072_v49  ;;  %v4070_v41 = vld [vmem:[#allocation15 + $0x428] sm:$0xff]  ;;  %v4120_v49 = vld [vmem:[#allocation15 + $0x5b8] sm:$0xff] }
 0x881   :  { %v3554_v10 = vadd.f32 %v3553_v13, %v3552_v6  ;;  %v4076_v13 = vld [vmem:[#allocation15 + $0x458] sm:$0xff] }
 0x882   :  { %11280 = vmatpush1.bf16.msra.mxu0 %v13830_v26  ;;  %11312 = vmatpush1.bf16.msra.mxu1 %v14201_v29  ;;  %v13047_v19 = vpop.eup %13046  ;;  %v11359_v29 = vpack.c.bf16 %v4041_v2, %v4035_v33  ;;  %v11337_v6 = vpack.c.bf16 %v4076_v13, %v4070_v41  ;;  %v4088_v33 = vld [vmem:[#allocation15 + $0x4b8] sm:$0xff]  ;;  %v4118_v41 = vld [vmem:[#allocation15 + $0x5a8] sm:$0xff] }
 0x883   :  { %13048 = vtanh.f32 %v3554_v10  ;;  %11282 = vmatprep.subr.bf16.mxu0 %v13836_v28  ;;  %11314 = vmatprep.subr.bf16.mxu1 %v14204_v32  ;;  %v15077_v16 = vsel %vm1725_vm12, %v3554_v10, %v14971_v47  ;;  %v11327_v32 = vpack.c.bf16 %v4039_v27, %v4033_v11  ;;  %v4047_v47 = vld [vmem:[#allocation15 + $0x370] sm:$0xff]  ;;  %v4077_v10 = vld [vmem:[#allocation15 + $0x460] sm:$0xff]  ;;  %v4124_v13 = vld [vmem:[#allocation15 + $0x5d8] sm:$0xff] }
 0x884   :  { %v11363_v20 = vpack.c.bf16 %v4053_v40, %v4047_v47  ;;  %v4089_v11 = vld [vmem:[#allocation15 + $0x4c0] sm:$0xff]  ;;  %v4100_v47 = vld [vmem:[#allocation15 + $0x518] sm:$0xff] }
 0x885   :  { %v4081_v27 = vld [vmem:[#allocation15 + $0x480] sm:$0xff] }
 0x886   :  { %11284 = vmatpush1.bf16.msra.mxu0 %v13841_v34  ;;  %11316 = vmatpush1.bf16.msra.mxu1 %v14207_v45  ;;  %v4036_v34 = vld [vmem:[#allocation15 + $0x318] sm:$0xff] }
 0x887   :  { %11286 = vmatprep.subr.bf16.mxu0 %v13847_v36  ;;  %11318 = vmatprep.subr.bf16.mxu1 %v14210_v60  ;;  %v4042_v36 = vld [vmem:[#allocation15 + $0x348] sm:$0xff]  ;;  %v4048_v45 = vld [vmem:[#allocation15 + $0x378] sm:$0xff] }
 0x888   :  { %v4054_v60 = vld [vmem:[#allocation15 + $0x3a8] sm:$0xff] }
 0x88a   :  { %11288 = vmatpush1.bf16.msra.mxu0 %v13852_v42  ;;  %11320 = vmatpush1.bf16.msra.mxu1 %v14213_v12  ;;  %v11357_v42 = vpack.c.bf16 %v4042_v36, %v4036_v34  ;;  %v11361_v12 = vpack.c.bf16 %v4054_v60, %v4048_v45  ;;  %v4084_v36 = vld [vmem:[#allocation15 + $0x498] sm:$0xff] }
 0x88b   :  { %11290 = vmatprep.subr.bf16.mxu0 %v13858_v44  ;;  %11322 = vmatprep.subr.bf16.mxu1 %v14216_v24  ;;  %v4034_v44 = vld [vmem:[#allocation15 + $0x308] sm:$0xff]  ;;  %v4096_v60 = vld [vmem:[#allocation15 + $0x4f8] sm:$0xff] }
 0x88c   :  { %v4046_v24 = vld [vmem:[#allocation15 + $0x368] sm:$0xff] }
 0x88d   :  { %v13049_v21 = vpop.eup %13048 }
 0x88e   :  { %11292 = vmatpush1.bf16.msra.mxu0 %v13875_v53  ;;  %11324 = vmatpush1.bf16.msra.mxu1 %v14219_v9  ;;  %v15089_v26 = vmul.f32 %v13049_v21, %v13047_v19  ;;  %v4040_v53 = vld [vmem:[#allocation15 + $0x338] sm:$0xff]  ;;  %v4069_v19 = vld [vmem:[#allocation15 + $0x420] sm:$0xff]  ;;  %v4075_v21 = vld [vmem:[#allocation15 + $0x450] sm:$0xff] }
 0x88f   :  { %v11325_v51 = vpack.c.bf16 %v4040_v53, %v4034_v44  ;;  %11358 = vmatprep.subr.bf16.mxu1 %v11357_v42  ;;  %v4052_v9 = vld [vmem:[#allocation15 + $0x398] sm:$0xff]  ;;  %v11339_v34 = vpack.c.bf16 %v4075_v21, %v4069_v19  ;;  %v4090_v42 = vld [vmem:[#allocation15 + $0x4c8] sm:$0xff]  ;;  %v4125_v19 = vld [vmem:[#allocation15 + $0x5e0] sm:$0xff] }
 0x890   :  { %v3565_v28 = vsel %vm1725_vm12, %v15089_v26, %v14991_v63  ;;  %v11329_v63 = vpack.c.bf16 %v4052_v9, %v4046_v24  ;;  %v11373_v44 = vpack.c.bf16 %v4090_v42, %v4084_v36  ;;  %v4082_v53 = vld [vmem:[#allocation15 + $0x488] sm:$0xff]  ;;  %v4117_v21 = vld [vmem:[#allocation15 + $0x5a0] sm:$0xff] }
 0x891   :  { %3786 = vmatmul.mubr.f32.vlgmr.msra.gmra.mrb[28].mxu0 %v3565_v28  ;;  %3857 = vmatmul.mubr.f32.vlgmr.msra.gmra.mrb[48].mxu1 %v3565_v28  ;;  %v11371_v28 = vpack.c.bf16 %v4077_v10, %v4071_v59  ;;  %v11341_v2 = vpack.c.bf16 %v4088_v33, %v4082_v53  ;;  %v4094_v9 = vld [vmem:[#allocation15 + $0x4e8] sm:$0xff]  ;;  %v4119_v10 = vld [vmem:[#allocation15 + $0x5b0] sm:$0xff] }
 0x892   :  { %4193 = vmatprep.mubr.f32.mxu0 %v17296_v52  ;;  %4306 = vmatprep.mubr.f32.mxu1 %v17296_v52  ;;  %v11345_v40 = vpack.c.bf16 %v4100_v47, %v4094_v9  ;;  %v3937_v36 = vld [vmem:[#allocation15 + $0x48] sm:$0xff]  ;;  %v11387_v42 = vpack.c.bf16 %v4125_v19, %v4119_v10 }
 0x893   :  { %11326 = vmatprep.subr.bf16.mxu0 %v11325_v51  ;;  %11360 = vmatpush1.bf16.msra.mxu1 %v11359_v29  ;;  %v4083_v51 = vld [vmem:[#allocation15 + $0x490] sm:$0xff]  ;;  %v4038_v33 = vld [vmem:[#allocation15 + $0x328] sm:$0xff] }
 0x894   :  { %11328 = vmatpush1.bf16.msra.mxu0 %v11327_v32  ;;  %11362 = vmatprep.subr.bf16.mxu1 %v11361_v12  ;;  %v4087_v29 = vld [vmem:[#allocation15 + $0x4b0] sm:$0xff]  ;;  %v11375_v32 = vpack.c.bf16 %v4089_v11, %v4083_v51  ;;  %v4102_v12 = vld [vmem:[#allocation15 + $0x528] sm:$0xff]  ;;  %v4044_v51 = vld [vmem:[#allocation15 + $0x358] sm:$0xff] }
 0x895   :  { %11330 = vmatprep.subr.bf16.mxu0 %v11329_v63  ;;  %v11343_v45 = vpack.c.bf16 %v4087_v29, %v4081_v27  ;;  %v11377_v24 = vpack.c.bf16 %v4102_v12, %v4096_v60  ;;  %v4095_v63 = vld [vmem:[#allocation15 + $0x4f0] sm:$0xff]  ;;  %v17553_v11 = vld [vmem:[#allocation68_spill] sm:$0xff]  ;;  %v17554_v29 = vld [vmem:[#allocation69_spill] sm:$0xff] }
 0x896   :  { %v457_v27 = vadd.f32 %v17553_v11, %v17545_v23 }
 0x897   :  { %11364 = vmatpush1.bf16.msra.mxu1 %v11363_v20  ;;  %v4099_v20 = vld [vmem:[#allocation15 + $0x510] sm:$0xff] }
 0x898   :  { %11332 = vmatpush1.bf16.msra.mxu0 %v11331_v5  ;;  %11366 = vmatprep.subr.bf16.mxu1 %v11365_v18  ;;  %v11379_v5 = vpack.c.bf16 %v4101_v56, %v4095_v63  ;;  %v11347_v35 = vpack.c.bf16 %v4099_v20, %v4093_v3  ;;  %v4114_v18 = vld [vmem:[#allocation15 + $0x588] sm:$0xff] }
 0x899   :  { %11334 = vmatprep.subr.bf16.mxu0 %v11333_v43  ;;  %v11381_v61 = vpack.c.bf16 %v4114_v18, %v4108_v14  ;;  %v4107_v43 = vld [vmem:[#allocation15 + $0x550] sm:$0xff] }
 0x89a   :  { %v11383_v46 = vpack.c.bf16 %v4113_v38, %v4107_v43 }
 0x89b   :  { %11368 = vmatpush1.bf16.msra.mxu1 %v11367_v30  ;;  %v4105_v30 = vld [vmem:[#allocation15 + $0x540] sm:$0xff] }
 0x89c   :  { %11336 = vmatpush1.bf16.msra.mxu0 %v11335_v25  ;;  %11370 = vmatprep.subr.bf16.mxu1 %v11369_v37  ;;  %v4111_v25 = vld [vmem:[#allocation15 + $0x570] sm:$0xff]  ;;  %v4126_v37 = vld [vmem:[#allocation15 + $0x5e8] sm:$0xff] }
 0x89d   :  { %11338 = vmatprep.subr.bf16.mxu0 %v11337_v6  ;;  %v11351_v55 = vpack.c.bf16 %v4111_v25, %v4105_v30  ;;  %v11385_v59 = vpack.c.bf16 %v4126_v37, %v4120_v49  ;;  %v11353_v6 = vpack.c.bf16 %v4124_v13, %v4118_v41 }
 0x89f   :  { %11372 = vmatpush1.bf16.msra.mxu1 %v11371_v28  ;;  %v4123_v28 = vld [vmem:[#allocation15 + $0x5d0] sm:$0xff] }
 0x8a0   :  { %11340 = vmatpush1.bf16.msra.mxu0 %v11339_v34  ;;  %11374 = vmatprep.subr.bf16.mxu1 %v11373_v44  ;;  %v3931_v34 = vld [vmem:[#allocation15 + $0x18] sm:$0xff]  ;;  %v11355_v44 = vpack.c.bf16 %v4123_v28, %v4117_v21 }
 0x8a1   :  { %11342 = vmatprep.subr.bf16.mxu0 %v11341_v2  ;;  %v11453_v53 = vpack.c.bf16 %v3937_v36, %v3931_v34  ;;  %v11389_v2 = vpack.c.bf16 %v4044_v51, %v4038_v33 }
 0x8a3   :  { %11376 = vmatpush1.bf16.msra.mxu1 %v11375_v32  ;;  %v459_v32 = vadd.f32 %v17554_v29, %v17362_v58  ;;  %v3936_v29 = vld [vmem:[#allocation15 + $0x40] sm:$0xff] }
 0x8a4   :  { %11344 = vmatpush1.bf16.msra.mxu0 %v11343_v45  ;;  %11378 = vmatprep.subr.bf16.mxu1 %v11377_v24 }
 0x8a5   :  { %11346 = vmatprep.subr.bf16.mxu0 %v11345_v40 }
 0x8a7   :  { %11380 = vmatpush1.bf16.msra.mxu1 %v11379_v5 }
 0x8a8   :  { %11348 = vmatpush1.bf16.msra.mxu0 %v11347_v35  ;;  %11382 = vmatprep.subr.bf16.mxu1 %v11381_v61 }
 0x8a9   :  { %11350 = vmatprep.subr.bf16.mxu0 %v11349_v39 }
 0x8ab   :  { %11384 = vmatpush1.bf16.msra.mxu1 %v11383_v46 }
 0x8ac   :  { %11352 = vmatpush1.bf16.msra.mxu0 %v11351_v55  ;;  %11386 = vmatprep.subr.bf16.mxu1 %v11385_v59  ;;  %v17556_v55 = vld [vmem:[#allocation72_spill] sm:$0xff] }
 0x8ad   :  { %11354 = vmatprep.subr.bf16.mxu0 %v11353_v6 }
 0x8af   :  { %11388 = vmatpush1.bf16.msra.mxu1 %v11387_v42 }
 0x8b0   :  { %11356 = vmatpush1.bf16.msra.mxu0 %v11355_v44  ;;  %11454 = vmatprep.subr.bf16.mxu1 %v11453_v53 }
 0x8b1   :  { %11390 = vmatprep.subr.bf16.mxu0 %v11389_v2 }
 0x944   :  { %v3637_v45 = vpop.f32.mrb[26].mxu0  ;;  %v3708_v60 = vpop.f32.mrb[30].mxu1 }
 0x945   :  { %v3713_v12 = vadd.f32 %v3637_v45, %v457_v27  ;;  %v3639_v24 = vpop.f32.mrb[27].mxu0  ;;  %v3710_v9 = vpop.f32.mrb[31].mxu1  ;;  %v12604_v20 = vadd.f32 %v3708_v60, %v17548_v4  ;;  %v17555_v4 = vld [vmem:[#allocation71_spill] sm:$0xff] }
 0x946   :  { %v3714_v47 = vadd.f32 %v3639_v24, %v459_v32  ;;  %v12605_v56 = vadd.f32 %v3710_v9, %v14345_v7  ;;  %v4037_v32 = vld [vmem:[#allocation15 + $0x320] sm:$0xff]  ;;  %v4043_v45 = vld [vmem:[#allocation15 + $0x350] sm:$0xff]  ;;  %v3943_v60 = vld [vmem:[#allocation15 + $0x78] sm:$0xff] }
 0x947   :  { %v8891_v63 = vmul.f32 -1.442695, %v3713_v12  ;;  %v3949_v24 = vld [vmem:[#allocation15 + $0xa8] sm:$0xff] }
 0x948   :  { %v8892_v40 = vmul.f32 -1.442695, %v3714_v47  ;;  %v8893_v3 = vmul.f32 -1.442695, %v12605_v56  ;;  %v4050_v9 = vld [vmem:[#allocation15 + $0x388] sm:$0xff]  ;;  %v4056_v47 = vld [vmem:[#allocation15 + $0x3b8] sm:$0xff]  ;;  %v11391_v56 = vpack.c.bf16 %v4043_v45, %v4037_v32 }
 0x949   :  { %13050 = vpow2.f32 %v8891_v63  ;;  %v3991_v32 = vld [vmem:[#allocation15 + $0x1f8] sm:$0xff]  ;;  %v17558_v45 = vld [vmem:[#allocation62_spill] sm:$0xff] }
 0x94a   :  { %13052 = vpow2.f32 %v8892_v40 }
 0x94b   :  { %13054 = vpow2.f32 %v8893_v3  ;;  %v3942_v3 = vld [vmem:[#allocation15 + $0x70] sm:$0xff] }
 0x94c   :  { %13056 = vtanh.f32 %v12604_v20 }
 0x953   :  { %v13051_v5 = vpop.eup %13050 }
 0x954   :  { %v13053_v23 = vpop.eup %13052  ;;  %v3870_v35 = vadd.f32 1.0, %v13051_v5  ;;  %v3948_v5 = vld [vmem:[#allocation15 + $0xa0] sm:$0xff] }
 0x955   :  { %v3876_v58 = vadd.f32 1.0, %v13053_v23  ;;  %v13055_v14 = vpop.eup %13054  ;;  %v4055_v23 = vld [vmem:[#allocation15 + $0x3b0] sm:$0xff] }
 0x956   :  { %13058 = vrcp.f32 %v3870_v35  ;;  %v13057_v18 = vpop.eup %13056  ;;  %v3883_v43 = vadd.f32 1.0, %v13055_v14  ;;  %v11457_v35 = vpack.c.bf16 %v3949_v24, %v3943_v60  ;;  %v3955_v14 = vld [vmem:[#allocation15 + $0xd8] sm:$0xff]  ;;  %v4098_v24 = vld [vmem:[#allocation15 + $0x508] sm:$0xff] }
 0x957   :  { %13060 = vrcp.f32 %v3876_v58  ;;  %v11393_v58 = vpack.c.bf16 %v4056_v47, %v4050_v9  ;;  %v4104_v9 = vld [vmem:[#allocation15 + $0x538] sm:$0xff]  ;;  %v4974_v60 = vld [vmem:[%s17032_s10 + $0x138] sm:$0xff] }
 0x958   :  { %13062 = vrcp.f32 %v3883_v43  ;;  %v11459_v43 = vpack.c.bf16 %v3948_v5, %v3942_v3  ;;  %v4097_v3 = vld [vmem:[#allocation15 + $0x500] sm:$0xff]  ;;  %v4103_v5 = vld [vmem:[#allocation15 + $0x530] sm:$0xff] }
 0x960   :  { %v13059_v31 = vpop.eup %13058 }
 0x961   :  { %v13061_v61 = vpop.eup %13060  ;;  %v3887_v8 = vmul.f32 %v13059_v31, %v13057_v18  ;;  %v3961_v31 = vld [vmem:[#allocation15 + $0x108] sm:$0xff] }
 0x962   :  { %v3886_v38 = vmul.f32 %v13061_v61, %v15041_v15  ;;  %v13063_v6 = vpop.eup %13062  ;;  %v4062_v61 = vld [vmem:[#allocation15 + $0x3e8] sm:$0xff] }
 0x964   :  { %v3888_v7 = vadd.f32 %v3887_v8, %v3886_v38  ;;  %v3787_v39 = vpop.f32.mrb[28].mxu0  ;;  %v3858_v46 = vpop.f32.mrb[48].mxu1  ;;  %v4068_v8 = vld [vmem:[#allocation15 + $0x418] sm:$0xff] }
 0x965   :  { %v3863_v30 = vadd.f32 %v3787_v39, %v17555_v4  ;;  %v3789_v25 = vpop.f32.mrb[29].mxu0  ;;  %v3860_v49 = vpop.f32.mrb[49].mxu1  ;;  %v12638_v19 = vadd.f32 %v3858_v46, %v14355_v17  ;;  %v3930_v17 = vld [vmem:[#allocation15 + $0x10] sm:$0xff]  ;;  %v3960_v39 = vld [vmem:[#allocation15 + $0x100] sm:$0xff] }
 0x966   :  { %13064 = vtanh.f32 %v3888_v7  ;;  %v3864_v37 = vadd.f32 %v3789_v25, %v17556_v55  ;;  %v12639_v59 = vadd.f32 %v3860_v49, %v14362_v22  ;;  %v11455_v40 = vpack.c.bf16 %v3936_v29, %v3930_v17  ;;  %v3954_v7 = vld [vmem:[#allocation15 + $0xd0] sm:$0xff]  ;;  %v4061_v46 = vld [vmem:[#allocation15 + $0x3e0] sm:$0xff]  ;;  %v3967_v49 = vld [vmem:[#allocation15 + $0x138] sm:$0xff] }
 0x967   :  { %v8894_v41 = vmul.f32 -1.442695, %v3863_v30  ;;  %v4067_v4 = vld [vmem:[#allocation15 + $0x410] sm:$0xff]  ;;  %v11461_v30 = vpack.c.bf16 %v3961_v31, %v3955_v14  ;;  %v11397_v25 = vpack.c.bf16 %v4068_v8, %v4062_v61  ;;  %v3973_v55 = vld [vmem:[#allocation15 + $0x168] sm:$0xff]  ;;  %v4116_v8 = vld [vmem:[#allocation15 + $0x598] sm:$0xff] }
 0x968   :  { %v8895_v13 = vmul.f32 -1.442695, %v3864_v37  ;;  %v8896_v15 = vmul.f32 -1.442695, %v12639_v59  ;;  %v4074_v37 = vld [vmem:[#allocation15 + $0x448] sm:$0xff]  ;;  %v11399_v59 = vpack.c.bf16 %v4067_v4, %v4061_v46  ;;  %v4109_v46 = vld [vmem:[#allocation15 + $0x560] sm:$0xff] }
 0x969   :  { %13066 = vpow2.f32 %v8894_v41  ;;  %v4080_v41 = vld [vmem:[#allocation15 + $0x478] sm:$0xff]  ;;  %v4009_v31 = vld [vmem:[#allocation15 + $0x288] sm:$0xff]  ;;  %v4115_v4 = vld [vmem:[#allocation15 + $0x590] sm:$0xff] }
 0x96a   :  { %13068 = vpow2.f32 %v8895_v13  ;;  %v11463_v13 = vpack.c.bf16 %v3960_v39, %v3954_v7  ;;  %v4110_v61 = vld [vmem:[#allocation15 + $0x568] sm:$0xff]  ;;  %v4002_v7 = vld [vmem:[#allocation15 + $0x250] sm:$0xff]  ;;  %v4008_v39 = vld [vmem:[#allocation15 + $0x280] sm:$0xff] }
 0x96b   :  { %13070 = vpow2.f32 %v8896_v15  ;;  %v4073_v15 = vld [vmem:[#allocation15 + $0x440] sm:$0xff]  ;;  %v4971_v14 = vld [vmem:[%s17032_s10 + $0x120] sm:$0xff] }
 0x96c   :  { %13072 = vtanh.f32 %v12638_v19  ;;  %v4079_v19 = vld [vmem:[#allocation15 + $0x470] sm:$0xff] }
 0x970   :  { %v13065_v10 = vpop.eup %13064 }
 0x971   :  { %v15108_v21 = vmul.f32 %v13065_v10, %v13063_v6  ;;  %v3966_v6 = vld [vmem:[#allocation15 + $0x130] sm:$0xff]  ;;  %v3972_v10 = vld [vmem:[#allocation15 + $0x160] sm:$0xff] }
 0x973   :  { %v13067_v28 = vpop.eup %13066 }
 0x974   :  { %v13069_v34 = vpop.eup %13068  ;;  %v3894_v36 = vadd.f32 1.0, %v13067_v28  ;;  %v11465_v28 = vpack.c.bf16 %v3973_v55, %v3967_v49  ;;  %v4015_v49 = vld [vmem:[#allocation15 + $0x2b8] sm:$0xff]  ;;  %v17562_v55 = vld [vmem:[#allocation81_spill] sm:$0xff] }
 0x975   :  { %v3900_v42 = vadd.f32 1.0, %v13069_v34  ;;  %v13071_v44 = vpop.eup %13070  ;;  %v11401_v34 = vpack.c.bf16 %v4080_v41, %v4074_v37  ;;  %v4021_v37 = vld [vmem:[#allocation15 + $0x2e8] sm:$0xff] }
 0x976   :  { %13074 = vrcp.f32 %v3894_v36  ;;  %v13073_v53 = vpop.eup %13072  ;;  %v3907_v2 = vadd.f32 1.0, %v13071_v44  ;;  %v3979_v36 = vld [vmem:[#allocation15 + $0x198] sm:$0xff]  ;;  %v4086_v44 = vld [vmem:[#allocation15 + $0x4a8] sm:$0xff] }
 0x977   :  { %13076 = vrcp.f32 %v3900_v42  ;;  %v3985_v42 = vld [vmem:[#allocation15 + $0x1c8] sm:$0xff] }
 0x978   :  { %13078 = vrcp.f32 %v3907_v2  ;;  %v3984_v2 = vld [vmem:[#allocation15 + $0x1c0] sm:$0xff]  ;;  %v11469_v17 = vpack.c.bf16 %v3985_v42, %v3979_v36  ;;  %v4122_v41 = vld [vmem:[#allocation15 + $0x5c8] sm:$0xff]  ;;  %v17563_v42 = vld [vmem:[#allocation83_spill] sm:$0xff] }
 0x980   :  { %v13075_v33 = vpop.eup %13074 }
 0x981   :  { %v13077_v51 = vpop.eup %13076  ;;  %v3911_v22 = vmul.f32 %v13075_v33, %v13073_v53  ;;  %v4092_v53 = vld [vmem:[#allocation15 + $0x4d8] sm:$0xff]  ;;  %v11467_v33 = vpack.c.bf16 %v3972_v10, %v3966_v6  ;;  %v11415_v6 = vpack.c.bf16 %v4115_v4, %v4109_v46  ;;  %v4014_v10 = vld [vmem:[#allocation15 + $0x2b0] sm:$0xff]  ;;  %v3965_v4 = vld [vmem:[#allocation15 + $0x128] sm:$0xff] }
 0x982   :  { %v3910_v11 = vmul.f32 %v13077_v51, %v15077_v16  ;;  %v13079_v12 = vpop.eup %13078  ;;  %v4049_v16 = vld [vmem:[#allocation15 + $0x380] sm:$0xff]  ;;  %v11403_v51 = vpack.c.bf16 %v4079_v19, %v4073_v15  ;;  %v11405_v29 = vpack.c.bf16 %v4092_v53, %v4086_v44  ;;  %v3929_v44 = vld [vmem:[#allocation15 + $0x8] sm:$0xff]  ;;  %v3935_v53 = vld [vmem:[#allocation15 + $0x38] sm:$0xff] }
 0x983   :  { %v11395_v38 = vpack.c.bf16 %v4055_v23, %v4049_v16  ;;  %v11409_v23 = vpack.c.bf16 %v4104_v9, %v4098_v24  ;;  %v4020_v15 = vld [vmem:[#allocation15 + $0x2e0] sm:$0xff]  ;;  %v3947_v24 = vld [vmem:[#allocation15 + $0x98] sm:$0xff] }
 0x984   :  { %v3912_v27 = vadd.f32 %v3911_v22, %v3910_v11  ;;  %v3978_v22 = vld [vmem:[#allocation15 + $0x190] sm:$0xff]  ;;  %v4085_v11 = vld [vmem:[#allocation15 + $0x4a0] sm:$0xff] }
 0x985   :  { %v11471_v47 = vpack.c.bf16 %v3984_v2, %v3978_v22  ;;  %v4121_v19 = vld [vmem:[#allocation15 + $0x5c0] sm:$0xff]  ;;  %v17567_v46 = vld [vmem:[#allocation87_spill] sm:$0xff] }
 0x986   :  { %13080 = vtanh.f32 %v3912_v27  ;;  %v4091_v27 = vld [vmem:[#allocation15 + $0x4d0] sm:$0xff]  ;;  %v4937_v22 = vld [vmem:[%s17032_s10 + $0x10] sm:$0xff]  ;;  %v4940_v2 = vld [vmem:[%s17032_s10 + $0x28] sm:$0xff] }
 0x987   :  { %v15181_v9 = vpack.c.bf16 %v4940_v2, %v4937_v22  ;;  %v3995_v22 = vld [vmem:[#allocation15 + $0x218] sm:$0xff] }
 0x990   :  { %v13081_v63 = vpop.eup %13080 }
 0x991   :  { %v15111_v20 = vmul.f32 %v13081_v63, %v13079_v12  ;;  %v3997_v12 = vld [vmem:[#allocation15 + $0x228] sm:$0xff]  ;;  %v11407_v63 = vpack.c.bf16 %v4091_v27, %v4085_v11  ;;  %v3928_v11 = vld [vmem:[#allocation15] sm:$0xff]  ;;  %v3934_v27 = vld [vmem:[#allocation15 + $0x30] sm:$0xff] }
 0x992   :  { %v11473_v16 = vpack.c.bf16 %v3997_v12, %v3991_v32  ;;  %v3941_v12 = vld [vmem:[#allocation15 + $0x68] sm:$0xff] }
 0x993   :  { %9007 = vmatmul.mubr.msk.f32.vlgmr.msra.gmra.mrb[30].mxu0 %vm17237_vm10, %v15111_v20  ;;  %9015 = vmatmul.mubr.msk.f32.vlgmr.msra.gmra.mrb[64].mxu1 %vm17237_vm10, %v15111_v20 }
 0x994   :  { %11456 = vmatpush1.bf16.msra.mxu1 %v11455_v40  ;;  %11392 = vmatpush1.bf16.msra.mxu0 %v11391_v56  ;;  %v3990_v40 = vld [vmem:[#allocation15 + $0x1f0] sm:$0xff]  ;;  %v3996_v56 = vld [vmem:[#allocation15 + $0x220] sm:$0xff] }
 0x995   :  { %4199 = vmatprep.mubr.f32.mxu0 %v17296_v52  ;;  %4312 = vmatprep.mubr.f32.mxu1 %v17296_v52 }
 0x996   :  { %11458 = vmatprep.subr.bf16.mxu1 %v11457_v35  ;;  %11394 = vmatprep.subr.bf16.mxu0 %v11393_v58  ;;  %v4003_v35 = vld [vmem:[#allocation15 + $0x258] sm:$0xff] }
 0x997   :  { %9008 = vmatmul.mubr.msk.f32.gmra.mrb[32].mxu0 %vm1725_vm12, %v15089_v26  ;;  %9016 = vmatmul.mubr.msk.f32.gmra.mrb[66].mxu1 %vm1725_vm12, %v15089_v26  ;;  %v17560_v58 = vld [vmem:[#allocation79_spill] sm:$0xff] }
 0x998   :  { %11460 = vmatpush1.bf16.msra.mxu1 %v11459_v43  ;;  %11396 = vmatpush1.bf16.msra.mxu0 %v11395_v38  ;;  %v11475_v43 = vpack.c.bf16 %v3996_v56, %v3990_v40  ;;  %v11411_v38 = vpack.c.bf16 %v4103_v5, %v4097_v3  ;;  %v4946_v40 = vld [vmem:[%s17032_s10 + $0x58] sm:$0xff]  ;;  %v3940_v56 = vld [vmem:[#allocation15 + $0x60] sm:$0xff]  ;;  %v17182_v5 = vmov 0.0|0.0  }
 0x999   :  { %4205 = vmatprep.mubr.f32.mxu0 %v17296_v52  ;;  %4318 = vmatprep.mubr.f32.mxu1 %v17296_v52  ;;  %v3946_v3 = vld [vmem:[#allocation15 + $0x90] sm:$0xff] }
 0x99a   :  { %11462 = vmatprep.subr.bf16.mxu1 %v11461_v30  ;;  %11398 = vmatprep.subr.bf16.mxu0 %v11397_v25  ;;  %v11477_v30 = vpack.c.bf16 %v4009_v31, %v4003_v35  ;;  %v11413_v25 = vpack.c.bf16 %v4116_v8, %v4110_v61  ;;  %v3953_v35 = vld [vmem:[#allocation15 + $0xc8] sm:$0xff]  ;;  %v3959_v31 = vld [vmem:[#allocation15 + $0xf8] sm:$0xff]  ;;  %v11427_v8 = vpack.c.bf16 %v3946_v3, %v3940_v56 }
 0x99b   :  { %9009 = vmatmul.mubr.msk.f32.gmra.mrb[34].mxu0 %vm2101_vm14, %v14983_v0  ;;  %9017 = vmatmul.mubr.msk.f32.gmra.mrb[68].mxu1 %vm2101_vm14, %v14983_v0 }
 0x99c   :  { %11464 = vmatpush1.bf16.msra.mxu1 %v11463_v13  ;;  %11400 = vmatpush1.bf16.msra.mxu0 %v11399_v59  ;;  %v4128_v13 = vld [vmem:[#allocation15 + $0x5f8] sm:$0xff]  ;;  %v11479_v59 = vpack.c.bf16 %v4008_v39, %v4002_v7  ;;  %v3958_v7 = vld [vmem:[#allocation15 + $0xf0] sm:$0xff]  ;;  %v11429_v39 = vpack.c.bf16 %v3959_v31, %v3953_v35  ;;  %v4000_v35 = vld [vmem:[#allocation15 + $0x240] sm:$0xff] }
 0x99d   :  { %4211 = vmatprep.mubr.f32.mxu0 %v17296_v52  ;;  %4324 = vmatprep.mubr.f32.mxu1 %v17296_v52  ;;  %v11417_v36 = vpack.c.bf16 %v4128_v13, %v4122_v41  ;;  %v3964_v41 = vld [vmem:[#allocation15 + $0x120] sm:$0xff]  ;;  %v3970_v13 = vld [vmem:[#allocation15 + $0x150] sm:$0xff] }
 0x99e   :  { %11466 = vmatprep.subr.bf16.mxu1 %v11465_v28  ;;  %11402 = vmatprep.subr.bf16.mxu0 %v11401_v34  ;;  %v4127_v28 = vld [vmem:[#allocation15 + $0x5f0] sm:$0xff]  ;;  %v11481_v34 = vpack.c.bf16 %v4021_v37, %v4015_v49 }
 0x99f   :  { %9010 = vmatmul.mubr.msk.f32.gmra.mrb[36].mxu0 %vm2477_vm0, %v17558_v45  ;;  %9018 = vmatmul.mubr.msk.f32.gmra.mrb[70].mxu1 %vm2477_vm0, %v17558_v45  ;;  %v4955_v37 = vld [vmem:[%s17032_s10 + $0xa0] sm:$0xff] }
 0x9a0   :  { %11468 = vmatpush1.bf16.msra.mxu1 %v11467_v33  ;;  %11404 = vmatpush1.bf16.msra.mxu0 %v11403_v51  ;;  %v11483_v33 = vpack.c.bf16 %v4020_v15, %v4014_v10  ;;  %v11419_v51 = vpack.c.bf16 %v4127_v28, %v4121_v19  ;;  %v3977_v10 = vld [vmem:[#allocation15 + $0x188] sm:$0xff]  ;;  %v3983_v15 = vld [vmem:[#allocation15 + $0x1b8] sm:$0xff]  ;;  %v11435_v28 = vpack.c.bf16 %v3970_v13, %v3964_v41  ;;  %v4006_v31 = vld [vmem:[#allocation15 + $0x270] sm:$0xff] }
 0x9a1   :  { %4217 = vmatprep.mubr.f32.mxu0 %v17296_v52  ;;  %4330 = vmatprep.mubr.f32.mxu1 %v17296_v52  ;;  %v3933_v41 = vld [vmem:[#allocation15 + $0x28] sm:$0xff]  ;;  %v3939_v13 = vld [vmem:[#allocation15 + $0x58] sm:$0xff] }
 0x9a2   :  { %11470 = vmatprep.subr.bf16.mxu1 %v11469_v17  ;;  %11406 = vmatprep.subr.bf16.mxu0 %v11405_v29  ;;  %v11421_v17 = vpack.c.bf16 %v3935_v53, %v3929_v44  ;;  %v17564_v29 = vld [vmem:[#allocation94_spill] sm:$0xff]  ;;  %v11437_v53 = vpack.c.bf16 %v3983_v15, %v3977_v10  ;;  %v4983_v15 = vld [vmem:[#allocation18] sm:$0xff] }
 0x9a3   :  { %9011 = vmatmul.mubr.msk.f32.gmra.mrb[38].mxu0 %vm2485_vm1, %v17560_v58  ;;  %9019 = vmatmul.mubr.msk.f32.gmra.mrb[72].mxu1 %vm2485_vm1, %v17560_v58  ;;  %v3982_v44 = vld [vmem:[#allocation15 + $0x1b0] sm:$0xff] }
 0x9a4   :  { %11472 = vmatpush1.bf16.msra.mxu1 %v11471_v47  ;;  %11408 = vmatpush1.bf16.msra.mxu0 %v11407_v63  ;;  %v11423_v47 = vpack.c.bf16 %v3934_v27, %v3928_v11  ;;  %v4943_v63 = vld [vmem:[%s17032_s10 + $0x40] sm:$0xff] }
 0x9a5   :  { %4223 = vmatprep.mubr.f32.mxu0 %v17296_v52  ;;  %4336 = vmatprep.mubr.f32.mxu1 %v17296_v52  ;;  %v15199_v61 = vpack.c.bf16 %v4946_v40, %v4943_v63  ;;  %v4967_v27 = vld [vmem:[%s17032_s10 + $0x100] sm:$0xff]  ;;  %v4001_v63 = vld [vmem:[#allocation15 + $0x248] sm:$0xff] }
 0x9a6   :  { %11474 = vmatprep.subr.bf16.mxu1 %v11473_v16  ;;  %11410 = vmatprep.subr.bf16.mxu0 %v11409_v23  ;;  %v11425_v16 = vpack.c.bf16 %v3947_v24, %v3941_v12  ;;  %v17566_v23 = vld [vmem:[#allocation91_spill] sm:$0xff] }
 0x9a7   :  { %9012 = vmatmul.mubr.msk.f32.gmra.mrb[40].mxu0 %vm2109_vm15, %v17562_v55  ;;  %9020 = vmatmul.mubr.msk.f32.gmra.mrb[74].mxu1 %vm2109_vm15, %v17562_v55  ;;  %v3994_v12 = vld [vmem:[#allocation15 + $0x210] sm:$0xff]  ;;  %v4007_v40 = vld [vmem:[#allocation15 + $0x278] sm:$0xff] }
 0x9a8   :  { %11476 = vmatpush1.bf16.msra.mxu1 %v11475_v43  ;;  %11412 = vmatpush1.bf16.msra.mxu0 %v11411_v38  ;;  %v4949_v43 = vld [vmem:[%s17032_s10 + $0x70] sm:$0xff] }
 0x9a9   :  { %4229 = vmatprep.mubr.f32.mxu0 %v17296_v52  ;;  %4342 = vmatprep.mubr.f32.mxu1 %v17296_v52  ;;  %v3952_v38 = vld [vmem:[#allocation15 + $0xc0] sm:$0xff] }
 0x9aa   :  { %11478 = vmatprep.subr.bf16.mxu1 %v11477_v30  ;;  %11414 = vmatprep.subr.bf16.mxu0 %v11413_v25  ;;  %v3971_v30 = vld [vmem:[#allocation15 + $0x158] sm:$0xff]  ;;  %v11431_v49 = vpack.c.bf16 %v3958_v7, %v3952_v38  ;;  %v11447_v7 = vpack.c.bf16 %v4006_v31, %v4000_v35  ;;  %v4996_v31 = vld [vmem:[#allocation18 + $0x68] sm:$0xff] }
 0x9ab   :  { %9013 = vmatmul.mubr.msk.f32.gmra.mrb[42].mxu0 %vm1733_vm13, %v17563_v42  ;;  %9021 = vmatmul.mubr.msk.f32.gmra.mrb[76].mxu1 %vm1733_vm13, %v17563_v42 }
 0x9ac   :  { %11480 = vmatpush1.bf16.msra.mxu1 %v11479_v59  ;;  %11416 = vmatpush1.bf16.msra.mxu0 %v11415_v6  ;;  %v11433_v59 = vpack.c.bf16 %v3971_v30, %v3965_v4  ;;  %v17569_v6 = vld [vmem:[#allocation58_spill] sm:$0xff]  ;;  %v4012_v4 = vld [vmem:[#allocation15 + $0x2a0] sm:$0xff] }
 0x9ad   :  { %4235 = vmatprep.mubr.f32.mxu0 %v17296_v52  ;;  %4348 = vmatprep.mubr.f32.mxu1 %v17296_v52  ;;  %v4018_v30 = vld [vmem:[#allocation15 + $0x2d0] sm:$0xff] }
 0x9ae   :  { %11482 = vmatprep.subr.bf16.mxu1 %v11481_v34  ;;  %11418 = vmatprep.subr.bf16.mxu0 %v11417_v36  ;;  %v4961_v34 = vld [vmem:[%s17032_s10 + $0xd0] sm:$0xff]  ;;  %v11451_v10 = vpack.c.bf16 %v4018_v30, %v4012_v4 }
 0x9af   :  { %9014 = vmatmul.mubr.msk.f32.gmra.mrb[44].mxu0 %vm1359_vm11, %v17564_v29  ;;  %9022 = vmatmul.mubr.msk.f32.gmra.mrb[78].mxu1 %vm1359_vm11, %v17564_v29  ;;  %v3976_v36 = vld [vmem:[#allocation15 + $0x180] sm:$0xff] }
 0x9b0   :  { %11484 = vmatpush1.bf16.msra.mxu1 %v11483_v33  ;;  %11420 = vmatpush1.bf16.msra.mxu0 %v11419_v51  ;;  %v17571_v33 = vld [vmem:[#allocation60_spill] sm:$0xff]  ;;  %v3989_v51 = vld [vmem:[#allocation15 + $0x1e8] sm:$0xff]  ;;  %v11439_v11 = vpack.c.bf16 %v3982_v44, %v3976_v36  ;;  %v3938_v36 = vld [vmem:[#allocation15 + $0x50] sm:$0xff] }
 0x9b1   :  { %4419 = vmatprep.mubr.f32.mxu0 %v17296_v52  ;;  %4645 = vmatprep.mubr.f32.mxu1 %v17296_v52  ;;  %v11441_v24 = vpack.c.bf16 %v3995_v22, %v3989_v51  ;;  %v4990_v51 = vld [vmem:[#allocation18 + $0x38] sm:$0xff]  ;;  %v4993_v22 = vld [vmem:[#allocation18 + $0x50] sm:$0xff] }
 0x9b2   :  { %11549 = vmatprep.subr.bf16.mxu1 %v17182_v5  ;;  %11422 = vmatprep.subr.bf16.mxu0 %v11421_v17  ;;  %v3988_v17 = vld [vmem:[#allocation15 + $0x1e0] sm:$0xff] }
 0x9b3   :  { %9023 = vmatmul.mubr.msk.f32.vlgmr.msra.gmra.mrb[46].mxu0 %vm17237_vm10, %v15111_v20  ;;  %9039 = vmatmul.mubr.msk.f32.vlgmr.msra.gmra.mrb[64].mxu1 %vm17237_vm10, %v17566_v23  ;;  %v4952_v20 = vld [vmem:[%s17032_s10 + $0x88] sm:$0xff]  ;;  %v11443_v3 = vpack.c.bf16 %v3994_v12, %v3988_v17 }
 0x9b4   :  { %11551 = vmatpush3.bf16.msra.mxu1 %v15181_v9  ;;  %11424 = vmatpush1.bf16.msra.mxu0 %v11423_v47  ;;  %v15217_v25 = vpack.c.bf16 %v4952_v20, %v4949_v43  ;;  %v17573_v47 = vld [vmem:[#allocation80_spill] sm:$0xff]  ;;  %v4013_v43 = vld [vmem:[#allocation15 + $0x2a8] sm:$0xff] }
 0x9b5   :  { %4425 = vmatprep.mubr.f32.mxu0 %v17296_v52  ;;  %4651 = vmatprep.mubr.f32.mxu1 %v17296_v52  ;;  %v4019_v20 = vld [vmem:[#allocation15 + $0x2d8] sm:$0xff] }
 0x9b6   :  { %11552 = vmatprep.subr.bf16.mxu1 %v17182_v5  ;;  %11426 = vmatprep.subr.bf16.mxu0 %v11425_v16  ;;  %17568 = vst [vmem:[#allocation63_spill] sm:$0xff] %v15217_v25  ;;  %v4973_v16 = vld [vmem:[%s17032_s10 + $0x130] sm:$0xff] }
 0x9b7   :  { %9024 = vmatmul.mubr.msk.f32.gmra.mrb[48].mxu0 %vm1725_vm12, %v15089_v26  ;;  %9040 = vmatmul.mubr.msk.f32.gmra.mrb[66].mxu1 %vm1725_vm12, %v17567_v46  ;;  %v4958_v26 = vld [vmem:[%s17032_s10 + $0xb8] sm:$0xff] }
 0x9b8   :  { %11554 = vmatpush3.bf16.msra.mxu1 %v15199_v61  ;;  %11428 = vmatpush1.bf16.msra.mxu0 %v11427_v8  ;;  %v15235_v19 = vpack.c.bf16 %v4958_v26, %v4955_v37  ;;  %v11445_v8 = vpack.c.bf16 %v4007_v40, %v4001_v63  ;;  %v4984_v37 = vld [vmem:[#allocation18 + $0x8] sm:$0xff]  ;;  %v4987_v26 = vld [vmem:[#allocation18 + $0x20] sm:$0xff] }
 0x9b9   :  { %4431 = vmatprep.mubr.f32.mxu0 %v17296_v52  ;;  %4657 = vmatprep.mubr.f32.mxu1 %v17296_v52  ;;  %v15313_v44 = vpack.c.bf16 %v4987_v26, %v4984_v37  ;;  %v4992_v40 = vld [vmem:[#allocation18 + $0x48] sm:$0xff]  ;;  %v3956_v37 = vld [vmem:[#allocation15 + $0xe0] sm:$0xff] }
 0x9ba   :  { %11555 = vmatprep.subr.bf16.mxu1 %v17182_v5  ;;  %11430 = vmatprep.subr.bf16.mxu0 %v11429_v39  ;;  %17570 = vst [vmem:[#allocation77_spill] sm:$0xff] %v15235_v19  ;;  %v4979_v39 = vld [vmem:[%s17032_s10 + $0x160] sm:$0xff] }
 0x9bb   :  { %9025 = vmatmul.mubr.msk.f32.gmra.mrb[50].mxu0 %vm2101_vm14, %v14983_v0  ;;  %9041 = vmatmul.mubr.msk.f32.gmra.mrb[68].mxu1 %vm2101_vm14, %v17569_v6  ;;  %v4964_v0 = vld [vmem:[%s17032_s10 + $0xe8] sm:$0xff]  ;;  %17578 = vst [vmem:[#allocation65_spill] sm:$0xff] %v15313_v44  ;;  %v3962_v26 = vld [vmem:[#allocation15 + $0x110] sm:$0xff] }
 0x9bc   :  { %11557 = vmatpush3.bf16.msra.mxu1 %v15217_v25  ;;  %11432 = vmatpush1.bf16.msra.mxu0 %v11431_v49  ;;  %v15253_v2 = vpack.c.bf16 %v4964_v0, %v4961_v34  ;;  %v11449_v49 = vpack.c.bf16 %v4019_v20, %v4013_v43  ;;  %v3932_v0 = vld [vmem:[#allocation15 + $0x20] sm:$0xff]  ;;  %v3957_v43 = vld [vmem:[#allocation15 + $0xe8] sm:$0xff]  ;;  %v3963_v20 = vld [vmem:[#allocation15 + $0x118] sm:$0xff] }
 0x9bd   :  { %4437 = vmatprep.mubr.f32.mxu0 %v17296_v52  ;;  %4663 = vmatprep.mubr.f32.mxu1 %v17296_v52  ;;  %v11487_v12 = vpack.c.bf16 %v3938_v36, %v3932_v0  ;;  %v5001_v0 = vld [vmem:[#allocation18 + $0x90] sm:$0xff] }
 0x9be   :  { %11558 = vmatprep.subr.bf16.mxu1 %v17182_v5  ;;  %11434 = vmatprep.subr.bf16.mxu0 %v11433_v59  ;;  %17572 = vst [vmem:[#allocation78_spill] sm:$0xff] %v15253_v2 }
 0x9bf   :  { %9026 = vmatmul.mubr.msk.f32.gmra.mrb[52].mxu0 %vm2477_vm0, %v17558_v45  ;;  %9042 = vmatmul.mubr.msk.f32.gmra.mrb[70].mxu1 %vm2477_vm0, %v17571_v33  ;;  %v4970_v45 = vld [vmem:[%s17032_s10 + $0x118] sm:$0xff] }
 0x9c0   :  { %11560 = vmatpush3.bf16.msra.mxu1 %v15235_v19  ;;  %11436 = vmatpush1.bf16.msra.mxu0 %v11435_v28  ;;  %v15271_v56 = vpack.c.bf16 %v4970_v45, %v4967_v27  ;;  %v17577_v28 = vld [vmem:[#allocation39_spill] sm:$0xff]  ;;  %v15321_v45 = vpop.xlane.xlu0 %185 }
 0x9c1   :  { %4443 = vmatprep.mubr.f32.mxu0 %v17296_v52  ;;  %4669 = vmatprep.mubr.f32.mxu1 %v17296_v52  ;;  %v181_v34 = vand.u32 65535, %v17577_v28  ;;  %v3951_v27 = vld [vmem:[#allocation15 + $0xb8] sm:$0xff] }
 0x9c2   :  { %11561 = vmatprep.subr.bf16.mxu1 %v17182_v5  ;;  %11438 = vmatprep.subr.bf16.mxu0 %v11437_v53  ;;  %17574 = vst [vmem:[#allocation41_spill] sm:$0xff] %v15271_v56  ;;  %v11485_v53 = vpack.c.bf16 %v3939_v13, %v3933_v41  ;;  %v11493_v41 = vpack.c.bf16 %v3963_v20, %v3957_v43  ;;  %v5002_v13 = vld [vmem:[#allocation18 + $0x98] sm:$0xff] }
 0x9c3   :  { %9027 = vmatmul.mubr.msk.f32.gmra.mrb[54].mxu0 %vm2485_vm1, %v17560_v58  ;;  %9043 = vmatmul.mubr.msk.f32.gmra.mrb[72].mxu1 %vm2485_vm1, %v17573_v47  ;;  %v4976_v58 = vld [vmem:[%s17032_s10 + $0x148] sm:$0xff]  ;;  %v183_v63 = vcvt.s32.f32 %v181_v34 }
 0x9c4   :  { %11563 = vmatpush3.bf16.msra.mxu1 %v15253_v2  ;;  %11440 = vmatpush1.bf16.msra.mxu0 %v11439_v11  ;;  %v15289_v38 = vpack.c.bf16 %v4976_v58, %v4973_v16  ;;  %v3945_v11 = vld [vmem:[#allocation15 + $0x88] sm:$0xff]  ;;  %v3950_v16 = vld [vmem:[#allocation15 + $0xb0] sm:$0xff]  ;;  %v17579_v58 = vld [vmem:[#allocation40_spill] sm:$0xff] }
 0x9c5   :  { %4449 = vmatprep.mubr.f32.mxu0 %v17296_v52  ;;  %4675 = vmatprep.mubr.f32.mxu1 %v17296_v52  ;;  %vm187_vm3 = vcmp.eq.f32.partialorder %v17579_v58, %v15321_v45  ;;  %v11489_v35 = vpack.c.bf16 %v3951_v27, %v3945_v11  ;;  %v3975_v28 = vld [vmem:[#allocation15 + $0x178] sm:$0xff]  ;;  %v5008_v27 = vld [vmem:[#allocation18 + $0xc8] sm:$0xff] }
 0x9c6   :  { %11564 = vmatprep.subr.bf16.mxu1 %v17182_v5  ;;  %11442 = vmatprep.subr.bf16.mxu0 %v11441_v24  ;;  %17575 = vst [vmem:[#allocation26_spill] sm:$0xff] %v15289_v38  ;;  %v4989_v24 = vld [vmem:[#allocation18 + $0x30] sm:$0xff]  ;;  %v188_v4 = vsel %vm187_vm3, %v183_v63, -inf  ;;  %v5014_v20 = vld [vmem:[#allocation18 + $0xf8] sm:$0xff] }
 0x9c7   :  { %9028 = vmatmul.mubr.msk.f32.gmra.mrb[56].mxu0 %vm2109_vm15, %v17562_v55  ;;  %9044 = vmatmul.mubr.msk.f32.gmra.mrb[74].mxu1 %vm2109_vm15, %v14935_v57  ;;  %v4982_v55 = vld [vmem:[%s17032_s10 + $0x178] sm:$0xff]  ;;  %v3987_v63 = vld [vmem:[#allocation15 + $0x1d8] sm:$0xff] }
 0x9c8   :  { %11566 = vmatpush3.bf16.msra.mxu1 %v15271_v56  ;;  %11444 = vmatpush1.bf16.msra.mxu0 %v11443_v3  ;;  %v15307_v59 = vpack.c.bf16 %v4982_v55, %v4979_v39  ;;  %v3944_v3 = vld [vmem:[#allocation15 + $0x80] sm:$0xff] }
 0x9c9   :  { %4455 = vmatprep.mubr.f32.mxu0 %v17296_v52  ;;  %4681 = vmatprep.mubr.f32.mxu1 %v17296_v52  ;;  %v11491_v39 = vpack.c.bf16 %v3950_v16, %v3944_v3  ;;  %v4995_v55 = vld [vmem:[#allocation18 + $0x60] sm:$0xff] }
 0x9ca   :  { %11567 = vmatprep.subr.bf16.mxu1 %v17182_v5  ;;  %11446 = vmatprep.subr.bf16.mxu0 %v11445_v8  ;;  %17576 = vst [vmem:[#allocation64_spill] sm:$0xff] %v15307_v59  ;;  %v4999_v8 = vld [vmem:[#allocation18 + $0x80] sm:$0xff] }
 0x9cb   :  { %9029 = vmatmul.mubr.msk.f32.gmra.mrb[58].mxu0 %vm1733_vm13, %v17563_v42  ;;  %9045 = vmatmul.mubr.msk.f32.gmra.mrb[76].mxu1 %vm1733_vm13, %v15045_v50  ;;  %v4986_v42 = vld [vmem:[#allocation18 + $0x18] sm:$0xff]  ;;  %v15343_v30 = vpack.c.bf16 %v4999_v8, %v4996_v31  ;;  %v5007_v16 = vld [vmem:[#allocation18 + $0xc0] sm:$0xff]  ;;  %v3986_v8 = vld [vmem:[#allocation15 + $0x1d0] sm:$0xff] }
 0x9cc   :  { %11569 = vmatpush3.bf16.msra.mxu1 %v15289_v38  ;;  %11448 = vmatpush1.bf16.msra.mxu0 %v11447_v7  ;;  %v15324_v17 = vpack.c.bf16 %v4986_v42, %v4983_v15  ;;  %v15339_v7 = vpack.c.bf16 %v4992_v40, %v4989_v24  ;;  %v3969_v15 = vld [vmem:[#allocation15 + $0x148] sm:$0xff]  ;;  %v11495_v42 = vpack.c.bf16 %v3962_v26, %v3956_v37  ;;  %v3980_v31 = vld [vmem:[#allocation15 + $0x1a0] sm:$0xff]  ;;  %v5013_v26 = vld [vmem:[#allocation18 + $0xf0] sm:$0xff] }
 0x9cd   :  { %4461 = vmatprep.mubr.f32.mxu0 %v17296_v52  ;;  %4687 = vmatprep.mubr.f32.mxu1 %v17296_v52  ;;  %v11497_v11 = vpack.c.bf16 %v3975_v28, %v3969_v15  ;;  %v3981_v24 = vld [vmem:[#allocation15 + $0x1a8] sm:$0xff]  ;;  %v11503_v37 = vpack.c.bf16 %v3986_v8, %v3980_v31  ;;  %v3998_v15 = vld [vmem:[#allocation15 + $0x230] sm:$0xff] }
 0x9ce   :  { %11570 = vmatprep.subr.bf16.mxu1 %v17182_v5  ;;  %11450 = vmatprep.subr.bf16.mxu0 %v11449_v49  ;;  %v4998_v49 = vld [vmem:[#allocation18 + $0x78] sm:$0xff]  ;;  %v11501_v43 = vpack.c.bf16 %v3987_v63, %v3981_v24  ;;  %v5029_v31 = vld [vmem:[#allocation18 + $0x170] sm:$0xff]  ;;  %v4017_v8 = vld [vmem:[#allocation15 + $0x2c8] sm:$0xff] }
 0x9cf   :  { %9030 = vmatmul.mubr.msk.f32.gmra.mrb[60].mxu0 %vm1359_vm11, %v17564_v29  ;;  %9046 = vmatmul.mubr.msk.f32.gmra.mrb[78].mxu1 %vm1359_vm11, %v15108_v21  ;;  %v15329_v29 = vpack.c.bf16 %v4993_v22, %v4990_v51  ;;  %v15350_v34 = vpack.c.bf16 %v4998_v49, %v4995_v55  ;;  %v3968_v51 = vld [vmem:[#allocation15 + $0x140] sm:$0xff]  ;;  %v3974_v22 = vld [vmem:[#allocation15 + $0x170] sm:$0xff]  ;;  %v3993_v55 = vld [vmem:[#allocation15 + $0x208] sm:$0xff] }
 0x9d0   :  { %11572 = vmatpush3.bf16.msra.mxu1 %v15307_v59  ;;  %11452 = vmatpush1.bf16.msra.mxu0 %v11451_v10  ;;  %v5005_v10 = vld [vmem:[#allocation18 + $0xb0] sm:$0xff]  ;;  %v11499_v3 = vpack.c.bf16 %v3974_v22, %v3968_v51  ;;  %v5022_v24 = vld [vmem:[#allocation18 + $0x138] sm:$0xff] }
 0x9d1   :  { %4532 = vmatprep.mubr.f32.mxu0 %v17296_v52  ;;  %9472 = vmatprep.mubr.msk.f32.mxu1 %vm13449_vm2, %v17296_v52  ;;  %v15354_v36 = vpack.c.bf16 %v5005_v10, %v5002_v13  ;;  %v5016_v13 = vld [vmem:[#allocation18 + $0x108] sm:$0xff]  ;;  %v3992_v10 = vld [vmem:[#allocation15 + $0x200] sm:$0xff]  ;;  %v4011_v51 = vld [vmem:[#allocation15 + $0x298] sm:$0xff] }
 0x9d2   :  { %11574 = vmatprep.subr.bf16.mxu1 %v15313_v44  ;;  %11486 = vmatprep.subr.bf16.mxu0 %v11485_v53  ;;  %v5004_v53 = vld [vmem:[#allocation18 + $0xa8] sm:$0xff]  ;;  %v15380_v22 = vpack.c.bf16 %v5016_v13, %v5013_v26  ;;  %v4004_v63 = vld [vmem:[#allocation15 + $0x260] sm:$0xff] }
 0x9d3   :  { %9031 = vmatmul.mubr.msk.f32.vlgmr.msra.gmra.mrb[30].mxu0 %vm17237_vm10, %v17566_v23  ;;  %9473 = vmatmul.mubr.f32.vlgmr.msra.gmra.mrb[80].mxu1 %v17296_v52  ;;  %v15360_v40 = vpack.c.bf16 %v5004_v53, %v5001_v0  ;;  %v5023_v0 = vld [vmem:[#allocation18 + $0x140] sm:$0xff]  ;;  %v4022_v13 = vld [vmem:[#allocation15 + $0x2f0] sm:$0xff] }
 0x9d4   :  { %11576 = vmatpush1.bf16.msra.mxu1 %v15324_v17  ;;  %11488 = vmatpush1.bf16.msra.mxu0 %v11487_v12  ;;  %v5011_v12 = vld [vmem:[#allocation18 + $0xe0] sm:$0xff] }
 0x9d5   :  { %4538 = vmatprep.mubr.f32.mxu0 %v17296_v52  ;;  %11578 = vmatprep.subr.bf16.mxu1 %v15329_v29  ;;  %v15364_v58 = vpack.c.bf16 %v5011_v12, %v5008_v27  ;;  %v4005_v53 = vld [vmem:[#allocation15 + $0x268] sm:$0xff]  ;;  %v4016_v26 = vld [vmem:[#allocation15 + $0x2c0] sm:$0xff] }
 0x9d6   :  { %11490 = vmatprep.subr.bf16.mxu0 %v11489_v35  ;;  %5282 = vmatprep.mubr.f32.mxu1 %v17296_v52  ;;  %v5010_v35 = vld [vmem:[#allocation18 + $0xd8] sm:$0xff]  ;;  %v5019_v27 = vld [vmem:[#allocation18 + $0x120] sm:$0xff] }
 0x9d7   :  { %9032 = vmatmul.mubr.msk.f32.gmra.mrb[32].mxu0 %vm1725_vm12, %v17567_v46  ;;  %189 = vmax.xlane.f32.xlu1 %v188_v4  ;;  %v3999_v4 = vld [vmem:[#allocation15 + $0x238] sm:$0xff]  ;;  %v15370_v49 = vpack.c.bf16 %v5010_v35, %v5007_v16  ;;  %v11509_v16 = vpack.c.bf16 %v4011_v51, %v4005_v53  ;;  %v4988_v51 = vld [vmem:[#allocation18 + $0x28] sm:$0xff] }
 0x9d8   :  { %11580 = vmatpush1.bf16.msra.mxu1 %v15339_v7  ;;  %11492 = vmatpush1.bf16.msra.mxu0 %v11491_v39  ;;  %v5017_v39 = vld [vmem:[#allocation18 + $0x110] sm:$0xff]  ;;  %v11505_v28 = vpack.c.bf16 %v3999_v4, %v3993_v55  ;;  %v5026_v35 = vld [vmem:[#allocation18 + $0x158] sm:$0xff] }
 0x9d9   :  { %4544 = vmatprep.mubr.f32.mxu0 %v17296_v52  ;;  %11582 = vmatprep.subr.bf16.mxu1 %v15343_v30  ;;  %v5025_v55 = vld [vmem:[#allocation18 + $0x150] sm:$0xff]  ;;  %v15394_v4 = vpack.c.bf16 %v5029_v31, %v5026_v35  ;;  %v4991_v31 = vld [vmem:[#allocation18 + $0x40] sm:$0xff] }
 0x9da   :  { %11494 = vmatprep.subr.bf16.mxu0 %v11493_v41  ;;  %v15374_v41 = vpack.c.bf16 %v5017_v39, %v5014_v20  ;;  %v15390_v20 = vpack.c.bf16 %v5022_v24, %v5019_v27  ;;  %v4985_v53 = vld [vmem:[#allocation18 + $0x10] sm:$0xff] }
 0x9db   :  { %9033 = vmatmul.mubr.msk.f32.gmra.mrb[34].mxu0 %vm2101_vm14, %v17569_v6  ;;  %v4938_v27 = vld [vmem:[%s17032_s10 + $0x18] sm:$0xff] }
 0x9dc   :  { %11584 = vmatpush1.bf16.msra.mxu1 %v15350_v34  ;;  %11496 = vmatpush1.bf16.msra.mxu0 %v11495_v42  ;;  %v5020_v42 = vld [vmem:[#allocation18 + $0x128] sm:$0xff] }
 0x9dd   :  { %4550 = vmatprep.mubr.f32.mxu0 %v17296_v52  ;;  %11586 = vmatprep.subr.bf16.mxu1 %v15354_v36  ;;  %v15384_v12 = vpack.c.bf16 %v5023_v0, %v5020_v42  ;;  %v11515_v0 = vpack.c.bf16 %v4022_v13, %v4016_v26  ;;  %v4951_v26 = vld [vmem:[%s17032_s10 + $0x80] sm:$0xff] }
 0x9de   :  { %11498 = vmatprep.subr.bf16.mxu0 %v11497_v11  ;;  %v11507_v11 = vpack.c.bf16 %v3998_v15, %v3992_v10  ;;  %v4936_v15 = vld [vmem:[%s17032_s10 + $0x8] sm:$0xff] }
 0x9df   :  { %9034 = vmatmul.mubr.msk.f32.gmra.mrb[36].mxu0 %vm2477_vm0, %v17571_v33 }
 0x9e0   :  { %11588 = vmatpush1.bf16.msra.mxu1 %v15360_v40  ;;  %11500 = vmatpush1.bf16.msra.mxu0 %v11499_v3  ;;  %v4010_v3 = vld [vmem:[#allocation15 + $0x290] sm:$0xff] }
 0x9e1   :  { %4556 = vmatprep.mubr.f32.mxu0 %v17296_v52  ;;  %11590 = vmatprep.subr.bf16.mxu1 %v15364_v58  ;;  %v11511_v39 = vpack.c.bf16 %v4010_v3, %v4004_v63  ;;  %v4942_v63 = vld [vmem:[%s17032_s10 + $0x38] sm:$0xff]  ;;  %v4945_v3 = vld [vmem:[%s17032_s10 + $0x50] sm:$0xff] }
 0x9e2   :  { %11502 = vmatprep.subr.bf16.mxu0 %v11501_v43  ;;  %v4023_v43 = vld [vmem:[#allocation15 + $0x2f8] sm:$0xff] }
 0x9e3   :  { %9035 = vmatmul.mubr.msk.f32.gmra.mrb[38].mxu0 %vm2485_vm1, %v17573_v47  ;;  %v11513_v10 = vpack.c.bf16 %v4023_v43, %v4017_v8  ;;  %v4994_v8 = vld [vmem:[#allocation18 + $0x58] sm:$0xff]  ;;  %v4941_v43 = vld [vmem:[%s17032_s10 + $0x30] sm:$0xff] }
 0x9e4   :  { %11592 = vmatpush1.bf16.msra.mxu1 %v15370_v49  ;;  %11504 = vmatpush1.bf16.msra.mxu0 %v11503_v37  ;;  %v5028_v37 = vld [vmem:[#allocation18 + $0x168] sm:$0xff]  ;;  %v15455_v13 = vpack.c.bf16 %v4994_v8, %v4991_v31  ;;  %v4956_v8 = vld [vmem:[%s17032_s10 + $0xa8] sm:$0xff] }
 0x9e5   :  { %4562 = vmatprep.mubr.f32.mxu0 %v17296_v52  ;;  %11594 = vmatprep.subr.bf16.mxu1 %v15374_v41  ;;  %v15406_v42 = vpack.c.bf16 %v5028_v37, %v5025_v55  ;;  %v15441_v55 = vpack.c.bf16 %v4945_v3, %v4942_v63  ;;  %v4948_v37 = vld [vmem:[%s17032_s10 + $0x68] sm:$0xff]  ;;  %v4953_v31 = vld [vmem:[%s17032_s10 + $0x90] sm:$0xff] }
 0x9e6   :  { %11506 = vmatprep.subr.bf16.mxu0 %v11505_v28  ;;  %v4939_v28 = vld [vmem:[%s17032_s10 + $0x20] sm:$0xff]  ;;  %v5003_v3 = vld [vmem:[#allocation18 + $0xa0] sm:$0xff] }
 0x9e7   :  { %9036 = vmatmul.mubr.msk.f32.gmra.mrb[40].mxu0 %vm2109_vm15, %v14935_v57  ;;  %v15416_v24 = vpack.c.bf16 %v4939_v28, %v4936_v15  ;;  %v4997_v15 = vld [vmem:[#allocation18 + $0x70] sm:$0xff] }
 0x9e8   :  { %11596 = vmatpush1.bf16.msra.mxu1 %v15380_v22  ;;  %11508 = vmatpush1.bf16.msra.mxu0 %v11507_v11  ;;  %v4935_v11 = vld [vmem:[%s17032_s10] sm:$0xff] }
 0x9e9   :  { %4568 = vmatprep.mubr.f32.mxu0 %v17296_v52  ;;  %11598 = vmatprep.subr.bf16.mxu1 %v15384_v12  ;;  %v15430_v35 = vpack.c.bf16 %v4938_v27, %v4935_v11  ;;  %v4947_v28 = vld [vmem:[%s17032_s10 + $0x60] sm:$0xff]  ;;  %v4957_v11 = vld [vmem:[%s17032_s10 + $0xb0] sm:$0xff] }
 0x9ea   :  { %11510 = vmatprep.subr.bf16.mxu0 %v11509_v16  ;;  %v15428_v16 = vpack.c.bf16 %v4988_v51, %v4985_v53  ;;  %v15468_v53 = vpack.c.bf16 %v4951_v26, %v4948_v37  ;;  %v4954_v51 = vld [vmem:[%s17032_s10 + $0x98] sm:$0xff]  ;;  %v4963_v37 = vld [vmem:[%s17032_s10 + $0xe0] sm:$0xff] }
 0x9eb   :  { %9037 = vmatmul.mubr.msk.f32.gmra.mrb[42].mxu0 %vm1733_vm13, %v15045_v50 }
 0x9ec   :  { %11600 = vmatpush1.bf16.msra.mxu1 %v15390_v20  ;;  %11512 = vmatpush1.bf16.msra.mxu0 %v11511_v39  ;;  %v4944_v39 = vld [vmem:[%s17032_s10 + $0x48] sm:$0xff] }
 0x9ed   :  { %4574 = vmatprep.mubr.f32.mxu0 %v17296_v52  ;;  %11602 = vmatprep.subr.bf16.mxu1 %v15394_v4 }
 0x9ee   :  { %11514 = vmatprep.subr.bf16.mxu0 %v11513_v10  ;;  %v15457_v10 = vpack.c.bf16 %v4944_v39, %v4941_v43  ;;  %v15496_v43 = vpack.c.bf16 %v4957_v11, %v4954_v51  ;;  %v4960_v39 = vld [vmem:[%s17032_s10 + $0xc8] sm:$0xff]  ;;  %v4966_v11 = vld [vmem:[%s17032_s10 + $0xf8] sm:$0xff] }
 0x9ef   :  { %9038 = vmatmul.mubr.msk.f32.gmra.mrb[44].mxu0 %vm1359_vm11, %v15108_v21  ;;  %v15522_v51 = vpack.c.bf16 %v4963_v37, %v4960_v39  ;;  %v4965_v39 = vld [vmem:[%s17032_s10 + $0xf0] sm:$0xff]  ;;  %v4968_v37 = vld [vmem:[%s17032_s10 + $0x108] sm:$0xff] }
 0x9f0   :  { %11604 = vmatpush1.bf16.msra.mxu1 %v15406_v42  ;;  %11516 = vmatpush1.bf16.msra.mxu0 %v11515_v0  ;;  %v4950_v0 = vld [vmem:[%s17032_s10 + $0x78] sm:$0xff]  ;;  %17581 = vst [vmem:[#allocation76_spill] sm:$0xff] %v15496_v43 }
 0x9f1   :  { %4758 = vmatprep.mubr.f32.mxu0 %v17296_v52  ;;  %11605 = vmatprep.subr.bf16.mxu1 %v17182_v5  ;;  %v15485_v63 = vpack.c.bf16 %v4950_v0, %v4947_v28  ;;  %v4959_v28 = vld [vmem:[%s17032_s10 + $0xc0] sm:$0xff]  ;;  %v4962_v0 = vld [vmem:[%s17032_s10 + $0xd8] sm:$0xff]  ;;  %17583 = vst [vmem:[#allocation27_spill] sm:$0xff] %v15522_v51 }
 0x9f2   :  { %11518 = vmatprep.subr.bf16.mxu0 %v15416_v24 }
 0x9f3   :  { %5283 = vmatmul.mubr.f32.vlgmr.msra.gmra.mrb[82].mxu1 %v17296_v52  ;;  %9047 = vmatmul.mubr.msk.f32.vlgmr.msra.gmra.mrb[46].mxu0 %vm17237_vm10, %v17566_v23  ;;  %v5000_v23 = vld [vmem:[#allocation18 + $0x88] sm:$0xff]  ;;  %17580 = vst [vmem:[#allocation75_spill] sm:$0xff] %v15485_v63 }
 0x9f4   :  { %11607 = vmatpush3.bf16.msra.mxu1 %v15428_v16  ;;  %11520 = vmatpush1.bf16.msra.mxu0 %v15430_v35  ;;  %v15483_v27 = vpack.c.bf16 %v5000_v23, %v4997_v15  ;;  %v15511_v15 = vpack.c.bf16 %v4956_v8, %v4953_v31  ;;  %v5009_v23 = vld [vmem:[#allocation18 + $0xd0] sm:$0xff]  ;;  %v15537_v31 = vpack.c.bf16 %v4962_v0, %v4959_v28  ;;  %v5015_v8 = vld [vmem:[#allocation18 + $0x100] sm:$0xff] }
 0x9f5   :  { %4764 = vmatprep.mubr.f32.mxu0 %v17296_v52  ;;  %11608 = vmatprep.subr.bf16.mxu1 %v17182_v5  ;;  %v4975_v28 = vld [vmem:[%s17032_s10 + $0x140] sm:$0xff] }
 0x9f6   :  { %11522 = vmatprep.subr.bf16.mxu0 %v15441_v55  ;;  %9507 = vmatprep.mubr.msk.f32.mxu1 %vm13449_vm2, %v17296_v52  ;;  %17582 = vst [vmem:[#allocation42_spill] sm:$0xff] %v15511_v15  ;;  %17584 = vst [vmem:[#allocation43_spill] sm:$0xff] %v15537_v31 }
 0x9f7   :  { %9048 = vmatmul.mubr.msk.f32.gmra.mrb[48].mxu0 %vm1725_vm12, %v17567_v46  ;;  %v5006_v46 = vld [vmem:[#allocation18 + $0xb8] sm:$0xff] }
 0x9f8   :  { %11610 = vmatpush3.bf16.msra.mxu1 %v15455_v13  ;;  %11524 = vmatpush1.bf16.msra.mxu0 %v15457_v10  ;;  %v15509_v26 = vpack.c.bf16 %v5006_v46, %v5003_v3  ;;  %v4969_v3 = vld [vmem:[%s17032_s10 + $0x110] sm:$0xff] }
 0x9f9   :  { %4770 = vmatprep.mubr.f32.mxu0 %v17296_v52  ;;  %11611 = vmatprep.subr.bf16.mxu1 %v17182_v5 }
 0x9fa   :  { %11526 = vmatprep.subr.bf16.mxu0 %v15468_v53 }
 0x9fb   :  { %9049 = vmatmul.mubr.msk.f32.gmra.mrb[50].mxu0 %vm2101_vm14, %v17569_v6  ;;  %v5012_v6 = vld [vmem:[#allocation18 + $0xe8] sm:$0xff] }
 0x9fc   :  { %11613 = vmatpush3.bf16.msra.mxu1 %v15483_v27  ;;  %11528 = vmatpush1.bf16.msra.mxu0 %v15485_v63  ;;  %v15535_v46 = vpack.c.bf16 %v5012_v6, %v5009_v23  ;;  %v15548_v23 = vpack.c.bf16 %v4969_v3, %v4966_v11  ;;  %v4972_v6 = vld [vmem:[%s17032_s10 + $0x128] sm:$0xff]  ;;  %v15563_v11 = vpack.c.bf16 %v4968_v37, %v4965_v39  ;;  %v5021_v3 = vld [vmem:[#allocation18 + $0x130] sm:$0xff]  ;;  %v4981_v39 = vld [vmem:[%s17032_s10 + $0x170] sm:$0xff] }
 0x9fd   :  { %4776 = vmatprep.mubr.f32.mxu0 %v17296_v52  ;;  %11614 = vmatprep.subr.bf16.mxu1 %v17182_v5 }
 0x9fe   :  { %11530 = vmatprep.subr.bf16.mxu0 %v15496_v43  ;;  %17585 = vst [vmem:[#allocation28_spill] sm:$0xff] %v15548_v23  ;;  %17586 = vst [vmem:[#allocation44_spill] sm:$0xff] %v15563_v11 }
 0x9ff   :  { %9050 = vmatmul.mubr.msk.f32.gmra.mrb[52].mxu0 %vm2477_vm0, %v17571_v33  ;;  %v5018_v33 = vld [vmem:[#allocation18 + $0x118] sm:$0xff] }
 0xa00   :  { %11616 = vmatpush3.bf16.msra.mxu1 %v15509_v26  ;;  %11532 = vmatpush1.bf16.msra.mxu0 %v15511_v15  ;;  %v15561_v0 = vpack.c.bf16 %v5018_v33, %v5015_v8  ;;  %v15574_v8 = vpack.c.bf16 %v4975_v28, %v4972_v6  ;;  %v4978_v33 = vld [vmem:[%s17032_s10 + $0x158] sm:$0xff]  ;;  %v15589_v6 = vpack.c.bf16 %v4974_v60, %v4971_v14  ;;  %v5027_v28 = vld [vmem:[#allocation18 + $0x160] sm:$0xff] }
 0xa01   :  { %4782 = vmatprep.mubr.f32.mxu0 %v17296_v52  ;;  %11617 = vmatprep.subr.bf16.mxu1 %v17182_v5  ;;  %v15609_v14 = vpack.c.bf16 %v4980_v54, %v4977_v1  ;;  %v192_v1 = vcvt.f32.s32 %v15321_v45 }
 0xa02   :  { %11534 = vmatprep.subr.bf16.mxu0 %v15522_v51  ;;  %17587 = vst [vmem:[#allocation29_spill] sm:$0xff] %v15574_v8  ;;  %17588 = vst [vmem:[#allocation45_spill] sm:$0xff] %v15589_v6 }
 0xa03   :  { %9051 = vmatmul.mubr.msk.f32.gmra.mrb[54].mxu0 %vm2485_vm1, %v17573_v47  ;;  %v5024_v47 = vld [vmem:[#allocation18 + $0x148] sm:$0xff]  ;;  %17590 = vst [vmem:[#allocation46_spill] sm:$0xff] %v15609_v14  ;;  %v193_v54 = vshll.u32 %v192_v1, 16 }
 0xa04   :  { %11619 = vmatpush3.bf16.msra.mxu1 %v15535_v46  ;;  %11536 = vmatpush1.bf16.msra.mxu0 %v15537_v31  ;;  %v15587_v37 = vpack.c.bf16 %v5024_v47, %v5021_v3  ;;  %v15600_v3 = vpack.c.bf16 %v4981_v39, %v4978_v33 }
 0xa05   :  { %4788 = vmatprep.mubr.f32.mxu0 %v17296_v52  ;;  %11620 = vmatprep.subr.bf16.mxu1 %v17182_v5 }
 0xa06   :  { %11538 = vmatprep.subr.bf16.mxu0 %v15548_v23  ;;  %17589 = vst [vmem:[#allocation30_spill] sm:$0xff] %v15600_v3 }
 0xa07   :  { %9052 = vmatmul.mubr.msk.f32.gmra.mrb[56].mxu0 %vm2109_vm15, %v14935_v57  ;;  %v5030_v57 = vld [vmem:[#allocation18 + $0x178] sm:$0xff] }
 0xa08   :  { %11622 = vmatpush3.bf16.msra.mxu1 %v15561_v0  ;;  %11540 = vmatpush1.bf16.msra.mxu0 %v15563_v11  ;;  %v15607_v60 = vpack.c.bf16 %v5030_v57, %v5027_v28 }
 0xa09   :  { %4794 = vmatprep.mubr.f32.mxu0 %v17296_v52  ;;  %11623 = vmatprep.subr.bf16.mxu1 %v17182_v5 }
 0xa0a   :  { %11542 = vmatprep.subr.bf16.mxu0 %v15574_v8 }
 0xa0b   :  { %9053 = vmatmul.mubr.msk.f32.gmra.mrb[58].mxu0 %vm1733_vm13, %v15045_v50 }
 0xa0c   :  { %11625 = vmatpush3.bf16.msra.mxu1 %v15587_v37  ;;  %11544 = vmatpush1.bf16.msra.mxu0 %v15589_v6 }
 0xa0d   :  { %4800 = vmatprep.mubr.f32.mxu0 %v17296_v52  ;;  %11626 = vmatprep.subr.bf16.mxu1 %v17182_v5 }
 0xa0e   :  { %11546 = vmatprep.subr.bf16.mxu0 %v15600_v3 }
 0xa0f   :  { %9054 = vmatmul.mubr.msk.f32.gmra.mrb[60].mxu0 %vm1359_vm11, %v15108_v21 }
 0xa10   :  { %11628 = vmatpush3.bf16.msra.mxu1 %v15607_v60  ;;  %11548 = vmatpush1.bf16.msra.mxu0 %v15609_v14 }
 0xa11   :  { %5125 = vmatprep.mubr.f32.mxu0 %v17296_v52  ;;  %11630 = vmatprep.subr.bf16.mxu0 %v15416_v24 }
 0xa12   :  { %11661 = vmatprep.subr.bf16.mxu1 %v17182_v5 }
 0xa13   :  { %9508 = vmatmul.mubr.f32.vlgmr.msra.gmra.mrb[84].mxu1 %v17296_v52  ;;  %5126 = vmatmul.mubr.f32.vlgmr.msra.gmra.mrb[30].mxu0 %v17296_v52 }
 0xa14   :  { %11632 = vmatpush1.bf16.msra.mxu0 %v15430_v35  ;;  %11663 = vmatpush3.bf16.msra.mxu1 %v15181_v9 }
 0xa15   :  { %11634 = vmatprep.subr.bf16.mxu0 %v15441_v55  ;;  %11664 = vmatprep.subr.bf16.mxu1 %v17182_v5 }
 0xa16   :  { %5493 = vmatprep.mubr.f32.mxu0 %v17296_v52  ;;  %9542 = vmatprep.mubr.msk.f32.mxu1 %vm13449_vm2, %v17296_v52 }
 0xa18   :  { %11636 = vmatpush1.bf16.msra.mxu0 %v15457_v10  ;;  %11666 = vmatpush3.bf16.msra.mxu1 %v15199_v61 }
 0xa19   :  { %11638 = vmatprep.subr.bf16.mxu0 %v15468_v53  ;;  %11667 = vmatprep.subr.bf16.mxu1 %v17182_v5 }
 0xa1c   :  { %11640 = vmatpush1.bf16.msra.mxu0 %v15485_v63  ;;  %11669 = vmatpush3.bf16.msra.mxu1 %v15217_v25 }
 0xa1d   :  { %11642 = vmatprep.subr.bf16.mxu0 %v15496_v43  ;;  %11670 = vmatprep.subr.bf16.mxu1 %v17182_v5 }
 0xa20   :  { %11644 = vmatpush1.bf16.msra.mxu0 %v15511_v15  ;;  %11672 = vmatpush3.bf16.msra.mxu1 %v15235_v19 }
 0xa21   :  { %11646 = vmatprep.subr.bf16.mxu0 %v15522_v51  ;;  %11673 = vmatprep.subr.bf16.mxu1 %v17182_v5 }
 0xa24   :  { %11648 = vmatpush1.bf16.msra.mxu0 %v15537_v31  ;;  %11675 = vmatpush3.bf16.msra.mxu1 %v15253_v2 }
 0xa25   :  { %11650 = vmatprep.subr.bf16.mxu0 %v15548_v23  ;;  %11676 = vmatprep.subr.bf16.mxu1 %v17182_v5 }
 0xa28   :  { %11652 = vmatpush1.bf16.msra.mxu0 %v15563_v11  ;;  %11678 = vmatpush3.bf16.msra.mxu1 %v15271_v56 }
 0xa29   :  { %11654 = vmatprep.subr.bf16.mxu0 %v15574_v8  ;;  %11679 = vmatprep.subr.bf16.mxu1 %v17182_v5 }
 0xa2c   :  { %11656 = vmatpush1.bf16.msra.mxu0 %v15589_v6  ;;  %11681 = vmatpush3.bf16.msra.mxu1 %v15289_v38 }
 0xa2d   :  { %11658 = vmatprep.subr.bf16.mxu0 %v15600_v3  ;;  %11682 = vmatprep.subr.bf16.mxu1 %v17182_v5 }
 0xa30   :  { %11660 = vmatpush1.bf16.msra.mxu0 %v15609_v14  ;;  %11684 = vmatpush3.bf16.msra.mxu1 %v15307_v59  ;;  %v15660_v59 = vld [vmem:[#allocation17] sm:$0x3f] }
 0xa31   :  { %11686 = vmatprep.subr.bf16.mxu0 %v15313_v44  ;;  %11717 = vmatprep.subr.bf16.mxu1 %v17182_v5  ;;  %v17591_v44 = vld [vmem:[#allocation70_spill] sm:$0xff] }
 0xa32   :  { %v17592_v5 = vsub.s32 3, %v17591_v44 }
 0xa34   :  { %v4824_v45 = vrot.slane %v15660_v59, %v17592_v5 }
 0xa64   :  { %v190_v50 = vpop.xlane.xlu1 %189 }
 0xa65   :  { %v191_v21 = vcvt.f32.s32 %v190_v50 }
 0xa67   :  { %v194_v47 = vadd.s32 %v193_v54, %v191_v21  ;;  %v17594_v21 = vld [vmem:[#allocation89_spill] sm:$0xff] }
 0xa69   :  { %v195_v33 = vrot.slane %v194_v47, 4 }
 0xa6b   :  { %vm196_vm4 = vcmp.gt.s32.totalorder %v194_v47, %v195_v33 }
 0xa6c   :  { %v197_v39 = vsel %vm196_vm4, %v194_v47, %v195_v33  ;;  %v15671_v47 = vrot.slane %v15660_v59, %v17594_v21 }
 0xa6d   :  { %v198_v28 = vrot.slane %v197_v39, 2 }
 0xa6f   :  { %vm199_vm6 = vcmp.gt.s32.totalorder %v197_v39, %v198_v28 }
 0xa70   :  { %v200_v57 = vsel %vm199_vm6, %v197_v39, %v198_v28 }
 0xa71   :  { %v201_v62 = vrot.slane %v200_v57, 1 }
 0xa73   :  { %vm202_vm7 = vcmp.gt.s32.totalorder %v200_v57, %v201_v62 }
 0xa74   :  { %v203_v48 = vsel %vm202_vm7, %v200_v57, %v201_v62 }
 0xa75   :  { %12800 = vpush %v203_v48 }
 0xa86   :  { %v15665_v1 = vpop.f32.mrb[64].mxu1 }
 0xa87   :  { %v4649_v50 = vpop.f32.mrb[65].mxu1 }
 0xa88   :  { %v15667_v54 = vadd.f32 %v4824_v45, %v4649_v50 }
 0xa8a   :  { %17593 = vst [vmem:[#allocation31_spill] sm:$0xff] %v15667_v54  ;;  %v4653_v33 = vpop.f32.mrb[66].mxu1 }
 0xa8b   :  { %v15674_v39 = vadd.f32 %v15671_v47, %v4653_v33  ;;  %v4655_v62 = vpop.f32.mrb[67].mxu1 }
 0xa8c   :  { %v15676_v48 = vadd.f32 %v4824_v45, %v4655_v62 }
 0xa8d   :  { %17595 = vst [vmem:[#allocation47_spill] sm:$0xff] %v15674_v39 }
 0xa8e   :  { %17596 = vst [vmem:[#allocation32_spill] sm:$0xff] %v15676_v48  ;;  %v4659_v28 = vpop.f32.mrb[68].mxu1 }
 0xa8f   :  { %v15679_v57 = vadd.f32 %v15671_v47, %v4659_v28  ;;  %v4661_v5 = vpop.f32.mrb[69].mxu1 }
 0xa90   :  { %v15681_v14 = vadd.f32 %v4824_v45, %v4661_v5 }
 0xa91   :  { %17597 = vst [vmem:[#allocation48_spill] sm:$0xff] %v15679_v57 }
 0xa92   :  { %17598 = vst [vmem:[#allocation33_spill] sm:$0xff] %v15681_v14  ;;  %v4665_v50 = vpop.f32.mrb[70].mxu1 }
 0xa93   :  { %v15684_v54 = vadd.f32 %v15671_v47, %v4665_v50  ;;  %v4667_v3 = vpop.f32.mrb[71].mxu1 }
 0xa94   :  { %v15686_v38 = vadd.f32 %v4824_v45, %v4667_v3 }
 0xa95   :  { %17599 = vst [vmem:[#allocation49_spill] sm:$0xff] %v15684_v54 }
 0xa96   :  { %17600 = vst [vmem:[#allocation34_spill] sm:$0xff] %v15686_v38  ;;  %v4671_v6 = vpop.f32.mrb[72].mxu1 }
 0xa97   :  { %v15689_v33 = vadd.f32 %v15671_v47, %v4671_v6  ;;  %v4673_v62 = vpop.f32.mrb[73].mxu1 }
 0xa98   :  { %v15691_v48 = vadd.f32 %v4824_v45, %v4673_v62 }
 0xa99   :  { %17601 = vst [vmem:[#allocation50_spill] sm:$0xff] %v15689_v33 }
 0xa9a   :  { %17602 = vst [vmem:[#allocation35_spill] sm:$0xff] %v15691_v48  ;;  %v4677_v39 = vpop.f32.mrb[74].mxu1 }
 0xa9b   :  { %v15694_v28 = vadd.f32 %v15671_v47, %v4677_v39  ;;  %v4679_v5 = vpop.f32.mrb[75].mxu1  ;;  %v5032_v39 = vld [vmem:[%s17035_s13] sm:$0x7] }
 0xa9c   :  { %v15696_v14 = vadd.f32 %v4824_v45, %v4679_v5  ;;  %v17608_v5 = vld [vmem:[#allocation86_spill] sm:$0xff] }
 0xa9d   :  { %17603 = vst [vmem:[#allocation51_spill] sm:$0xff] %v15694_v28  ;;  %v15712_v28 = vrot.slane %v5032_v39, %v17608_v5 }
 0xa9e   :  { %17604 = vst [vmem:[#allocation36_spill] sm:$0xff] %v15696_v14  ;;  %v4683_v57 = vpop.f32.mrb[76].mxu1 }
 0xa9f   :  { %v15699_v50 = vadd.f32 %v15671_v47, %v4683_v57  ;;  %v4685_v3 = vpop.f32.mrb[77].mxu1  ;;  %17609 = vst [vmem:[#allocation38_spill] sm:$0xff] %v15712_v28  ;;  %v17610_v57 = vsub.s32 4, %v17591_v44 }
 0xaa0   :  { %v15701_v38 = vadd.f32 %v4824_v45, %v4685_v3 }
 0xaa1   :  { %17605 = vst [vmem:[#allocation52_spill] sm:$0xff] %v15699_v50  ;;  %v4828_v3 = vrot.slane %v15660_v59, %v17610_v57  ;;  %v17611_v50 = vsub.s32 5, %v17591_v44 }
 0xaa2   :  { %17606 = vst [vmem:[#allocation37_spill] sm:$0xff] %v15701_v38  ;;  %v4689_v54 = vpop.f32.mrb[78].mxu1 }
 0xaa3   :  { %v15704_v6 = vadd.f32 %v15671_v47, %v4689_v54  ;;  %v4691_v62 = vpop.f32.mrb[79].mxu1  ;;  %v4832_v54 = vrot.slane %v15660_v59, %v17611_v50 }
 0xaa4   :  { %v4884_v38 = vadd.f32 %v4824_v45, %v4691_v62 }
 0xaa5   :  { %17607 = vst [vmem:[#allocation53_spill] sm:$0xff] %v15704_v6 }
 0xaa6   :  { %v15706_v33 = vpop.f32.mrb[80].mxu1 }
 0xaa7   :  { %v9474_v48 = vpop.f32.mrb[81].mxu1 }
 0xac6   :  { %v5284_v6 = vpop.f32.mrb[82].mxu1  ;;  %v4760_v14 = vpop.f32.mrb[46].mxu0 }
 0xac7   :  { %v5285_v48 = vadd.f32 %v5284_v6, %v15712_v28  ;;  %v15721_v8 = vadd.f32 %v4828_v3, %v4760_v14  ;;  %v4762_v56 = vpop.f32.mrb[47].mxu0  ;;  %v5286_v11 = vpop.f32.mrb[83].mxu1 }
 0xac8   :  { %v15723_v23 = vadd.f32 %v4832_v54, %v4762_v56 }
 0xac9   :  { %17612 = vst [vmem:[#allocation54_spill] sm:$0xff] %v15721_v8  ;;  %v5380_v2 = vadd.f32 %v5285_v48, %v4884_v38 }
 0xaca   :  { %17613 = vst [vmem:[#allocation25_spill] sm:$0xff] %v15723_v23  ;;  %v4766_v31 = vpop.f32.mrb[48].mxu0 }
 0xacb   :  { %v8899_v51 = vmul.f32 -1.442695, %v5380_v2  ;;  %v15725_v19 = vadd.f32 %v4828_v3, %v4766_v31  ;;  %v4768_v57 = vpop.f32.mrb[49].mxu0 }
 0xacc   :  { %v15727_v44 = vadd.f32 %v4832_v54, %v4768_v57 }
 0xacd   :  { %17614 = vst [vmem:[#allocation55_spill] sm:$0xff] %v15725_v19  ;;  %13082 = vpow2.f32 %v8899_v51  ;;  %v17624_v19 = vld [vmem:[#allocation85_spill] sm:$0xff] }
 0xace   :  { %17615 = vst [vmem:[#allocation88_spill] sm:$0xff] %v15727_v44  ;;  %v4772_v50 = vpop.f32.mrb[50].mxu0 }
 0xacf   :  { %v15729_v15 = vadd.f32 %v4828_v3, %v4772_v50  ;;  %v4774_v45 = vpop.f32.mrb[51].mxu0 }
 0xad0   :  { %v15731_v6 = vadd.f32 %v4832_v54, %v4774_v45 }
 0xad1   :  { %17616 = vst [vmem:[#allocation66_spill] sm:$0xff] %v15729_v15 }
 0xad2   :  { %17617 = vst [vmem:[#allocation67_spill] sm:$0xff] %v15731_v6  ;;  %v4778_v14 = vpop.f32.mrb[52].mxu0 }
 0xad3   :  { %v15733_v62 = vadd.f32 %v4828_v3, %v4778_v14  ;;  %v4780_v56 = vpop.f32.mrb[53].mxu0  ;;  %v15746_v14 = vrot.slane %v5032_v39, %v17624_v19 }
 0xad4   :  { %v15735_v23 = vadd.f32 %v4832_v54, %v4780_v56  ;;  %v5031_v56 = vld [vmem:[%s17034_s12] sm:$0x7]  ;;  %s15979_s12 = spop %12800 }
 0xad5   :  { %17618 = vst [vmem:[#allocation90_spill] sm:$0xff] %v15733_v62  ;;  %17625 = vst [vmem:[#allocation72_spill] sm:$0xff] %v15746_v14  ;;  %v4816_v62 = vrot.slane %v15660_v59, %v17624_v19  ;;  %p5405_p8 = scmp.gt.s32.totalorder %s15979_s12, 0  ;;  %p5759_p9 = scmp.gt.s32.totalorder %s15979_s12, 1 }
 0xad6   :  { %17619 = vst [vmem:[#allocation73_spill] sm:$0xff] %v15735_v23  ;;  %v4784_v38 = vpop.f32.mrb[54].mxu0  ;;  %p6113_p10 = scmp.gt.s32.totalorder %s15979_s12, 2  ;;  %p5411_p11 = scmp.gt.s32.totalorder %s15979_s12, 7 }
 0xad7   :  { %v13083_v2 = vpop.eup %13082  ;;  %v15737_v31 = vadd.f32 %v4828_v3, %v4784_v38  ;;  %v4786_v48 = vpop.f32.mrb[55].mxu0  ;;  %s5407_s9 = scalar_select %p5405_p8, 1, 0 }
 0xad8   :  { %v15739_v57 = vadd.f32 %v4832_v54, %v4786_v48  ;;  %v5384_v51 = vadd.f32 1.0, %v13083_v2  ;;  %v4812_v2 = vrot.slane %v15660_v59, %v17608_v5  ;;  %s5761_s29 = scalar_select %p5759_p9, 1, 0 }
 0xad9   :  { %17620 = vst [vmem:[#allocation74_spill] sm:$0xff] %v15737_v31  ;;  %s6115_s2 = scalar_select %p6113_p10, 1, 0 }
 0xada   :  { %17621 = vst [vmem:[#allocation68_spill] sm:$0xff] %v15739_v57  ;;  %v4790_v8 = vpop.f32.mrb[56].mxu0  ;;  %13084 = vrcp.f32 %v5384_v51  ;;  %v5053_v57 = vrot.slane %v5031_v56, %v17624_v19  ;;  %s5413_s19 = scalar_select %p5411_p11, 1, 0 }
 0xadb   :  { %v15741_v50 = vadd.f32 %v4828_v3, %v4790_v8  ;;  %v4792_v44 = vpop.f32.mrb[57].mxu0  ;;  %v5049_v8 = vrot.slane %v5031_v56, %v17608_v5  ;;  %p5765_p12 = scmp.gt.s32.totalorder %s15979_s12, 6  ;;  %p6119_p13 = scmp.gt.s32.totalorder %s15979_s12, 5 }
 0xadc   :  { %v15743_v45 = vadd.f32 %v4832_v54, %v4792_v44  ;;  %v5287_v44 = vadd.f32 %v5286_v11, %v15746_v14  ;;  %p6467_p0 = scmp.gt.s32.totalorder %s15979_s12, 3  ;;  %p6473_p1 = scmp.gt.s32.totalorder %s15979_s12, 4 }
 0xadd   :  { %17622 = vst [vmem:[#allocation69_spill] sm:$0xff] %v15741_v50  ;;  %s5767_s6 = scalar_select %p5765_p12, 1, 0 }
 0xade   :  { %17623 = vst [vmem:[#allocation71_spill] sm:$0xff] %v15743_v45  ;;  %v4796_v38 = vpop.f32.mrb[58].mxu0  ;;  %v15765_v45 = vadd.f32 %v5049_v8, %v4812_v2  ;;  %s6121_s25 = scalar_select %p6119_p13, 1, 0 }
 0xadf   :  { %v15751_v6 = vadd.f32 %v4828_v3, %v4796_v38  ;;  %v4798_v48 = vpop.f32.mrb[59].mxu0  ;;  %v15763_v38 = vrot.slane %v5032_v39, %v17594_v21  ;;  %s6469_s11 = scalar_select %p6467_p0, 1, 0 }
 0xae0   :  { %v15756_v15 = vadd.f32 %v4832_v54, %v4798_v48  ;;  %17628 = vst [vmem:[#allocation81_spill] sm:$0xff] %v15765_v45  ;;  %v15767_v48 = vadd.f32 %v5053_v57, %v4816_v62  ;;  %s6475_s0 = scalar_select %p6473_p1, 1, 0 }
 0xae1   :  { %17626 = vst [vmem:[#allocation62_spill] sm:$0xff] %v15751_v6  ;;  %s205_s24 = scvt.s32.f32 %s15979_s12 }
 0xae2   :  { %17627 = vst [vmem:[#allocation79_spill] sm:$0xff] %v15756_v15  ;;  %v4802_v23 = vpop.f32.mrb[60].mxu0  ;;  %17629 = vst [vmem:[#allocation83_spill] sm:$0xff] %v15767_v48 }
 0xae3   :  { %v4885_v51 = vadd.f32 %v4828_v3, %v4802_v23  ;;  %v4804_v31 = vpop.f32.mrb[61].mxu0 }
 0xae4   :  { %v13085_v19 = vpop.eup %13084  ;;  %v4886_v23 = vadd.f32 %v4832_v54, %v4804_v31 }
 0xae5   :  { %v5387_v50 = vadd.f32 %v5287_v44, %v4885_v51 }
 0xae6   :  { %v5355_v6 = vpop.f32.mrb[84].mxu1  ;;  %v5127_v5 = vpop.f32.mrb[30].mxu0 }
 0xae7   :  { %v8900_v15 = vmul.f32 -1.442695, %v5387_v50  ;;  %v5356_v11 = vadd.f32 %v5355_v6, %v15763_v38  ;;  %v12655_v14 = vadd.f32 %v15765_v45, %v5127_v5  ;;  %v5129_v59 = vpop.f32.mrb[31].mxu0  ;;  %v9509_v28 = vpop.f32.mrb[85].mxu1 }
 0xae8   :  { %v12657_v2 = vadd.f32 %v15767_v48, %v5129_v59  ;;  %v15773_v28 = vrot.slane %v5031_v56, %v17594_v21  ;;  %v4841_v59 = vadd.f32 %v15671_v47, %v15665_v1  ;;  %v17631_v1 = vmov 0.0|0.0   ;;  %v17632_v47 = vld [vmem:[#allocation42_spill] sm:$0xff] }
 0xae9   :  { %13086 = vpow2.f32 %v8900_v15  ;;  %v5394_v3 = vmul.f32 %v13085_v19, %v5356_v11  ;;  %v8897_v39 = vmul.f32 -1.442695, %v12655_v14 }
 0xaea   :  { %v8898_v44 = vmul.f32 -1.442695, %v12657_v2  ;;  %17630 = vst [vmem:[#allocation94_spill] sm:$0xff] %v15773_v28  ;;  %v5199_v14 = vadd.f32 %v15706_v33, %v15773_v28  ;;  %v17633_v33 = vld [vmem:[#allocation77_spill] sm:$0xff] }
 0xaeb   :  { %v5395_v8 = vadd.f32 %v5394_v3, %v4886_v23  ;;  %13088 = vpow2.f32 %v8897_v39 }
 0xaec   :  { %13090 = vpow2.f32 %v8898_v44 }
 0xaf3   :  { %v13087_v62 = vpop.eup %13086 }
 0xaf4   :  { %v5391_v57 = vadd.f32 1.0, %v13087_v62 }
 0xaf5   :  { %v13089_v50 = vpop.eup %13088 }
 0xaf6   :  { %13092 = vrcp.f32 %v5391_v57  ;;  %v5363_v6 = vadd.f32 1.0, %v13089_v50  ;;  %v13091_v51 = vpop.eup %13090  ;;  %v17634_v50 = vld [vmem:[#allocation27_spill] sm:$0xff] }
 0xaf7   :  { %13094 = vtanh.f32 %v5395_v8  ;;  %v5370_v15 = vadd.f32 1.0, %v13091_v51  ;;  %v17636_v51 = vld [vmem:[#allocation78_spill] sm:$0xff] }
 0xaf8   :  { %13096 = vrcp.f32 %v5363_v6  ;;  %v17635_v6 = vld [vmem:[#allocation43_spill] sm:$0xff] }
 0xaf9   :  { %13098 = vrcp.f32 %v5370_v15  ;;  %v17637_v15 = vld [vmem:[#allocation28_spill] sm:$0xff] }
 0xb00   :  { %v13093_v54 = vpop.eup %13092 }
 0xb01   :  { %v13095_v31 = vpop.eup %13094  ;;  %v5397_v5 = vsub.f32 1.0, %v13093_v54  ;;  %v5399_v3 = vmul.f32 0.0, %v13093_v54  ;;  %v17638_v54 = vld [vmem:[#allocation44_spill] sm:$0xff] }
 0xb02   :  { %v13097_v11 = vpop.eup %13096 }
 0xb03   :  { %v5373_v19 = vmul.f32 %v13097_v11, %v5199_v14  ;;  %v5398_v23 = vmul.f32 %v13095_v31, %v5397_v5  ;;  %v13099_v21 = vpop.eup %13098  ;;  %v17639_v31 = vld [vmem:[#allocation41_spill] sm:$0xff]  ;;  %v17642_v11 = vld [vmem:[#allocation26_spill] sm:$0xff] }
 0xb04   :  { %v5376_v56 = vsub.f32 1.0, %v13099_v21  ;;  %v5378_v62 = vmul.f32 0.0, %v13099_v21  ;;  %v17640_v14 = vld [vmem:[#allocation29_spill] sm:$0xff] }
 0xb05   :  { %v5374_v39 = vadd.f32 %v5373_v19, %v4841_v59  ;;  %v15779_v2 = vadd.f32 %v5399_v3, %v5398_v23  ;;  %v17641_v5 = vld [vmem:[#allocation45_spill] sm:$0xff]  ;;  %v17643_v59 = vld [vmem:[#allocation30_spill] sm:$0xff]  ;;  %v17645_v23 = vld [vmem:[#allocation64_spill] sm:$0xff] }
 0xb06   :  { %v17644_v19 = vld [vmem:[#allocation46_spill] sm:$0xff]  ;;  %v17646_v3 = vld [vmem:[#allocation65_spill] sm:$0xff] }
 0xb07   :  { %13100 = vtanh.f32 %v5374_v39 }
 0xb11   :  { %v13101_v8 = vpop.eup %13100 }
 0xb12   :  { %v5377_v44 = vmul.f32 %v13101_v8, %v5376_v56 }
 0xb14   :  { %v15781_v57 = vadd.f32 %v5378_v62, %v5377_v44 }
 0xb16   :  { %8901 = vmatmul.mubr.msk.f32.vlgmr.msra.gmra.mrb[32].mxu0 %vm17237_vm10, %v15781_v57  ;;  %9543 = vmatmul.mubr.msk.f32.vlgmr.msra.gmra.mrb[86].mxu1 %vm17237_vm10, %v15781_v57 }
 0xb17   :  { %11688 = vmatpush1.bf16.msra.mxu0 %v15324_v17  ;;  %11719 = vmatpush3.bf16.msra.mxu1 %v15428_v16 }
 0xb18   :  { %11690 = vmatprep.subr.bf16.mxu0 %v15329_v29  ;;  %11720 = vmatprep.subr.bf16.mxu1 %v17631_v1 }
 0xb19   :  { %5634 = vmatprep.mubr.f32.mxu0 %v17296_v52  ;;  %9577 = vmatprep.mubr.msk.f32.mxu1 %vm13449_vm2, %v17296_v52 }
 0xb1b   :  { %11692 = vmatpush1.bf16.msra.mxu0 %v15339_v7  ;;  %11722 = vmatpush3.bf16.msra.mxu1 %v15455_v13 }
 0xb1c   :  { %11694 = vmatprep.subr.bf16.mxu0 %v15343_v30  ;;  %11723 = vmatprep.subr.bf16.mxu1 %v17631_v1 }
 0xb1f   :  { %11696 = vmatpush1.bf16.msra.mxu0 %v15350_v34  ;;  %11725 = vmatpush3.bf16.msra.mxu1 %v15483_v27 }
 0xb20   :  { %11698 = vmatprep.subr.bf16.mxu0 %v15354_v36  ;;  %11726 = vmatprep.subr.bf16.mxu1 %v17631_v1 }
 0xb23   :  { %11700 = vmatpush1.bf16.msra.mxu0 %v15360_v40  ;;  %11728 = vmatpush3.bf16.msra.mxu1 %v15509_v26 }
 0xb24   :  { %11702 = vmatprep.subr.bf16.mxu0 %v15364_v58  ;;  %11729 = vmatprep.subr.bf16.mxu1 %v17631_v1 }
 0xb27   :  { %11704 = vmatpush1.bf16.msra.mxu0 %v15370_v49  ;;  %11731 = vmatpush3.bf16.msra.mxu1 %v15535_v46 }
 0xb28   :  { %11706 = vmatprep.subr.bf16.mxu0 %v15374_v41  ;;  %11732 = vmatprep.subr.bf16.mxu1 %v17631_v1 }
 0xb2b   :  { %11708 = vmatpush1.bf16.msra.mxu0 %v15380_v22  ;;  %11734 = vmatpush3.bf16.msra.mxu1 %v15561_v0 }
 0xb2c   :  { %11710 = vmatprep.subr.bf16.mxu0 %v15384_v12  ;;  %11735 = vmatprep.subr.bf16.mxu1 %v17631_v1 }
 0xb2f   :  { %11712 = vmatpush1.bf16.msra.mxu0 %v15390_v20  ;;  %11737 = vmatpush3.bf16.msra.mxu1 %v15587_v37 }
 0xb30   :  { %11714 = vmatprep.subr.bf16.mxu0 %v15394_v4  ;;  %11738 = vmatprep.subr.bf16.mxu1 %v17631_v1 }
 0xb33   :  { %11716 = vmatpush1.bf16.msra.mxu0 %v15406_v42  ;;  %11740 = vmatpush3.bf16.msra.mxu1 %v15607_v60 }
 0xb34   :  { %11742 = vmatprep.subr.bf16.mxu0 %v15416_v24  ;;  %11773 = vmatprep.subr.bf16.mxu1 %v17631_v1 }
 0xb36   :  { %8903 = vmatmul.mubr.msk.f32.vlgmr.msra.gmra.mrb[62].mxu0 %vm1359_vm11, %v15779_v2  ;;  %9578 = vmatmul.mubr.msk.f32.vlgmr.msra.gmra.mrb[88].mxu1 %vm1359_vm11, %v15779_v2 }
 0xb37   :  { %11744 = vmatpush1.bf16.msra.mxu0 %v15430_v35  ;;  %11775 = vmatpush3.bf16.msra.mxu1 %v15181_v9 }
 0xb38   :  { %11746 = vmatprep.subr.bf16.mxu0 %v15441_v55  ;;  %11776 = vmatprep.subr.bf16.mxu1 %v17631_v1 }
 0xb39   :  { %5847 = vmatprep.mubr.f32.mxu0 %v17296_v52  ;;  %9612 = vmatprep.mubr.msk.f32.mxu1 %vm13449_vm2, %v17296_v52 }
 0xb3b   :  { %11748 = vmatpush1.bf16.msra.mxu0 %v15457_v10  ;;  %11778 = vmatpush3.bf16.msra.mxu1 %v15199_v61 }
 0xb3c   :  { %11750 = vmatprep.subr.bf16.mxu0 %v15468_v53  ;;  %11779 = vmatprep.subr.bf16.mxu1 %v17631_v1 }
 0xb3f   :  { %11752 = vmatpush1.bf16.msra.mxu0 %v15485_v63  ;;  %11781 = vmatpush3.bf16.msra.mxu1 %v15217_v25 }
 0xb40   :  { %11754 = vmatprep.subr.bf16.mxu0 %v15496_v43  ;;  %11782 = vmatprep.subr.bf16.mxu1 %v17631_v1 }
 0xb43   :  { %11756 = vmatpush1.bf16.msra.mxu0 %v17632_v47  ;;  %11784 = vmatpush3.bf16.msra.mxu1 %v17633_v33 }
 0xb44   :  { %11758 = vmatprep.subr.bf16.mxu0 %v17634_v50  ;;  %11785 = vmatprep.subr.bf16.mxu1 %v17631_v1 }
 0xb47   :  { %11760 = vmatpush1.bf16.msra.mxu0 %v17635_v6  ;;  %11787 = vmatpush3.bf16.msra.mxu1 %v17636_v51  ;;  %v17651_v51 = vld [vmem:[#allocation62_spill] sm:$0xff] }
 0xb48   :  { %11762 = vmatprep.subr.bf16.mxu0 %v17637_v15  ;;  %11788 = vmatprep.subr.bf16.mxu1 %v17631_v1  ;;  %v17647_v15 = vld [vmem:[#allocation47_spill] sm:$0xff] }
 0xb4b   :  { %11764 = vmatpush1.bf16.msra.mxu0 %v17638_v54  ;;  %11790 = vmatpush3.bf16.msra.mxu1 %v17639_v31 }
 0xb4c   :  { %11766 = vmatprep.subr.bf16.mxu0 %v17640_v14  ;;  %11791 = vmatprep.subr.bf16.mxu1 %v17631_v1 }
 0xb4f   :  { %11768 = vmatpush1.bf16.msra.mxu0 %v17641_v5  ;;  %11793 = vmatpush3.bf16.msra.mxu1 %v17642_v11 }
 0xb50   :  { %11770 = vmatprep.subr.bf16.mxu0 %v17643_v59  ;;  %11794 = vmatprep.subr.bf16.mxu1 %v17631_v1 }
 0xb53   :  { %11772 = vmatpush1.bf16.msra.mxu0 %v17644_v19  ;;  %11796 = vmatpush3.bf16.msra.mxu1 %v17645_v23 }
 0xb54   :  { %11798 = vmatprep.subr.bf16.mxu0 %v17646_v3  ;;  %11829 = vmatprep.subr.bf16.mxu1 %v17631_v1 }
 0xbe9   :  { %v5495_v39 = vpop.f32.mrb[32].mxu0  ;;  %v5566_v21 = vpop.f32.mrb[86].mxu1 }
 0xbea   :  { %v12659_v56 = vadd.f32 %v15765_v45, %v5495_v39  ;;  %v5497_v8 = vpop.f32.mrb[33].mxu0  ;;  %v9544_v44 = vpop.f32.mrb[87].mxu1  ;;  %v5567_v3 = vadd.f32 %v5566_v21, %v15773_v28 }
 0xbeb   :  { %v12661_v11 = vadd.f32 %v15767_v48, %v5497_v8 }
 0xbec   :  { %v8905_v62 = vmul.f32 -1.442695, %v12659_v56  ;;  %v17648_v56 = vld [vmem:[#allocation38_spill] sm:$0xff] }
 0xbed   :  { %v8906_v59 = vmul.f32 -1.442695, %v12661_v11 }
 0xbee   :  { %13102 = vpow2.f32 %v8905_v62 }
 0xbef   :  { %13104 = vpow2.f32 %v8906_v59  ;;  %v17649_v59 = vld [vmem:[#allocation72_spill] sm:$0xff] }
 0xbf8   :  { %v13103_v5 = vpop.eup %13102 }
 0xbf9   :  { %v5715_v19 = vadd.f32 1.0, %v13103_v5  ;;  %v13105_v23 = vpop.eup %13104  ;;  %v17650_v5 = vld [vmem:[#allocation37_spill] sm:$0xff] }
 0xbfa   :  { %v5722_v14 = vadd.f32 1.0, %v13105_v23 }
 0xbfb   :  { %13106 = vrcp.f32 %v5715_v19 }
 0xbfc   :  { %13108 = vrcp.f32 %v5722_v14 }
 0xc05   :  { %v13107_v31 = vpop.eup %13106 }
 0xc06   :  { %v5725_v54 = vmul.f32 %v13107_v31, %v5567_v3  ;;  %v13109_v21 = vpop.eup %13108 }
 0xc07   :  { %v5728_v14 = vsub.f32 1.0, %v13109_v21 }
 0xc08   :  { %v5726_v39 = vadd.f32 %v5725_v54, %v17647_v15  ;;  %v15876_v15 = vsel %vm17237_vm10, %v15781_v57, 0.0 }
 0xc09   :  { %v5636_v45 = vpop.f32.mrb[62].mxu0  ;;  %v5707_v44 = vpop.f32.mrb[88].mxu1  ;;  %v5730_v54 = vmul.f32 %v13109_v21, %v15876_v15 }
 0xc0a   :  { %13110 = vtanh.f32 %v5726_v39  ;;  %v5637_v8 = vadd.f32 %v5636_v45, %v17648_v56  ;;  %v5638_v62 = vpop.f32.mrb[63].mxu0  ;;  %v9579_v11 = vpop.f32.mrb[89].mxu1 }
 0xc0b   :  { %v5639_v48 = vadd.f32 %v5638_v62, %v17649_v59  ;;  %v5708_v11 = vadd.f32 %v5707_v44, %v15763_v38 }
 0xc0c   :  { %v5732_v19 = vadd.f32 %v5637_v8, %v17650_v5 }
 0xc0d   :  { %v5739_v23 = vadd.f32 %v5639_v48, %v17651_v51 }
 0xc0e   :  { %v8907_v6 = vmul.f32 -1.442695, %v5732_v19 }
 0xc0f   :  { %v8908_v31 = vmul.f32 -1.442695, %v5739_v23  ;;  %v17653_v23 = vld [vmem:[#allocation79_spill] sm:$0xff] }
 0xc10   :  { %13112 = vpow2.f32 %v8907_v6 }
 0xc11   :  { %13114 = vpow2.f32 %v8908_v31 }
 0xc14   :  { %v13111_v3 = vpop.eup %13110 }
 0xc15   :  { %v5729_v45 = vmul.f32 %v13111_v3, %v5728_v14  ;;  %v15925_v3 = vsel %vm1359_vm11, %v15779_v2, 0.0  ;;  %v17655_v2 = vld [vmem:[#allocation43_spill] sm:$0xff] }
 0xc17   :  { %v15879_v39 = vadd.f32 %v5730_v54, %v5729_v45 }
 0xc19   :  { %v15885_v51 = vsel %vm1725_vm12, %v15879_v39, %v15876_v15 }
 0xc1a   :  { %v13113_v6 = vpop.eup %13112  ;;  %5848 = vmatmul.mubr.f32.vlgmr.msra.gmra.mrb[34].mxu0 %v15885_v51  ;;  %9613 = vmatmul.mubr.f32.vlgmr.msra.gmra.mrb[90].mxu1 %v15885_v51 }
 0xc1b   :  { %v5736_v8 = vadd.f32 1.0, %v13113_v6  ;;  %11800 = vmatpush1.bf16.msra.mxu0 %v15324_v17  ;;  %11831 = vmatpush3.bf16.msra.mxu1 %v15428_v16  ;;  %v13115_v57 = vpop.eup %13114 }
 0xc1c   :  { %11802 = vmatprep.subr.bf16.mxu0 %v15329_v29  ;;  %11832 = vmatprep.subr.bf16.mxu1 %v17631_v1  ;;  %v5743_v62 = vadd.f32 1.0, %v13115_v57 }
 0xc1d   :  { %13116 = vrcp.f32 %v5736_v8  ;;  %5988 = vmatprep.mubr.f32.mxu0 %v17296_v52  ;;  %9647 = vmatprep.mubr.msk.f32.mxu1 %vm13449_vm2, %v17296_v52  ;;  %v17705_v8 = vld [vmem:[#allocation81_spill] sm:$0xff] }
 0xc1e   :  { %13118 = vrcp.f32 %v5743_v62  ;;  %v17656_v62 = vld [vmem:[#allocation78_spill] sm:$0xff] }
 0xc1f   :  { %11804 = vmatpush1.bf16.msra.mxu0 %v15339_v7  ;;  %11834 = vmatpush3.bf16.msra.mxu1 %v15455_v13 }
 0xc20   :  { %11806 = vmatprep.subr.bf16.mxu0 %v15343_v30  ;;  %11835 = vmatprep.subr.bf16.mxu1 %v17631_v1 }
 0xc23   :  { %11808 = vmatpush1.bf16.msra.mxu0 %v15350_v34  ;;  %11837 = vmatpush3.bf16.msra.mxu1 %v15483_v27 }
 0xc24   :  { %11810 = vmatprep.subr.bf16.mxu0 %v15354_v36  ;;  %11838 = vmatprep.subr.bf16.mxu1 %v17631_v1 }
 0xc27   :  { %v13117_v5 = vpop.eup %13116  ;;  %11812 = vmatpush1.bf16.msra.mxu0 %v15360_v40  ;;  %11840 = vmatpush3.bf16.msra.mxu1 %v15509_v26 }
 0xc28   :  { %v5746_v19 = vmul.f32 %v13117_v5, %v5708_v11  ;;  %11814 = vmatprep.subr.bf16.mxu0 %v15364_v58  ;;  %11841 = vmatprep.subr.bf16.mxu1 %v17631_v1  ;;  %v13119_v44 = vpop.eup %13118  ;;  %v17657_v11 = vld [vmem:[#allocation28_spill] sm:$0xff] }
 0xc29   :  { %v5749_v31 = vsub.f32 1.0, %v13119_v44  ;;  %v5751_v54 = vmul.f32 %v13119_v44, %v15925_v3  ;;  %v17658_v5 = vld [vmem:[#allocation44_spill] sm:$0xff]  ;;  %v17662_v44 = vld [vmem:[#allocation26_spill] sm:$0xff] }
 0xc2a   :  { %v5747_v21 = vadd.f32 %v5746_v19, %v17653_v23  ;;  %v17659_v19 = vld [vmem:[#allocation41_spill] sm:$0xff] }
 0xc2b   :  { %11816 = vmatpush1.bf16.msra.mxu0 %v15370_v49  ;;  %11843 = vmatpush3.bf16.msra.mxu1 %v15535_v46  ;;  %v17660_v23 = vld [vmem:[#allocation29_spill] sm:$0xff] }
 0xc2c   :  { %13120 = vtanh.f32 %v5747_v21  ;;  %11818 = vmatprep.subr.bf16.mxu0 %v15374_v41  ;;  %11844 = vmatprep.subr.bf16.mxu1 %v17631_v1  ;;  %v17661_v21 = vld [vmem:[#allocation45_spill] sm:$0xff] }
 0xc2f   :  { %11820 = vmatpush1.bf16.msra.mxu0 %v15380_v22  ;;  %11846 = vmatpush3.bf16.msra.mxu1 %v15561_v0 }
 0xc30   :  { %11822 = vmatprep.subr.bf16.mxu0 %v15384_v12  ;;  %11847 = vmatprep.subr.bf16.mxu1 %v17631_v1 }
 0xc33   :  { %11824 = vmatpush1.bf16.msra.mxu0 %v15390_v20  ;;  %11849 = vmatpush3.bf16.msra.mxu1 %v15587_v37 }
 0xc34   :  { %11826 = vmatprep.subr.bf16.mxu0 %v15394_v4  ;;  %11850 = vmatprep.subr.bf16.mxu1 %v17631_v1 }
 0xc36   :  { %v13121_v14 = vpop.eup %13120 }
 0xc37   :  { %11828 = vmatpush1.bf16.msra.mxu0 %v15406_v42  ;;  %11852 = vmatpush3.bf16.msra.mxu1 %v15607_v60  ;;  %v5750_v45 = vmul.f32 %v13121_v14, %v5749_v31  ;;  %v17663_v31 = vld [vmem:[#allocation30_spill] sm:$0xff] }
 0xc38   :  { %11854 = vmatprep.subr.bf16.mxu0 %v15416_v24  ;;  %11885 = vmatprep.subr.bf16.mxu1 %v17631_v1  ;;  %v17664_v14 = vld [vmem:[#allocation46_spill] sm:$0xff] }
 0xc39   :  { %v15932_v6 = vadd.f32 %v5751_v54, %v5750_v45  ;;  %v17665_v45 = vld [vmem:[#allocation64_spill] sm:$0xff]  ;;  %v17666_v54 = vld [vmem:[#allocation65_spill] sm:$0xff] }
 0xc3b   :  { %v15938_v57 = vsel %vm1733_vm13, %v15932_v6, %v15925_v3 }
 0xc3c   :  { %5989 = vmatmul.mubr.f32.vlgmr.msra.gmra.mrb[64].mxu0 %v15938_v57  ;;  %9648 = vmatmul.mubr.f32.vlgmr.msra.gmra.mrb[92].mxu1 %v15938_v57 }
 0xc3d   :  { %11856 = vmatpush1.bf16.msra.mxu0 %v15430_v35  ;;  %11887 = vmatpush3.bf16.msra.mxu1 %v15181_v9 }
 0xc3e   :  { %11858 = vmatprep.subr.bf16.mxu0 %v15441_v55  ;;  %11888 = vmatprep.subr.bf16.mxu1 %v17631_v1 }
 0xc3f   :  { %6201 = vmatprep.mubr.f32.mxu0 %v17296_v52  ;;  %9682 = vmatprep.mubr.msk.f32.mxu1 %vm13449_vm2, %v17296_v52 }
 0xc41   :  { %11860 = vmatpush1.bf16.msra.mxu0 %v15457_v10  ;;  %11890 = vmatpush3.bf16.msra.mxu1 %v15199_v61 }
 0xc42   :  { %11862 = vmatprep.subr.bf16.mxu0 %v15468_v53  ;;  %11891 = vmatprep.subr.bf16.mxu1 %v17631_v1 }
 0xc45   :  { %11864 = vmatpush1.bf16.msra.mxu0 %v15485_v63  ;;  %11893 = vmatpush3.bf16.msra.mxu1 %v15217_v25 }
 0xc46   :  { %11866 = vmatprep.subr.bf16.mxu0 %v15496_v43  ;;  %11894 = vmatprep.subr.bf16.mxu1 %v17631_v1 }
 0xc49   :  { %11868 = vmatpush1.bf16.msra.mxu0 %v17632_v47  ;;  %11896 = vmatpush3.bf16.msra.mxu1 %v17633_v33 }
 0xc4a   :  { %11870 = vmatprep.subr.bf16.mxu0 %v17634_v50  ;;  %11897 = vmatprep.subr.bf16.mxu1 %v17631_v1 }
 0xc4d   :  { %11872 = vmatpush1.bf16.msra.mxu0 %v17655_v2  ;;  %11899 = vmatpush3.bf16.msra.mxu1 %v17656_v62 }
 0xc4e   :  { %11874 = vmatprep.subr.bf16.mxu0 %v17657_v11  ;;  %11900 = vmatprep.subr.bf16.mxu1 %v17631_v1 }
 0xc51   :  { %11876 = vmatpush1.bf16.msra.mxu0 %v17658_v5  ;;  %11902 = vmatpush3.bf16.msra.mxu1 %v17659_v19 }
 0xc52   :  { %11878 = vmatprep.subr.bf16.mxu0 %v17660_v23  ;;  %11903 = vmatprep.subr.bf16.mxu1 %v17631_v1  ;;  %v17667_v23 = vld [vmem:[#allocation81_spill] sm:$0xff] }
 0xc55   :  { %11880 = vmatpush1.bf16.msra.mxu0 %v17661_v21  ;;  %11905 = vmatpush3.bf16.msra.mxu1 %v17662_v44  ;;  %v17668_v44 = vld [vmem:[#allocation83_spill] sm:$0xff] }
 0xc56   :  { %11882 = vmatprep.subr.bf16.mxu0 %v17663_v31  ;;  %11906 = vmatprep.subr.bf16.mxu1 %v17631_v1 }
 0xc59   :  { %11884 = vmatpush1.bf16.msra.mxu0 %v17664_v14  ;;  %11908 = vmatpush3.bf16.msra.mxu1 %v17665_v45 }
 0xc5a   :  { %11910 = vmatprep.subr.bf16.mxu0 %v17666_v54  ;;  %11941 = vmatprep.subr.bf16.mxu1 %v17631_v1 }
 0xced   :  { %v5849_v18 = vpop.f32.mrb[34].mxu0  ;;  %v5920_v32 = vpop.f32.mrb[90].mxu1 }
 0xcee   :  { %v12663_v19 = vadd.f32 %v17667_v23, %v5849_v18  ;;  %v5851_v5 = vpop.f32.mrb[35].mxu0  ;;  %v9614_v21 = vpop.f32.mrb[91].mxu1  ;;  %v5921_v18 = vadd.f32 %v5920_v32, %v15773_v28  ;;  %v17670_v32 = vld [vmem:[#allocation36_spill] sm:$0xff] }
 0xcef   :  { %v12665_v62 = vadd.f32 %v17668_v44, %v5851_v5 }
 0xcf0   :  { %v8909_v11 = vmul.f32 -1.442695, %v12663_v19 }
 0xcf1   :  { %v8910_v31 = vmul.f32 -1.442695, %v12665_v62 }
 0xcf2   :  { %13122 = vpow2.f32 %v8909_v11  ;;  %v17669_v11 = vld [vmem:[#allocation48_spill] sm:$0xff] }
 0xcf3   :  { %13124 = vpow2.f32 %v8910_v31 }
 0xcfc   :  { %v13123_v2 = vpop.eup %13122 }
 0xcfd   :  { %v6069_v14 = vadd.f32 1.0, %v13123_v2  ;;  %v13125_v45 = vpop.eup %13124 }
 0xcfe   :  { %v6076_v50 = vadd.f32 1.0, %v13125_v45  ;;  %v5408_v45 = vstv %s5407_s9 }
 0xcff   :  { %13126 = vrcp.f32 %v6069_v14  ;;  %vm15991_vm8 = vcmp.eq.s32.totalorder %v5408_v45, 1  ;;  %v17675_v45 = vmov 0 }
 0xd00   :  { %13128 = vrcp.f32 %v6076_v50  ;;  %v5406_v50 = vmax.f32 %v15876_v15, -1e+30 }
 0xd09   :  { %v13127_v23 = vpop.eup %13126 }
 0xd0a   :  { %v6079_v19 = vmul.f32 %v13127_v23, %v5921_v18  ;;  %v17671_v23 = vld [vmem:[#allocation69_spill] sm:$0xff] }
 0xd0c   :  { %v6080_v62 = vadd.f32 %v6079_v19, %v17669_v11  ;;  %v13129_v19 = vpop.eup %13128  ;;  %v17672_v11 = vmov 0 }
 0xd0d   :  { %v17673_v11 = vsel %vm15991_vm8, 4294967295, %v17672_v11 }
 0xd0e   :  { %13130 = vtanh.f32 %v6080_v62  ;;  %17674 = vst [vmem:[#allocation91_spill] sm:$0xff] %v17673_v11 }
 0xd0f   :  { %v5990_v2 = vpop.f32.mrb[64].mxu0  ;;  %v6061_v5 = vpop.f32.mrb[92].mxu1 }
 0xd10   :  { %v5991_v21 = vadd.f32 %v5990_v2, %v17648_v56  ;;  %v5992_v31 = vpop.f32.mrb[65].mxu0  ;;  %v9649_v14 = vpop.f32.mrb[93].mxu1  ;;  %v5753_v2 = vsel %vm1725_vm12, %v15879_v39, 0.0  ;;  %v6116_v56 = vstv %s6115_s2 }
 0xd11   :  { %v5993_v44 = vadd.f32 %v5992_v31, %v17649_v59  ;;  %v5762_v31 = vstv %s5761_s29  ;;  %v6082_v14 = vsub.f32 1.0, %v13129_v19  ;;  %v5757_v39 = vadd.f32 %v5753_v2, %v15876_v15 }
 0xd12   :  { %v6086_v28 = vadd.f32 %v5991_v21, %v17670_v32  ;;  %v5410_v21 = vsel %vm15991_vm8, %v5406_v50, -1e+30  ;;  %vm16000_vm9 = vcmp.eq.s32.totalorder %v5762_v31, 1  ;;  %vm16015_vm3 = vcmp.eq.s32.totalorder %v6116_v56, 1 }
 0xd13   :  { %v6093_v18 = vadd.f32 %v5993_v44, %v17671_v23  ;;  %v5760_v59 = vmax.f32 %v5410_v21, %v5753_v2  ;;  %v17676_v45 = vsel %vm16000_vm9, 4294967295, %v17675_v45  ;;  %v17679_v31 = vmov 0 }
 0xd14   :  { %v8911_v62 = vmul.f32 -1.442695, %v6086_v28  ;;  %17677 = vst [vmem:[#allocation87_spill] sm:$0xff] %v17676_v45  ;;  %v6084_v28 = vmul.f32 %v13129_v19, %v15885_v51  ;;  %v17680_v31 = vsel %vm16015_vm3, 4294967295, %v17679_v31 }
 0xd15   :  { %v8912_v44 = vmul.f32 -1.442695, %v6093_v18  ;;  %17681 = vst [vmem:[#allocation58_spill] sm:$0xff] %v17680_v31 }
 0xd16   :  { %13132 = vpow2.f32 %v8911_v62  ;;  %v5764_v62 = vsel %vm16000_vm9, %v5760_v59, %v5410_v21 }
 0xd17   :  { %13134 = vpow2.f32 %v8912_v44 }
 0xd18   :  { %v13131_v32 = vpop.eup %13130 }
 0xd19   :  { %v6083_v23 = vmul.f32 %v13131_v32, %v6082_v14  ;;  %v17682_v32 = vld [vmem:[#allocation71_spill] sm:$0xff] }
 0xd1b   :  { %v6085_v48 = vadd.f32 %v6084_v28, %v6083_v23  ;;  %v5412_v28 = vmax.f32 %v15925_v3, -1e+30 }
 0xd1d   :  { %v6107_v11 = vsel %vm2101_vm14, %v6085_v48, 0.0  ;;  %v16013_v18 = vsel %vm2101_vm14, %v6085_v48, %v15885_v51 }
 0xd1e   :  { %v16019_v19 = vadd.f32 %v6107_v11, %v5757_v39  ;;  %v6114_v14 = vmax.f32 %v5764_v62, %v6107_v11  ;;  %6202 = vmatmul.mubr.f32.vlgmr.msra.gmra.mrb[36].mxu0 %v16013_v18  ;;  %9683 = vmatmul.mubr.f32.vlgmr.msra.gmra.mrb[94].mxu1 %v16013_v18  ;;  %v6062_v11 = vadd.f32 %v6061_v5, %v15763_v38  ;;  %v5414_v5 = vstv %s5413_s19 }
 0xd1f   :  { %11912 = vmatpush1.bf16.msra.mxu0 %v15324_v17  ;;  %11943 = vmatpush3.bf16.msra.mxu1 %v15428_v16  ;;  %vm16064_vm4 = vcmp.eq.s32.totalorder %v5414_v5, 1  ;;  %v17683_v39 = vmov 0 }
 0xd20   :  { %v13133_v59 = vpop.eup %13132  ;;  %11914 = vmatprep.subr.bf16.mxu0 %v15329_v29  ;;  %11944 = vmatprep.subr.bf16.mxu1 %v17631_v1  ;;  %v16029_v56 = vsel %vm16015_vm3, %v6114_v14, %v5764_v62  ;;  %v17684_v39 = vsel %vm16064_vm4, 4294967295, %v17683_v39  ;;  %v5754_v62 = vsel %vm1733_vm13, %v15932_v6, 0.0  ;;  %v17686_v6 = vmov 0 }
 0xd21   :  { %v6090_v15 = vadd.f32 1.0, %v13133_v59  ;;  %6342 = vmatprep.mubr.f32.mxu0 %v17296_v52  ;;  %9717 = vmatprep.mubr.msk.f32.mxu1 %vm13449_vm2, %v17296_v52  ;;  %v13135_v48 = vpop.eup %13134  ;;  %17685 = vst [vmem:[#allocation60_spill] sm:$0xff] %v17684_v39  ;;  %v5768_v59 = vstv %s5767_s6 }
 0xd22   :  { %v6097_v51 = vadd.f32 1.0, %v13135_v48  ;;  %v5416_v48 = vsel %vm16064_vm4, %v5412_v28, -1e+30  ;;  %vm16078_vm6 = vcmp.eq.s32.totalorder %v5768_v59, 1  ;;  %v17690_v28 = vmov 0  ;;  %v17695_v59 = vld [vmem:[#allocation78_spill] sm:$0xff] }
 0xd23   :  { %13136 = vrcp.f32 %v6090_v15  ;;  %11916 = vmatpush1.bf16.msra.mxu0 %v15339_v7  ;;  %11946 = vmatpush3.bf16.msra.mxu1 %v15455_v13  ;;  %v17687_v6 = vsel %vm16078_vm6, 4294967295, %v17686_v6 }
 0xd24   :  { %11918 = vmatprep.subr.bf16.mxu0 %v15343_v30  ;;  %11947 = vmatprep.subr.bf16.mxu1 %v17631_v1  ;;  %13138 = vrcp.f32 %v6097_v51  ;;  %17688 = vst [vmem:[#allocation80_spill] sm:$0xff] %v17687_v6 }
 0xd27   :  { %11920 = vmatpush1.bf16.msra.mxu0 %v15350_v34  ;;  %11949 = vmatpush3.bf16.msra.mxu1 %v15483_v27 }
 0xd28   :  { %11922 = vmatprep.subr.bf16.mxu0 %v15354_v36  ;;  %11950 = vmatprep.subr.bf16.mxu1 %v17631_v1 }
 0xd2b   :  { %11924 = vmatpush1.bf16.msra.mxu0 %v15360_v40  ;;  %11952 = vmatpush3.bf16.msra.mxu1 %v15509_v26 }
 0xd2c   :  { %11926 = vmatprep.subr.bf16.mxu0 %v15364_v58  ;;  %11953 = vmatprep.subr.bf16.mxu1 %v17631_v1 }
 0xd2d   :  { %v13137_v2 = vpop.eup %13136 }
 0xd2e   :  { %v6100_v21 = vmul.f32 %v13137_v2, %v6062_v11  ;;  %v13139_v23 = vpop.eup %13138  ;;  %v5766_v2 = vmax.f32 %v5416_v48, %v5754_v62 }
 0xd2f   :  { %11928 = vmatpush1.bf16.msra.mxu0 %v15370_v49  ;;  %11955 = vmatpush3.bf16.msra.mxu1 %v15535_v46  ;;  %v6103_v14 = vsub.f32 1.0, %v13139_v23  ;;  %v6105_v11 = vmul.f32 %v13139_v23, %v15938_v57 }
 0xd30   :  { %v6101_v44 = vadd.f32 %v6100_v21, %v17682_v32  ;;  %11930 = vmatprep.subr.bf16.mxu0 %v15374_v41  ;;  %11956 = vmatprep.subr.bf16.mxu1 %v17631_v1  ;;  %v6122_v21 = vstv %s6121_s25  ;;  %v5770_v23 = vsel %vm16078_vm6, %v5766_v2, %v5416_v48  ;;  %v17697_v48 = vld [vmem:[#allocation44_spill] sm:$0xff]  ;;  %v17700_v2 = vld [vmem:[#allocation45_spill] sm:$0xff] }
 0xd31   :  { %vm16090_vm7 = vcmp.eq.s32.totalorder %v6122_v21, 1  ;;  %v17701_v21 = vld [vmem:[#allocation26_spill] sm:$0xff] }
 0xd32   :  { %13140 = vtanh.f32 %v6101_v44  ;;  %v5758_v44 = vadd.f32 %v5754_v62, %v15925_v3  ;;  %v17691_v28 = vsel %vm16090_vm7, 4294967295, %v17690_v28  ;;  %v17694_v62 = vld [vmem:[#allocation43_spill] sm:$0xff] }
 0xd33   :  { %11932 = vmatpush1.bf16.msra.mxu0 %v15380_v22  ;;  %11958 = vmatpush3.bf16.msra.mxu1 %v15561_v0  ;;  %17692 = vst [vmem:[#allocation39_spill] sm:$0xff] %v17691_v28 }
 0xd34   :  { %11934 = vmatprep.subr.bf16.mxu0 %v15384_v12  ;;  %11959 = vmatprep.subr.bf16.mxu1 %v17631_v1 }
 0xd37   :  { %11936 = vmatpush1.bf16.msra.mxu0 %v15390_v20  ;;  %11961 = vmatpush3.bf16.msra.mxu1 %v15587_v37 }
 0xd38   :  { %11938 = vmatprep.subr.bf16.mxu0 %v15394_v4  ;;  %11962 = vmatprep.subr.bf16.mxu1 %v17631_v1 }
 0xd3b   :  { %11940 = vmatpush1.bf16.msra.mxu0 %v15406_v42  ;;  %11964 = vmatpush3.bf16.msra.mxu1 %v15607_v60 }
 0xd3c   :  { %v13141_v15 = vpop.eup %13140  ;;  %11966 = vmatprep.subr.bf16.mxu0 %v15416_v24  ;;  %11997 = vmatprep.subr.bf16.mxu1 %v17631_v1 }
 0xd3d   :  { %v6104_v51 = vmul.f32 %v13141_v15, %v6103_v14  ;;  %v17696_v15 = vld [vmem:[#allocation28_spill] sm:$0xff] }
 0xd3f   :  { %v6106_v32 = vadd.f32 %v6105_v11, %v6104_v51  ;;  %v17698_v51 = vld [vmem:[#allocation41_spill] sm:$0xff] }
 0xd40   :  { %v17699_v11 = vld [vmem:[#allocation29_spill] sm:$0xff] }
 0xd41   :  { %v6108_v45 = vsel %vm2109_vm15, %v6106_v32, 0.0  ;;  %v16088_v39 = vsel %vm2109_vm15, %v6106_v32, %v15938_v57  ;;  %v17702_v32 = vld [vmem:[#allocation30_spill] sm:$0xff] }
 0xd42   :  { %v16096_v14 = vadd.f32 %v6108_v45, %v5758_v44  ;;  %6343 = vmatmul.mubr.f32.vlgmr.msra.gmra.mrb[66].mxu0 %v16088_v39  ;;  %9718 = vmatmul.mubr.f32.vlgmr.msra.gmra.mrb[96].mxu1 %v16088_v39  ;;  %v6120_v3 = vmax.f32 %v5770_v23, %v6108_v45  ;;  %v17693_v45 = vld [vmem:[#allocation27_spill] sm:$0xff]  ;;  %v17703_v44 = vld [vmem:[#allocation46_spill] sm:$0xff] }
 0xd43   :  { %11968 = vmatpush1.bf16.msra.mxu0 %v15430_v35  ;;  %11999 = vmatpush3.bf16.msra.mxu1 %v15181_v9 }
 0xd44   :  { %11970 = vmatprep.subr.bf16.mxu0 %v15441_v55  ;;  %12000 = vmatprep.subr.bf16.mxu1 %v17631_v1  ;;  %v16106_v57 = vsel %vm16090_vm7, %v6120_v3, %v5770_v23  ;;  %v17704_v23 = vld [vmem:[#allocation64_spill] sm:$0xff] }
 0xd45   :  { %6549 = vmatprep.mubr.f32.mxu0 %v17296_v52  ;;  %9752 = vmatprep.mubr.msk.f32.mxu1 %vm13449_vm2, %v17296_v52 }
 0xd47   :  { %11972 = vmatpush1.bf16.msra.mxu0 %v15457_v10  ;;  %12002 = vmatpush3.bf16.msra.mxu1 %v15199_v61 }
 0xd48   :  { %11974 = vmatprep.subr.bf16.mxu0 %v15468_v53  ;;  %12003 = vmatprep.subr.bf16.mxu1 %v17631_v1 }
 0xd4b   :  { %11976 = vmatpush1.bf16.msra.mxu0 %v15485_v63  ;;  %12005 = vmatpush3.bf16.msra.mxu1 %v15217_v25 }
 0xd4c   :  { %11978 = vmatprep.subr.bf16.mxu0 %v15496_v43  ;;  %12006 = vmatprep.subr.bf16.mxu1 %v17631_v1 }
 0xd4f   :  { %11980 = vmatpush1.bf16.msra.mxu0 %v17632_v47  ;;  %12008 = vmatpush3.bf16.msra.mxu1 %v17633_v33 }
 0xd50   :  { %11982 = vmatprep.subr.bf16.mxu0 %v17693_v45  ;;  %12009 = vmatprep.subr.bf16.mxu1 %v17631_v1  ;;  %v17712_v45 = vld [vmem:[#allocation74_spill] sm:$0xff] }
 0xd53   :  { %11984 = vmatpush1.bf16.msra.mxu0 %v17694_v62  ;;  %12011 = vmatpush3.bf16.msra.mxu1 %v17695_v59  ;;  %v17711_v62 = vld [vmem:[#allocation35_spill] sm:$0xff] }
 0xd54   :  { %11986 = vmatprep.subr.bf16.mxu0 %v17696_v15  ;;  %12012 = vmatprep.subr.bf16.mxu1 %v17631_v1 }
 0xd57   :  { %11988 = vmatpush1.bf16.msra.mxu0 %v17697_v48  ;;  %12014 = vmatpush3.bf16.msra.mxu1 %v17698_v51  ;;  %v17707_v51 = vld [vmem:[#allocation94_spill] sm:$0xff] }
 0xd58   :  { %11990 = vmatprep.subr.bf16.mxu0 %v17699_v11  ;;  %12015 = vmatprep.subr.bf16.mxu1 %v17631_v1 }
 0xd5b   :  { %11992 = vmatpush1.bf16.msra.mxu0 %v17700_v2  ;;  %12017 = vmatpush3.bf16.msra.mxu1 %v17701_v21  ;;  %v17706_v21 = vld [vmem:[#allocation83_spill] sm:$0xff] }
 0xd5c   :  { %11994 = vmatprep.subr.bf16.mxu0 %v17702_v32  ;;  %12018 = vmatprep.subr.bf16.mxu1 %v17631_v1 }
 0xd5f   :  { %11996 = vmatpush1.bf16.msra.mxu0 %v17703_v44  ;;  %12020 = vmatpush3.bf16.msra.mxu1 %v17704_v23 }
 0xd60   :  { %12022 = vmatprep.subr.bf16.mxu0 %v17666_v54  ;;  %12053 = vmatprep.subr.bf16.mxu1 %v17631_v1 }
 0xdf1   :  { %v6203_v3 = vpop.f32.mrb[36].mxu0  ;;  %v6274_v6 = vpop.f32.mrb[94].mxu1 }
 0xdf2   :  { %v12667_v31 = vadd.f32 %v17705_v8, %v6203_v3  ;;  %v6205_v50 = vpop.f32.mrb[37].mxu0  ;;  %v9684_v28 = vpop.f32.mrb[95].mxu1  ;;  %v6275_v48 = vadd.f32 %v6274_v6, %v17707_v51  ;;  %v17708_v3 = vld [vmem:[#allocation49_spill] sm:$0xff] }
 0xdf3   :  { %v12669_v2 = vadd.f32 %v17706_v21, %v6205_v50  ;;  %v17709_v50 = vld [vmem:[#allocation38_spill] sm:$0xff]  ;;  %v17710_v21 = vld [vmem:[#allocation72_spill] sm:$0xff] }
 0xdf4   :  { %v8913_v5 = vmul.f32 -1.442695, %v12667_v31 }
 0xdf5   :  { %v8914_v32 = vmul.f32 -1.442695, %v12669_v2 }
 0xdf6   :  { %13142 = vpow2.f32 %v8913_v5 }
 0xdf7   :  { %13144 = vpow2.f32 %v8914_v32 }
 0xe00   :  { %v13143_v11 = vpop.eup %13142 }
 0xe01   :  { %v6423_v44 = vadd.f32 1.0, %v13143_v11  ;;  %v13145_v23 = vpop.eup %13144 }
 0xe02   :  { %v6430_v54 = vadd.f32 1.0, %v13145_v23 }
 0xe03   :  { %13146 = vrcp.f32 %v6423_v44 }
 0xe04   :  { %13148 = vrcp.f32 %v6430_v54 }
 0xe0d   :  { %v13147_v15 = vpop.eup %13146 }
 0xe0e   :  { %v6433_v59 = vmul.f32 %v13147_v15, %v6275_v48  ;;  %v13149_v44 = vpop.eup %13148  ;;  %v6470_v48 = vstv %s6469_s11 }
 0xe0f   :  { %v6436_v54 = vsub.f32 1.0, %v13149_v44  ;;  %vm16156_vm5 = vcmp.eq.s32.totalorder %v6470_v48, 1 }
 0xe10   :  { %v6434_v8 = vadd.f32 %v6433_v59, %v17708_v3  ;;  %v6438_v59 = vmul.f32 %v13149_v44, %v16013_v18 }
 0xe12   :  { %13150 = vtanh.f32 %v6434_v8 }
 0xe15   :  { %v6344_v31 = vpop.f32.mrb[66].mxu0  ;;  %v6415_v28 = vpop.f32.mrb[96].mxu1 }
 0xe16   :  { %v6345_v5 = vadd.f32 %v6344_v31, %v17709_v50  ;;  %v6346_v2 = vpop.f32.mrb[67].mxu0  ;;  %v9719_v32 = vpop.f32.mrb[97].mxu1 }
 0xe17   :  { %v6347_v11 = vadd.f32 %v6346_v2, %v17710_v21 }
 0xe18   :  { %v6440_v23 = vadd.f32 %v6345_v5, %v17711_v62 }
 0xe19   :  { %v6447_v6 = vadd.f32 %v6347_v11, %v17712_v45  ;;  %v6416_v11 = vadd.f32 %v6415_v28, %v15763_v38  ;;  %v17743_v45 = vld [vmem:[#allocation76_spill] sm:$0xff] }
 0xe1a   :  { %v8915_v51 = vmul.f32 -1.442695, %v6440_v23 }
 0xe1b   :  { %v8916_v3 = vmul.f32 -1.442695, %v6447_v6  ;;  %v17716_v6 = vld [vmem:[#allocation68_spill] sm:$0xff] }
 0xe1c   :  { %v13151_v15 = vpop.eup %13150  ;;  %13152 = vpow2.f32 %v8915_v51 }
 0xe1d   :  { %v6437_v8 = vmul.f32 %v13151_v15, %v6436_v54  ;;  %13154 = vpow2.f32 %v8916_v3  ;;  %v6476_v3 = vstv %s6475_s0 }
 0xe1e   :  { %vm16217_vm10 = vcmp.eq.s32.totalorder %v6476_v3, 1  ;;  %v17731_v3 = vld [vmem:[#allocation64_spill] sm:$0xff] }
 0xe1f   :  { %v6439_v31 = vadd.f32 %v6438_v59, %v6437_v8 }
 0xe21   :  { %v6461_v50 = vsel %vm2477_vm0, %v6439_v31, 0.0  ;;  %v16154_v62 = vsel %vm2477_vm0, %v6439_v31, %v16013_v18 }
 0xe22   :  { %v6468_v51 = vmax.f32 %v16029_v56, %v6461_v50  ;;  %6550 = vmatmul.mubr.f32.vlgmr.msra.gmra.mrb[38].mxu0 %v16154_v62  ;;  %9753 = vmatmul.mubr.f32.vlgmr.msra.gmra.mrb[98].mxu1 %v16154_v62  ;;  %v16164_v5 = vadd.f32 %v6461_v50, %v16019_v19 }
 0xe23   :  { %12024 = vmatpush1.bf16.msra.mxu0 %v15324_v17  ;;  %12055 = vmatpush3.bf16.msra.mxu1 %v15428_v16 }
 0xe24   :  { %12026 = vmatprep.subr.bf16.mxu0 %v15329_v29  ;;  %12056 = vmatprep.subr.bf16.mxu1 %v17631_v1  ;;  %v16173_v18 = vsel %vm16156_vm5, %v6468_v51, %v16029_v56 }
 0xe25   :  { %6690 = vmatprep.mubr.f32.mxu0 %v17296_v52  ;;  %9787 = vmatprep.mubr.msk.f32.mxu1 %vm13449_vm2, %v17296_v52 }
 0xe26   :  { %v13153_v19 = vpop.eup %13152 }
 0xe27   :  { %v6444_v50 = vadd.f32 1.0, %v13153_v19  ;;  %12028 = vmatpush1.bf16.msra.mxu0 %v15339_v7  ;;  %12058 = vmatpush3.bf16.msra.mxu1 %v15455_v13  ;;  %v13155_v56 = vpop.eup %13154 }
 0xe28   :  { %12030 = vmatprep.subr.bf16.mxu0 %v15343_v30  ;;  %12059 = vmatprep.subr.bf16.mxu1 %v17631_v1  ;;  %v6451_v2 = vadd.f32 1.0, %v13155_v56 }
 0xe29   :  { %13156 = vrcp.f32 %v6444_v50 }
 0xe2a   :  { %13158 = vrcp.f32 %v6451_v2 }
 0xe2b   :  { %12032 = vmatpush1.bf16.msra.mxu0 %v15350_v34  ;;  %12061 = vmatpush3.bf16.msra.mxu1 %v15483_v27 }
 0xe2c   :  { %12034 = vmatprep.subr.bf16.mxu0 %v15354_v36  ;;  %12062 = vmatprep.subr.bf16.mxu1 %v17631_v1 }
 0xe2f   :  { %12036 = vmatpush1.bf16.msra.mxu0 %v15360_v40  ;;  %12064 = vmatpush3.bf16.msra.mxu1 %v15509_v26 }
 0xe30   :  { %12038 = vmatprep.subr.bf16.mxu0 %v15364_v58  ;;  %12065 = vmatprep.subr.bf16.mxu1 %v17631_v1 }
 0xe33   :  { %v13157_v44 = vpop.eup %13156  ;;  %12040 = vmatpush1.bf16.msra.mxu0 %v15370_v49  ;;  %12067 = vmatpush3.bf16.msra.mxu1 %v15535_v46 }
 0xe34   :  { %v6454_v23 = vmul.f32 %v13157_v44, %v6416_v11  ;;  %12042 = vmatprep.subr.bf16.mxu0 %v15374_v41  ;;  %12068 = vmatprep.subr.bf16.mxu1 %v17631_v1  ;;  %v13159_v28 = vpop.eup %13158  ;;  %v17722_v44 = vld [vmem:[#allocation78_spill] sm:$0xff] }
 0xe35   :  { %v6457_v15 = vsub.f32 1.0, %v13159_v28  ;;  %v6459_v48 = vmul.f32 %v13159_v28, %v16088_v39  ;;  %v17726_v28 = vld [vmem:[#allocation29_spill] sm:$0xff] }
 0xe36   :  { %v6455_v54 = vadd.f32 %v6454_v23, %v17716_v6  ;;  %v17723_v23 = vld [vmem:[#allocation28_spill] sm:$0xff] }
 0xe37   :  { %12044 = vmatpush1.bf16.msra.mxu0 %v15380_v22  ;;  %12070 = vmatpush3.bf16.msra.mxu1 %v15561_v0  ;;  %v17724_v6 = vld [vmem:[#allocation44_spill] sm:$0xff] }
 0xe38   :  { %13160 = vtanh.f32 %v6455_v54  ;;  %12046 = vmatprep.subr.bf16.mxu0 %v15384_v12  ;;  %12071 = vmatprep.subr.bf16.mxu1 %v17631_v1  ;;  %v17725_v54 = vld [vmem:[#allocation41_spill] sm:$0xff] }
 0xe3b   :  { %12048 = vmatpush1.bf16.msra.mxu0 %v15390_v20  ;;  %12073 = vmatpush3.bf16.msra.mxu1 %v15587_v37 }
 0xe3c   :  { %12050 = vmatprep.subr.bf16.mxu0 %v15394_v4  ;;  %12074 = vmatprep.subr.bf16.mxu1 %v17631_v1 }
 0xe3f   :  { %12052 = vmatpush1.bf16.msra.mxu0 %v15406_v42  ;;  %12076 = vmatpush3.bf16.msra.mxu1 %v15607_v60 }
 0xe40   :  { %12078 = vmatprep.subr.bf16.mxu0 %v15416_v24  ;;  %12109 = vmatprep.subr.bf16.mxu1 %v17631_v1 }
 0xe42   :  { %v13161_v8 = vpop.eup %13160 }
 0xe43   :  { %v6458_v59 = vmul.f32 %v13161_v8, %v6457_v15  ;;  %v17727_v15 = vld [vmem:[#allocation45_spill] sm:$0xff]  ;;  %v17728_v8 = vld [vmem:[#allocation26_spill] sm:$0xff] }
 0xe45   :  { %v6460_v31 = vadd.f32 %v6459_v48, %v6458_v59  ;;  %v17729_v59 = vld [vmem:[#allocation30_spill] sm:$0xff] }
 0xe46   :  { %v17730_v48 = vld [vmem:[#allocation46_spill] sm:$0xff] }
 0xe47   :  { %v6462_v19 = vsel %vm2485_vm1, %v6460_v31, 0.0  ;;  %v16215_v50 = vsel %vm2485_vm1, %v6460_v31, %v16088_v39  ;;  %v17732_v31 = vld [vmem:[#allocation65_spill] sm:$0xff] }
 0xe48   :  { %v16222_v2 = vadd.f32 %v6462_v19, %v16096_v14  ;;  %6691 = vmatmul.mubr.f32.vlgmr.msra.gmra.mrb[68].mxu0 %v16215_v50  ;;  %9788 = vmatmul.mubr.f32.vlgmr.msra.gmra.mrb[100].mxu1 %v16215_v50  ;;  %v6474_v11 = vmax.f32 %v16106_v57, %v6462_v19  ;;  %v17720_v14 = vld [vmem:[#allocation27_spill] sm:$0xff] }
 0xe49   :  { %12080 = vmatpush1.bf16.msra.mxu0 %v15430_v35  ;;  %12111 = vmatpush3.bf16.msra.mxu1 %v15181_v9 }
 0xe4a   :  { %12082 = vmatprep.subr.bf16.mxu0 %v15441_v55  ;;  %12112 = vmatprep.subr.bf16.mxu1 %v17631_v1  ;;  %v16234_v39 = vsel %vm16217_vm10, %v6474_v11, %v16106_v57  ;;  %v17721_v57 = vld [vmem:[#allocation43_spill] sm:$0xff] }
 0xe4b   :  { %6889 = vmatprep.mubr.f32.mxu0 %v17296_v52  ;;  %9822 = vmatprep.mubr.msk.f32.mxu1 %vm13449_vm2, %v17296_v52 }
 0xe4d   :  { %12084 = vmatpush1.bf16.msra.mxu0 %v15457_v10  ;;  %12114 = vmatpush3.bf16.msra.mxu1 %v15199_v61 }
 0xe4e   :  { %12086 = vmatprep.subr.bf16.mxu0 %v15468_v53  ;;  %12115 = vmatprep.subr.bf16.mxu1 %v17631_v1 }
 0xe51   :  { %12088 = vmatpush1.bf16.msra.mxu0 %v15485_v63  ;;  %12117 = vmatpush3.bf16.msra.mxu1 %v15217_v25  ;;  %v17736_v25 = vld [vmem:[#allocation50_spill] sm:$0xff] }
 0xe52   :  { %12090 = vmatprep.subr.bf16.mxu0 %v15496_v43  ;;  %12118 = vmatprep.subr.bf16.mxu1 %v17631_v1 }
 0xe55   :  { %12092 = vmatpush1.bf16.msra.mxu0 %v17632_v47  ;;  %12120 = vmatpush3.bf16.msra.mxu1 %v17633_v33 }
 0xe56   :  { %12094 = vmatprep.subr.bf16.mxu0 %v17720_v14  ;;  %12121 = vmatprep.subr.bf16.mxu1 %v17631_v1 }
 0xe59   :  { %12096 = vmatpush1.bf16.msra.mxu0 %v17721_v57  ;;  %12123 = vmatpush3.bf16.msra.mxu1 %v17722_v44 }
 0xe5a   :  { %12098 = vmatprep.subr.bf16.mxu0 %v17723_v23  ;;  %12124 = vmatprep.subr.bf16.mxu1 %v17631_v1 }
 0xe5d   :  { %12100 = vmatpush1.bf16.msra.mxu0 %v17724_v6  ;;  %12126 = vmatpush3.bf16.msra.mxu1 %v17725_v54 }
 0xe5e   :  { %12102 = vmatprep.subr.bf16.mxu0 %v17726_v28  ;;  %12127 = vmatprep.subr.bf16.mxu1 %v17631_v1  ;;  %v17733_v28 = vld [vmem:[#allocation81_spill] sm:$0xff] }
 0xe61   :  { %12104 = vmatpush1.bf16.msra.mxu0 %v17727_v15  ;;  %12129 = vmatpush3.bf16.msra.mxu1 %v17728_v8  ;;  %v17734_v8 = vld [vmem:[#allocation83_spill] sm:$0xff] }
 0xe62   :  { %12106 = vmatprep.subr.bf16.mxu0 %v17729_v59  ;;  %12130 = vmatprep.subr.bf16.mxu1 %v17631_v1 }
 0xe65   :  { %12108 = vmatpush1.bf16.msra.mxu0 %v17730_v48  ;;  %12132 = vmatpush3.bf16.msra.mxu1 %v17731_v3 }
 0xe66   :  { %12134 = vmatprep.subr.bf16.mxu0 %v17732_v31  ;;  %12165 = vmatprep.subr.bf16.mxu1 %v17631_v1  ;;  %v17735_v31 = vld [vmem:[#allocation94_spill] sm:$0xff] }
 0xef5   :  { %v6551_v19 = vpop.f32.mrb[38].mxu0  ;;  %v6622_v11 = vpop.f32.mrb[98].mxu1 }
 0xef6   :  { %v12671_v54 = vadd.f32 %v17733_v28, %v6551_v19  ;;  %v6553_v6 = vpop.f32.mrb[39].mxu0  ;;  %v9754_v15 = vpop.f32.mrb[99].mxu1  ;;  %v6623_v33 = vadd.f32 %v6622_v11, %v17735_v31 }
 0xef7   :  { %v12673_v44 = vadd.f32 %v17734_v8, %v6553_v6  ;;  %v17737_v6 = vld [vmem:[#allocation38_spill] sm:$0xff] }
 0xef8   :  { %v8917_v23 = vmul.f32 -1.442695, %v12671_v54 }
 0xef9   :  { %v8918_v59 = vmul.f32 -1.442695, %v12673_v44 }
 0xefa   :  { %13162 = vpow2.f32 %v8917_v23 }
 0xefb   :  { %13164 = vpow2.f32 %v8918_v59 }
 0xf04   :  { %v13163_v57 = vpop.eup %13162 }
 0xf05   :  { %v6771_v48 = vadd.f32 1.0, %v13163_v57  ;;  %v13165_v3 = vpop.eup %13164 }
 0xf06   :  { %v6778_v14 = vadd.f32 1.0, %v13165_v3  ;;  %v17739_v3 = vld [vmem:[#allocation90_spill] sm:$0xff] }
 0xf07   :  { %13166 = vrcp.f32 %v6771_v48  ;;  %v17738_v48 = vld [vmem:[#allocation34_spill] sm:$0xff] }
 0xf08   :  { %13168 = vrcp.f32 %v6778_v14 }
 0xf11   :  { %v13167_v47 = vpop.eup %13166 }
 0xf12   :  { %v6781_v43 = vmul.f32 %v13167_v47, %v6623_v33  ;;  %v13169_v28 = vpop.eup %13168 }
 0xf13   :  { %v6784_v11 = vsub.f32 1.0, %v13169_v28 }
 0xf14   :  { %v6782_v19 = vadd.f32 %v6781_v43, %v17736_v25  ;;  %v6786_v25 = vmul.f32 %v13169_v28, %v16154_v62 }
 0xf16   :  { %13170 = vtanh.f32 %v6782_v19 }
 0xf1b   :  { %v6692_v15 = vpop.f32.mrb[68].mxu0  ;;  %v6763_v54 = vpop.f32.mrb[100].mxu1 }
 0xf1c   :  { %v6693_v23 = vadd.f32 %v6692_v15, %v17737_v6  ;;  %v6694_v44 = vpop.f32.mrb[69].mxu0  ;;  %v9789_v59 = vpop.f32.mrb[101].mxu1  ;;  %v6764_v56 = vadd.f32 %v6763_v54, %v15763_v38 }
 0xf1d   :  { %v6695_v57 = vadd.f32 %v6694_v44, %v17710_v21  ;;  %v17740_v44 = vld [vmem:[#allocation73_spill] sm:$0xff] }
 0xf1e   :  { %v6788_v8 = vadd.f32 %v6693_v23, %v17738_v48 }
 0xf1f   :  { %v6795_v63 = vadd.f32 %v6695_v57, %v17739_v3 }
 0xf20   :  { %v13171_v31 = vpop.eup %13170  ;;  %v8919_v47 = vmul.f32 -1.442695, %v6788_v8 }
 0xf21   :  { %v6785_v33 = vmul.f32 %v13171_v31, %v6784_v11  ;;  %v8920_v14 = vmul.f32 -1.442695, %v6795_v63 }
 0xf22   :  { %13172 = vpow2.f32 %v8919_v47 }
 0xf23   :  { %v6787_v43 = vadd.f32 %v6786_v25, %v6785_v33  ;;  %13174 = vpow2.f32 %v8920_v14 }
 0xf25   :  { %v16279_v19 = vsel %vm2485_vm1, %v6787_v43, %v16154_v62  ;;  %v6809_v15 = vsel %vm2485_vm1, %v6787_v43, 0.0 }
 0xf26   :  { %6890 = vmatmul.mubr.f32.vlgmr.msra.gmra.mrb[40].mxu0 %v16279_v19  ;;  %9823 = vmatmul.mubr.f32.vlgmr.msra.gmra.mrb[102].mxu1 %v16279_v19  ;;  %v16286_v8 = vadd.f32 %v6809_v15, %v16164_v5  ;;  %v6815_v28 = vmax.f32 %v16173_v18, %v6809_v15  ;;  %v17745_v15 = vld [vmem:[#allocation77_spill] sm:$0xff] }
 0xf27   :  { %12136 = vmatpush1.bf16.msra.mxu0 %v15324_v17  ;;  %12167 = vmatpush3.bf16.msra.mxu1 %v15428_v16 }
 0xf28   :  { %12138 = vmatprep.subr.bf16.mxu0 %v15329_v29  ;;  %12168 = vmatprep.subr.bf16.mxu1 %v17631_v1  ;;  %v16296_v63 = vsel %vm16217_vm10, %v6815_v28, %v16173_v18  ;;  %v17746_v28 = vld [vmem:[#allocation27_spill] sm:$0xff] }
 0xf29   :  { %7030 = vmatprep.mubr.f32.mxu0 %v17296_v52  ;;  %9857 = vmatprep.mubr.msk.f32.mxu1 %vm13449_vm2, %v17296_v52 }
 0xf2b   :  { %12140 = vmatpush1.bf16.msra.mxu0 %v15339_v7  ;;  %12170 = vmatpush3.bf16.msra.mxu1 %v15455_v13 }
 0xf2c   :  { %v13173_v62 = vpop.eup %13172  ;;  %12142 = vmatprep.subr.bf16.mxu0 %v15343_v30  ;;  %12171 = vmatprep.subr.bf16.mxu1 %v17631_v1 }
 0xf2d   :  { %v6792_v5 = vadd.f32 1.0, %v13173_v62  ;;  %v13175_v18 = vpop.eup %13174  ;;  %v17747_v62 = vld [vmem:[#allocation43_spill] sm:$0xff] }
 0xf2e   :  { %v6799_v51 = vadd.f32 1.0, %v13175_v18  ;;  %v17749_v18 = vld [vmem:[#allocation28_spill] sm:$0xff] }
 0xf2f   :  { %13176 = vrcp.f32 %v6792_v5  ;;  %12144 = vmatpush1.bf16.msra.mxu0 %v15350_v34  ;;  %12173 = vmatpush3.bf16.msra.mxu1 %v15483_v27  ;;  %v17748_v5 = vld [vmem:[#allocation78_spill] sm:$0xff] }
 0xf30   :  { %12146 = vmatprep.subr.bf16.mxu0 %v15354_v36  ;;  %12174 = vmatprep.subr.bf16.mxu1 %v17631_v1  ;;  %13178 = vrcp.f32 %v6799_v51  ;;  %v17750_v51 = vld [vmem:[#allocation44_spill] sm:$0xff] }
 0xf33   :  { %12148 = vmatpush1.bf16.msra.mxu0 %v15360_v40  ;;  %12176 = vmatpush3.bf16.msra.mxu1 %v15509_v26 }
 0xf34   :  { %12150 = vmatprep.subr.bf16.mxu0 %v15364_v58  ;;  %12177 = vmatprep.subr.bf16.mxu1 %v17631_v1 }
 0xf37   :  { %12152 = vmatpush1.bf16.msra.mxu0 %v15370_v49  ;;  %12179 = vmatpush3.bf16.msra.mxu1 %v15535_v46 }
 0xf38   :  { %12154 = vmatprep.subr.bf16.mxu0 %v15374_v41  ;;  %12180 = vmatprep.subr.bf16.mxu1 %v17631_v1 }
 0xf39   :  { %v13177_v31 = vpop.eup %13176 }
 0xf3a   :  { %v6802_v23 = vmul.f32 %v13177_v31, %v6764_v56  ;;  %v13179_v54 = vpop.eup %13178  ;;  %v17751_v56 = vld [vmem:[#allocation41_spill] sm:$0xff] }
 0xf3b   :  { %12156 = vmatpush1.bf16.msra.mxu0 %v15380_v22  ;;  %12182 = vmatpush3.bf16.msra.mxu1 %v15561_v0  ;;  %v6805_v57 = vsub.f32 1.0, %v13179_v54  ;;  %v6807_v11 = vmul.f32 %v13179_v54, %v16215_v50  ;;  %v17752_v31 = vld [vmem:[#allocation29_spill] sm:$0xff]  ;;  %v17756_v54 = vld [vmem:[#allocation46_spill] sm:$0xff] }
 0xf3c   :  { %v6803_v59 = vadd.f32 %v6802_v23, %v17740_v44  ;;  %12158 = vmatprep.subr.bf16.mxu0 %v15384_v12  ;;  %12183 = vmatprep.subr.bf16.mxu1 %v17631_v1  ;;  %v17753_v23 = vld [vmem:[#allocation45_spill] sm:$0xff]  ;;  %v17754_v44 = vld [vmem:[#allocation26_spill] sm:$0xff] }
 0xf3e   :  { %13180 = vtanh.f32 %v6803_v59  ;;  %v17755_v59 = vld [vmem:[#allocation30_spill] sm:$0xff] }
 0xf3f   :  { %12160 = vmatpush1.bf16.msra.mxu0 %v15390_v20  ;;  %12185 = vmatpush3.bf16.msra.mxu1 %v15587_v37 }
 0xf40   :  { %12162 = vmatprep.subr.bf16.mxu0 %v15394_v4  ;;  %12186 = vmatprep.subr.bf16.mxu1 %v17631_v1 }
 0xf43   :  { %12164 = vmatpush1.bf16.msra.mxu0 %v15406_v42  ;;  %12188 = vmatpush3.bf16.msra.mxu1 %v15607_v60 }
 0xf44   :  { %12190 = vmatprep.subr.bf16.mxu0 %v15416_v24  ;;  %12221 = vmatprep.subr.bf16.mxu1 %v17631_v1 }
 0xf48   :  { %v13181_v48 = vpop.eup %13180 }
 0xf49   :  { %v6806_v3 = vmul.f32 %v13181_v48, %v6805_v57  ;;  %v17757_v57 = vld [vmem:[#allocation64_spill] sm:$0xff]  ;;  %v17758_v48 = vld [vmem:[#allocation65_spill] sm:$0xff] }
 0xf4b   :  { %v6808_v47 = vadd.f32 %v6807_v11, %v6806_v3 }
 0xf4d   :  { %v6810_v33 = vsel %vm2477_vm0, %v6808_v47, 0.0  ;;  %v16337_v25 = vsel %vm2477_vm0, %v6808_v47, %v16215_v50  ;;  %v17741_v50 = vld [vmem:[#allocation75_spill] sm:$0xff]  ;;  %v17759_v47 = vld [vmem:[#allocation81_spill] sm:$0xff] }
 0xf4e   :  { %v16340_v43 = vadd.f32 %v6810_v33, %v16222_v2  ;;  %7031 = vmatmul.mubr.f32.vlgmr.msra.gmra.mrb[70].mxu0 %v16337_v25  ;;  %9858 = vmatmul.mubr.f32.vlgmr.msra.gmra.mrb[104].mxu1 %v16337_v25  ;;  %v6817_v14 = vmax.f32 %v16234_v39, %v6810_v33  ;;  %v17742_v2 = vld [vmem:[#allocation63_spill] sm:$0xff] }
 0xf4f   :  { %12192 = vmatpush1.bf16.msra.mxu0 %v15430_v35  ;;  %12223 = vmatpush3.bf16.msra.mxu1 %v15181_v9 }
 0xf50   :  { %12194 = vmatprep.subr.bf16.mxu0 %v15441_v55  ;;  %12224 = vmatprep.subr.bf16.mxu1 %v17631_v1  ;;  %v16352_v32 = vsel %vm16156_vm5, %v6817_v14, %v16234_v39  ;;  %v17744_v39 = vld [vmem:[#allocation42_spill] sm:$0xff]  ;;  %vm8217_vm5 = vcmask 64512  }
 0xf51   :  { %7229 = vmatprep.mubr.f32.mxu0 %v17296_v52  ;;  %9892 = vmatprep.mubr.msk.f32.mxu1 %vm13449_vm2, %v17296_v52 }
 0xf53   :  { %12196 = vmatpush1.bf16.msra.mxu0 %v15457_v10  ;;  %12226 = vmatpush3.bf16.msra.mxu1 %v15199_v61 }
 0xf54   :  { %12198 = vmatprep.subr.bf16.mxu0 %v15468_v53  ;;  %12227 = vmatprep.subr.bf16.mxu1 %v17631_v1 }
 0xf57   :  { %12200 = vmatpush1.bf16.msra.mxu0 %v17741_v50  ;;  %12229 = vmatpush3.bf16.msra.mxu1 %v17742_v2 }
 0xf58   :  { %12202 = vmatprep.subr.bf16.mxu0 %v17743_v45  ;;  %12230 = vmatprep.subr.bf16.mxu1 %v17631_v1 }
 0xf5b   :  { %12204 = vmatpush1.bf16.msra.mxu0 %v17744_v39  ;;  %12232 = vmatpush3.bf16.msra.mxu1 %v17745_v15  ;;  %v17762_v15 = vld [vmem:[#allocation51_spill] sm:$0xff] }
 0xf5c   :  { %12206 = vmatprep.subr.bf16.mxu0 %v17746_v28  ;;  %12233 = vmatprep.subr.bf16.mxu1 %v17631_v1 }
 0xf5f   :  { %12208 = vmatpush1.bf16.msra.mxu0 %v17747_v62  ;;  %12235 = vmatpush3.bf16.msra.mxu1 %v17748_v5 }
 0xf60   :  { %12210 = vmatprep.subr.bf16.mxu0 %v17749_v18  ;;  %12236 = vmatprep.subr.bf16.mxu1 %v17631_v1 }
 0xf63   :  { %12212 = vmatpush1.bf16.msra.mxu0 %v17750_v51  ;;  %12238 = vmatpush3.bf16.msra.mxu1 %v17751_v56 }
 0xf64   :  { %12214 = vmatprep.subr.bf16.mxu0 %v17752_v31  ;;  %12239 = vmatprep.subr.bf16.mxu1 %v17631_v1 }
 0xf67   :  { %12216 = vmatpush1.bf16.msra.mxu0 %v17753_v23  ;;  %12241 = vmatpush3.bf16.msra.mxu1 %v17754_v44  ;;  %v17760_v44 = vld [vmem:[#allocation83_spill] sm:$0xff] }
 0xf68   :  { %12218 = vmatprep.subr.bf16.mxu0 %v17755_v59  ;;  %12242 = vmatprep.subr.bf16.mxu1 %v17631_v1 }
 0xf6b   :  { %12220 = vmatpush1.bf16.msra.mxu0 %v17756_v54  ;;  %12244 = vmatpush3.bf16.msra.mxu1 %v17757_v57 }
 0xf6c   :  { %12246 = vmatprep.subr.bf16.mxu0 %v17758_v48  ;;  %12277 = vmatprep.subr.bf16.mxu1 %v17631_v1  ;;  %v17761_v48 = vld [vmem:[#allocation94_spill] sm:$0xff] }
 0xff9   :  { %v6891_v3 = vpop.f32.mrb[40].mxu0  ;;  %v6962_v11 = vpop.f32.mrb[102].mxu1 }
 0xffa   :  { %v12675_v33 = vadd.f32 %v17759_v47, %v6891_v3  ;;  %v6893_v14 = vpop.f32.mrb[41].mxu0  ;;  %v9824_v23 = vpop.f32.mrb[103].mxu1  ;;  %v6963_v5 = vadd.f32 %v6962_v11, %v17761_v48  ;;  %v17764_v11 = vld [vmem:[#allocation66_spill] sm:$0xff] }
 0xffb   :  { %v12677_v56 = vadd.f32 %v17760_v44, %v6893_v14 }
 0xffc   :  { %v8921_v31 = vmul.f32 -1.442695, %v12675_v33 }
 0xffd   :  { %v8922_v59 = vmul.f32 -1.442695, %v12677_v56 }
 0xffe   :  { %13182 = vpow2.f32 %v8921_v31 }
 0xfff   :  { %13184 = vpow2.f32 %v8922_v59 }
0x1008   :  { %v13183_v51 = vpop.eup %13182 }
0x1009   :  { %v7111_v54 = vadd.f32 1.0, %v13183_v51  ;;  %v13185_v57 = vpop.eup %13184 }
0x100a   :  { %v7118_v18 = vadd.f32 1.0, %v13185_v57  ;;  %v17763_v57 = vld [vmem:[#allocation33_spill] sm:$0xff] }
0x100b   :  { %13186 = vrcp.f32 %v7111_v54 }
0x100c   :  { %13188 = vrcp.f32 %v7118_v18 }
0x1015   :  { %v13187_v62 = vpop.eup %13186 }
0x1016   :  { %v7121_v28 = vmul.f32 %v13187_v62, %v6963_v5  ;;  %v13189_v23 = vpop.eup %13188 }
0x1017   :  { %v7124_v54 = vsub.f32 1.0, %v13189_v23  ;;  %v7126_v5 = vmul.f32 %v13189_v23, %v16279_v19 }
0x1018   :  { %v7122_v3 = vadd.f32 %v7121_v28, %v17762_v15 }
0x101a   :  { %13190 = vtanh.f32 %v7122_v3 }
0x1021   :  { %v7032_v33 = vpop.f32.mrb[70].mxu0  ;;  %v7103_v47 = vpop.f32.mrb[104].mxu1 }
0x1022   :  { %v7033_v31 = vadd.f32 %v7032_v33, %v17737_v6  ;;  %v7034_v56 = vpop.f32.mrb[71].mxu0  ;;  %v9859_v59 = vpop.f32.mrb[105].mxu1 }
0x1023   :  { %v7035_v51 = vadd.f32 %v7034_v56, %v17710_v21 }
0x1024   :  { %v13191_v14 = vpop.eup %13190  ;;  %v7128_v44 = vadd.f32 %v7033_v31, %v17763_v57  ;;  %v17767_v57 = vld [vmem:[#allocation67_spill] sm:$0xff] }
0x1025   :  { %v7135_v48 = vadd.f32 %v7035_v51, %v17764_v11  ;;  %v7125_v62 = vmul.f32 %v13191_v14, %v7124_v54  ;;  %v7104_v51 = vadd.f32 %v7103_v47, %v15763_v38 }
0x1026   :  { %v8923_v15 = vmul.f32 -1.442695, %v7128_v44 }
0x1027   :  { %v7127_v28 = vadd.f32 %v7126_v5, %v7125_v62  ;;  %v8924_v44 = vmul.f32 -1.442695, %v7135_v48 }
0x1028   :  { %13192 = vpow2.f32 %v8923_v15 }
0x1029   :  { %v16397_v3 = vsel %vm2109_vm15, %v7127_v28, %v16279_v19  ;;  %v7149_v33 = vsel %vm2109_vm15, %v7127_v28, 0.0  ;;  %13194 = vpow2.f32 %v8924_v44 }
0x102a   :  { %7230 = vmatmul.mubr.f32.vlgmr.msra.gmra.mrb[42].mxu0 %v16397_v3  ;;  %9893 = vmatmul.mubr.f32.vlgmr.msra.gmra.mrb[106].mxu1 %v16397_v3  ;;  %v16404_v31 = vadd.f32 %v7149_v33, %v16286_v8  ;;  %v7155_v23 = vmax.f32 %v16296_v63, %v7149_v33 }
0x102b   :  { %12248 = vmatpush1.bf16.msra.mxu0 %v15324_v17  ;;  %12279 = vmatpush3.bf16.msra.mxu1 %v15428_v16 }
0x102c   :  { %12250 = vmatprep.subr.bf16.mxu0 %v15329_v29  ;;  %12280 = vmatprep.subr.bf16.mxu1 %v17631_v1  ;;  %v16414_v56 = vsel %vm16090_vm7, %v7155_v23, %v16296_v63 }
0x102d   :  { %7370 = vmatprep.mubr.f32.mxu0 %v17296_v52  ;;  %9927 = vmatprep.mubr.msk.f32.mxu1 %vm13449_vm2, %v17296_v52 }
0x102f   :  { %12252 = vmatpush1.bf16.msra.mxu0 %v15339_v7  ;;  %12282 = vmatpush3.bf16.msra.mxu1 %v15455_v13 }
0x1030   :  { %12254 = vmatprep.subr.bf16.mxu0 %v15343_v30  ;;  %12283 = vmatprep.subr.bf16.mxu1 %v17631_v1 }
0x1032   :  { %v13193_v8 = vpop.eup %13192 }
0x1033   :  { %v7132_v48 = vadd.f32 1.0, %v13193_v8  ;;  %12256 = vmatpush1.bf16.msra.mxu0 %v15350_v34  ;;  %12285 = vmatpush3.bf16.msra.mxu1 %v15483_v27  ;;  %v13195_v63 = vpop.eup %13194 }
0x1034   :  { %12258 = vmatprep.subr.bf16.mxu0 %v15354_v36  ;;  %12286 = vmatprep.subr.bf16.mxu1 %v17631_v1  ;;  %v7139_v59 = vadd.f32 1.0, %v13195_v63  ;;  %v17783_v63 = vld [vmem:[#allocation65_spill] sm:$0xff] }
0x1035   :  { %13196 = vrcp.f32 %v7132_v48  ;;  %v17782_v48 = vld [vmem:[#allocation64_spill] sm:$0xff] }
0x1036   :  { %13198 = vrcp.f32 %v7139_v59  ;;  %v206_v59 = vstv %s205_s24 }
0x1037   :  { %12260 = vmatpush1.bf16.msra.mxu0 %v15360_v40  ;;  %12288 = vmatpush3.bf16.msra.mxu1 %v15509_v26 }
0x1038   :  { %12262 = vmatprep.subr.bf16.mxu0 %v15364_v58  ;;  %12289 = vmatprep.subr.bf16.mxu1 %v17631_v1 }
0x103b   :  { %12264 = vmatpush1.bf16.msra.mxu0 %v15370_v49  ;;  %12291 = vmatpush3.bf16.msra.mxu1 %v15535_v46 }
0x103c   :  { %12266 = vmatprep.subr.bf16.mxu0 %v15374_v41  ;;  %12292 = vmatprep.subr.bf16.mxu1 %v17631_v1 }
0x103f   :  { %v13197_v54 = vpop.eup %13196  ;;  %12268 = vmatpush1.bf16.msra.mxu0 %v15380_v22  ;;  %12294 = vmatpush3.bf16.msra.mxu1 %v15561_v0 }
0x1040   :  { %v7142_v14 = vmul.f32 %v13197_v54, %v7104_v51  ;;  %12270 = vmatprep.subr.bf16.mxu0 %v15384_v12  ;;  %12295 = vmatprep.subr.bf16.mxu1 %v17631_v1  ;;  %v13199_v47 = vpop.eup %13198 }
0x1041   :  { %v7145_v62 = vsub.f32 1.0, %v13199_v47  ;;  %v7147_v28 = vmul.f32 %v13199_v47, %v16337_v25 }
0x1042   :  { %v7143_v11 = vadd.f32 %v7142_v14, %v17767_v57  ;;  %v17784_v57 = vld [vmem:[#allocation81_spill] sm:$0xff] }
0x1043   :  { %12272 = vmatpush1.bf16.msra.mxu0 %v15390_v20  ;;  %12297 = vmatpush3.bf16.msra.mxu1 %v15587_v37 }
0x1044   :  { %13200 = vtanh.f32 %v7143_v11  ;;  %12274 = vmatprep.subr.bf16.mxu0 %v15394_v4  ;;  %12298 = vmatprep.subr.bf16.mxu1 %v17631_v1 }
0x1045   :  { %13202 = vrcp.f32 %v206_v59 }
0x1047   :  { %12276 = vmatpush1.bf16.msra.mxu0 %v15406_v42  ;;  %12300 = vmatpush3.bf16.msra.mxu1 %v15607_v60 }
0x1048   :  { %12302 = vmatprep.subr.bf16.mxu0 %v15416_v24  ;;  %12333 = vmatprep.subr.bf16.mxu1 %v17631_v1 }
0x104e   :  { %v13201_v5 = vpop.eup %13200 }
0x104f   :  { %v7146_v15 = vmul.f32 %v13201_v5, %v7145_v62  ;;  %v13203_v51 = vpop.eup %13202 }
0x1050   :  { %12802 = vpush %v13203_v51 }
0x1051   :  { %v7148_v18 = vadd.f32 %v7147_v28, %v7146_v15  ;;  %v17785_v15 = vld [vmem:[#allocation83_spill] sm:$0xff] }
0x1053   :  { %v7150_v23 = vsel %vm2101_vm14, %v7148_v18, 0.0  ;;  %v16455_v44 = vsel %vm2101_vm14, %v7148_v18, %v16337_v25 }
0x1054   :  { %v16458_v19 = vadd.f32 %v7150_v23, %v16340_v43  ;;  %7371 = vmatmul.mubr.f32.vlgmr.msra.gmra.mrb[72].mxu0 %v16455_v44  ;;  %9928 = vmatmul.mubr.f32.vlgmr.msra.gmra.mrb[108].mxu1 %v16455_v44  ;;  %v7157_v24 = vmax.f32 %v16352_v32, %v7150_v23  ;;  %v17776_v43 = vld [vmem:[#allocation41_spill] sm:$0xff] }
0x1055   :  { %12304 = vmatpush1.bf16.msra.mxu0 %v15430_v35  ;;  %12335 = vmatpush3.bf16.msra.mxu1 %v15181_v9  ;;  %v17770_v9 = vld [vmem:[#allocation77_spill] sm:$0xff]  ;;  %v17771_v35 = vld [vmem:[#allocation27_spill] sm:$0xff] }
0x1056   :  { %12306 = vmatprep.subr.bf16.mxu0 %v15441_v55  ;;  %12336 = vmatprep.subr.bf16.mxu1 %v17631_v1  ;;  %v16470_v8 = vsel %vm16015_vm3, %v7157_v24, %v16352_v32  ;;  %v17773_v55 = vld [vmem:[#allocation78_spill] sm:$0xff]  ;;  %v17777_v32 = vld [vmem:[#allocation29_spill] sm:$0xff] }
0x1057   :  { %7569 = vmatprep.mubr.f32.mxu0 %v17296_v52  ;;  %9962 = vmatprep.mubr.msk.f32.mxu1 %vm13449_vm2, %v17296_v52 }
0x1059   :  { %12308 = vmatpush1.bf16.msra.mxu0 %v15457_v10  ;;  %12338 = vmatpush3.bf16.msra.mxu1 %v15199_v61  ;;  %v17772_v61 = vld [vmem:[#allocation43_spill] sm:$0xff]  ;;  %v17774_v10 = vld [vmem:[#allocation28_spill] sm:$0xff] }
0x105a   :  { %12310 = vmatprep.subr.bf16.mxu0 %v15468_v53  ;;  %12339 = vmatprep.subr.bf16.mxu1 %v17631_v1  ;;  %v17775_v53 = vld [vmem:[#allocation44_spill] sm:$0xff] }
0x105d   :  { %12312 = vmatpush1.bf16.msra.mxu0 %v17741_v50  ;;  %12341 = vmatpush3.bf16.msra.mxu1 %v17742_v2  ;;  %v17778_v50 = vld [vmem:[#allocation45_spill] sm:$0xff]  ;;  %v17779_v2 = vld [vmem:[#allocation26_spill] sm:$0xff] }
0x105e   :  { %12314 = vmatprep.subr.bf16.mxu0 %v17743_v45  ;;  %12342 = vmatprep.subr.bf16.mxu1 %v17631_v1  ;;  %v17780_v45 = vld [vmem:[#allocation30_spill] sm:$0xff] }
0x1061   :  { %12316 = vmatpush1.bf16.msra.mxu0 %v17744_v39  ;;  %12344 = vmatpush3.bf16.msra.mxu1 %v17770_v9  ;;  %v17781_v39 = vld [vmem:[#allocation46_spill] sm:$0xff] }
0x1062   :  { %12318 = vmatprep.subr.bf16.mxu0 %v17771_v35  ;;  %12345 = vmatprep.subr.bf16.mxu1 %v17631_v1  ;;  %v17786_v9 = vld [vmem:[#allocation94_spill] sm:$0xff] }
0x1065   :  { %12320 = vmatpush1.bf16.msra.mxu0 %v17772_v61  ;;  %12347 = vmatpush3.bf16.msra.mxu1 %v17773_v55 }
0x1066   :  { %12322 = vmatprep.subr.bf16.mxu0 %v17774_v10  ;;  %12348 = vmatprep.subr.bf16.mxu1 %v17631_v1  ;;  %v17787_v10 = vld [vmem:[#allocation52_spill] sm:$0xff] }
0x1069   :  { %12324 = vmatpush1.bf16.msra.mxu0 %v17775_v53  ;;  %12350 = vmatpush3.bf16.msra.mxu1 %v17776_v43 }
0x106a   :  { %12326 = vmatprep.subr.bf16.mxu0 %v17777_v32  ;;  %12351 = vmatprep.subr.bf16.mxu1 %v17631_v1 }
0x106d   :  { %12328 = vmatpush1.bf16.msra.mxu0 %v17778_v50  ;;  %12353 = vmatpush3.bf16.msra.mxu1 %v17779_v2 }
0x106e   :  { %12330 = vmatprep.subr.bf16.mxu0 %v17780_v45  ;;  %12354 = vmatprep.subr.bf16.mxu1 %v17631_v1 }
0x1071   :  { %12332 = vmatpush1.bf16.msra.mxu0 %v17781_v39  ;;  %12356 = vmatpush3.bf16.msra.mxu1 %v17782_v48 }
0x1072   :  { %12358 = vmatprep.subr.bf16.mxu0 %v17783_v63  ;;  %12389 = vmatprep.subr.bf16.mxu1 %v17631_v1 }
0x1081   :  { %s16670_s28 = spop %12802 }
0x10fd   :  { %v7231_v54 = vpop.f32.mrb[42].mxu0  ;;  %v7302_v14 = vpop.f32.mrb[106].mxu1 }
0x10fe   :  { %v12679_v11 = vadd.f32 %v17784_v57, %v7231_v54  ;;  %v7233_v47 = vpop.f32.mrb[43].mxu0  ;;  %v9894_v62 = vpop.f32.mrb[107].mxu1  ;;  %v7303_v35 = vadd.f32 %v7302_v14, %v17786_v9  ;;  %v17788_v14 = vld [vmem:[#allocation32_spill] sm:$0xff] }
0x10ff   :  { %v12681_v28 = vadd.f32 %v17785_v15, %v7233_v47  ;;  %v17789_v47 = vld [vmem:[#allocation55_spill] sm:$0xff] }
0x1100   :  { %v8925_v5 = vmul.f32 -1.442695, %v12679_v11 }
0x1101   :  { %v8926_v18 = vmul.f32 -1.442695, %v12681_v28 }
0x1102   :  { %13204 = vpow2.f32 %v8925_v5 }
0x1103   :  { %13206 = vpow2.f32 %v8926_v18 }
0x110c   :  { %v13205_v33 = vpop.eup %13204 }
0x110d   :  { %v7451_v23 = vadd.f32 1.0, %v13205_v33  ;;  %v13207_v24 = vpop.eup %13206 }
0x110e   :  { %v7458_v25 = vadd.f32 1.0, %v13207_v24 }
0x110f   :  { %13208 = vrcp.f32 %v7451_v23 }
0x1110   :  { %13210 = vrcp.f32 %v7458_v25 }
0x1119   :  { %v13209_v61 = vpop.eup %13208 }
0x111a   :  { %v7461_v55 = vmul.f32 %v13209_v61, %v7303_v35  ;;  %v13211_v43 = vpop.eup %13210 }
0x111b   :  { %v7464_v2 = vsub.f32 1.0, %v13211_v43  ;;  %v7466_v54 = vmul.f32 %v13211_v43, %v16397_v3  ;;  %v8939_v43 = vld [vmem:[%s17037_s15 + $0xb0] sm:$0xff] }
0x111c   :  { %v7462_v53 = vadd.f32 %v7461_v55, %v17787_v10  ;;  %v8937_v55 = vld [vmem:[%s17037_s15 + $0xa0] sm:$0xff]  ;;  %v8938_v10 = vld [vmem:[%s17037_s15 + $0xa8] sm:$0xff] }
0x111e   :  { %13212 = vtanh.f32 %v7462_v53  ;;  %v12420_v53 = vpack.c.bf16 %v8938_v10, %v8937_v55 }
0x1127   :  { %v7372_v32 = vpop.f32.mrb[72].mxu0  ;;  %v7443_v50 = vpop.f32.mrb[108].mxu1 }
0x1128   :  { %v13213_v45 = vpop.eup %13212  ;;  %v7373_v39 = vadd.f32 %v7372_v32, %v17737_v6  ;;  %v7374_v48 = vpop.f32.mrb[73].mxu0  ;;  %v8940_v32 = vld [vmem:[%s17037_s15 + $0xb8] sm:$0xff] }
0x1129   :  { %v9929_v63 = vpop.f32.mrb[109].mxu1  ;;  %v7375_v59 = vadd.f32 %v7374_v48, %v17710_v21  ;;  %v7465_v51 = vmul.f32 %v13213_v45, %v7464_v2  ;;  %v8941_v2 = vld [vmem:[%s17037_s15 + $0xc0] sm:$0xff]  ;;  %v8942_v45 = vld [vmem:[%s17037_s15 + $0xc8] sm:$0xff]  ;;  %v8943_v48 = vld [vmem:[%s17037_s15 + $0xd0] sm:$0xff] }
0x112a   :  { %v7468_v11 = vadd.f32 %v7373_v39, %v17788_v14  ;;  %v12426_v39 = vpack.c.bf16 %v8942_v45, %v8941_v2  ;;  %v8944_v63 = vld [vmem:[%s17037_s15 + $0xd8] sm:$0xff] }
0x112b   :  { %v7475_v62 = vadd.f32 %v7375_v59, %v17789_v47  ;;  %v7467_v5 = vadd.f32 %v7466_v54, %v7465_v51  ;;  %v12429_v59 = vpack.c.bf16 %v8944_v63, %v8943_v48  ;;  %v8945_v51 = vld [vmem:[%s17037_s15 + $0xe0] sm:$0xff]  ;;  %v8946_v54 = vld [vmem:[%s17037_s15 + $0xe8] sm:$0xff]  ;;  %v8948_v47 = vld [vmem:[%s17037_s15 + $0xf8] sm:$0xff] }
0x112c   :  { %v8927_v28 = vmul.f32 -1.442695, %v7468_v11  ;;  %v12432_v14 = vpack.c.bf16 %v8946_v54, %v8945_v51  ;;  %v8947_v11 = vld [vmem:[%s17037_s15 + $0xf0] sm:$0xff] }
0x112d   :  { %v16516_v33 = vsel %vm1733_vm13, %v7467_v5, %v16397_v3  ;;  %v7489_v23 = vsel %vm1733_vm13, %v7467_v5, 0.0  ;;  %v8928_v61 = vmul.f32 -1.442695, %v7475_v62  ;;  %v12435_v62 = vpack.c.bf16 %v8948_v47, %v8947_v11  ;;  %v17800_v63 = vld [vmem:[#allocation25_spill] sm:$0xff] }
0x112e   :  { %13214 = vpow2.f32 %v8927_v28  ;;  %7570 = vmatmul.mubr.f32.vlgmr.msra.gmra.mrb[44].mxu0 %v16516_v33  ;;  %9963 = vmatmul.mubr.f32.vlgmr.msra.gmra.mrb[110].mxu1 %v16516_v33  ;;  %v16523_v24 = vadd.f32 %v7489_v23, %v16404_v31  ;;  %v7495_v25 = vmax.f32 %v16414_v56, %v7489_v23  ;;  %v8934_v31 = vld [vmem:[%s17037_s15 + $0x88] sm:$0xff]  ;;  %vm17806_vm13 = vcmask 7168  }
0x112f   :  { %12360 = vmatpush1.bf16.msra.mxu0 %v15324_v17  ;;  %12391 = vmatpush3.bf16.msra.mxu1 %v15428_v16  ;;  %13216 = vpow2.f32 %v8928_v61 }
0x1130   :  { %12362 = vmatprep.subr.bf16.mxu0 %v15329_v29  ;;  %12392 = vmatprep.subr.bf16.mxu1 %v17631_v1  ;;  %v16533_v35 = vsel %vm16078_vm6, %v7495_v25, %v16414_v56 }
0x1131   :  { %7710 = vmatprep.mubr.f32.mxu0 %v17296_v52  ;;  %9997 = vmatprep.mubr.msk.f32.mxu1 %vm13449_vm2, %v17296_v52 }
0x1133   :  { %12364 = vmatpush1.bf16.msra.mxu0 %v15339_v7  ;;  %12394 = vmatpush3.bf16.msra.mxu1 %v15455_v13 }
0x1134   :  { %12366 = vmatprep.subr.bf16.mxu0 %v15343_v30  ;;  %12395 = vmatprep.subr.bf16.mxu1 %v17631_v1 }
0x1137   :  { %12368 = vmatpush1.bf16.msra.mxu0 %v15350_v34  ;;  %12397 = vmatpush3.bf16.msra.mxu1 %v15483_v27  ;;  %v7444_v34 = vadd.f32 %v7443_v50, %v15763_v38  ;;  %v12423_v50 = vpack.c.bf16 %v8940_v32, %v8939_v43 }
0x1138   :  { %v13215_v17 = vpop.eup %13214  ;;  %12370 = vmatprep.subr.bf16.mxu0 %v15354_v36  ;;  %12398 = vmatprep.subr.bf16.mxu1 %v17631_v1 }
0x1139   :  { %v7472_v29 = vadd.f32 1.0, %v13215_v17  ;;  %v13217_v7 = vpop.eup %13216 }
0x113a   :  { %v7479_v30 = vadd.f32 1.0, %v13217_v7 }
0x113b   :  { %13218 = vrcp.f32 %v7472_v29  ;;  %12372 = vmatpush1.bf16.msra.mxu0 %v15360_v40  ;;  %12400 = vmatpush3.bf16.msra.mxu1 %v15509_v26 }
0x113c   :  { %12374 = vmatprep.subr.bf16.mxu0 %v15364_v58  ;;  %12401 = vmatprep.subr.bf16.mxu1 %v17631_v1  ;;  %13220 = vrcp.f32 %v7479_v30  ;;  %v17792_v58 = vld [vmem:[#allocation88_spill] sm:$0xff] }
0x113f   :  { %12376 = vmatpush1.bf16.msra.mxu0 %v15370_v49  ;;  %12403 = vmatpush3.bf16.msra.mxu1 %v15535_v46 }
0x1140   :  { %12378 = vmatprep.subr.bf16.mxu0 %v15374_v41  ;;  %12404 = vmatprep.subr.bf16.mxu1 %v17631_v1 }
0x1143   :  { %12380 = vmatpush1.bf16.msra.mxu0 %v15380_v22  ;;  %12406 = vmatpush3.bf16.msra.mxu1 %v15561_v0 }
0x1144   :  { %12382 = vmatprep.subr.bf16.mxu0 %v15384_v12  ;;  %12407 = vmatprep.subr.bf16.mxu1 %v17631_v1 }
0x1145   :  { %v13219_v36 = vpop.eup %13218 }
0x1146   :  { %v7482_v40 = vmul.f32 %v13219_v36, %v7444_v34  ;;  %v13221_v41 = vpop.eup %13220 }
0x1147   :  { %12384 = vmatpush1.bf16.msra.mxu0 %v15390_v20  ;;  %12409 = vmatpush3.bf16.msra.mxu1 %v15587_v37  ;;  %v7485_v22 = vsub.f32 1.0, %v13221_v41  ;;  %v7487_v16 = vmul.f32 %v13221_v41, %v16455_v44 }
0x1148   :  { %v7483_v49 = vadd.f32 %v7482_v40, %v17792_v58  ;;  %12386 = vmatprep.subr.bf16.mxu0 %v15394_v4  ;;  %12410 = vmatprep.subr.bf16.mxu1 %v17631_v1 }
0x114a   :  { %13222 = vtanh.f32 %v7483_v49  ;;  %v17795_v49 = vld [vmem:[#allocation53_spill] sm:$0xff] }
0x114b   :  { %12388 = vmatpush1.bf16.msra.mxu0 %v15406_v42  ;;  %12412 = vmatpush3.bf16.msra.mxu1 %v15607_v60  ;;  %v8933_v60 = vld [vmem:[%s17037_s15 + $0x80] sm:$0xff] }
0x114c   :  { %12413 = vmatprep.subr.bf16.mxu0 %v17631_v1  ;;  %10140 = vmatprep.subr.mxu1 %v17296_v52  ;;  %v12414_v56 = vpack.c.bf16 %v8934_v31, %v8933_v60  ;;  %v17796_v60 = vld [vmem:[#allocation31_spill] sm:$0xff] }
0x1154   :  { %v13223_v12 = vpop.eup %13222 }
0x1155   :  { %v7486_v20 = vmul.f32 %v13223_v12, %v7485_v22 }
0x1157   :  { %v7488_v13 = vadd.f32 %v7487_v16, %v7486_v20 }
0x1159   :  { %v7490_v4 = vsel %vm1725_vm12, %v7488_v13, 0.0  ;;  %v16574_v42 = vsel %vm1725_vm12, %v7488_v13, %v16455_v44  ;;  %v8935_v44 = vld [vmem:[%s17037_s15 + $0x90] sm:$0xff] }
0x115a   :  { %v16577_v26 = vadd.f32 %v7490_v4, %v16458_v19  ;;  %7711 = vmatmul.mubr.f32.vlgmr.msra.gmra.mrb[74].mxu0 %v16574_v42  ;;  %9998 = vmatmul.mubr.f32.vlgmr.msra.gmra.mrb[112].mxu1 %v16574_v42  ;;  %v7497_v46 = vmax.f32 %v16470_v8, %v7490_v4  ;;  %v8936_v19 = vld [vmem:[%s17037_s15 + $0x98] sm:$0xff] }
0x115b   :  { %10142 = vmatprep.mubr.msk.f32.mxu1 %vm13449_vm2, %v17296_v52  ;;  %10032 = vmatprep.mubr.msk.f32.mxu0 %vm13449_vm2, %v17296_v52 }
0x115c   :  { %v16589_v37 = vsel %vm16000_vm9, %v7497_v46, %v16470_v8  ;;  %12415 = vmatpush3.bf16.msra.mxu0 %v12414_v56  ;;  %v12417_v8 = vpack.c.bf16 %v8936_v19, %v8935_v44  ;;  %v17798_v19 = vld [vmem:[#allocation54_spill] sm:$0xff] }
0x115d   :  { %12416 = vmatprep.subr.bf16.mxu0 %v17631_v1 }
0x1160   :  { %12418 = vmatpush3.bf16.msra.mxu0 %v12417_v8 }
0x1161   :  { %12419 = vmatprep.subr.bf16.mxu0 %v17631_v1 }
0x1164   :  { %12421 = vmatpush3.bf16.msra.mxu0 %v12420_v53 }
0x1165   :  { %12422 = vmatprep.subr.bf16.mxu0 %v17631_v1 }
0x1168   :  { %12424 = vmatpush3.bf16.msra.mxu0 %v12423_v50 }
0x1169   :  { %12425 = vmatprep.subr.bf16.mxu0 %v17631_v1 }
0x116c   :  { %12427 = vmatpush3.bf16.msra.mxu0 %v12426_v39 }
0x116d   :  { %12428 = vmatprep.subr.bf16.mxu0 %v17631_v1 }
0x1170   :  { %12430 = vmatpush3.bf16.msra.mxu0 %v12429_v59 }
0x1171   :  { %12431 = vmatprep.subr.bf16.mxu0 %v17631_v1 }
0x1174   :  { %12433 = vmatpush3.bf16.msra.mxu0 %v12432_v14 }
0x1175   :  { %12434 = vmatprep.subr.bf16.mxu0 %v17631_v1 }
0x1178   :  { %12436 = vmatpush3.bf16.msra.mxu0 %v12435_v62  ;;  %v8216_v62 = vld [vmem:[#allocation9 + $0x8] sm:$0xff] }
0x1179   :  { %12437 = vmatprep.subr.bf16.mxu0 %v17631_v1 }
0x1201   :  { %v7571_v5 = vpop.f32.mrb[44].mxu0  ;;  %v7642_v28 = vpop.f32.mrb[110].mxu1 }
0x1202   :  { %v12683_v18 = vadd.f32 %v17784_v57, %v7571_v5  ;;  %v7573_v23 = vpop.f32.mrb[45].mxu0  ;;  %v9964_v25 = vpop.f32.mrb[111].mxu1  ;;  %v7643_v36 = vadd.f32 %v7642_v28, %v17786_v9  ;;  %v7843_v5 = vld [vmem:[%s17037_s15 + $0x8] sm:$0xff] }
0x1203   :  { %v12685_v61 = vadd.f32 %v17785_v15, %v7573_v23  ;;  %v17801_v28 = vld [vmem:[#allocation92_spill] sm:$0xff] }
0x1204   :  { %v8929_v3 = vmul.f32 -1.442695, %v12683_v18  ;;  %vm17802_vm10 = vcmp.eq.s32.totalorder %v17801_v28, 1  ;;  %v8966_v28 = vld [vmem:[%s17037_s15 + $0x188] sm:$0xff] }
0x1205   :  { %v8930_v17 = vmul.f32 -1.442695, %v12685_v61  ;;  %vm17803_vm12 = vmmov %vm17802_vm10  ;;  %v7839_v61 = vstv %s16670_s28 }
0x1206   :  { %13224 = vpow2.f32 %v8929_v3 }
0x1207   :  { %13226 = vpow2.f32 %v8930_v17 }
0x1210   :  { %v13225_v29 = vpop.eup %13224 }
0x1211   :  { %v7791_v7 = vadd.f32 1.0, %v13225_v29  ;;  %v13227_v30 = vpop.eup %13226 }
0x1212   :  { %v7798_v34 = vadd.f32 1.0, %v13227_v30  ;;  %v8974_v30 = vld [vmem:[%s17037_s15 + $0x1c8] sm:$0xff] }
0x1213   :  { %13228 = vrcp.f32 %v7791_v7 }
0x1214   :  { %13230 = vrcp.f32 %v7798_v34 }
0x121d   :  { %v13229_v40 = vpop.eup %13228 }
0x121e   :  { %v7801_v58 = vmul.f32 %v13229_v40, %v7643_v36  ;;  %v13231_v41 = vpop.eup %13230  ;;  %v8214_v36 = vld [vmem:[#allocation9] sm:$0xff] }
0x121f   :  { %v7804_v22 = vsub.f32 1.0, %v13231_v41  ;;  %v7806_v20 = vmul.f32 %v13231_v41, %v16516_v33  ;;  %v7846_v40 = vld [vmem:[%s17037_s15 + $0x20] sm:$0xff]  ;;  %v7849_v41 = vld [vmem:[%s17037_s15 + $0x38] sm:$0xff] }
0x1220   :  { %v7802_v57 = vadd.f32 %v7801_v58, %v17795_v49  ;;  %v8367_v49 = vld [vmem:[#allocation9 + $0x18] sm:$0xff] }
0x1222   :  { %13232 = vtanh.f32 %v7802_v57  ;;  %v7848_v57 = vld [vmem:[%s17037_s15 + $0x30] sm:$0xff] }
0x122c   :  { %v13233_v12 = vpop.eup %13232 }
0x122d   :  { %v7805_v15 = vmul.f32 %v13233_v12, %v7804_v22  ;;  %v7712_v16 = vpop.f32.mrb[74].mxu0  ;;  %v7783_v13 = vpop.f32.mrb[112].mxu1  ;;  %v12447_v22 = vpack.c.bf16 %v7849_v41, %v7848_v57  ;;  %v7850_v12 = vld [vmem:[%s17037_s15 + $0x40] sm:$0xff]  ;;  %v8979_v41 = vld [vmem:[%s17037_s15 + $0x1f0] sm:$0xff] }
0x122e   :  { %v7713_v27 = vadd.f32 %v7712_v16, %v17737_v6  ;;  %v7714_v4 = vpop.f32.mrb[75].mxu0  ;;  %v9999_v46 = vpop.f32.mrb[113].mxu1  ;;  %v7784_v39 = vadd.f32 %v7783_v13, %v15763_v38  ;;  %v7842_v38 = vld [vmem:[%s17037_s15] sm:$0xff]  ;;  %v7852_v16 = vld [vmem:[%s17037_s15 + $0x50] sm:$0xff]  ;;  %v7853_v13 = vld [vmem:[%s17037_s15 + $0x58] sm:$0xff] }
0x122f   :  { %v7807_v0 = vadd.f32 %v7806_v20, %v7805_v15  ;;  %v7715_v9 = vadd.f32 %v7714_v4, %v17710_v21  ;;  %v12438_v29 = vpack.c.bf16 %v7843_v5, %v7842_v38  ;;  %v7851_v15 = vld [vmem:[%s17037_s15 + $0x48] sm:$0xff]  ;;  %v12453_v4 = vpack.c.bf16 %v7853_v13, %v7852_v16  ;;  %v7854_v46 = vld [vmem:[%s17037_s15 + $0x60] sm:$0xff]  ;;  %v8952_v6 = vld [vmem:[%s17037_s15 + $0x118] sm:$0xff] }
0x1230   :  { %v7808_v31 = vadd.f32 %v7713_v27, %v17796_v60  ;;  %v12450_v20 = vpack.c.bf16 %v7851_v15, %v7850_v12  ;;  %v8365_v27 = vld [vmem:[#allocation9 + $0x10] sm:$0xff]  ;;  %v8965_v5 = vld [vmem:[%s17037_s15 + $0x180] sm:$0xff] }
0x1231   :  { %v7829_v44 = vsel %vm1359_vm11, %v7807_v0, 0.0  ;;  %v7815_v8 = vadd.f32 %v7715_v9, %v17798_v19  ;;  %v7831_v17 = vsel %vm1359_vm11, %v7807_v0, %v16516_v33  ;;  %v7855_v0 = vld [vmem:[%s17037_s15 + $0x68] sm:$0xff]  ;;  %v7856_v60 = vld [vmem:[%s17037_s15 + $0x70] sm:$0xff]  ;;  %v8514_v15 = vld [vmem:[%s17036_s14] sm:$0xff]  ;;  %vm8715_vm11 = vcmask 130048  }
0x1232   :  { %v16659_v55 = vadd.f32 %v7829_v44, %v16523_v24  ;;  %v7835_v10 = vmax.f32 %v16533_v35, %v7829_v44  ;;  %v8931_v53 = vmul.f32 -1.442695, %v7808_v31  ;;  %v12456_v9 = vpack.c.bf16 %v7855_v0, %v7854_v46  ;;  %v7857_v31 = vld [vmem:[%s17037_s15 + $0x78] sm:$0xff]  ;;  %v8949_v44 = vld [vmem:[%s17037_s15 + $0x100] sm:$0xff]  ;;  %v8950_v19 = vld [vmem:[%s17037_s15 + $0x108] sm:$0xff] }
0x1233   :  { %v8932_v21 = vmul.f32 -1.442695, %v7815_v8  ;;  %v12459_v56 = vpack.c.bf16 %v7857_v31, %v7856_v60  ;;  %v12462_v8 = vpack.c.bf16 %v8950_v19, %v8949_v44  ;;  %v8516_v13 = vld [vmem:[%s17036_s14 + $0x10] sm:$0xff]  ;;  %v8518_v46 = vld [vmem:[%s17036_s14 + $0x20] sm:$0xff]  ;;  %v8519_v0 = vld [vmem:[%s17036_s14 + $0x28] sm:$0xff] }
0x1234   :  { %13234 = vpow2.f32 %v8931_v53  ;;  %v16665_v43 = vsel %vm16064_vm4, %v7835_v10, %v16533_v35  ;;  %v7840_v10 = vmul.f32 %v7839_v61, %v16659_v55  ;;  %v8951_v53 = vld [vmem:[%s17037_s15 + $0x110] sm:$0xff]  ;;  %v8953_v55 = vld [vmem:[%s17037_s15 + $0x120] sm:$0xff]  ;;  %v8521_v60 = vld [vmem:[%s17036_s14 + $0x38] sm:$0xff] }
0x1235   :  { %13236 = vpow2.f32 %v8932_v21  ;;  %v12465_v21 = vpack.c.bf16 %v8952_v6, %v8951_v53  ;;  %v8523_v44 = vld [vmem:[%s17036_s14 + $0x48] sm:$0xff]  ;;  %v8526_v6 = vld [vmem:[%s17036_s14 + $0x60] sm:$0xff] }
0x123e   :  { %v13235_v32 = vpop.eup %13234 }
0x123f   :  { %v7812_v50 = vadd.f32 1.0, %v13235_v32  ;;  %v13237_v2 = vpop.eup %13236  ;;  %v8954_v32 = vld [vmem:[%s17037_s15 + $0x128] sm:$0xff] }
0x1240   :  { %v7819_v45 = vadd.f32 1.0, %v13237_v2  ;;  %v8955_v2 = vld [vmem:[%s17037_s15 + $0x130] sm:$0xff] }
0x1241   :  { %13238 = vrcp.f32 %v7812_v50  ;;  %v12468_v50 = vpack.c.bf16 %v8954_v32, %v8953_v55  ;;  %v8528_v32 = vld [vmem:[%s17036_s14 + $0x70] sm:$0xff] }
0x1242   :  { %13240 = vrcp.f32 %v7819_v45  ;;  %v8956_v45 = vld [vmem:[%s17037_s15 + $0x138] sm:$0xff] }
0x124b   :  { %v13239_v24 = vpop.eup %13238 }
0x124c   :  { %v7822_v48 = vmul.f32 %v13239_v24, %v7784_v39  ;;  %v13241_v51 = vpop.eup %13240  ;;  %v12471_v39 = vpack.c.bf16 %v8956_v45, %v8955_v2  ;;  %v8957_v24 = vld [vmem:[%s17037_s15 + $0x140] sm:$0xff] }
0x124d   :  { %v7825_v54 = vsub.f32 1.0, %v13241_v51  ;;  %v7827_v11 = vmul.f32 %v13241_v51, %v16574_v42  ;;  %v8960_v51 = vld [vmem:[%s17037_s15 + $0x158] sm:$0xff]  ;;  %v8987_v45 = vld [vmem:[%s17036_s14 + $0x80] sm:$0xff] }
0x124e   :  { %v7823_v59 = vadd.f32 %v7822_v48, %v17800_v63  ;;  %v8958_v48 = vld [vmem:[%s17037_s15 + $0x148] sm:$0xff] }
0x124f   :  { %v12474_v63 = vpack.c.bf16 %v8958_v48, %v8957_v24  ;;  %v8989_v48 = vld [vmem:[%s17036_s14 + $0x90] sm:$0xff] }
0x1250   :  { %13242 = vtanh.f32 %v7823_v59  ;;  %v8959_v59 = vld [vmem:[%s17037_s15 + $0x150] sm:$0xff] }
0x125a   :  { %v13243_v14 = vpop.eup %13242 }
0x125b   :  { %v7826_v35 = vmul.f32 %v13243_v14, %v7825_v54  ;;  %v12477_v54 = vpack.c.bf16 %v8960_v51, %v8959_v59  ;;  %v8961_v14 = vld [vmem:[%s17037_s15 + $0x160] sm:$0xff] }
0x125d   :  { %v7828_v47 = vadd.f32 %v7827_v11, %v7826_v35  ;;  %v8962_v35 = vld [vmem:[%s17037_s15 + $0x168] sm:$0xff] }
0x125e   :  { %v12480_v11 = vpack.c.bf16 %v8962_v35, %v8961_v14  ;;  %v8991_v14 = vld [vmem:[%s17036_s14 + $0xa0] sm:$0xff]  ;;  %v8992_v35 = vld [vmem:[%s17036_s14 + $0xa8] sm:$0xff] }
0x125f   :  { %v7830_v18 = vsel %vm17802_vm10, %v7828_v47, 0.0  ;;  %v7832_v23 = vsel %vm17803_vm12, %v7828_v47, %v16574_v42  ;;  %v7844_v42 = vld [vmem:[%s17037_s15 + $0x10] sm:$0xff] }
0x1260   :  { %10141 = vmatpush3.msra.mxu1 %v7832_v23  ;;  %v7834_v25 = vadd.f32 %v7830_v18, %v16577_v26  ;;  %v7837_v3 = vmax.f32 %v16589_v37, %v7830_v18  ;;  %v7845_v26 = vld [vmem:[%s17037_s15 + $0x18] sm:$0xff]  ;;  %v8963_v47 = vld [vmem:[%s17037_s15 + $0x170] sm:$0xff]  ;;  %v12486_v18 = vpack.c.bf16 %v8966_v28, %v8965_v5  ;;  %v8996_v5 = vld [vmem:[%s17036_s14 + $0xc8] sm:$0xff] }
0x1261   :  { %10143 = vmatmul.mubr.msk.f32.vlgmr.msra.gmra.mrb[114].mxu1 %vm8217_vm5, %v8216_v62  ;;  %10145 = vmatprep.subr.mxu1 %v17296_v52  ;;  %v12441_v33 = vpack.c.bf16 %v7845_v26, %v7844_v42  ;;  %v8964_v62 = vld [vmem:[%s17037_s15 + $0x178] sm:$0xff]  ;;  %v8973_v26 = vld [vmem:[%s17037_s15 + $0x1c0] sm:$0xff] }
0x1262   :  { %10146 = vmatpush3.msra.mxu1 %v7831_v17  ;;  %v7841_v7 = vmul.f32 %v7839_v61, %v7834_v25  ;;  %10147 = vmatprep.mubr.msk.f32.mxu1 %vm13449_vm2, %v17296_v52  ;;  %v16704_v34 = vsel %vm15991_vm8, %v7837_v3, %v16589_v37  ;;  %v7847_v37 = vld [vmem:[%s17037_s15 + $0x28] sm:$0xff]  ;;  %v12483_v38 = vpack.c.bf16 %v8964_v62, %v8963_v47  ;;  %v8968_v25 = vld [vmem:[%s17037_s15 + $0x198] sm:$0xff]  ;;  %v8969_v61 = vld [vmem:[%s17037_s15 + $0x1a0] sm:$0xff] }
0x1263   :  { %10150 = vmatprep.subr.mxu1 %v17296_v52  ;;  %v12444_v58 = vpack.c.bf16 %v7847_v37, %v7846_v40  ;;  %v8976_v40 = vld [vmem:[%s17037_s15 + $0x1d8] sm:$0xff]  ;;  %v8993_v47 = vld [vmem:[%s17036_s14 + $0xb0] sm:$0xff] }
0x1264   :  { %10033 = vmatmul.mubr.f32.vlgmr.msra.gmra.mrb[76].mxu0 %v7841_v7  ;;  %v8972_v7 = vld [vmem:[%s17037_s15 + $0x1b8] sm:$0xff] }
0x1265   :  { %12439 = vmatpush3.bf16.msra.mxu0 %v12438_v29  ;;  %10067 = vmatprep.mubr.msk.f32.mxu0 %vm13449_vm2, %v17296_v52 }
0x1266   :  { %12440 = vmatprep.subr.bf16.mxu0 %v17631_v1 }
0x1269   :  { %12442 = vmatpush3.bf16.msra.mxu0 %v12441_v33  ;;  %10148 = vmatmul.mubr.msk.f32.vlgmr.msra.gmra.mrb[114].mxu1 %vm8217_vm5, %v8214_v36  ;;  %v12498_v33 = vpack.c.bf16 %v8974_v30, %v8973_v26  ;;  %v8975_v36 = vld [vmem:[%s17037_s15 + $0x1d0] sm:$0xff]  ;;  %v8706_v30 = vld [vmem:[%s17042_s20] sm:$0xff] }
0x126a   :  { %10151 = vmatpush3.msra.mxu1 %v7832_v23  ;;  %12443 = vmatprep.subr.bf16.mxu0 %v17631_v1  ;;  %v8967_v23 = vld [vmem:[%s17037_s15 + $0x190] sm:$0xff]  ;;  %v12501_v37 = vpack.c.bf16 %v8976_v40, %v8975_v36  ;;  %v8981_v40 = vld [vmem:[%s17038_s16] ss:$0 sm:$0xff] }
0x126b   :  { %10152 = vmatprep.mubr.msk.f32.mxu1 %vm13449_vm2, %v17296_v52  ;;  %10155 = vmatprep.subr.mxu1 %v17296_v52  ;;  %v12489_v3 = vpack.c.bf16 %v8968_v25, %v8967_v23  ;;  %v8997_v25 = vld [vmem:[%s17036_s14 + $0xd0] sm:$0xff] }
0x126d   :  { %12445 = vmatpush3.bf16.msra.mxu0 %v12444_v58  ;;  %10153 = vmatmul.mubr.msk.f32.vlgmr.msra.gmra.mrb[116].mxu1 %vm8217_vm5, %v8367_v49  ;;  %v8977_v58 = vld [vmem:[%s17037_s15 + $0x1e0] sm:$0xff]  ;;  %v8978_v49 = vld [vmem:[%s17037_s15 + $0x1e8] sm:$0xff] }
0x126e   :  { %10156 = vmatpush3.msra.mxu1 %v7831_v17  ;;  %12446 = vmatprep.subr.bf16.mxu0 %v17631_v1  ;;  %v8970_v17 = vld [vmem:[%s17037_s15 + $0x1a8] sm:$0xff]  ;;  %v12504_v57 = vpack.c.bf16 %v8978_v49, %v8977_v58 }
0x126f   :  { %10157 = vmatprep.mubr.msk.f32.mxu1 %vm13449_vm2, %v17296_v52  ;;  %12557 = vmatprep.subr.bf16.mxu1 %v17631_v1  ;;  %v12492_v29 = vpack.c.bf16 %v8970_v17, %v8969_v61  ;;  %v8999_v17 = vld [vmem:[%s17036_s14 + $0xe0] sm:$0xff] }
0x1271   :  { %12448 = vmatpush3.bf16.msra.mxu0 %v12447_v22  ;;  %v8980_v22 = vld [vmem:[%s17037_s15 + $0x1f8] sm:$0xff] }
0x1272   :  { %12449 = vmatprep.subr.bf16.mxu0 %v17631_v1  ;;  %v12507_v12 = vpack.c.bf16 %v8980_v22, %v8979_v41 }
0x1275   :  { %12451 = vmatpush3.bf16.msra.mxu0 %v12450_v20  ;;  %10158 = vmatmul.mubr.msk.f32.vlgmr.msra.gmra.mrb[116].mxu1 %vm8217_vm5, %v8365_v27  ;;  %v8515_v20 = vld [vmem:[%s17036_s14 + $0x8] sm:$0xff]  ;;  %v8517_v27 = vld [vmem:[%s17036_s14 + $0x18] sm:$0xff] }
0x1276   :  { %12452 = vmatprep.subr.bf16.mxu0 %v17631_v1  ;;  %10234 = vmatprep.mubr.msk.f32.mxu1 %vm13449_vm2, %v17296_v52  ;;  %v12510_v16 = vpack.c.bf16 %v8515_v20, %v8514_v15  ;;  %v9004_v20 = vld [vmem:[%s17805_s21] ss:$0 sm:$0xff] }
0x1279   :  { %12454 = vmatpush3.bf16.msra.mxu0 %v12453_v4  ;;  %v12513_v4 = vpack.c.bf16 %v8517_v27, %v8516_v13  ;;  %v9005_v27 = vld [vmem:[#allocation6] ss:$0 sm:$0xff] }
0x127a   :  { %12455 = vmatprep.subr.bf16.mxu0 %v17631_v1 }
0x127d   :  { %12457 = vmatpush3.bf16.msra.mxu0 %v12456_v9  ;;  %v12516_v9 = vpack.c.bf16 %v8519_v0, %v8518_v46 }
0x127e   :  { %12458 = vmatprep.subr.bf16.mxu0 %v17631_v1 }
0x1281   :  { %12460 = vmatpush3.bf16.msra.mxu0 %v12459_v56  ;;  %v8522_v56 = vld [vmem:[%s17036_s14 + $0x40] sm:$0xff] }
0x1282   :  { %12461 = vmatprep.subr.bf16.mxu0 %v17631_v1  ;;  %v12522_v19 = vpack.c.bf16 %v8523_v44, %v8522_v56 }
0x1284   :  { %10068 = vmatmul.mubr.f32.vlgmr.msra.gmra.mrb[76].mxu0 %v7840_v10  ;;  %v8525_v10 = vld [vmem:[%s17036_s14 + $0x58] sm:$0xff] }
0x1285   :  { %12463 = vmatpush3.bf16.msra.mxu0 %v12462_v8  ;;  %10102 = vmatprep.mubr.msk.f32.mxu0 %vm13449_vm2, %v17296_v52  ;;  %v8524_v8 = vld [vmem:[%s17036_s14 + $0x50] sm:$0xff] }
0x1286   :  { %12464 = vmatprep.subr.bf16.mxu0 %v17631_v1  ;;  %v12525_v53 = vpack.c.bf16 %v8525_v10, %v8524_v8 }
0x1289   :  { %12466 = vmatpush3.bf16.msra.mxu0 %v12465_v21  ;;  %v8527_v21 = vld [vmem:[%s17036_s14 + $0x68] sm:$0xff] }
0x128a   :  { %12467 = vmatprep.subr.bf16.mxu0 %v17631_v1  ;;  %v12528_v55 = vpack.c.bf16 %v8527_v21, %v8526_v6 }
0x128d   :  { %12469 = vmatpush3.bf16.msra.mxu0 %v12468_v50  ;;  %v8529_v50 = vld [vmem:[%s17036_s14 + $0x78] sm:$0xff] }
0x128e   :  { %12470 = vmatprep.subr.bf16.mxu0 %v17631_v1  ;;  %v12531_v2 = vpack.c.bf16 %v8529_v50, %v8528_v32 }
0x1291   :  { %12472 = vmatpush3.bf16.msra.mxu0 %v12471_v39  ;;  %v8988_v39 = vld [vmem:[%s17036_s14 + $0x88] sm:$0xff] }
0x1292   :  { %12473 = vmatprep.subr.bf16.mxu0 %v17631_v1  ;;  %v12534_v24 = vpack.c.bf16 %v8988_v39, %v8987_v45 }
0x1295   :  { %12475 = vmatpush3.bf16.msra.mxu0 %v12474_v63  ;;  %v8990_v63 = vld [vmem:[%s17036_s14 + $0x98] sm:$0xff] }
0x1296   :  { %12476 = vmatprep.subr.bf16.mxu0 %v17631_v1 }
0x1299   :  { %12478 = vmatpush3.bf16.msra.mxu0 %v12477_v54  ;;  %v12537_v54 = vpack.c.bf16 %v8990_v63, %v8989_v48 }
0x129a   :  { %12479 = vmatprep.subr.bf16.mxu0 %v17631_v1 }
0x129d   :  { %12481 = vmatpush3.bf16.msra.mxu0 %v12480_v11  ;;  %v12540_v11 = vpack.c.bf16 %v8992_v35, %v8991_v14 }
0x129e   :  { %12482 = vmatprep.subr.bf16.mxu0 %v17631_v1 }
0x12a1   :  { %12484 = vmatpush3.bf16.msra.mxu0 %v12483_v38  ;;  %v8995_v38 = vld [vmem:[%s17036_s14 + $0xc0] sm:$0xff] }
0x12a2   :  { %12485 = vmatprep.subr.bf16.mxu0 %v17631_v1  ;;  %v12546_v23 = vpack.c.bf16 %v8996_v5, %v8995_v38 }
0x12a4   :  { %10103 = vmatmul.mubr.f32.vlgmr.msra.gmra.mrb[76].mxu0 %v16665_v43  ;;  %v8971_v43 = vld [vmem:[%s17037_s15 + $0x1b0] sm:$0xff] }
0x12a5   :  { %12487 = vmatpush3.bf16.msra.mxu0 %v12486_v18  ;;  %10137 = vmatprep.mubr.msk.f32.mxu0 %vm13449_vm2, %v17296_v52  ;;  %v12495_v42 = vpack.c.bf16 %v8972_v7, %v8971_v43  ;;  %v9001_v7 = vld [vmem:[%s17036_s14 + $0xf0] sm:$0xff] }
0x12a6   :  { %12488 = vmatprep.subr.bf16.mxu0 %v17631_v1 }
0x12a9   :  { %12490 = vmatpush3.bf16.msra.mxu0 %v12489_v3  ;;  %v8998_v3 = vld [vmem:[%s17036_s14 + $0xd8] sm:$0xff] }
0x12aa   :  { %12491 = vmatprep.subr.bf16.mxu0 %v17631_v1  ;;  %v12549_v61 = vpack.c.bf16 %v8998_v3, %v8997_v25 }
0x12ad   :  { %12493 = vmatpush3.bf16.msra.mxu0 %v12492_v29  ;;  %v9000_v29 = vld [vmem:[%s17036_s14 + $0xe8] sm:$0xff] }
0x12ae   :  { %12494 = vmatprep.subr.bf16.mxu0 %v17631_v1  ;;  %v12552_v43 = vpack.c.bf16 %v9000_v29, %v8999_v17 }
0x12b1   :  { %12496 = vmatpush3.bf16.msra.mxu0 %v12495_v42  ;;  %v9002_v42 = vld [vmem:[%s17036_s14 + $0xf8] sm:$0xff] }
0x12b2   :  { %12497 = vmatprep.subr.bf16.mxu0 %v17631_v1  ;;  %v12555_v26 = vpack.c.bf16 %v9002_v42, %v9001_v7 }
0x12b5   :  { %12499 = vmatpush3.bf16.msra.mxu0 %v12498_v33  ;;  %v8707_v33 = vld [vmem:[%s17042_s20 + $0x8] sm:$0xff] }
0x12b6   :  { %12500 = vmatprep.subr.bf16.mxu0 %v17631_v1  ;;  %v12558_v36 = vpack.c.bf16 %v8707_v33, %v8706_v30 }
0x12b8   :  { %12559 = vmatpush3.bf16.msra.mxu1 %v12558_v36 }
0x12b9   :  { %12502 = vmatpush3.bf16.msra.mxu0 %v12501_v37  ;;  %v8196_v37 = vpop.permute.xlu0 %8195 }
0x12ba   :  { %12503 = vmatprep.subr.bf16.mxu0 %v17631_v1  ;;  %v8204_v58 = vmul.f32 %v8981_v40, %v8196_v37 }
0x12bd   :  { %12505 = vmatpush3.bf16.msra.mxu0 %v12504_v57 }
0x12be   :  { %12506 = vmatprep.subr.bf16.mxu0 %v17631_v1 }
0x12c1   :  { %12508 = vmatpush3.bf16.msra.mxu0 %v12507_v12  ;;  %v9003_v12 = vld [vmem:[%s17040_s18] ss:$0 sm:$0xff] }
0x12c2   :  { %12509 = vmatprep.subr.bf16.mxu0 %v17631_v1 }
0x12c4   :  { %10138 = vmatmul.mubr.f32.vlgmr.msra.gmra.mrb[76].mxu0 %v16704_v34  ;;  %v8520_v34 = vld [vmem:[%s17036_s14 + $0x30] sm:$0xff] }
0x12c5   :  { %12511 = vmatpush3.bf16.msra.mxu0 %v12510_v16  ;;  %10192 = vmatprep.mubr.msk.f32.mxu0 %vm13449_vm2, %v17296_v52  ;;  %v12519_v31 = vpack.c.bf16 %v8521_v60, %v8520_v34 }
0x12c6   :  { %12512 = vmatprep.subr.bf16.mxu0 %v17631_v1 }
0x12c9   :  { %12514 = vmatpush3.bf16.msra.mxu0 %v12513_v4 }
0x12ca   :  { %12515 = vmatprep.subr.bf16.mxu0 %v17631_v1 }
0x12cd   :  { %12517 = vmatpush3.bf16.msra.mxu0 %v12516_v9 }
0x12ce   :  { %12518 = vmatprep.subr.bf16.mxu0 %v17631_v1 }
0x12d1   :  { %12520 = vmatpush3.bf16.msra.mxu0 %v12519_v31 }
0x12d2   :  { %12521 = vmatprep.subr.bf16.mxu0 %v17631_v1 }
0x12d5   :  { %12523 = vmatpush3.bf16.msra.mxu0 %v12522_v19 }
0x12d6   :  { %12524 = vmatprep.subr.bf16.mxu0 %v17631_v1 }
0x12d9   :  { %12526 = vmatpush3.bf16.msra.mxu0 %v12525_v53 }
0x12da   :  { %12527 = vmatprep.subr.bf16.mxu0 %v17631_v1 }
0x12dd   :  { %12529 = vmatpush3.bf16.msra.mxu0 %v12528_v55 }
0x12de   :  { %12530 = vmatprep.subr.bf16.mxu0 %v17631_v1 }
0x12e1   :  { %12532 = vmatpush3.bf16.msra.mxu0 %v12531_v2 }
0x12e2   :  { %12533 = vmatprep.subr.bf16.mxu0 %v17631_v1 }
0x133c   :  { %v8360_v59 = vpop.f32.mrb[114].mxu1 }
0x133d   :  { %v10149_v51 = vpop.f32.mrb[115].mxu1  ;;  %10193 = vmatmul.mubr.f32.vlgmr.msra.gmra.mrb[76].mxu0 %v8360_v59 }
0x133e   :  { %12535 = vmatpush3.bf16.msra.mxu0 %v12534_v24  ;;  %10227 = vmatprep.mubr.msk.f32.mxu0 %vm13449_vm2, %v17296_v52  ;;  %v8994_v52 = vld [vmem:[%s17036_s14 + $0xb8] sm:$0xff] }
0x133f   :  { %12536 = vmatprep.subr.bf16.mxu0 %v17631_v1  ;;  %v12543_v62 = vpack.c.bf16 %v8994_v52, %v8993_v47 }
0x1342   :  { %12538 = vmatpush3.bf16.msra.mxu0 %v12537_v54 }
0x1343   :  { %12539 = vmatprep.subr.bf16.mxu0 %v17631_v1 }
0x1346   :  { %12541 = vmatpush3.bf16.msra.mxu0 %v12540_v11 }
0x1347   :  { %12542 = vmatprep.subr.bf16.mxu0 %v17631_v1 }
0x1348   :  { %v8510_v28 = vpop.f32.mrb[116].mxu1 }
0x1349   :  { %v10159_v18 = vpop.f32.mrb[117].mxu1 }
0x134a   :  { %12544 = vmatpush3.bf16.msra.mxu0 %v12543_v62 }
0x134b   :  { %12545 = vmatprep.subr.bf16.mxu0 %v17631_v1 }
0x134e   :  { %12547 = vmatpush3.bf16.msra.mxu0 %v12546_v23 }
0x134f   :  { %12548 = vmatprep.subr.bf16.mxu0 %v17631_v1 }
0x1352   :  { %12550 = vmatpush3.bf16.msra.mxu0 %v12549_v61 }
0x1353   :  { %12551 = vmatprep.subr.bf16.mxu0 %v17631_v1 }
0x1356   :  { %12553 = vmatpush3.bf16.msra.mxu0 %v12552_v43 }
0x1357   :  { %12554 = vmatprep.subr.bf16.mxu0 %v17631_v1  ;;  %v8982_v1 = vld [vmem:[%s17039_s17] ss:$0 sm:$0xff] }
0x1358   :  { %v12686_v49 = vadd.f32 %v8982_v1, %v8204_v58 }
0x135a   :  { %12556 = vmatpush3.bf16.msra.mxu0 %v12555_v26 }
0x135d   :  { %10228 = vmatmul.mubr.f32.vlgmr.msra.gmra.mrb[76].mxu0 %v8510_v28 }
0x1430   :  { %v8684_v57 = vpop.f32.mrb[76].mxu0 }
0x1431   :  { %v12687_v41 = vadd.f32 %v12686_v49, %v8684_v57  ;;  %v10229_v22 = vpop.f32.mrb[77].mxu0 }
0x1433   :  { %v8689_v15 = vmax.f32 %v12687_v41, 0.0 }
0x1435   :  { %v8697_v16 = vmul.f32 %v9003_v12, %v8689_v15 }
0x1437   :  { %v8705_v13 = vadd.f32 %v9004_v20, %v8697_v16 }
0x1439   :  { %10235 = vmatmul.mubr.msk.f32.vlgmr.msra.gmra.mrb[118].mxu1 %vm8715_vm11, %v8705_v13 }
0x150c   :  { %v8785_v4 = vpop.f32.mrb[118].mxu1 }
0x150d   :  { %v8786_v46 = vadd.f32 %v9005_v27, %v8785_v4  ;;  %v10236_v0 = vpop.f32.mrb[119].mxu1 }
0x150f   :  { %8789 = vst.msk [vmem:[%s17807_s7] sm:$0xff] %vm17806_vm13, %v8786_v46 }
0x1510   :  { %8794 = vsyncpa [#allocation8], 1 }
0x1511   :  { %8795 = vsyncpa [#allocation10], 1 }
0x1512   :  { %8796 = vsyncpa [#allocation13], 1 }
0x1513   :  { %8797 = vsyncpa [#allocation16], 1 }
0x1514   :  { %8798 = vsyncpa [#allocation19], 1 }

</bundles_post_ra>
